<compile_context>
chip_gen: v7x
topology: tpu7x:2x2x1
jax: 0.10.0
libtpu: 0.0.40
codegen_flags: <defaults>
</compile_context>

<pallas_src>
import jax
import jax.numpy as jnp
from jax import lax
from jax.experimental import pallas as pl
from jax.experimental.pallas import tpu as pltpu


# ------------------------------------------------------------------
# Fused kernel:  energy = convV( tanh( conv_{W||H}( x||h ) ) )
#   xh_ref : (1, H+4p, W+4p, Cin)   input||hidden, padded by 2p
#   w1_ref : (K*K, Cin, A)          stacked W/H weights, tap-major
#   w2_ref : (K*K, A, Cop)          V weights, Cout padded to 128
#   o_ref  : (1, H, W, Cop)         lane-dense output
#   a_ref  : (H+2p, W+2p, A) VMEM   tanh activation with zeroed halo ring
# ------------------------------------------------------------------
def _make_fused_attention_kernel(K, p):
    def kernel(xh_ref, w1_ref, w2_ref, o_ref, a_ref):
        _, Ho, Wo, Cop = o_ref.shape
        Cin = xh_ref.shape[-1]
        A = w1_ref.shape[-1]
        Hp, Wp = Ho + 2 * p, Wo + 2 * p          # haloed stage-1 domain

        # ---- stage 1: tanh( conv(x||h) ) on the haloed (Hp, Wp) domain ----
        acc1 = jnp.zeros((Hp * Wp, A), jnp.float32)
        for kh in range(K):
            for kw in range(K):
                t = kh * K + kw
                win = xh_ref[0, kh:kh + Hp, kw:kw + Wp, :].reshape(Hp * Wp, Cin)
                acc1 = acc1 + jnp.dot(win, w1_ref[t],
                                      preferred_element_type=jnp.float32)
        act = jnp.tanh(acc1).reshape(Hp, Wp, A)

        # Zero the halo ring: stage 2's "same" padding must be zeros, not the
        # extrapolated conv values we just computed there.
        row = lax.broadcasted_iota(jnp.int32, (Hp, Wp, A), 0)
        col = lax.broadcasted_iota(jnp.int32, (Hp, Wp, A), 1)
        interior = ((row >= p) & (row < p + Ho) &
                    (col >= p) & (col < p + Wo))
        a_ref[...] = jnp.where(interior, act, 0.0)

        # ---- stage 2: energy = convV(activation), lane-dense output ----
        acc2 = jnp.zeros((Ho * Wo, Cop), jnp.float32)
        for kh in range(K):
            for kw in range(K):
                t = kh * K + kw
                win = a_ref[kh:kh + Ho, kw:kw + Wo, :].reshape(Ho * Wo, A)
                acc2 = acc2 + jnp.dot(win, w2_ref[t],
                                      preferred_element_type=jnp.float32)
        o_ref[0] = acc2.reshape(Ho, Wo, Cop)

    return kernel


# ------------------------------------------------------------------
# Wrapper: layout plumbing (NCHW<->NHWC, channel concat, weight stacking,
# Cout padding to 128) in plain JAX; a single pallas_call does the math.
# ------------------------------------------------------------------
def attention_forward(input_tensor, hidden, w_H, w_W, w_V, kernel_size):
    """
    input_tensor : (B, input_dim,  H, W)   NCHW (like PyTorch)
    hidden       : tuple; hidden[0] is (B, hidden_dim, H, W)
    w_H, w_W, w_V: conv weights in PyTorch OIHW layout (Cout, Cin, K, K)
    returns energy: (B, 65, H, W)  NCHW
    """
    K = kernel_size
    p = K // 2
    LANE = 128

    x = jnp.transpose(input_tensor, (0, 2, 3, 1))   # (B, H, W, Cx)
    h = jnp.transpose(hidden[0], (0, 2, 3, 1))      # (B, H, W, Ch)
    xh = jnp.concatenate([x, h], axis=-1)           # (B, H, W, Cx+Ch)

    B, Ho, Wo, Cin = xh.shape
    A = w_H.shape[0]
    Co = w_V.shape[0]
    Cop = ((Co + LANE - 1) // LANE) * LANE          # 65 -> 128 (lane-dense)

    # Stage-1 weights: OIHW -> HWIO, fuse input-path (W) and hidden-path (H)
    # along Cin (matching the x||h concat order), flatten taps -> (K*K, Cin, A)
    wW_h = jnp.transpose(w_W, (2, 3, 1, 0))         # (K, K, Cx, A)
    wH_h = jnp.transpose(w_H, (2, 3, 1, 0))         # (K, K, Ch, A)
    w1 = jnp.concatenate([wW_h, wH_h], axis=2).reshape(K * K, Cin, A)

    # Stage-2 weights: OIHW -> HWIO, zero-pad Cout to 128, flatten taps
    wV_h = jnp.transpose(w_V, (2, 3, 1, 0))         # (K, K, A, Co)
    wV_h = jnp.pad(wV_h, ((0, 0), (0, 0), (0, 0), (0, Cop - Co)))
    w2 = wV_h.reshape(K * K, A, Cop)

    # Pad spatially by 2p: stage 1 is evaluated on the (H+2p, W+2p) haloed
    # domain that the fused in-kernel stage-2 conv needs.
    xh_pp = jnp.pad(xh, ((0, 0), (2 * p, 2 * p), (2 * p, 2 * p), (0, 0)))
    Hpp, Wpp = Ho + 4 * p, Wo + 4 * p
    Hp, Wp = Ho + 2 * p, Wo + 2 * p

    out = pl.pallas_call(
        _make_fused_attention_kernel(K, p),
        out_shape=jax.ShapeDtypeStruct((B, Ho, Wo, Cop), jnp.float32),
        grid_spec=pltpu.PrefetchScalarGridSpec(
            num_scalar_prefetch=0,
            grid=(B,),
            in_specs=[
                pl.BlockSpec((1, Hpp, Wpp, Cin), lambda b: (b, 0, 0, 0)),
                pl.BlockSpec((K * K, Cin, A), lambda b: (0, 0, 0)),
                pl.BlockSpec((K * K, A, Cop), lambda b: (0, 0, 0)),
            ],
            out_specs=pl.BlockSpec((1, Ho, Wo, Cop), lambda b: (b, 0, 0, 0)),
            scratch_shapes=[pltpu.VMEM((Hp, Wp, A), jnp.float32)],
        ),
        compiler_params=pltpu.CompilerParams(
            dimension_semantics=("parallel",)),
    )(xh_pp, w1, w2)

    # Drop the channel padding, back to NCHW.
    return jnp.transpose(out[..., :Co], (0, 3, 1, 2))


# ------------------------------------------------------------------
# Pure-JAX reference (lax conv) for correctness check
# ------------------------------------------------------------------
def reference_forward(input_tensor, hidden, w_H, w_W, w_V, kernel_size):
    p = kernel_size // 2
    dn = ('NCHW', 'OIHW', 'NCHW')

    def conv(x, w):
        return jax.lax.conv_general_dilated(
            x, w, window_strides=(1, 1), padding=[(p, p), (p, p)],
            dimension_numbers=dn)

    hid = conv(hidden[0], w_H)
    inp = conv(input_tensor, w_W)
    return conv(jnp.tanh(hid + inp), w_V)


if __name__ == "__main__":
    # Module hyperparameters (small, consistent with the forward pass)
    B = 2
    input_dim = 4
    hidden_dim = 8
    attn_channel = 16
    kernel_size = 3
    H = W = 16
    out_channels = 65   # fixed by the module definition

    key = jax.random.PRNGKey(0)
    k1, k2, k3, k4, k5, k6 = jax.random.split(key, 6)

    # Deterministic parameter init (PyTorch OIHW layout, no bias)
    w_H = 0.1 * jax.random.normal(
        k1, (attn_channel, hidden_dim, kernel_size, kernel_size), jnp.float32)
    w_W = 0.1 * jax.random.normal(
        k2, (attn_channel, input_dim, kernel_size, kernel_size), jnp.float32)
    w_V = 0.1 * jax.random.normal(
        k3, (out_channels, attn_channel, kernel_size, kernel_size), jnp.float32)

    # Inputs (NCHW, like PyTorch); hidden is the usual (h, c) tuple
    input_tensor = jax.random.normal(k4, (B, input_dim, H, W), jnp.float32)
    h0 = jax.random.normal(k5, (B, hidden_dim, H, W), jnp.float32)
    c0 = jax.random.normal(k6, (B, hidden_dim, H, W), jnp.float32)
    hidden = (h0, c0)

    energy = attention_forward(input_tensor, hidden, w_H, w_W, w_V, kernel_size)
    energy = jax.block_until_ready(energy)

    ref = reference_forward(input_tensor, hidden, w_H, w_W, w_V, kernel_size)
    ref = jax.block_until_ready(ref)

    assert energy.shape == (B, out_channels, H, W), energy.shape
    assert jnp.allclose(energy, ref, atol=1e-4, rtol=1e-4), \
        float(jnp.max(jnp.abs(energy - ref)))

    print("KERNEL_OK")
</pallas_src>

<mosaic_0001>
module attributes {stable_mosaic.version = 11 : i64} {
  func.func @kernel(%arg0: i32, %arg1: memref<1x20x20x12xf32, #tpu.memory_space<vmem>>, %arg2: memref<9x12x16xf32, #tpu.memory_space<vmem>>, %arg3: memref<9x16x128xf32, #tpu.memory_space<vmem>>, %arg4: memref<1x16x16x128xf32, #tpu.memory_space<vmem>>, %arg5: memref<18x18x16xf32, #tpu.memory_space<vmem>>) attributes {dimension_semantics = [#tpu.dimension_semantics<parallel>], iteration_bounds = array<i64: 2>, scalar_prefetch = 0 : i64, scratch_operands = 1 : i64, tpu.core_type = #tpu.core_type<tc>, window_params = [{transform_indices = @transform_0, window_bounds = array<i64: 1, 20, 20, 12>}, {pipeline_mode = #tpu.pipeline_mode<synchronous>, transform_indices = @transform_1, window_bounds = array<i64: 9, 12, 16>}, {pipeline_mode = #tpu.pipeline_mode<synchronous>, transform_indices = @transform_2, window_bounds = array<i64: 9, 16, 128>}, {transform_indices = @transform_3, window_bounds = array<i64: 1, 16, 16, 128>}]} {
    %cst = arith.constant 0.000000e+00 : f32
    %0 = vector.broadcast %cst : f32 to vector<324x16xf32>
    %c0 = arith.constant 0 : index
    %c0_0 = arith.constant 0 : index
    %c0_1 = arith.constant 0 : index
    %c0_2 = arith.constant 0 : index
    %1 = vector.load %arg1[%c0, %c0_0, %c0_1, %c0_2] : memref<1x20x20x12xf32, #tpu.memory_space<vmem>>, vector<1x18x18x12xf32>
    %2 = vector.shape_cast %1 : vector<1x18x18x12xf32> to vector<18x18x12xf32>
    %3 = vector.shape_cast %2 : vector<18x18x12xf32> to vector<324x12xf32>
    %c0_3 = arith.constant 0 : index
    %c0_4 = arith.constant 0 : index
    %c0_5 = arith.constant 0 : index
    %4 = vector.load %arg2[%c0_3, %c0_4, %c0_5] : memref<9x12x16xf32, #tpu.memory_space<vmem>>, vector<1x12x16xf32>
    %5 = vector.shape_cast %4 : vector<1x12x16xf32> to vector<12x16xf32>
    %cst_6 = arith.constant dense<0.000000e+00> : vector<324x16xf32>
    %6 = tpu.matmul %3, %5, %cst_6 {dimension_numbers = #tpu.dot_dimension_numbers<[1], [0], [0], [1], [0, 0, 1, 1], [], []>} : vector<324x12xf32>, vector<12x16xf32>, vector<324x16xf32> -> vector<324x16xf32>
    %7 = arith.addf %0, %6 : vector<324x16xf32>
    %c0_7 = arith.constant 0 : index
    %c0_8 = arith.constant 0 : index
    %c1 = arith.constant 1 : index
    %c0_9 = arith.constant 0 : index
    %8 = vector.load %arg1[%c0_7, %c0_8, %c1, %c0_9] : memref<1x20x20x12xf32, #tpu.memory_space<vmem>>, vector<1x18x18x12xf32>
    %9 = vector.shape_cast %8 : vector<1x18x18x12xf32> to vector<18x18x12xf32>
    %10 = vector.shape_cast %9 : vector<18x18x12xf32> to vector<324x12xf32>
    %c1_10 = arith.constant 1 : index
    %c0_11 = arith.constant 0 : index
    %c0_12 = arith.constant 0 : index
    %11 = vector.load %arg2[%c1_10, %c0_11, %c0_12] : memref<9x12x16xf32, #tpu.memory_space<vmem>>, vector<1x12x16xf32>
    %12 = vector.shape_cast %11 : vector<1x12x16xf32> to vector<12x16xf32>
    %cst_13 = arith.constant dense<0.000000e+00> : vector<324x16xf32>
    %13 = tpu.matmul %10, %12, %cst_13 {dimension_numbers = #tpu.dot_dimension_numbers<[1], [0], [0], [1], [0, 0, 1, 1], [], []>} : vector<324x12xf32>, vector<12x16xf32>, vector<324x16xf32> -> vector<324x16xf32>
    %14 = arith.addf %7, %13 : vector<324x16xf32>
    %c0_14 = arith.constant 0 : index
    %c0_15 = arith.constant 0 : index
    %c2 = arith.constant 2 : index
    %c0_16 = arith.constant 0 : index
    %15 = vector.load %arg1[%c0_14, %c0_15, %c2, %c0_16] : memref<1x20x20x12xf32, #tpu.memory_space<vmem>>, vector<1x18x18x12xf32>
    %16 = vector.shape_cast %15 : vector<1x18x18x12xf32> to vector<18x18x12xf32>
    %17 = vector.shape_cast %16 : vector<18x18x12xf32> to vector<324x12xf32>
    %c2_17 = arith.constant 2 : index
    %c0_18 = arith.constant 0 : index
    %c0_19 = arith.constant 0 : index
    %18 = vector.load %arg2[%c2_17, %c0_18, %c0_19] : memref<9x12x16xf32, #tpu.memory_space<vmem>>, vector<1x12x16xf32>
    %19 = vector.shape_cast %18 : vector<1x12x16xf32> to vector<12x16xf32>
    %cst_20 = arith.constant dense<0.000000e+00> : vector<324x16xf32>
    %20 = tpu.matmul %17, %19, %cst_20 {dimension_numbers = #tpu.dot_dimension_numbers<[1], [0], [0], [1], [0, 0, 1, 1], [], []>} : vector<324x12xf32>, vector<12x16xf32>, vector<324x16xf32> -> vector<324x16xf32>
    %21 = arith.addf %14, %20 : vector<324x16xf32>
    %c0_21 = arith.constant 0 : index
    %c1_22 = arith.constant 1 : index
    %c0_23 = arith.constant 0 : index
    %c0_24 = arith.constant 0 : index
    %22 = vector.load %arg1[%c0_21, %c1_22, %c0_23, %c0_24] : memref<1x20x20x12xf32, #tpu.memory_space<vmem>>, vector<1x18x18x12xf32>
    %23 = vector.shape_cast %22 : vector<1x18x18x12xf32> to vector<18x18x12xf32>
    %24 = vector.shape_cast %23 : vector<18x18x12xf32> to vector<324x12xf32>
    %c3 = arith.constant 3 : index
    %c0_25 = arith.constant 0 : index
    %c0_26 = arith.constant 0 : index
    %25 = vector.load %arg2[%c3, %c0_25, %c0_26] : memref<9x12x16xf32, #tpu.memory_space<vmem>>, vector<1x12x16xf32>
    %26 = vector.shape_cast %25 : vector<1x12x16xf32> to vector<12x16xf32>
    %cst_27 = arith.constant dense<0.000000e+00> : vector<324x16xf32>
    %27 = tpu.matmul %24, %26, %cst_27 {dimension_numbers = #tpu.dot_dimension_numbers<[1], [0], [0], [1], [0, 0, 1, 1], [], []>} : vector<324x12xf32>, vector<12x16xf32>, vector<324x16xf32> -> vector<324x16xf32>
    %28 = arith.addf %21, %27 : vector<324x16xf32>
    %c0_28 = arith.constant 0 : index
    %c1_29 = arith.constant 1 : index
    %c1_30 = arith.constant 1 : index
    %c0_31 = arith.constant 0 : index
    %29 = vector.load %arg1[%c0_28, %c1_29, %c1_30, %c0_31] : memref<1x20x20x12xf32, #tpu.memory_space<vmem>>, vector<1x18x18x12xf32>
    %30 = vector.shape_cast %29 : vector<1x18x18x12xf32> to vector<18x18x12xf32>
    %31 = vector.shape_cast %30 : vector<18x18x12xf32> to vector<324x12xf32>
    %c4 = arith.constant 4 : index
    %c0_32 = arith.constant 0 : index
    %c0_33 = arith.constant 0 : index
    %32 = vector.load %arg2[%c4, %c0_32, %c0_33] : memref<9x12x16xf32, #tpu.memory_space<vmem>>, vector<1x12x16xf32>
    %33 = vector.shape_cast %32 : vector<1x12x16xf32> to vector<12x16xf32>
    %cst_34 = arith.constant dense<0.000000e+00> : vector<324x16xf32>
    %34 = tpu.matmul %31, %33, %cst_34 {dimension_numbers = #tpu.dot_dimension_numbers<[1], [0], [0], [1], [0, 0, 1, 1], [], []>} : vector<324x12xf32>, vector<12x16xf32>, vector<324x16xf32> -> vector<324x16xf32>
    %35 = arith.addf %28, %34 : vector<324x16xf32>
    %c0_35 = arith.constant 0 : index
    %c1_36 = arith.constant 1 : index
    %c2_37 = arith.constant 2 : index
    %c0_38 = arith.constant 0 : index
    %36 = vector.load %arg1[%c0_35, %c1_36, %c2_37, %c0_38] : memref<1x20x20x12xf32, #tpu.memory_space<vmem>>, vector<1x18x18x12xf32>
    %37 = vector.shape_cast %36 : vector<1x18x18x12xf32> to vector<18x18x12xf32>
    %38 = vector.shape_cast %37 : vector<18x18x12xf32> to vector<324x12xf32>
    %c5 = arith.constant 5 : index
    %c0_39 = arith.constant 0 : index
    %c0_40 = arith.constant 0 : index
    %39 = vector.load %arg2[%c5, %c0_39, %c0_40] : memref<9x12x16xf32, #tpu.memory_space<vmem>>, vector<1x12x16xf32>
    %40 = vector.shape_cast %39 : vector<1x12x16xf32> to vector<12x16xf32>
    %cst_41 = arith.constant dense<0.000000e+00> : vector<324x16xf32>
    %41 = tpu.matmul %38, %40, %cst_41 {dimension_numbers = #tpu.dot_dimension_numbers<[1], [0], [0], [1], [0, 0, 1, 1], [], []>} : vector<324x12xf32>, vector<12x16xf32>, vector<324x16xf32> -> vector<324x16xf32>
    %42 = arith.addf %35, %41 : vector<324x16xf32>
    %c0_42 = arith.constant 0 : index
    %c2_43 = arith.constant 2 : index
    %c0_44 = arith.constant 0 : index
    %c0_45 = arith.constant 0 : index
    %43 = vector.load %arg1[%c0_42, %c2_43, %c0_44, %c0_45] : memref<1x20x20x12xf32, #tpu.memory_space<vmem>>, vector<1x18x18x12xf32>
    %44 = vector.shape_cast %43 : vector<1x18x18x12xf32> to vector<18x18x12xf32>
    %45 = vector.shape_cast %44 : vector<18x18x12xf32> to vector<324x12xf32>
    %c6 = arith.constant 6 : index
    %c0_46 = arith.constant 0 : index
    %c0_47 = arith.constant 0 : index
    %46 = vector.load %arg2[%c6, %c0_46, %c0_47] : memref<9x12x16xf32, #tpu.memory_space<vmem>>, vector<1x12x16xf32>
    %47 = vector.shape_cast %46 : vector<1x12x16xf32> to vector<12x16xf32>
    %cst_48 = arith.constant dense<0.000000e+00> : vector<324x16xf32>
    %48 = tpu.matmul %45, %47, %cst_48 {dimension_numbers = #tpu.dot_dimension_numbers<[1], [0], [0], [1], [0, 0, 1, 1], [], []>} : vector<324x12xf32>, vector<12x16xf32>, vector<324x16xf32> -> vector<324x16xf32>
    %49 = arith.addf %42, %48 : vector<324x16xf32>
    %c0_49 = arith.constant 0 : index
    %c2_50 = arith.constant 2 : index
    %c1_51 = arith.constant 1 : index
    %c0_52 = arith.constant 0 : index
    %50 = vector.load %arg1[%c0_49, %c2_50, %c1_51, %c0_52] : memref<1x20x20x12xf32, #tpu.memory_space<vmem>>, vector<1x18x18x12xf32>
    %51 = vector.shape_cast %50 : vector<1x18x18x12xf32> to vector<18x18x12xf32>
    %52 = vector.shape_cast %51 : vector<18x18x12xf32> to vector<324x12xf32>
    %c7 = arith.constant 7 : index
    %c0_53 = arith.constant 0 : index
    %c0_54 = arith.constant 0 : index
    %53 = vector.load %arg2[%c7, %c0_53, %c0_54] : memref<9x12x16xf32, #tpu.memory_space<vmem>>, vector<1x12x16xf32>
    %54 = vector.shape_cast %53 : vector<1x12x16xf32> to vector<12x16xf32>
    %cst_55 = arith.constant dense<0.000000e+00> : vector<324x16xf32>
    %55 = tpu.matmul %52, %54, %cst_55 {dimension_numbers = #tpu.dot_dimension_numbers<[1], [0], [0], [1], [0, 0, 1, 1], [], []>} : vector<324x12xf32>, vector<12x16xf32>, vector<324x16xf32> -> vector<324x16xf32>
    %56 = arith.addf %49, %55 : vector<324x16xf32>
    %c0_56 = arith.constant 0 : index
    %c2_57 = arith.constant 2 : index
    %c2_58 = arith.constant 2 : index
    %c0_59 = arith.constant 0 : index
    %57 = vector.load %arg1[%c0_56, %c2_57, %c2_58, %c0_59] : memref<1x20x20x12xf32, #tpu.memory_space<vmem>>, vector<1x18x18x12xf32>
    %58 = vector.shape_cast %57 : vector<1x18x18x12xf32> to vector<18x18x12xf32>
    %59 = vector.shape_cast %58 : vector<18x18x12xf32> to vector<324x12xf32>
    %c8 = arith.constant 8 : index
    %c0_60 = arith.constant 0 : index
    %c0_61 = arith.constant 0 : index
    %60 = vector.load %arg2[%c8, %c0_60, %c0_61] : memref<9x12x16xf32, #tpu.memory_space<vmem>>, vector<1x12x16xf32>
    %61 = vector.shape_cast %60 : vector<1x12x16xf32> to vector<12x16xf32>
    %cst_62 = arith.constant dense<0.000000e+00> : vector<324x16xf32>
    %62 = tpu.matmul %59, %61, %cst_62 {dimension_numbers = #tpu.dot_dimension_numbers<[1], [0], [0], [1], [0, 0, 1, 1], [], []>} : vector<324x12xf32>, vector<12x16xf32>, vector<324x16xf32> -> vector<324x16xf32>
    %63 = arith.addf %56, %62 : vector<324x16xf32>
    %64 = math.tanh %63 : vector<324x16xf32>
    %65 = vector.shape_cast %64 : vector<324x16xf32> to vector<18x18x16xf32>
    %66 = tpu.iota {dimensions = array<i32: 0>} : vector<18x18x16xi32>
    %67 = tpu.iota {dimensions = array<i32: 1>} : vector<18x18x16xi32>
    %c1_i32 = arith.constant 1 : i32
    %68 = vector.broadcast %c1_i32 : i32 to vector<18x18x16xi32>
    %69 = arith.cmpi sge, %66, %68 : vector<18x18x16xi32>
    %c17_i32 = arith.constant 17 : i32
    %70 = vector.broadcast %c17_i32 : i32 to vector<18x18x16xi32>
    %71 = arith.cmpi slt, %66, %70 : vector<18x18x16xi32>
    %72 = arith.andi %69, %71 : vector<18x18x16xi1>
    %c1_i32_63 = arith.constant 1 : i32
    %73 = vector.broadcast %c1_i32_63 : i32 to vector<18x18x16xi32>
    %74 = arith.cmpi sge, %67, %73 : vector<18x18x16xi32>
    %75 = arith.andi %72, %74 : vector<18x18x16xi1>
    %c17_i32_64 = arith.constant 17 : i32
    %76 = vector.broadcast %c17_i32_64 : i32 to vector<18x18x16xi32>
    %77 = arith.cmpi slt, %67, %76 : vector<18x18x16xi32>
    %78 = arith.andi %75, %77 : vector<18x18x16xi1>
    %cst_65 = arith.constant 0.000000e+00 : f32
    %79 = vector.broadcast %cst_65 : f32 to vector<18x18x16xf32>
    %80 = arith.select %78, %65, %79 : vector<18x18x16xi1>, vector<18x18x16xf32>
    %c0_66 = arith.constant 0 : index
    %c0_67 = arith.constant 0 : index
    %c0_68 = arith.constant 0 : index
    %81 = vector.load %arg5[%c0_66, %c0_67, %c0_68] : memref<18x18x16xf32, #tpu.memory_space<vmem>>, vector<18x18x16xf32>
    tpu.vector_store %arg5[%c0_66, %c0_67, %c0_68], %80 {strides = array<i32>} : memref<18x18x16xf32, #tpu.memory_space<vmem>>, vector<18x18x16xf32>,
    %cst_69 = arith.constant 0.000000e+00 : f32
    %82 = vector.broadcast %cst_69 : f32 to vector<256x128xf32>
    %c0_70 = arith.constant 0 : index
    %c0_71 = arith.constant 0 : index
    %c0_72 = arith.constant 0 : index
    %83 = vector.load %arg5[%c0_70, %c0_71, %c0_72] : memref<18x18x16xf32, #tpu.memory_space<vmem>>, vector<16x16x16xf32>
    %84 = vector.shape_cast %83 : vector<16x16x16xf32> to vector<256x16xf32>
    %c0_73 = arith.constant 0 : index
    %c0_74 = arith.constant 0 : index
    %c0_75 = arith.constant 0 : index
    %85 = vector.load %arg3[%c0_73, %c0_74, %c0_75] : memref<9x16x128xf32, #tpu.memory_space<vmem>>, vector<1x16x128xf32>
    %86 = vector.shape_cast %85 : vector<1x16x128xf32> to vector<16x128xf32>
    %cst_76 = arith.constant dense<0.000000e+00> : vector<256x128xf32>
    %87 = tpu.matmul %84, %86, %cst_76 {dimension_numbers = #tpu.dot_dimension_numbers<[1], [0], [0], [1], [0, 0, 1, 1], [], []>} : vector<256x16xf32>, vector<16x128xf32>, vector<256x128xf32> -> vector<256x128xf32>
    %88 = arith.addf %82, %87 : vector<256x128xf32>
    %c0_77 = arith.constant 0 : index
    %c1_78 = arith.constant 1 : index
    %c0_79 = arith.constant 0 : index
    %89 = vector.load %arg5[%c0_77, %c1_78, %c0_79] : memref<18x18x16xf32, #tpu.memory_space<vmem>>, vector<16x16x16xf32>
    %90 = vector.shape_cast %89 : vector<16x16x16xf32> to vector<256x16xf32>
    %c1_80 = arith.constant 1 : index
    %c0_81 = arith.constant 0 : index
    %c0_82 = arith.constant 0 : index
    %91 = vector.load %arg3[%c1_80, %c0_81, %c0_82] : memref<9x16x128xf32, #tpu.memory_space<vmem>>, vector<1x16x128xf32>
    %92 = vector.shape_cast %91 : vector<1x16x128xf32> to vector<16x128xf32>
    %cst_83 = arith.constant dense<0.000000e+00> : vector<256x128xf32>
    %93 = tpu.matmul %90, %92, %cst_83 {dimension_numbers = #tpu.dot_dimension_numbers<[1], [0], [0], [1], [0, 0, 1, 1], [], []>} : vector<256x16xf32>, vector<16x128xf32>, vector<256x128xf32> -> vector<256x128xf32>
    %94 = arith.addf %88, %93 : vector<256x128xf32>
    %c0_84 = arith.constant 0 : index
    %c2_85 = arith.constant 2 : index
    %c0_86 = arith.constant 0 : index
    %95 = vector.load %arg5[%c0_84, %c2_85, %c0_86] : memref<18x18x16xf32, #tpu.memory_space<vmem>>, vector<16x16x16xf32>
    %96 = vector.shape_cast %95 : vector<16x16x16xf32> to vector<256x16xf32>
    %c2_87 = arith.constant 2 : index
    %c0_88 = arith.constant 0 : index
    %c0_89 = arith.constant 0 : index
    %97 = vector.load %arg3[%c2_87, %c0_88, %c0_89] : memref<9x16x128xf32, #tpu.memory_space<vmem>>, vector<1x16x128xf32>
    %98 = vector.shape_cast %97 : vector<1x16x128xf32> to vector<16x128xf32>
    %cst_90 = arith.constant dense<0.000000e+00> : vector<256x128xf32>
    %99 = tpu.matmul %96, %98, %cst_90 {dimension_numbers = #tpu.dot_dimension_numbers<[1], [0], [0], [1], [0, 0, 1, 1], [], []>} : vector<256x16xf32>, vector<16x128xf32>, vector<256x128xf32> -> vector<256x128xf32>
    %100 = arith.addf %94, %99 : vector<256x128xf32>
    %c1_91 = arith.constant 1 : index
    %c0_92 = arith.constant 0 : index
    %c0_93 = arith.constant 0 : index
    %101 = vector.load %arg5[%c1_91, %c0_92, %c0_93] : memref<18x18x16xf32, #tpu.memory_space<vmem>>, vector<16x16x16xf32>
    %102 = vector.shape_cast %101 : vector<16x16x16xf32> to vector<256x16xf32>
    %c3_94 = arith.constant 3 : index
    %c0_95 = arith.constant 0 : index
    %c0_96 = arith.constant 0 : index
    %103 = vector.load %arg3[%c3_94, %c0_95, %c0_96] : memref<9x16x128xf32, #tpu.memory_space<vmem>>, vector<1x16x128xf32>
    %104 = vector.shape_cast %103 : vector<1x16x128xf32> to vector<16x128xf32>
    %cst_97 = arith.constant dense<0.000000e+00> : vector<256x128xf32>
    %105 = tpu.matmul %102, %104, %cst_97 {dimension_numbers = #tpu.dot_dimension_numbers<[1], [0], [0], [1], [0, 0, 1, 1], [], []>} : vector<256x16xf32>, vector<16x128xf32>, vector<256x128xf32> -> vector<256x128xf32>
    %106 = arith.addf %100, %105 : vector<256x128xf32>
    %c1_98 = arith.constant 1 : index
    %c1_99 = arith.constant 1 : index
    %c0_100 = arith.constant 0 : index
    %107 = vector.load %arg5[%c1_98, %c1_99, %c0_100] : memref<18x18x16xf32, #tpu.memory_space<vmem>>, vector<16x16x16xf32>
    %108 = vector.shape_cast %107 : vector<16x16x16xf32> to vector<256x16xf32>
    %c4_101 = arith.constant 4 : index
    %c0_102 = arith.constant 0 : index
    %c0_103 = arith.constant 0 : index
    %109 = vector.load %arg3[%c4_101, %c0_102, %c0_103] : memref<9x16x128xf32, #tpu.memory_space<vmem>>, vector<1x16x128xf32>
    %110 = vector.shape_cast %109 : vector<1x16x128xf32> to vector<16x128xf32>
    %cst_104 = arith.constant dense<0.000000e+00> : vector<256x128xf32>
    %111 = tpu.matmul %108, %110, %cst_104 {dimension_numbers = #tpu.dot_dimension_numbers<[1], [0], [0], [1], [0, 0, 1, 1], [], []>} : vector<256x16xf32>, vector<16x128xf32>, vector<256x128xf32> -> vector<256x128xf32>
    %112 = arith.addf %106, %111 : vector<256x128xf32>
    %c1_105 = arith.constant 1 : index
    %c2_106 = arith.constant 2 : index
    %c0_107 = arith.constant 0 : index
    %113 = vector.load %arg5[%c1_105, %c2_106, %c0_107] : memref<18x18x16xf32, #tpu.memory_space<vmem>>, vector<16x16x16xf32>
    %114 = vector.shape_cast %113 : vector<16x16x16xf32> to vector<256x16xf32>
    %c5_108 = arith.constant 5 : index
    %c0_109 = arith.constant 0 : index
    %c0_110 = arith.constant 0 : index
    %115 = vector.load %arg3[%c5_108, %c0_109, %c0_110] : memref<9x16x128xf32, #tpu.memory_space<vmem>>, vector<1x16x128xf32>
    %116 = vector.shape_cast %115 : vector<1x16x128xf32> to vector<16x128xf32>
    %cst_111 = arith.constant dense<0.000000e+00> : vector<256x128xf32>
    %117 = tpu.matmul %114, %116, %cst_111 {dimension_numbers = #tpu.dot_dimension_numbers<[1], [0], [0], [1], [0, 0, 1, 1], [], []>} : vector<256x16xf32>, vector<16x128xf32>, vector<256x128xf32> -> vector<256x128xf32>
    %118 = arith.addf %112, %117 : vector<256x128xf32>
    %c2_112 = arith.constant 2 : index
    %c0_113 = arith.constant 0 : index
    %c0_114 = arith.constant 0 : index
    %119 = vector.load %arg5[%c2_112, %c0_113, %c0_114] : memref<18x18x16xf32, #tpu.memory_space<vmem>>, vector<16x16x16xf32>
    %120 = vector.shape_cast %119 : vector<16x16x16xf32> to vector<256x16xf32>
    %c6_115 = arith.constant 6 : index
    %c0_116 = arith.constant 0 : index
    %c0_117 = arith.constant 0 : index
    %121 = vector.load %arg3[%c6_115, %c0_116, %c0_117] : memref<9x16x128xf32, #tpu.memory_space<vmem>>, vector<1x16x128xf32>
    %122 = vector.shape_cast %121 : vector<1x16x128xf32> to vector<16x128xf32>
    %cst_118 = arith.constant dense<0.000000e+00> : vector<256x128xf32>
    %123 = tpu.matmul %120, %122, %cst_118 {dimension_numbers = #tpu.dot_dimension_numbers<[1], [0], [0], [1], [0, 0, 1, 1], [], []>} : vector<256x16xf32>, vector<16x128xf32>, vector<256x128xf32> -> vector<256x128xf32>
    %124 = arith.addf %118, %123 : vector<256x128xf32>
    %c2_119 = arith.constant 2 : index
    %c1_120 = arith.constant 1 : index
    %c0_121 = arith.constant 0 : index
    %125 = vector.load %arg5[%c2_119, %c1_120, %c0_121] : memref<18x18x16xf32, #tpu.memory_space<vmem>>, vector<16x16x16xf32>
    %126 = vector.shape_cast %125 : vector<16x16x16xf32> to vector<256x16xf32>
    %c7_122 = arith.constant 7 : index
    %c0_123 = arith.constant 0 : index
    %c0_124 = arith.constant 0 : index
    %127 = vector.load %arg3[%c7_122, %c0_123, %c0_124] : memref<9x16x128xf32, #tpu.memory_space<vmem>>, vector<1x16x128xf32>
    %128 = vector.shape_cast %127 : vector<1x16x128xf32> to vector<16x128xf32>
    %cst_125 = arith.constant dense<0.000000e+00> : vector<256x128xf32>
    %129 = tpu.matmul %126, %128, %cst_125 {dimension_numbers = #tpu.dot_dimension_numbers<[1], [0], [0], [1], [0, 0, 1, 1], [], []>} : vector<256x16xf32>, vector<16x128xf32>, vector<256x128xf32> -> vector<256x128xf32>
    %130 = arith.addf %124, %129 : vector<256x128xf32>
    %c2_126 = arith.constant 2 : index
    %c2_127 = arith.constant 2 : index
    %c0_128 = arith.constant 0 : index
    %131 = vector.load %arg5[%c2_126, %c2_127, %c0_128] : memref<18x18x16xf32, #tpu.memory_space<vmem>>, vector<16x16x16xf32>
    %132 = vector.shape_cast %131 : vector<16x16x16xf32> to vector<256x16xf32>
    %c8_129 = arith.constant 8 : index
    %c0_130 = arith.constant 0 : index
    %c0_131 = arith.constant 0 : index
    %133 = vector.load %arg3[%c8_129, %c0_130, %c0_131] : memref<9x16x128xf32, #tpu.memory_space<vmem>>, vector<1x16x128xf32>
    %134 = vector.shape_cast %133 : vector<1x16x128xf32> to vector<16x128xf32>
    %cst_132 = arith.constant dense<0.000000e+00> : vector<256x128xf32>
    %135 = tpu.matmul %132, %134, %cst_132 {dimension_numbers = #tpu.dot_dimension_numbers<[1], [0], [0], [1], [0, 0, 1, 1], [], []>} : vector<256x16xf32>, vector<16x128xf32>, vector<256x128xf32> -> vector<256x128xf32>
    %136 = arith.addf %130, %135 : vector<256x128xf32>
    %137 = vector.shape_cast %136 : vector<256x128xf32> to vector<16x16x128xf32>
    %c0_133 = arith.constant 0 : index
    %c0_134 = arith.constant 0 : index
    %c0_135 = arith.constant 0 : index
    %c0_136 = arith.constant 0 : index
    %138 = vector.load %arg4[%c0_133, %c0_134, %c0_135, %c0_136] : memref<1x16x16x128xf32, #tpu.memory_space<vmem>>, vector<1x16x16x128xf32>
    %139 = vector.shape_cast %138 : vector<1x16x16x128xf32> to vector<16x16x128xf32>
    %140 = vector.shape_cast %137 : vector<16x16x128xf32> to vector<1x16x16x128xf32>
    tpu.vector_store %arg4[%c0_133, %c0_134, %c0_135, %c0_136], %140 {strides = array<i32>} : memref<1x16x16x128xf32, #tpu.memory_space<vmem>>, vector<1x16x16x128xf32>,
    return
  }
  func.func @transform_0(%arg0: i32) -> (i32, i32, i32, i32) {
    %c0_i32 = arith.constant 0 : i32
    %c0_i32_0 = arith.constant 0 : i32
    %c0_i32_1 = arith.constant 0 : i32
    %c0_i32_2 = arith.constant 0 : i32
    return %arg0, %c0_i32, %c0_i32_0, %c0_i32_1 : i32, i32, i32, i32
  }
  func.func @transform_1(%arg0: i32) -> (i32, i32, i32) {
    %c0_i32 = arith.constant 0 : i32
    %c0_i32_0 = arith.constant 0 : i32
    %c0_i32_1 = arith.constant 0 : i32
    %c0_i32_2 = arith.constant 0 : i32
    return %c0_i32, %c0_i32_0, %c0_i32_1 : i32, i32, i32
  }
  func.func @transform_2(%arg0: i32) -> (i32, i32, i32) {
    %c0_i32 = arith.constant 0 : i32
    %c0_i32_0 = arith.constant 0 : i32
    %c0_i32_1 = arith.constant 0 : i32
    %c0_i32_2 = arith.constant 0 : i32
    return %c0_i32, %c0_i32_0, %c0_i32_1 : i32, i32, i32
  }
  func.func @transform_3(%arg0: i32) -> (i32, i32, i32, i32) {
    %c0_i32 = arith.constant 0 : i32
    %c0_i32_0 = arith.constant 0 : i32
    %c0_i32_1 = arith.constant 0 : i32
    %c0_i32_2 = arith.constant 0 : i32
    return %arg0, %c0_i32, %c0_i32_0, %c0_i32_1 : i32, i32, i32, i32
  }
}

</mosaic_0001>

<bundles_post_ra>
// kernel: tpu_custom_call.1
= control target key start
LH: loop header
LB: loop body
LE: loop exit
PB: predicated region body
PF: predicated region fallthrough
CT: control target
= control target key end

     0   :  { %8 = vsyncpa [#allocation4], 0  ;;  %s33112_s0 = inlined_call_operand.vmem [shape: f32[2,20,20,12], index: 0, kind: input, shape index: {}]   ;;  %s33113_s1 = inlined_call_operand.vmem [shape: f32[9,12,16], index: 1, kind: input, shape index: {}]   ;;  %s33114_s2 = inlined_call_operand.vmem [shape: f32[9,16,128], index: 2, kind: input, shape index: {}]   ;;  %s33115_s3 = inlined_call_operand.hbm [shape: f32[2,16,16,128], index: 3, kind: output, shape index: {}]  }
   0x1   :  { %10 = vsyncpa [#allocation4 + $0x1], 0  ;;  %s27598_s12 = smov 0   ;;  %s27600_s13 = smov 0  }
   0x2   :  { %s27602_s14 = smov 0   ;;  %s27604_s15 = smov 0  }
   0x3 LB: > { %s27619_s16 = sadd.s32 4294967295, %s27568_s15   ;;  %s22718_s17 = sadd.s32 4294967294, %s27568_s15   ;;  %s27568_s15 = sphi %s27604_s15, %s33619_s15   ;;  %s27564_s14 = sphi %s27602_s14, %s33618_s14   ;;  %s27560_s13 = sphi %s27600_s13, %s33617_s13   ;;  %s27556_s12 = sphi %s27598_s12, %s33616_s12  }
   0x4   : > { %s27623_s18 = sadd.s32 1, %s27568_s15   ;;  %s91_s19 = sadd.s32 1, %s27564_s14 }
   0x5   : > { %s88_s20 = ssub.s32 %s27568_s15, %s27623_s18  ;;  %p101_p0 = scmp.ne.s32.totalorder %s27564_s14, %s27560_s13 }
   0x6   : > { %p89_p1 = scmp.eq.s32.totalorder %s88_s20, 0  ;;  %p102_p2 = scmp.eq.s32.totalorder %s27619_s16, 1 }
   0x7   : > { %p107_p3 = scmp.ne.s32.totalorder %s27560_s13, %s27556_s12  ;;  %p108_p4 = scmp.eq.s32.totalorder %s22718_s17, 1 }
   0x8   : > { %s27634_s21 = scalar_select %p89_p1, %s27564_s14, %s91_s19  }
   0x9   : > { %p27636_p5 = por %p102_p2, %p101_p0  ;;  %p27640_p6 = por %p108_p4, %p107_p3 }
   0xa   : > { %p22721_p7 = scmp.ge.s32.totalorder %s27568_s15, 1  ;;  %p140_p8 = scmp.lt.s32.totalorder %s27568_s15, 3 }
   0xc   : > { %p141_p9 = pnand %p22721_p7, %p140_p8 }
   0xe   : > { %144 = sbr.rel (%p141_p9) target bundleno = 2031 (0x7ef), region = 32 }
  0x15   : > { %vm2637_vm0 = vcmask 1043456   ;;  %v22864_v0 = vld [vmem:[%s33113_s1 + $0x20] sm:$0xff]  ;;  %v22865_v1 = vld [vmem:[%s33113_s1 + $0x28] sm:$0xf]  ;;  %v281_v2 = vlaneseq  ;;  %v33116_v3 = vmov 0.0|0.0   ;;  %vm27571_vm1 = vmmov 1  }
  0x16   : > { %26226 = vmatprep.subr.bf16.mxu0 %v33116_v3  ;;  %vm27653_vm2 = vmpackc.low %vm2637_vm0, %vm27571_vm1  ;;  %v33271_v4 = vmov 0  ;;  %v27657_v5 = vpack.c.bf16 %v22865_v1, %v22864_v0  ;;  %p164_p10 = scmp.lt.s32.totalorder %s27619_s16, 1  ;;  %26218 = vmatprep.subr.bf16.mxu1 %v33116_v3  ;;  %vm27572_vm3 = vmmov 0   ;;  %v33118_v6 = vmov 0.0   ;;  %v22980_v39 = vld [vmem:[%s33113_s1 + $0x30] sm:$0xff]  ;;  %s23913_s8 = sshll.u32 %s27619_s16, 12 }
  0x17   : > { %v33272_v4 = vsel %vm27653_vm2, 4294967295, %v33271_v4  ;;  %24865 = vmatprep.mubr.msk.f32.mxu0 %vm27572_vm3, %v33118_v6  ;;  %v27574_v7 = vmov 1983009808   ;;  %v27663_v9 = vshrl.u32 %v281_v2, 7  ;;  %24611 = vmatprep.mubr.msk.f32.mxu1 %vm27572_vm3, %v33118_v6  ;;  %v22981_v40 = vld [vmem:[%s33113_s1 + $0x38] sm:$0xf]  ;;  %s33063_s17 = scalar_lea.hbm %s33115_s3, %s23913_s8 }
  0x18   : > { %33273 = vst [vmem:[#allocation6_spill] sm:$0xff] %v33272_v4  ;;  %33274 = vst [vmem:[#allocation7_spill] sm:$0xff] %v27657_v5  ;;  %v279_v8 = vunpack.c.l.s4 %v27574_v7  ;;  %26229 = vmatpush3.bf16.msk.msra.mxu0 %vm27653_vm2, %v27657_v5  ;;  %s165_s28 = scalar_select %p164_p10, %s27619_s16, 1  ;;  %vm2554_vm4 = vcmask 97280   ;;  %v26231_v51 = vpack.c.bf16 %v22981_v40, %v22980_v39  ;;  %vm19125_vm5 = vcmask 130048  }
  0x19   : > { %33275 = vst [vmem:[#allocation8_spill] sm:$0xff] %v27663_v9  ;;  %26230 = vmatprep.subr.bf16.mxu0 %v33116_v3  ;;  %vm19128_vm6 = vcmask 123904   ;;  %s27575_s20 = smov [#allocation3]  }
  0x1a   : > { %v280_v10 = vunpack.c.0.s8 %v279_v8  ;;  %s27103_s29 = smul.u32 480, %s165_s28  ;;  %s27510_s24 = sshll.u32 %s27575_s20, 4  ;;  %s27511_s24 = int_to_ptr.vmem [resolvable:$false] %s27510_s24 }
  0x1b   : > { %s27512_s25 = scalar_lea.vmem %s27511_s24, 8192 }
  0x1c   : > { %v27673_v11 = vsub.s32 %v280_v10, %v27663_v9  ;;  %s27678_s5 = scalar_lea.vmem %s33112_s0, %s27103_s29 }
  0x1d   : > { %v3954_v12 = vld [vmem:[%s27678_s5 + $0x2] sm:$0xff]  ;;  %v3955_v13 = vld [vmem:[%s27678_s5 + $0xa] sm:$0xff]  ;;  %v3957_v18 = vld [vmem:[%s27678_s5 + $0x1a] sm:$0xff] }
  0x1e   : > { %33276 = vst [vmem:[#allocation9_spill] sm:$0xff] %v27673_v11  ;;  %v4062_v14 = vcombine.high %v3954_v12, %v3954_v12  ;;  %v4069_v15 = vrot.slane %v3954_v12, %v27673_v11  ;;  %v4079_v16 = vcombine.high %v3955_v13, %v3955_v13  ;;  %v4086_v17 = vrot.slane %v3955_v13, %v27673_v11  ;;  %v3958_v19 = vld [vmem:[%s27678_s5 + $0x22] sm:$0xff]  ;;  %v22846_v26 = vld.sshfl [vmem:[%s27678_s5 + $0x12] sm:$0x3 pattern:$0x76325410] }
  0x1f   : > { %v4103_v20 = vcombine.high %v3957_v18, %v3957_v18  ;;  %v4110_v21 = vrot.slane %v3957_v18, %v27673_v11  ;;  %v4120_v29 = vcombine.high %v3958_v19, %v3958_v19  ;;  %v4127_v30 = vrot.slane %v3958_v19, %v27673_v11  ;;  %v3960_v36 = vld [vmem:[%s27678_s5 + $0x32] sm:$0xff]  ;;  %v3961_v52 = vld [vmem:[%s27678_s5 + $0x3a] sm:$0xff]  ;;  %v3963_v60 = vld [vmem:[%s27678_s5 + $0x4a] sm:$0xff] }
  0x20   : > { %v4076_v22 = vrot.slane %v4062_v14, %v27673_v11  ;;  %v4077_v23 = vcombine.high %v4069_v15, %v4069_v15  ;;  %v4093_v24 = vrot.slane %v4079_v16, %v27673_v11  ;;  %v4094_v25 = vcombine.high %v4086_v17, %v4086_v17  ;;  %v22847_v62 = vld.sshfl [vmem:[%s27678_s5 + $0x2a] sm:$0x3 pattern:$0x76325410] }
  0x21   : > { %v4117_v27 = vrot.slane %v4103_v20, %v27673_v11  ;;  %v4118_v28 = vcombine.high %v4110_v21, %v4110_v21  ;;  %v4837_v35 = vcombine.low %v22846_v26, %v4110_v21  ;;  %v4134_v45 = vrot.slane %v4120_v29, %v27673_v11  ;;  %v22848_v26 = vld.sshfl [vmem:[%s27678_s5 + $0x42] sm:$0x3 pattern:$0x76325410]  ;;  %v3967_v39 = vld [vmem:[%s27678_s5 + $0x6a] sm:$0xff] }
  0x22   : > { %v4078_v31 = vcombine.high %v4076_v22, %v4076_v22  ;;  %v4803_v32 = vcombine.low %v4069_v15, %v4077_v23  ;;  %v4095_v33 = vcombine.high %v4093_v24, %v4093_v24  ;;  %v4820_v34 = vcombine.low %v4086_v17, %v4094_v25  ;;  %v3964_v17 = vld [vmem:[%s27678_s5 + $0x52] sm:$0xff] }
  0x23   : > { %v4838_v42 = vcombine.low %v4118_v28, %v4117_v27  ;;  %v4119_v44 = vcombine.high %v4117_v27, %v4117_v27  ;;  %v4135_v46 = vcombine.high %v4127_v30, %v4127_v30  ;;  %v4151_v49 = vrot.slane %v3960_v36, %v27673_v11  ;;  %v3966_v28 = vld [vmem:[%s27678_s5 + $0x62] sm:$0xff] }
  0x24   : > { %v4804_v37 = vcombine.low %v4076_v22, %v4078_v31  ;;  %v4811_v38 = vrot.slane %v4803_v32, %v27673_v11  ;;  %v4821_v41 = vcombine.low %v4093_v24, %v4095_v33  ;;  %v4828_v43 = vrot.slane %v4820_v34, %v27673_v11 }
  0x25   : > { %v4144_v50 = vcombine.high %v3960_v36, %v3960_v36  ;;  %v4845_v54 = vrot.slane %v4837_v35, %v27673_v11  ;;  %v4852_v55 = vrot.slane %v4838_v42, %v27673_v11  ;;  %v4854_v56 = vcombine.low %v4119_v44, %v4127_v30 }
  0x26   : > { %v4818_v47 = vrot.slane %v4804_v37, %v27673_v11  ;;  %v4835_v48 = vrot.slane %v4821_v41, %v27673_v11  ;;  %v4855_v57 = vcombine.low %v4135_v46, %v4134_v45  ;;  %v4136_v58 = vcombine.high %v4134_v45, %v4134_v45 }
  0x27   : > { %v4159_v59 = vcombine.high %v4151_v49, %v4151_v49  ;;  %v4158_v63 = vrot.slane %v4144_v50, %v27673_v11  ;;  %v4168_v0 = vrot.slane %v3961_v52, %v27673_v11  ;;  %v4161_v1 = vcombine.high %v3961_v52, %v3961_v52 }
  0x28   : > { %v4819_v53 = vcombine.low %v4811_v38, %v4818_v47  ;;  %v4836_v61 = vcombine.low %v4828_v43, %v4835_v48  ;;  %v4185_v2 = vcombine.high %v3963_v60, %v3963_v60  ;;  %v4853_v7 = vcombine.low %v4845_v54, %v4852_v55  ;;  %v22849_v48 = vld.sshfl [vmem:[%s27678_s5 + $0x5a] sm:$0x3 pattern:$0x76325410] }
  0x29   : > { %v4862_v8 = vrot.slane %v4854_v56, %v27673_v11  ;;  %v4871_v10 = vcombine.low %v4136_v58, %v22847_v62  ;;  %v4872_v12 = vcombine.low %v4151_v49, %v4159_v59  ;;  %v4869_v13 = vrot.slane %v4855_v57, %v27673_v11  ;;  %v22909_v62 = vld [vmem:[%s27678_s5 + $0x20] sm:$0xff] }
  0x2a   : > { %24866 = vmatmul.mubr.msk.f32.vlgmr.msra.gmra.mrb[0].mxu0 %vm2554_vm4, %v4819_v53  ;;  %v4160_v14 = vcombine.high %v4158_v63, %v4158_v63  ;;  %v4176_v15 = vcombine.high %v4168_v0, %v4168_v0  ;;  %v4175_v16 = vrot.slane %v4161_v1, %v27673_v11  ;;  %v4199_v18 = vrot.slane %v4185_v2, %v27673_v11 }
  0x2b   : > { %26233 = vmatpush3.bf16.msk.msra.mxu0 %vm27653_vm2, %v26231_v51  ;;  %24868 = vmatprep.mubr.msk.f32.mxu0 %vm27572_vm3, %v33118_v6  ;;  %v4879_v19 = vrot.slane %v4871_v10, %v27673_v11  ;;  %v4886_v20 = vrot.slane %v4872_v12, %v27673_v11  ;;  %v4192_v21 = vrot.slane %v3963_v60, %v27673_v11  ;;  %v22908_v51 = vld [vmem:[%s27678_s5 + $0x18] sm:$0xff] }
  0x2c   : > { %26234 = vmatprep.subr.bf16.mxu0 %v33116_v3  ;;  %v4202_v22 = vcombine.high %v3964_v17, %v3964_v17  ;;  %v4870_v23 = vcombine.low %v4862_v8, %v4869_v13  ;;  %v4888_v24 = vcombine.low %v4158_v63, %v4160_v14  ;;  %v4889_v25 = vcombine.low %v4168_v0, %v4176_v15 }
  0x2d   : > { %v4177_v27 = vcombine.high %v4175_v16, %v4175_v16  ;;  %v4200_v29 = vcombine.high %v4192_v21, %v4192_v21  ;;  %v4201_v30 = vcombine.high %v4199_v18, %v4199_v18  ;;  %v4209_v31 = vrot.slane %v3964_v17, %v27673_v11 }
  0x2e   : > { %24869 = vmatmul.mubr.msk.f32.gmra.mrb[2].mxu0 %vm2554_vm4, %v4836_v61  ;;  %v4887_v32 = vcombine.low %v4879_v19, %v4886_v20  ;;  %v4906_v33 = vcombine.low %v22848_v26, %v4192_v21  ;;  %v4216_v34 = vrot.slane %v4202_v22, %v27673_v11  ;;  %v4896_v35 = vrot.slane %v4888_v24, %v27673_v11  ;;  %v22911_v20 = vld [vmem:[%s27678_s5 + $0x30] sm:$0xff] }
  0x2f   : > { %24871 = vmatprep.mubr.msk.f32.mxu0 %vm27572_vm3, %v33118_v6  ;;  %v4903_v36 = vrot.slane %v4889_v25, %v27673_v11  ;;  %v4905_v37 = vcombine.low %v4175_v16, %v4177_v27  ;;  %v4226_v38 = vcombine.high %v3966_v28, %v3966_v28  ;;  %v4922_v40 = vcombine.low %v4200_v29, %v4199_v18 }
  0x30   : > { %v4923_v41 = vcombine.low %v4201_v30, %v4209_v31  ;;  %v4233_v42 = vrot.slane %v3966_v28, %v27673_v11  ;;  %v4920_v43 = vrot.slane %v4906_v33, %v27673_v11  ;;  %v4217_v44 = vcombine.high %v4209_v31, %v4209_v31  ;;  %v22912_v30 = vld [vmem:[%s27678_s5 + $0x38] sm:$0xff] }
  0x31   : > { %v4218_v45 = vcombine.high %v4216_v34, %v4216_v34  ;;  %v4904_v46 = vcombine.low %v4896_v35, %v4903_v36  ;;  %v4913_v47 = vrot.slane %v4905_v37, %v27673_v11  ;;  %v4240_v49 = vrot.slane %v4226_v38, %v27673_v11  ;;  %v22914_v38 = vld [vmem:[%s27678_s5 + $0x48] sm:$0xff] }
  0x32   : > { %24872 = vmatmul.mubr.msk.f32.gmra.mrb[4].mxu0 %vm2554_vm4, %v4853_v7  ;;  %v4243_v50 = vcombine.high %v3967_v39, %v3967_v39  ;;  %v4930_v52 = vrot.slane %v4922_v40, %v27673_v11  ;;  %v4937_v53 = vrot.slane %v4923_v41, %v27673_v11  ;;  %v4241_v54 = vcombine.high %v4233_v42, %v4233_v42  ;;  %v22962_v41 = vld.sshfl [vmem:[%s27678_s5 + $0x28] sm:$0x3 pattern:$0x76325410] }
  0x33   : > { %24874 = vmatprep.mubr.msk.f32.mxu0 %vm27572_vm3, %v33118_v6  ;;  %v4939_v55 = vcombine.low %v4217_v44, %v4216_v34  ;;  %v4940_v56 = vcombine.low %v4218_v45, %v22849_v48  ;;  %v4250_v57 = vrot.slane %v3967_v39, %v27673_v11  ;;  %v4921_v58 = vcombine.low %v4913_v47, %v4920_v43  ;;  %v22915_v48 = vld [vmem:[%s27678_s5 + $0x50] sm:$0xff] }
  0x34   : > { %v4242_v59 = vcombine.high %v4240_v49, %v4240_v49  ;;  %v4257_v60 = vrot.slane %v4243_v50, %v27673_v11  ;;  %v5996_v61 = vcombine.high %v22908_v51, %v22908_v51  ;;  %v4938_v63 = vcombine.low %v4930_v52, %v4937_v53  ;;  %v23096_v50 = vld [vmem:[%s33113_s1 + $0x40] sm:$0xff] }
  0x35   : > { %v4956_v0 = vcombine.low %v4233_v42, %v4241_v54  ;;  %v4947_v1 = vrot.slane %v4939_v55, %v27673_v11  ;;  %v4954_v2 = vrot.slane %v4940_v56, %v27673_v11  ;;  %v4258_v7 = vcombine.high %v4250_v57, %v4250_v57  ;;  %v22917_v55 = vld [vmem:[%s27678_s5 + $0x60] sm:$0xff] }
  0x36   : > { %24875 = vmatmul.mubr.msk.f32.gmra.mrb[6].mxu0 %vm2554_vm4, %v4870_v23  ;;  %v6003_v8 = vrot.slane %v22908_v51, %v27673_v11  ;;  %v4957_v10 = vcombine.low %v4240_v49, %v4242_v59  ;;  %v4259_v12 = vcombine.high %v4257_v60, %v4257_v60  ;;  %v6010_v13 = vrot.slane %v5996_v61, %v27673_v11  ;;  %v23097_v51 = vld [vmem:[%s33113_s1 + $0x48] sm:$0xf] }
  0x37   : > { %24877 = vmatprep.mubr.msk.f32.mxu0 %vm27572_vm3, %v33118_v6  ;;  %v6013_v14 = vcombine.high %v22909_v62, %v22909_v62  ;;  %v4964_v15 = vrot.slane %v4956_v0, %v27673_v11  ;;  %v4955_v16 = vcombine.low %v4947_v1, %v4954_v2  ;;  %v4973_v17 = vcombine.low %v4250_v57, %v4258_v7  ;;  %v22918_v2 = vld [vmem:[%s27678_s5 + $0x68] sm:$0xff] }
  0x38   : > { %v6011_v18 = vcombine.high %v6003_v8, %v6003_v8  ;;  %v6020_v19 = vrot.slane %v22909_v62, %v27673_v11  ;;  %v4971_v21 = vrot.slane %v4957_v10, %v27673_v11  ;;  %v4974_v22 = vcombine.low %v4257_v60, %v4259_v12 }
  0x39   : > { %v6012_v23 = vcombine.high %v6010_v13, %v6010_v13  ;;  %v6027_v24 = vrot.slane %v6013_v14, %v27673_v11  ;;  %v6037_v25 = vcombine.high %v22911_v20, %v22911_v20  ;;  %v6044_v26 = vrot.slane %v22911_v20, %v27673_v11 }
  0x3a   : > { %24878 = vmatmul.mubr.msk.f32.gmra.mrb[8].mxu0 %vm2554_vm4, %v4887_v32  ;;  %v4981_v27 = vrot.slane %v4973_v17, %v27673_v11  ;;  %v6737_v28 = vcombine.low %v6003_v8, %v6011_v18  ;;  %v6028_v29 = vcombine.high %v6020_v19, %v6020_v19  ;;  %v4972_v31 = vcombine.low %v4964_v15, %v4971_v21  ;;  %v22963_v15 = vld.sshfl [vmem:[%s27678_s5 + $0x40] sm:$0x3 pattern:$0x76325410] }
  0x3b   : > { %24880 = vmatprep.mubr.msk.f32.mxu0 %vm27572_vm3, %v33118_v6  ;;  %v4988_v32 = vrot.slane %v4974_v22, %v27673_v11  ;;  %v6738_v33 = vcombine.low %v6010_v13, %v6012_v23  ;;  %v6029_v34 = vcombine.high %v6027_v24, %v6027_v24  ;;  %v6051_v35 = vrot.slane %v6037_v25, %v27673_v11  ;;  %v22920_v13 = vld [vmem:[%s27678_s5 + $0x78] sm:$0xff] }
  0x3c   : > { %v6052_v36 = vcombine.high %v6044_v26, %v6044_v26  ;;  %v6054_v37 = vcombine.high %v22912_v30, %v22912_v30  ;;  %v6745_v39 = vrot.slane %v6737_v28, %v27673_v11  ;;  %v6754_v40 = vcombine.low %v6020_v19, %v6028_v29  ;;  %v22921_v19 = vld [vmem:[%s27678_s5 + $0x80] sm:$0xff] }
  0x3d   : > { %v6061_v42 = vrot.slane %v22912_v30, %v27673_v11  ;;  %v6078_v43 = vcombine.high %v22914_v38, %v22914_v38  ;;  %v4989_v44 = vcombine.low %v4981_v27, %v4988_v32  ;;  %v6752_v45 = vrot.slane %v6738_v33, %v27673_v11 }
  0x3e   : > { %24881 = vmatmul.mubr.msk.f32.gmra.mrb[10].mxu0 %vm2554_vm4, %v4904_v46  ;;  %v6755_v46 = vcombine.low %v6027_v24, %v6029_v34  ;;  %v6053_v47 = vcombine.high %v6051_v35, %v6051_v35  ;;  %v6095_v49 = vcombine.high %v22915_v48, %v22915_v48  ;;  %v6771_v52 = vcombine.low %v22962_v41, %v6044_v26  ;;  %v22964_v24 = vld.sshfl [vmem:[%s27678_s5 + $0x58] sm:$0x3 pattern:$0x76325410] }
  0x3f   : > { %24883 = vmatprep.mubr.msk.f32.mxu0 %vm27572_vm3, %v33118_v6  ;;  %v6772_v53 = vcombine.low %v6052_v36, %v6051_v35  ;;  %v6068_v54 = vrot.slane %v6054_v37, %v27673_v11  ;;  %v6069_v56 = vcombine.high %v6061_v42, %v6061_v42  ;;  %v6085_v57 = vrot.slane %v22914_v38, %v27673_v11 }
  0x40   : > { %v6102_v59 = vrot.slane %v22915_v48, %v27673_v11  ;;  %v6753_v60 = vcombine.low %v6745_v39, %v6752_v45  ;;  %v6762_v61 = vrot.slane %v6754_v40, %v27673_v11  ;;  %v6769_v62 = vrot.slane %v6755_v46, %v27673_v11 }
  0x41   : > { %v26235_v0 = vpack.c.bf16 %v23097_v51, %v23096_v50  ;;  %v6109_v1 = vrot.slane %v6095_v49, %v27673_v11  ;;  %v6119_v7 = vcombine.high %v22917_v55, %v22917_v55  ;;  %v6779_v8 = vrot.slane %v6771_v52, %v27673_v11 }
  0x42   : > { %24884 = vmatmul.mubr.msk.f32.gmra.mrb[12].mxu0 %vm2554_vm4, %v4921_v58  ;;  %v6092_v58 = vrot.slane %v6078_v43, %v27673_v11  ;;  %v6786_v10 = vrot.slane %v6772_v53, %v27673_v11  ;;  %v6070_v12 = vcombine.high %v6068_v54, %v6068_v54  ;;  %v6789_v14 = vcombine.low %v6069_v56, %v6068_v54 }
  0x43   : > { %24886 = vmatprep.mubr.msk.f32.mxu0 %vm27572_vm3, %v33118_v6  ;;  %v6110_v18 = vcombine.high %v6102_v59, %v6102_v59  ;;  %v6770_v20 = vcombine.low %v6762_v61, %v6769_v62  ;;  %v6126_v22 = vrot.slane %v22917_v55, %v27673_v11  ;;  %v6136_v23 = vcombine.high %v22918_v2, %v22918_v2  ;;  %v22923_v55 = vld [vmem:[%s27678_s5 + $0x90] sm:$0xff]  ;;  %v22924_v61 = vld [vmem:[%s27678_s5 + $0x98] sm:$0xff] }
  0x44   : > { %v6094_v17 = vcombine.high %v6092_v58, %v6092_v58  ;;  %v6111_v25 = vcombine.high %v6109_v1, %v6109_v1  ;;  %v6133_v26 = vrot.slane %v6119_v7, %v27673_v11  ;;  %v6160_v27 = vcombine.high %v22920_v13, %v22920_v13 }
  0x45   : > { %v6787_v28 = vcombine.low %v6779_v8, %v6786_v10  ;;  %v6805_v29 = vcombine.low %v6070_v12, %v22963_v15  ;;  %v6167_v30 = vrot.slane %v22920_v13, %v27673_v11  ;;  %v6803_v32 = vrot.slane %v6789_v14, %v27673_v11  ;;  %v22926_v10 = vld [vmem:[%s27678_s5 + $0xa8] sm:$0xff] }
  0x46   : > { %24887 = vmatmul.mubr.msk.f32.gmra.mrb[14].mxu0 %vm2554_vm4, %v4938_v63  ;;  %v6788_v63 = vcombine.low %v6053_v47, %v6061_v42  ;;  %v6822_v34 = vcombine.low %v6092_v58, %v6094_v17  ;;  %v6823_v35 = vcombine.low %v6102_v59, %v6110_v18  ;;  %v6840_v36 = vcombine.low %v22964_v24, %v6126_v22  ;;  %v22965_v58 = vld.sshfl [vmem:[%s27678_s5 + $0x70] sm:$0x3 pattern:$0x76325410] }
  0x47   : > { %24889 = vmatprep.mubr.msk.f32.mxu0 %vm27572_vm3, %v33118_v6  ;;  %v6134_v37 = vcombine.high %v6126_v22, %v6126_v22  ;;  %v6143_v38 = vrot.slane %v22918_v2, %v27673_v11  ;;  %v6150_v39 = vrot.slane %v6136_v23, %v27673_v11  ;;  %v6839_v40 = vcombine.low %v6109_v1, %v6111_v25  ;;  %v22966_v24 = vld.sshfl [vmem:[%s27678_s5 + $0x88] sm:$0x3 pattern:$0x76325410] }
  0x48   : > { %v6796_v21 = vrot.slane %v6788_v63, %v27673_v11  ;;  %v6135_v41 = vcombine.high %v6133_v26, %v6133_v26  ;;  %v6174_v42 = vrot.slane %v6160_v27, %v27673_v11  ;;  %v6184_v43 = vrot.slane %v22921_v19, %v27673_v11 }
  0x49   : > { %v6175_v45 = vcombine.high %v6167_v30, %v6167_v30  ;;  %v6813_v47 = vrot.slane %v6805_v29, %v27673_v11  ;;  %v6830_v49 = vrot.slane %v6822_v34, %v27673_v11  ;;  %v6837_v50 = vrot.slane %v6823_v35, %v27673_v11  ;;  %v22929_v29 = vld [vmem:[%s27678_s5 + $0xc0] sm:$0xff] }
  0x4a   : > { %24890 = vmatmul.mubr.msk.f32.gmra.mrb[16].mxu0 %vm2554_vm4, %v4955_v16  ;;  %v6093_v16 = vcombine.high %v6085_v57, %v6085_v57  ;;  %v6804_v51 = vcombine.low %v6796_v21, %v6803_v32  ;;  %v6854_v52 = vrot.slane %v6840_v36, %v27673_v11  ;;  %v6856_v53 = vcombine.low %v6134_v37, %v6133_v26 }
  0x4b   : > { %24892 = vmatprep.mubr.msk.f32.mxu0 %vm27572_vm3, %v33118_v6  ;;  %v6152_v54 = vcombine.high %v6150_v39, %v6150_v39  ;;  %v6847_v56 = vrot.slane %v6839_v40, %v27673_v11  ;;  %v6176_v59 = vcombine.high %v6174_v42, %v6174_v42  ;;  %v6890_v63 = vcombine.low %v6167_v30, %v6175_v45 }
  0x4c   : > { %v6806_v33 = vcombine.low %v6085_v57, %v6093_v16  ;;  %v6857_v57 = vcombine.low %v6135_v41, %v6143_v38  ;;  %v6838_v2 = vcombine.low %v6830_v49, %v6837_v50  ;;  %v6201_v7 = vcombine.high %v22923_v55, %v22923_v55 }
  0x4d   : > { %v6208_v8 = vrot.slane %v22923_v55, %v27673_v11  ;;  %v6864_v12 = vrot.slane %v6856_v53, %v27673_v11  ;;  %v6874_v13 = vcombine.low %v6152_v54, %v22965_v58  ;;  %v6218_v14 = vcombine.high %v22924_v61, %v22924_v61 }
  0x4e   : > { %24893 = vmatmul.mubr.msk.f32.gmra.mrb[18].mxu0 %vm2554_vm4, %v4972_v31  ;;  %v6177_v31 = vcombine.high %v22921_v19, %v22921_v19  ;;  %v6820_v48 = vrot.slane %v6806_v33, %v27673_v11  ;;  %v6242_v15 = vcombine.high %v22926_v10, %v22926_v10  ;;  %v6855_v16 = vcombine.low %v6847_v56, %v6854_v52 }
  0x4f   : > { %24895 = vmatprep.mubr.msk.f32.mxu0 %vm27572_vm3, %v33118_v6  ;;  %v6871_v17 = vrot.slane %v6857_v57, %v27673_v11  ;;  %v6891_v18 = vcombine.low %v6174_v42, %v6176_v59  ;;  %v6898_v22 = vrot.slane %v6890_v63, %v27673_v11  ;;  %v6225_v25 = vrot.slane %v22924_v61, %v27673_v11 }
  0x50   : > { %v6191_v46 = vrot.slane %v6177_v31, %v27673_v11  ;;  %v6821_v1 = vcombine.low %v6813_v47, %v6820_v48  ;;  %v6215_v26 = vrot.slane %v6201_v7, %v27673_v11  ;;  %v6216_v27 = vcombine.high %v6208_v8, %v6208_v8  ;;  %v22967_v47 = vld.sshfl [vmem:[%s27678_s5 + $0xa0] sm:$0x3 pattern:$0x76325410] }
  0x51   : > { %v6888_v31 = vrot.slane %v6874_v13, %v27673_v11  ;;  %v6232_v32 = vrot.slane %v6218_v14, %v27673_v11  ;;  %v6256_v33 = vrot.slane %v6242_v15, %v27673_v11  ;;  %v6905_v35 = vrot.slane %v6891_v18, %v27673_v11 }
  0x52   : > { %24896 = vmatmul.mubr.msk.f32.gmra.mrb[20].mxu0 %vm2554_vm4, %v4989_v44  ;;  %v6151_v44 = vcombine.high %v6143_v38, %v6143_v38  ;;  %v6924_v37 = vcombine.low %v22966_v24, %v6208_v8  ;;  %v6217_v38 = vcombine.high %v6215_v26, %v6215_v26  ;;  %v6233_v41 = vcombine.high %v6225_v25, %v6225_v25 }
  0x53   : > { %24992 = vmatprep.mubr.msk.f32.mxu0 %vm27572_vm3, %v33118_v6  ;;  %v6234_v42 = vcombine.high %v6232_v32, %v6232_v32  ;;  %v6872_v45 = vcombine.low %v6864_v12, %v6871_v17  ;;  %v27878_v54 = vcombine.low %v6898_v22, %v6905_v35 }
  0x54   : > { %v6873_v62 = vcombine.low %v6151_v44, %v6150_v39  ;;  %v22930_v39 = vld [vmem:[%s27678_s5 + $0xc8] sm:$0xff]  ;;  %v22932_v44 = vld [vmem:[%s27678_s5 + $0xd8] sm:$0xff]  ;;  %v6932_v55 = vrot.slane %v6924_v37, %v27673_v11  ;;  %v6941_v56 = vcombine.low %v6217_v38, %v6225_v25  ;;  %v6942_v59 = vcombine.low %v6233_v41, %v6232_v32 }
  0x55   : > { %v6300_v53 = vcombine.high %v22930_v39, %v22930_v39  ;;  %v6324_v57 = vcombine.high %v22932_v44, %v22932_v44  ;;  %v6331_v13 = vrot.slane %v22932_v44, %v27673_v11  ;;  %v6307_v17 = vrot.slane %v22930_v39, %v27673_v11  ;;  %v22936_v44 = vld [vmem:[%s27678_s5 + $0xf8] sm:$0xff] }
  0x56   : > { %24993 = vmatmul.mubr.msk.f32.vlgmr.msra.gmra.mrb[22].mxu0 %vm2554_vm4, %v6753_v60  ;;  %v6192_v60 = vcombine.high %v6184_v43, %v6184_v43  ;;  %v6881_v21 = vrot.slane %v6873_v62, %v27673_v11  ;;  %v6949_v14 = vrot.slane %v6941_v56, %v27673_v11 }
  0x57   : > { %26237 = vmatpush3.bf16.msk.msra.mxu0 %vm27653_vm2, %v26235_v0  ;;  %24995 = vmatprep.mubr.msk.f32.mxu0 %vm27572_vm3, %v33118_v6  ;;  %v6193_v0 = vcombine.high %v6191_v46, %v6191_v46  ;;  %v6314_v12 = vrot.slane %v6300_v53, %v27673_v11  ;;  %v6338_v18 = vrot.slane %v6324_v57, %v27673_v11 }
  0x58   : > { %26238 = vmatprep.subr.bf16.mxu0 %v33116_v3  ;;  %v6907_v19 = vcombine.low %v6184_v43, %v6192_v60  ;;  %v6283_v43 = vcombine.high %v22929_v29, %v22929_v29  ;;  %v6889_v50 = vcombine.low %v6881_v21, %v6888_v31  ;;  %v6958_v60 = vcombine.low %v6234_v42, %v22967_v47 }
  0x59   : > { %v6908_v23 = vcombine.low %v6191_v46, %v6193_v0  ;;  %v6925_v46 = vcombine.low %v6216_v27, %v6215_v26  ;;  %v6315_v25 = vcombine.high %v6307_v17, %v6307_v17  ;;  %v22935_v26 = vld [vmem:[%s27678_s5 + $0xf0] sm:$0xff] }
  0x5a   : > { %24996 = vmatmul.mubr.msk.f32.gmra.mrb[24].mxu0 %vm2554_vm4, %v6770_v20  ;;  %v22927_v20 = vld [vmem:[%s27678_s5 + $0xb0] sm:$0xff]  ;;  %v6915_v36 = vrot.slane %v6907_v19, %v27673_v11  ;;  %v6297_v61 = vrot.slane %v6283_v43, %v27673_v11  ;;  %v6966_v19 = vrot.slane %v6958_v60, %v27673_v11  ;;  %v6365_v39 = vcombine.high %v22935_v26, %v22935_v26 }
  0x5b   : > { %24998 = vmatprep.mubr.msk.f32.mxu0 %vm27572_vm3, %v33118_v6  ;;  %v6259_v30 = vcombine.high %v22927_v20, %v22927_v20  ;;  %v6266_v34 = vrot.slane %v22927_v20, %v27673_v11  ;;  %v6922_v40 = vrot.slane %v6908_v23, %v27673_v11  ;;  %v6939_v62 = vrot.slane %v6925_v46, %v27673_v11  ;;  %v22939_v60 = vld [vmem:[%s27678_s5 + $0x110] sm:$0xff] }
  0x5c   : > { %v6299_v20 = vcombine.high %v6297_v61, %v6297_v61  ;;  %v7026_v42 = vcombine.low %v6315_v25, %v6314_v12  ;;  %v6372_v43 = vrot.slane %v22935_v26, %v27673_v11  ;;  %v6379_v57 = vrot.slane %v6365_v39, %v27673_v11  ;;  %v22944_v25 = vld [vmem:[%s27678_s5 + $0x138] sm:$0xff] }
  0x5d   : > { %v6273_v49 = vrot.slane %v6259_v30, %v27673_v11  ;;  %v6274_v52 = vcombine.high %v6266_v34, %v6266_v34  ;;  %v27881_v58 = vcombine.low %v6915_v36, %v6922_v40  ;;  %v6339_v30 = vcombine.high %v6331_v13, %v6331_v13 }
  0x5e   : > { %24999 = vmatmul.mubr.msk.f32.gmra.mrb[4].mxu0 %vm2554_vm4, %v6787_v28  ;;  %v6249_v28 = vrot.slane %v22926_v10, %v27673_v11  ;;  %v22968_v10 = vld.sshfl [vmem:[%s27678_s5 + $0xb8] sm:$0x3 pattern:$0x76325410]  ;;  %v27905_v31 = vcombine.low %v6932_v55, %v6939_v62  ;;  %v7010_v37 = vcombine.low %v6299_v20, %v6307_v17  ;;  %v7034_v62 = vrot.slane %v7026_v42, %v27673_v11 }
  0x5f   : > { %25001 = vmatprep.mubr.msk.f32.mxu0 %vm27572_vm3, %v33118_v6  ;;  %v6275_v0 = vcombine.high %v6273_v49, %v6273_v49  ;;  %v6976_v8 = vcombine.low %v6266_v34, %v6274_v52  ;;  %v6340_v34 = vcombine.high %v6338_v18, %v6338_v18  ;;  %v6488_v39 = vcombine.high %v22944_v25, %v22944_v25 }
  0x60   : > { %v6257_v48 = vcombine.high %v6249_v28, %v6249_v28  ;;  %v7024_v56 = vrot.slane %v7010_v37, %v27673_v11 }
  0x61   : > { %v6992_v23 = vcombine.low %v6273_v49, %v6275_v0  ;;  %v22938_v49 = vld [vmem:[%s27678_s5 + $0x108] sm:$0xff]  ;;  %v7044_v52 = vcombine.low %v6338_v18, %v6340_v34  ;;  %v6389_v0 = vrot.slane %v22936_v44, %v27673_v11 }
  0x62   : > { %25002 = vmatmul.mubr.msk.f32.gmra.mrb[6].mxu0 %vm2554_vm4, %v6804_v51  ;;  %v6258_v51 = vcombine.high %v6256_v33, %v6256_v33  ;;  %v6959_v63 = vcombine.low %v6249_v28, %v6257_v48  ;;  %v6990_v28 = vrot.slane %v6976_v8, %v27673_v11  ;;  %v7043_v48 = vcombine.low %v6331_v13, %v6339_v30 }
  0x63   : > { %25004 = vmatprep.mubr.msk.f32.mxu0 %vm27572_vm3, %v33118_v6  ;;  %v7000_v40 = vrot.slane %v6992_v23, %v27673_v11  ;;  %v6406_v55 = vcombine.high %v22938_v49, %v22938_v49  ;;  %v6381_v8 = vcombine.high %v6379_v57, %v6379_v57  ;;  %v7058_v13 = vrot.slane %v7044_v52, %v27673_v11  ;;  %v22942_v23 = vld [vmem:[%s27678_s5 + $0x128] sm:$0xff] }
  0x64   : > { %v6975_v7 = vcombine.low %v6256_v33, %v6258_v51  ;;  %v6973_v22 = vrot.slane %v6959_v63, %v27673_v11  ;;  %v22969_v33 = vld.sshfl [vmem:[%s27678_s5 + $0xd0] sm:$0x3 pattern:$0x76325410]  ;;  %v6380_v63 = vcombine.high %v6372_v43, %v6372_v43 }
  0x66   : > { %25005 = vmatmul.mubr.msk.f32.gmra.mrb[8].mxu0 %vm2554_vm4, %v6821_v1  ;;  %v6290_v1 = vrot.slane %v22929_v29, %v27673_v11  ;;  %v6983_v27 = vrot.slane %v6975_v7, %v27673_v11  ;;  %v6316_v29 = vcombine.high %v6314_v12, %v6314_v12  ;;  %v22970_v7 = vld.sshfl [vmem:[%s27678_s5 + $0xe8] sm:$0x3 pattern:$0x76325410]  ;;  %v22941_v12 = vld [vmem:[%s27678_s5 + $0x120] sm:$0xff] }
  0x67   : > { %25007 = vmatprep.mubr.msk.f32.mxu0 %vm27572_vm3, %v33118_v6  ;;  %v7077_v20 = vcombine.low %v22970_v7, %v6372_v43 }
  0x68   : > { %v6298_v15 = vcombine.high %v6290_v1, %v6290_v1  ;;  %v6993_v24 = vcombine.low %v22968_v10, %v6290_v1  ;;  %v27919_v46 = vcombine.low %v6983_v27, %v6990_v28  ;;  %v7027_v47 = vcombine.low %v6316_v29, %v22969_v33  ;;  %v22971_v33 = vld.sshfl [vmem:[%s27678_s5 + $0x100] sm:$0x3 pattern:$0x76325410] }
  0x69   : > { %v6413_v10 = vrot.slane %v22938_v49, %v27673_v11  ;;  %v7094_v27 = vcombine.low %v6381_v8, %v6389_v0 }
  0x6a   : > { %25008 = vmatmul.mubr.msk.f32.gmra.mrb[10].mxu0 %vm2554_vm4, %v6838_v2  ;;  %v22933_v2 = vld [vmem:[%s27678_s5 + $0xe0] sm:$0xff]  ;;  %v7009_v32 = vcombine.low %v6298_v15, %v6297_v61  ;;  %v7007_v41 = vrot.slane %v6993_v24, %v27673_v11  ;;  %v7041_v1 = vrot.slane %v7027_v47, %v27673_v11  ;;  %v6420_v15 = vrot.slane %v6406_v55, %v27673_v11 }
  0x6b   : > { %25010 = vmatprep.mubr.msk.f32.mxu0 %vm27572_vm3, %v33118_v6  ;;  %v6341_v21 = vcombine.high %v22933_v2, %v22933_v2  ;;  %v6348_v35 = vrot.slane %v22933_v2, %v27673_v11  ;;  %v7051_v2 = vrot.slane %v7043_v48, %v27673_v11  ;;  %v6447_v24 = vcombine.high %v22941_v12, %v22941_v12 }
  0x6c   : > { %v7017_v51 = vrot.slane %v7009_v32, %v27673_v11  ;;  %v27928_v61 = vcombine.low %v7000_v40, %v7007_v41  ;;  %v27951_v26 = vcombine.low %v7034_v62, %v7041_v1  ;;  %v6421_v29 = vcombine.high %v6413_v10, %v6413_v10 }
  0x6d   : > { %v6355_v38 = vrot.slane %v6341_v21, %v27673_v11  ;;  %v6356_v53 = vcombine.high %v6348_v35, %v6348_v35  ;;  %v7078_v21 = vcombine.low %v6380_v63, %v6379_v57  ;;  %v27955_v30 = vcombine.low %v7051_v2, %v7058_v13 }
  0x6e   : > { %25011 = vmatmul.mubr.msk.f32.gmra.mrb[12].mxu0 %vm2554_vm4, %v6855_v16  ;;  %v6956_v16 = vrot.slane %v6942_v59, %v27673_v11  ;;  %v6382_v59 = vcombine.high %v22936_v44, %v22936_v44  ;;  %v27944_v17 = vcombine.low %v7017_v51, %v7024_v56  ;;  %v6422_v34 = vcombine.high %v6420_v15, %v6420_v15  ;;  %v22945_v44 = vld [vmem:[%s27678_s5 + $0x140] sm:$0xff] }
  0x6f   : > { %25013 = vmatprep.mubr.msk.f32.mxu0 %vm27572_vm3, %v33118_v6  ;;  %v7085_v40 = vrot.slane %v7077_v20, %v27673_v11  ;;  %v7092_v41 = vrot.slane %v7078_v21, %v27673_v11  ;;  %v6461_v43 = vrot.slane %v6447_v24, %v27673_v11  ;;  %v7102_v47 = vrot.slane %v7094_v27, %v27673_v11 }
  0x70   : > { %v27909_v36 = vcombine.low %v6949_v14, %v6956_v16  ;;  %v7060_v14 = vcombine.low %v6348_v35, %v6356_v53  ;;  %v6396_v16 = vrot.slane %v6382_v59, %v27673_v11  ;;  %v7112_v49 = vcombine.low %v6413_v10, %v6421_v29 }
  0x71   : > { %v6495_v51 = vrot.slane %v22944_v25, %v27673_v11  ;;  %v7128_v52 = vcombine.low %v6420_v15, %v6422_v34  ;;  %v6454_v55 = vrot.slane %v22941_v12, %v27673_v11  ;;  %v6471_v56 = vrot.slane %v22942_v23, %v27673_v11 }
  0x72   : > { %25014 = vmatmul.mubr.msk.f32.gmra.mrb[14].mxu0 %vm2554_vm4, %v6872_v45  ;;  %v27917_v45 = vcombine.low %v6966_v19, %v6973_v22  ;;  %v6423_v19 = vcombine.high %v22939_v60, %v22939_v60  ;;  %v6397_v22 = vcombine.high %v6389_v0, %v6389_v0  ;;  %v6398_v28 = vcombine.high %v6396_v16, %v6396_v16 }
  0x73   : > { %25016 = vmatprep.mubr.msk.f32.mxu0 %vm27572_vm3, %v33118_v6  ;;  %v7068_v32 = vrot.slane %v7060_v14, %v27673_v11  ;;  %v6462_v63 = vcombine.high %v6454_v55, %v6454_v55  ;;  %v6463_v0 = vcombine.high %v6461_v43, %v6461_v43  ;;  %v6479_v1 = vcombine.high %v6471_v56, %v6471_v56 }
  0x74   : > { %v7095_v42 = vcombine.low %v6397_v22, %v6396_v16  ;;  %v7111_v48 = vcombine.low %v6398_v28, %v22971_v33  ;;  %v7126_v7 = vrot.slane %v7112_v49, %v27673_v11  ;;  %v6503_v8 = vcombine.high %v6495_v51, %v6495_v51 }
  0x75   : > { %v6512_v10 = vrot.slane %v22945_v44, %v27673_v11  ;;  %v7136_v13 = vrot.slane %v7128_v52, %v27673_v11  ;;  %v27990_v20 = vcombine.low %v7085_v40, %v7092_v41  ;;  %v7162_v21 = vcombine.low %v6462_v63, %v6461_v43  ;;  %v22950_v40 = vld [vmem:[%s27678_s5 + $0x168] sm:$0xff] }
  0x76   : > { %25017 = vmatmul.mubr.msk.f32.gmra.mrb[16].mxu0 %vm2554_vm4, %v6889_v50  ;;  %v6357_v50 = vcombine.high %v6355_v38, %v6355_v38  ;;  %v7109_v62 = vrot.slane %v7095_v42, %v27673_v11  ;;  %v7119_v2 = vrot.slane %v7111_v48, %v27673_v11  ;;  %v7163_v22 = vcombine.low %v6463_v0, %v6471_v56  ;;  %v22953_v48 = vld [vmem:[%s27678_s5 + $0x180] sm:$0xff]  ;;  %v22974_v52 = vld.sshfl [vmem:[%s27678_s5 + $0x148] sm:$0x3 pattern:$0x76325410] }
  0x77   : > { %25019 = vmatprep.mubr.msk.f32.mxu0 %vm27572_vm3, %v33118_v6  ;;  %v7196_v28 = vcombine.low %v6495_v51, %v6503_v8  ;;  %v6520_v29 = vcombine.high %v6512_v10, %v6512_v10  ;;  %v7170_v41 = vrot.slane %v7162_v21, %v27673_v11  ;;  %v22975_v21 = vld.sshfl [vmem:[%s27678_s5 + $0x160] sm:$0x3 pattern:$0x76325410] }
  0x78   : > { %v7061_v18 = vcombine.low %v6355_v38, %v6357_v50  ;;  %v6464_v38 = vcombine.high %v22942_v23, %v22942_v23  ;;  %v22972_v50 = vld.sshfl [vmem:[%s27678_s5 + $0x118] sm:$0x3 pattern:$0x76325410]  ;;  %v27995_v25 = vcombine.low %v7102_v47, %v7109_v62  ;;  %v27997_v27 = vcombine.low %v7119_v2, %v7126_v7  ;;  %v22951_v47 = vld [vmem:[%s27678_s5 + $0x170] sm:$0xff] }
  0x79   : > { %v7146_v15 = vcombine.low %v22972_v50, %v6454_v55  ;;  %v22973_v23 = vld.sshfl [vmem:[%s27678_s5 + $0x130] sm:$0x3 pattern:$0x76325410]  ;;  %v7177_v42 = vrot.slane %v7163_v22, %v27673_v11  ;;  %v7204_v49 = vrot.slane %v7196_v28, %v27673_v11  ;;  %v7213_v51 = vcombine.low %v6512_v10, %v6520_v29 }
  0x7a   : > { %25020 = vmatmul.mubr.msk.f32.gmra.mrb[18].mxu0 %vm2554_vm4, %v27878_v54  ;;  %v6430_v54 = vrot.slane %v22939_v60, %v27673_v11  ;;  %v7075_v37 = vrot.slane %v7061_v18, %v27673_v11  ;;  %v6478_v59 = vrot.slane %v6464_v38, %v27673_v11  ;;  %v6505_v60 = vcombine.high %v22945_v44, %v22945_v44 }
  0x7b   : > { %25022 = vmatprep.mubr.msk.f32.mxu0 %vm27572_vm3, %v33118_v6  ;;  %v7160_v34 = vrot.slane %v7146_v15, %v27673_v11  ;;  %v6587_v55 = vcombine.high %v22951_v47, %v22951_v47  ;;  %v6611_v62 = vcombine.high %v22953_v48, %v22953_v48  ;;  %v6594_v2 = vrot.slane %v22951_v47, %v27673_v11 }
  0x7c   : > { %v6438_v35 = vcombine.high %v6430_v54, %v6430_v54  ;;  %v27984_v12 = vcombine.low %v7068_v32, %v7075_v37  ;;  %v6519_v16 = vrot.slane %v6505_v60, %v27673_v11  ;;  %v7179_v24 = vcombine.low %v6479_v1, %v6478_v59  ;;  %v22948_v32 = vld [vmem:[%s27678_s5 + $0x158] sm:$0xff] }
  0x7d   : > { %v6546_v44 = vcombine.high %v22948_v32, %v22948_v32  ;;  %v28030_v8 = vcombine.low %v7170_v41, %v7177_v42  ;;  %v6625_v22 = vrot.slane %v6611_v62, %v27673_v11  ;;  %v6602_v29 = vcombine.high %v6594_v2, %v6594_v2  ;;  %v22976_v42 = vld.sshfl [vmem:[%s27678_s5 + $0x178] sm:$0x3 pattern:$0x76325410] }
  0x7e   : > { %25023 = vmatmul.mubr.msk.f32.gmra.mrb[20].mxu0 %vm2554_vm4, %v27881_v58  ;;  %v6437_v58 = vrot.slane %v6423_v19, %v27673_v11  ;;  %v7129_v53 = vcombine.low %v6430_v54, %v6438_v35  ;;  %v6480_v54 = vcombine.high %v6478_v59, %v6478_v59  ;;  %v22947_v19 = vld [vmem:[%s27678_s5 + $0x150] sm:$0xff]  ;;  %v7187_v43 = vrot.slane %v7179_v24, %v27673_v11 }
  0x7f   : > { %25025 = vmatprep.mubr.msk.f32.mxu0 %vm27572_vm3, %v33118_v6  ;;  %v6529_v35 = vcombine.high %v22947_v19, %v22947_v19  ;;  %v6577_v59 = vrot.slane %v22950_v40, %v27673_v11  ;;  %v6560_v1 = vrot.slane %v6546_v44, %v27673_v11  ;;  %v6627_v44 = vcombine.high %v6625_v22, %v6625_v22 }
  0x80   : > { %v6439_v57 = vcombine.high %v6437_v58, %v6437_v58  ;;  %v7143_v14 = vrot.slane %v7129_v53, %v27673_v11  ;;  %v6570_v53 = vcombine.high %v22950_v40, %v22950_v40 }
  0x81   : > { %v6543_v56 = vrot.slane %v6529_v35, %v27673_v11 }
  0x82   : > { %25026 = vmatmul.mubr.msk.f32.gmra.mrb[26].mxu0 %vm2554_vm4, %v27905_v31  ;;  %v6502_v31 = vrot.slane %v6488_v39, %v27673_v11  ;;  %v28002_v33 = vcombine.low %v7136_v13, %v7143_v14  ;;  %v6521_v39 = vcombine.high %v6519_v16, %v6519_v16  ;;  %v6584_v10 = vrot.slane %v6570_v53, %v27673_v11 }
  0x83   : > { %25028 = vmatprep.mubr.msk.f32.mxu0 %vm27572_vm3, %v33118_v6  ;;  %v6545_v0 = vcombine.high %v6543_v56, %v6543_v56  ;;  %v6601_v13 = vrot.slane %v6587_v55, %v27673_v11 }
  0x84   : > { %v6504_v18 = vcombine.high %v6502_v31, %v6502_v31  ;;  %v7214_v60 = vcombine.low %v6519_v16, %v6521_v39 }
  0x85   : > { %v6603_v35 = vcombine.high %v6601_v13, %v6601_v13 }
  0x86   : > { %25029 = vmatmul.mubr.msk.f32.gmra.mrb[28].mxu0 %vm2554_vm4, %v27909_v36  ;;  %v7145_v36 = vcombine.low %v6437_v58, %v6439_v57  ;;  %v7180_v58 = vcombine.low %v6480_v54, %v22973_v23  ;;  %v7197_v38 = vcombine.low %v6502_v31, %v6504_v18  ;;  %v6553_v57 = vrot.slane %v22948_v32, %v27673_v11  ;;  %v22954_v18 = vld [vmem:[%s27678_s5 + $0x188] sm:$0xff]  ;;  %v22956_v32 = vld [vmem:[%s27678_s5 + $0x198] sm:$0xff] }
  0x87   : > { %25031 = vmatprep.mubr.msk.f32.mxu0 %vm27572_vm3, %v33118_v6  ;;  %v6585_v54 = vcombine.high %v6577_v59, %v6577_v59  ;;  %v6635_v47 = vrot.slane %v22954_v18, %v27673_v11  ;;  %v7298_v55 = vcombine.low %v6601_v13, %v6603_v35  ;;  %v22960_v35 = vld [vmem:[%s27678_s5 + $0x1b8] sm:$0xff] }
  0x88   : > { %v7153_v37 = vrot.slane %v7145_v36, %v27673_v11  ;;  %v7194_v31 = vrot.slane %v7180_v58, %v27673_v11  ;;  %v6561_v15 = vcombine.high %v6553_v57, %v6553_v57  ;;  %v6562_v36 = vcombine.high %v6560_v1, %v6560_v1  ;;  %v22957_v58 = vld [vmem:[%s27678_s5 + $0x1a0] sm:$0xff] }
  0x89   : > { %v7247_v28 = vcombine.low %v6545_v0, %v6553_v57  ;;  %v7265_v41 = vcombine.low %v6577_v59, %v6585_v54  ;;  %v7316_v62 = vcombine.low %v6627_v44, %v6635_v47  ;;  %v22959_v0 = vld [vmem:[%s27678_s5 + $0x1b0] sm:$0xff] }
  0x8a   : > { %25032 = vmatmul.mubr.msk.f32.gmra.mrb[30].mxu0 %vm2554_vm4, %v27917_v45  ;;  %v6536_v45 = vrot.slane %v22947_v19, %v27673_v11  ;;  %v28028_v7 = vcombine.low %v7153_v37, %v7160_v34  ;;  %v28037_v16 = vcombine.low %v7187_v43, %v7194_v31  ;;  %v7228_v19 = vrot.slane %v7214_v60, %v27673_v11 }
  0x8b   : > { %25034 = vmatprep.mubr.msk.f32.mxu0 %vm27572_vm3, %v33118_v6  ;;  %v6586_v34 = vcombine.high %v6584_v10, %v6584_v10  ;;  %v6628_v37 = vcombine.high %v22954_v18, %v22954_v18  ;;  %v7248_v39 = vcombine.low %v6561_v15, %v6560_v1  ;;  %v7264_v40 = vcombine.low %v6562_v36, %v22975_v21  ;;  %v23024_v18 = vld [vmem:[%s27678_s5 + $0x19] sm:$0xff]  ;;  %v22977_v21 = vld.sshfl [vmem:[%s27678_s5 + $0x190] sm:$0x3 pattern:$0x76325410] }
  0x8c   : > { %v6544_v50 = vcombine.high %v6536_v45, %v6536_v45  ;;  %v7230_v63 = vcombine.low %v22974_v52, %v6536_v45  ;;  %v6618_v45 = vrot.slane %v22953_v48, %v27673_v11  ;;  %v7255_v48 = vrot.slane %v7247_v28, %v27673_v11 }
  0x8d   : > { %v6669_v52 = vcombine.high %v22957_v58, %v22957_v58  ;;  %v7281_v53 = vcombine.low %v6584_v10, %v6586_v34  ;;  %v7262_v59 = vrot.slane %v7248_v39, %v27673_v11  ;;  %v7272_v31 = vrot.slane %v7264_v40, %v27673_v11 }
  0x8e   : > { %25035 = vmatmul.mubr.msk.f32.gmra.mrb[32].mxu0 %vm2554_vm4, %v27919_v46  ;;  %v7211_v46 = vrot.slane %v7197_v38, %v27673_v11  ;;  %v7231_v14 = vcombine.low %v6544_v50, %v6543_v56  ;;  %v7238_v24 = vrot.slane %v7230_v63, %v27673_v11  ;;  %v6626_v43 = vcombine.high %v6618_v45, %v6618_v45 }
  0x8f   : > { %25037 = vmatprep.mubr.msk.f32.mxu0 %vm27572_vm3, %v33118_v6  ;;  %v7299_v56 = vcombine.low %v22976_v42, %v6618_v45  ;;  %v6642_v50 = vrot.slane %v6628_v37, %v27673_v11  ;;  %v6676_v10 = vrot.slane %v22957_v58, %v27673_v11  ;;  %v6683_v13 = vrot.slane %v6669_v52, %v27673_v11 }
  0x90   : > { %v28043_v23 = vcombine.low %v7204_v49, %v7211_v46  ;;  %v7245_v38 = vrot.slane %v7231_v14, %v27673_v11  ;;  %v7279_v46 = vrot.slane %v7265_v41, %v27673_v11  ;;  %v7315_v60 = vcombine.low %v6626_v43, %v6625_v22  ;;  %v22978_v43 = vld.sshfl [vmem:[%s27678_s5 + $0x1a8] sm:$0x3 pattern:$0x76325410] }
  0x91   : > { %v7289_v14 = vrot.slane %v7281_v53, %v27673_v11  ;;  %v7306_v15 = vrot.slane %v7298_v55, %v27673_v11  ;;  %v7313_v36 = vrot.slane %v7299_v56, %v27673_v11  ;;  %v6644_v54 = vcombine.high %v6642_v50, %v6642_v50 }
  0x92   : > { %25038 = vmatmul.mubr.msk.f32.gmra.mrb[34].mxu0 %vm2554_vm4, %v27928_v61  ;;  %v7221_v61 = vrot.slane %v7213_v51, %v27673_v11  ;;  %v7282_v51 = vcombine.low %v6594_v2, %v6602_v29  ;;  %v28064_v57 = vcombine.low %v7238_v24, %v7245_v38  ;;  %v6643_v2 = vcombine.high %v6635_v47, %v6635_v47  ;;  %v23025_v24 = vld [vmem:[%s27678_s5 + $0x21] sm:$0xff] }
  0x93   : > { %25040 = vmatprep.mubr.msk.f32.mxu0 %vm27572_vm3, %v33118_v6  ;;  %v6693_v22 = vcombine.high %v22959_v0, %v22959_v0  ;;  %v7323_v28 = vrot.slane %v7315_v60, %v27673_v11  ;;  %v7330_v29 = vrot.slane %v7316_v62, %v27673_v11  ;;  %v6684_v37 = vcombine.high %v6676_v10, %v6676_v10 }
  0x94   : > { %v28056_v49 = vcombine.low %v7221_v61, %v7228_v19  ;;  %v7296_v1 = vrot.slane %v7282_v51, %v27673_v11  ;;  %v28083_v61 = vcombine.low %v7255_v48, %v7262_v59  ;;  %v28085_v19 = vcombine.low %v7272_v31, %v7279_v46  ;;  %v23027_v31 = vld [vmem:[%s27678_s5 + $0x31] sm:$0xff] }
  0x95   : > { %v7332_v45 = vcombine.low %v6643_v2, %v6642_v50  ;;  %v6685_v58 = vcombine.high %v6683_v13, %v6683_v13  ;;  %v7929_v38 = vcombine.high %v23024_v18, %v23024_v18  ;;  %v28097_v40 = vcombine.low %v7306_v15, %v7313_v36 }
  0x96   : > { %25041 = vmatmul.mubr.msk.f32.gmra.mrb[36].mxu0 %vm2554_vm4, %v27944_v17  ;;  %v6652_v17 = vcombine.high %v22956_v32, %v22956_v32  ;;  %v28095_v39 = vcombine.low %v7289_v14, %v7296_v1  ;;  %v7333_v41 = vcombine.low %v6644_v54, %v22977_v21  ;;  %v7946_v42 = vcombine.high %v23025_v24, %v23025_v24  ;;  %v23028_v21 = vld [vmem:[%s27678_s5 + $0x39] sm:$0xff] }
  0x97   : > { %25043 = vmatprep.mubr.msk.f32.mxu0 %vm27572_vm3, %v33118_v6  ;;  %v6707_v44 = vrot.slane %v6693_v22, %v27673_v11  ;;  %v6717_v48 = vrot.slane %v22960_v35, %v27673_v11  ;;  %v28104_v51 = vcombine.low %v7323_v28, %v7330_v29  ;;  %v28107_v53 = vrot.slane %v23024_v18, %v27673_v11 }
  0x98   : > { %v6666_v63 = vrot.slane %v6652_v17, %v27673_v11  ;;  %v6710_v17 = vcombine.high %v22960_v35, %v22960_v35  ;;  %v7340_v55 = vrot.slane %v7332_v45, %v27673_v11  ;;  %v7366_v56 = vcombine.low %v6676_v10, %v6684_v37  ;;  %v28161_v35 = vld [vmem:[%s33113_s1 + $0x50] sm:$0xff]  ;;  %v28166_v45 = vld [vmem:[%s33113_s1 + $0x58] sm:$0xf] }
  0x99   : > { %v7367_v50 = vcombine.low %v6683_v13, %v6685_v58  ;;  %v28111_v59 = vrot.slane %v7929_v38, %v27673_v11  ;;  %v7347_v46 = vrot.slane %v7333_v41, %v27673_v11  ;;  %v28118_v62 = vrot.slane %v23025_v24, %v27673_v11  ;;  %33277 = vst [vmem:[#allocation10_spill] sm:$0xff] %v28161_v35  ;;  %v22979_v37 = vld.sshfl [vmem:[%s27678_s5 + $0x1c0] sm:$0x3 pattern:$0x76325410] }
  0x9a   : > { %25044 = vmatmul.mubr.msk.f32.gmra.mrb[38].mxu0 %vm2554_vm4, %v27951_v26  ;;  %v6659_v26 = vrot.slane %v22956_v32, %v27673_v11  ;;  %v6668_v34 = vcombine.high %v6666_v63, %v6666_v63  ;;  %v6724_v1 = vrot.slane %v6710_v17, %v27673_v11  ;;  %v6725_v2 = vcombine.high %v6717_v48, %v6717_v48 }
  0x9b   : > { %25046 = vmatprep.mubr.msk.f32.mxu0 %vm27572_vm3, %v33118_v6  ;;  %v28130_v13 = vcombine.high %v28107_v53, %v28107_v53  ;;  %v7970_v14 = vcombine.high %v23027_v31, %v23027_v31  ;;  %v7374_v15 = vrot.slane %v7366_v56, %v27673_v11  ;;  %v7381_v36 = vrot.slane %v7367_v50, %v27673_v11  ;;  %v28197_v56 = vld.sshfl [vmem:[%s27678_s5 + $0x29] sm:$0x3 pattern:$0x76325410] }
  0x9c   : > { %v6667_v32 = vcombine.high %v6659_v26, %v6659_v26  ;;  %v7350_v52 = vcombine.low %v6666_v63, %v6668_v34  ;;  %v28136_v54 = vcombine.high %v28111_v59, %v28111_v59  ;;  %v28139_v18 = vrot.slane %v23027_v31, %v27673_v11  ;;  %33278 = vst [vmem:[#allocation11_spill] sm:$0xff] %v28166_v45 }
  0x9d   : > { %v28144_v22 = vcombine.low %v7340_v55, %v7347_v46  ;;  %v28149_v24 = vcombine.high %v28118_v62, %v28118_v62  ;;  %v6726_v34 = vcombine.high %v6724_v1, %v6724_v1  ;;  %v8670_v58 = vcombine.low %v28107_v53, %v28130_v13 }
  0x9e   : > { %25047 = vmatmul.mubr.msk.f32.gmra.mrb[40].mxu0 %vm2554_vm4, %v27955_v30  ;;  %v6700_v30 = vrot.slane %v22959_v0, %v27673_v11  ;;  %v6709_v0 = vcombine.high %v6707_v44, %v6707_v44  ;;  %v7364_v10 = vrot.slane %v7350_v52, %v27673_v11  ;;  %v28172_v38 = vrot.slane %v7970_v14, %v27673_v11 }
  0x9f   : > { %25049 = vmatprep.mubr.msk.f32.mxu0 %vm27572_vm3, %v33118_v6  ;;  %v7987_v41 = vcombine.high %v23028_v21, %v23028_v21  ;;  %v28185_v17 = vcombine.high %v28139_v18, %v28139_v18  ;;  %v8687_v52 = vcombine.low %v28118_v62, %v28149_v24 }
  0xa0   : > { %v6708_v47 = vcombine.high %v6700_v30, %v6700_v30  ;;  %v7383_v60 = vcombine.low %v22978_v43, %v6700_v30  ;;  %v28201_v50 = vcombine.high %v28172_v38, %v28172_v38 }
  0xa2   : > { %25050 = vmatmul.mubr.msk.f32.gmra.mrb[42].mxu0 %vm2554_vm4, %v27984_v12  ;;  %v7349_v12 = vcombine.low %v6659_v26, %v6667_v32  ;;  %v28121_v26 = vrot.slane %v7946_v42, %v27673_v11  ;;  %v7384_v63 = vcombine.low %v6708_v47, %v6707_v44  ;;  %v7391_v30 = vrot.slane %v7383_v60, %v27673_v11 }
  0xa3   : > { %25052 = vmatprep.mubr.msk.f32.mxu0 %vm27572_vm3, %v33118_v6  ;;  %v7400_v32 = vcombine.low %v6709_v0, %v6717_v48  ;;  %v28175_v42 = vrot.slane %v23028_v21, %v27673_v11  ;;  %v28179_v44 = vcombine.low %v7374_v15, %v7381_v36  ;;  %v8671_v47 = vcombine.low %v28111_v59, %v28136_v54  ;;  %v23030_v48 = vld [vmem:[%s27678_s5 + $0x49] sm:$0xff] }
  0xa4   : > { %v28153_v28 = vcombine.high %v28121_v26, %v28121_v26  ;;  %v7398_v29 = vrot.slane %v7384_v63, %v27673_v11  ;;  %v28209_v60 = vcombine.low %v6726_v34, %v22979_v37  ;;  %v28212_v63 = vrot.slane %v8670_v58, %v27673_v11  ;;  %v23036_v37 = vld [vmem:[%s27678_s5 + $0x79] sm:$0xff] }
  0xa5   : > { %33279 = vst [vmem:[#allocation12_spill] sm:$0xff] %v28179_v44  ;;  %v7408_v31 = vrot.slane %v7400_v32, %v27673_v11  ;;  %v28215_v0 = vrot.slane %v7987_v41, %v27673_v11  ;;  %v28227_v14 = vrot.slane %v8671_v47, %v27673_v11  ;;  %v8704_v15 = vcombine.low %v28197_v56, %v28139_v18 }
  0xa6   : > { %25053 = vmatmul.mubr.msk.f32.gmra.mrb[44].mxu0 %vm2554_vm4, %v27990_v20  ;;  %v7357_v20 = vrot.slane %v7349_v12, %v27673_v11  ;;  %v8688_v55 = vcombine.low %v28121_v26, %v28153_v28  ;;  %33281 = vst [vmem:[#allocation14_spill] sm:$0xff] %v28209_v60  ;;  %33282 = vst [vmem:[#allocation15_spill] sm:$0xff] %v28212_v63  ;;  %v8705_v36 = vcombine.low %v28185_v17, %v28172_v38  ;;  %v23037_v12 = vld [vmem:[%s27678_s5 + $0x81] sm:$0xff] }
  0xa7   : > { %25055 = vmatprep.mubr.msk.f32.mxu0 %vm27572_vm3, %v33118_v6  ;;  %33283 = vst [vmem:[#allocation16_spill] sm:$0xff] %v28227_v14  ;;  %v8011_v21 = vcombine.high %v23030_v48, %v23030_v48  ;;  %v28269_v3 = vrot.slane %v8704_v15, %v27673_v11  ;;  %v28318_v14 = vrot.slane %v23036_v37, %v27673_v11 }
  0xa8   : > { %v28177_v43 = vcombine.low %v7357_v20, %v7364_v10  ;;  %v23031_v20 = vld [vmem:[%s27678_s5 + $0x51] sm:$0xff]  ;;  %v23033_v10 = vld [vmem:[%s27678_s5 + $0x61] sm:$0xff]  ;;  %v28240_v32 = vrot.slane %v8688_v55, %v27673_v11 }
  0xa9   : > { %v8028_v34 = vcombine.high %v23031_v20, %v23031_v20  ;;  %v28254_v41 = vrot.slane %v23031_v20, %v27673_v11  ;;  %v8052_v47 = vcombine.high %v23033_v10, %v23033_v10  ;;  %v28261_v55 = vld.sshfl [vmem:[%s27678_s5 + $0x41] sm:$0x3 pattern:$0x76325410]  ;;  %33289 = vst [vmem:[#allocation22_spill] sm:$0xff] %v28269_v3  ;;  %v28272_v20 = vrot.slane %v8705_v36, %v27673_v11 }
  0xaa   : > { %25056 = vmatmul.mubr.msk.f32.gmra.mrb[46].mxu0 %vm2554_vm4, %v27995_v25  ;;  %v7401_v25 = vcombine.low %v6725_v2, %v6724_v1  ;;  %v28219_v1 = vcombine.high %v28175_v42, %v28175_v42  ;;  %v28222_v2 = vrot.slane %v23030_v48, %v27673_v11  ;;  %33285 = vst [vmem:[#allocation18_spill] sm:$0xff] %v28240_v32  ;;  %v33293_v36 = vmov 0.0   ;;  %33300 = vst [vmem:[#allocation32_spill] sm:$0xff] %v28318_v14 }
  0xab   : > { %25058 = vmatprep.mubr.msk.f32.mxu0 %vm27572_vm3, %v33118_v6  ;;  %33287 = vst [vmem:[#allocation20_spill] sm:$0xff] %v28254_v41  ;;  %33290 = vst [vmem:[#allocation23_spill] sm:$0xff] %v28272_v20  ;;  %v8093_v48 = vcombine.high %v23036_v37, %v23036_v37  ;;  %v28287_v15 = vrot.slane %v8028_v34, %v27673_v11  ;;  %v28298_v9 = vrot.slane %v8052_v47, %v27673_v11  ;;  %v23039_v20 = vld [vmem:[%s27678_s5 + $0x91] sm:$0xff] }
  0xac   : > { %v7415_v46 = vrot.slane %v7401_v25, %v27673_v11  ;;  %v8721_v25 = vcombine.low %v28201_v50, %v28175_v42  ;;  %v28306_v32 = vrot.slane %v23033_v10, %v27673_v11  ;;  %v28326_v10 = vld.sshfl [vmem:[%s27678_s5 + $0x59] sm:$0x3 pattern:$0x76325410]  ;;  %19126 = vst.msk [vmem:[#allocation2] sm:$0xff] %vm19125_vm5, %v33293_v36  ;;  %19127 = vst.msk [vmem:[#allocation2 + $0x8] sm:$0xff] %vm19125_vm5, %v33293_v36 }
  0xad   : > { %33292 = vst [vmem:[#allocation25_spill] sm:$0xff] %v28287_v15  ;;  %33295 = vst [vmem:[#allocation27_spill] sm:$0xff] %v28298_v9  ;;  %v28352_v63 = vcombine.high %v28298_v9, %v28298_v9 }
  0xae   : > { %25059 = vmatmul.mubr.msk.f32.gmra.mrb[48].mxu0 %vm2554_vm4, %v27997_v27  ;;  %v28205_v27 = vcombine.low %v7391_v30, %v7398_v29  ;;  %v23034_v30 = vld [vmem:[%s27678_s5 + $0x69] sm:$0xff]  ;;  %v28237_v29 = vrot.slane %v8687_v52, %v27673_v11  ;;  %v28247_v58 = vcombine.low %v7408_v31, %v7415_v46  ;;  %v8722_v52 = vcombine.low %v28219_v1, %v28215_v0 }
  0xaf   : > { %25061 = vmatprep.mubr.msk.f32.mxu0 %vm27572_vm3, %v33118_v6  ;;  %v28265_v31 = vcombine.high %v28222_v2, %v28222_v2  ;;  %v8069_v46 = vcombine.high %v23034_v30, %v23034_v30  ;;  %v28284_v35 = vrot.slane %v8721_v25, %v27673_v11  ;;  %v8110_v25 = vcombine.high %v23037_v12, %v23037_v12 }
  0xb0   : > { %33280 = vst [vmem:[#allocation13_spill] sm:$0xff] %v28205_v27  ;;  %33284 = vst [vmem:[#allocation17_spill] sm:$0xff] %v28237_v29  ;;  %v28301_v5 = vrot.slane %v8722_v52, %v27673_v11  ;;  %v28321_v52 = vrot.slane %v8093_v48, %v27673_v11  ;;  %v28334_v45 = vcombine.high %v28306_v32, %v28306_v32 }
  0xb1   : > { %33286 = vst [vmem:[#allocation19_spill] sm:$0xff] %v28247_v58  ;;  %33288 = vst [vmem:[#allocation21_spill] sm:$0xff] %v28265_v31  ;;  %v8739_v34 = vcombine.low %v28222_v2, %v28265_v31  ;;  %v28309_v29 = vrot.slane %v8069_v46, %v27673_v11  ;;  %v28330_v46 = vcombine.high %v28287_v15, %v28287_v15 }
  0xb2   : > { %25062 = vmatmul.mubr.msk.f32.gmra.mrb[50].mxu0 %vm2554_vm4, %v28002_v33  ;;  %v28251_v33 = vcombine.high %v28215_v0, %v28215_v0  ;;  %33291 = vst [vmem:[#allocation24_spill] sm:$0xff] %v28284_v35  ;;  %33296 = vst [vmem:[#allocation28_spill] sm:$0xff] %v28301_v5  ;;  %v28337_v37 = vrot.slane %v23034_v30, %v27673_v11  ;;  %v28340_v48 = vrot.slane %v23037_v12, %v27673_v11  ;;  %v23040_v5 = vld [vmem:[%s27678_s5 + $0x99] sm:$0xff] }
  0xb3   : > { %25064 = vmatprep.mubr.msk.f32.mxu0 %vm27572_vm3, %v33118_v6  ;;  %v28275_v6 = vrot.slane %v8011_v21, %v27673_v11  ;;  %33297 = vst [vmem:[#allocation29_spill] sm:$0xff] %v28306_v32  ;;  %33298 = vst [vmem:[#allocation30_spill] sm:$0xff] %v28309_v29  ;;  %v28355_v30 = vrot.slane %v8110_v25, %v27673_v11  ;;  %v28360_v60 = vrot.slane %v8739_v34, %v27673_v11 }
  0xb4   : > { %v8738_v21 = vcombine.low %v28251_v33, %v28261_v55  ;;  %33301 = vst [vmem:[#allocation33_spill] sm:$0xff] %v28321_v52  ;;  %33302 = vst [vmem:[#allocation34_spill] sm:$0xff] %v28326_v10  ;;  %v28368_v58 = vcombine.high %v28309_v29, %v28309_v29  ;;  %v8773_v27 = vcombine.low %v28326_v10, %v28306_v32 }
  0xb5   : > { %v28315_v47 = vcombine.high %v28275_v6, %v28275_v6  ;;  %33303 = vst [vmem:[#allocation35_spill] sm:$0xff] %v28330_v46  ;;  %33304 = vst [vmem:[#allocation36_spill] sm:$0xff] %v28334_v45  ;;  %v28377_v25 = vcombine.high %v28318_v14, %v28318_v14  ;;  %v28381_v34 = vcombine.high %v28321_v52, %v28321_v52 }
  0xb6   : > { %25065 = vmatmul.mubr.msk.f32.gmra.mrb[52].mxu0 %vm2554_vm4, %v28028_v7  ;;  %v28295_v7 = vcombine.high %v28254_v41, %v28254_v41  ;;  %33305 = vst [vmem:[#allocation37_spill] sm:$0xff] %v28337_v37  ;;  %33306 = vst [vmem:[#allocation38_spill] sm:$0xff] %v28340_v48  ;;  %v8134_v12 = vcombine.high %v23039_v20, %v23039_v20  ;;  %v8772_v32 = vcombine.low %v28287_v15, %v28330_v46 }
  0xb7   : > { %25067 = vmatprep.mubr.msk.f32.mxu0 %vm27572_vm3, %v33293_v36  ;;  %33299 = vst [vmem:[#allocation31_spill] sm:$0xff] %v28315_v47  ;;  %33308 = vst [vmem:[#allocation40_spill] sm:$0xff] %v28352_v63  ;;  %v8755_v35 = vcombine.low %v28275_v6, %v28315_v47  ;;  %v8789_v10 = vcombine.low %v28334_v45, %v28298_v9  ;;  %v28394_v44 = vcombine.high %v28340_v48, %v28340_v48 }
  0xb8   : > { %33294 = vst [vmem:[#allocation26_spill] sm:$0xff] %v28295_v7  ;;  %v8756_v3 = vcombine.low %v28254_v41, %v28295_v7  ;;  %33309 = vst [vmem:[#allocation41_spill] sm:$0xff] %v28355_v30  ;;  %v28373_v7 = vld.sshfl [vmem:[%s27678_s5 + $0x71] sm:$0x3 pattern:$0x76325410]  ;;  %v28405_v46 = vcombine.high %v28355_v30, %v28355_v30  ;;  %v28408_v9 = vrot.slane %v23039_v20, %v27673_v11 }
  0xb9   : > { %33310 = vst [vmem:[#allocation42_spill] sm:$0xff] %v28360_v60  ;;  %33311 = vst [vmem:[#allocation43_spill] sm:$0xff] %v28368_v58  ;;  %v8807_v15 = vcombine.low %v28368_v58, %v28373_v7  ;;  %v28415_v47 = vrot.slane %v23040_v5, %v27673_v11  ;;  %v8824_v20 = vcombine.low %v28321_v52, %v28381_v34  ;;  %v23045_v60 = vld [vmem:[%s27678_s5 + $0xc1] sm:$0xff] }
  0xba   : > { %25068 = vmatmul.mubr.msk.f32.gmra.mrb[54].mxu0 %vm2554_vm4, %v28030_v8  ;;  %v28346_v8 = vrot.slane %v8738_v21, %v27673_v11  ;;  %v28364_v21 = vcombine.high %v28337_v37, %v28337_v37  ;;  %33312 = vst [vmem:[#allocation44_spill] sm:$0xff] %v28373_v7  ;;  %33313 = vst [vmem:[#allocation45_spill] sm:$0xff] %v28377_v25  ;;  %v28399_v41 = vrot.slane %v8756_v3, %v27673_v11 }
  0xbb   : > { %25070 = vmatprep.mubr.msk.f32.mxu0 %vm27572_vm3, %v33293_v36  ;;  %33314 = vst [vmem:[#allocation46_spill] sm:$0xff] %v28381_v34  ;;  %33315 = vst [vmem:[#allocation47_spill] sm:$0xff] %v28394_v44  ;;  %v8151_v3 = vcombine.high %v23040_v5, %v23040_v5  ;;  %v28425_v31 = vrot.slane %v8134_v12, %v27673_v11  ;;  %v28430_v7 = vrot.slane %v8755_v35, %v27673_v11  ;;  %v23042_v34 = vld [vmem:[%s27678_s5 + $0xa9] sm:$0xff] }
  0xbc   : > { %33307 = vst [vmem:[#allocation39_spill] sm:$0xff] %v28346_v8  ;;  %33316 = vst [vmem:[#allocation48_spill] sm:$0xff] %v28399_v41  ;;  %v8806_v45 = vcombine.low %v28364_v21, %v28309_v29  ;;  %v28433_v5 = vrot.slane %v8772_v32, %v27673_v11  ;;  %v28449_v35 = vld.sshfl [vmem:[%s27678_s5 + $0x89] sm:$0x3 pattern:$0x76325410]  ;;  %v28453_v32 = vcombine.high %v28408_v9, %v28408_v9 }
  0xbd   : > { %33317 = vst [vmem:[#allocation49_spill] sm:$0xff] %v28405_v46  ;;  %33318 = vst [vmem:[#allocation50_spill] sm:$0xff] %v28415_v47  ;;  %v1017_v29 = vld [vmem:[%s27678_s5 + $0x1] sm:$0xff] }
  0xbe   : > { %25071 = vmatmul.mubr.msk.f32.gmra.mrb[56].mxu0 %vm2554_vm4, %v28037_v16  ;;  %v8790_v16 = vcombine.low %v28352_v63, %v28337_v37  ;;  %v28418_v37 = vrot.slane %v8773_v27, %v27673_v11  ;;  %v8823_v63 = vcombine.low %v28318_v14, %v28377_v25  ;;  %33320 = vst [vmem:[#allocation52_spill] sm:$0xff] %v28430_v7  ;;  %33321 = vst [vmem:[#allocation53_spill] sm:$0xff] %v28433_v5  ;;  %v28531_v41 = vld.sshfl [vmem:[%s27678_s5 + $0xa1] sm:$0x3 pattern:$0x76325410] }
  0xbf   : > { %25073 = vmatprep.mubr.msk.f32.mxu0 %vm27572_vm3, %v33293_v36  ;;  %v28436_v27 = vrot.slane %v8789_v10, %v27673_v11  ;;  %v8840_v25 = vcombine.low %v28340_v48, %v28394_v44  ;;  %v28457_v10 = vcombine.high %v28425_v31, %v28425_v31  ;;  %v28460_v44 = vrot.slane %v8806_v45, %v27673_v11 }
  0xc0   : > { %33319 = vst [vmem:[#allocation51_spill] sm:$0xff] %v28418_v37  ;;  %v28444_v12 = vrot.slane %v8790_v16, %v27673_v11  ;;  %v28463_v48 = vrot.slane %v8807_v15, %v27673_v11  ;;  %v28466_v16 = vrot.slane %v8151_v3, %v27673_v11  ;;  %v28474_v52 = vrot.slane %v8823_v63, %v27673_v11 }
  0xc1   : > { %33322 = vst [vmem:[#allocation54_spill] sm:$0xff] %v28436_v27  ;;  %33324 = vst [vmem:[#allocation56_spill] sm:$0xff] %v28460_v44  ;;  %v28477_v14 = vrot.slane %v8824_v20, %v27673_v11  ;;  %v28480_v45 = vrot.slane %v23042_v34, %v27673_v11  ;;  %v8175_v15 = vcombine.high %v23042_v34, %v23042_v34 }
  0xc2   : > { %25074 = vmatmul.mubr.msk.f32.gmra.mrb[58].mxu0 %vm2554_vm4, %v28043_v23  ;;  %33323 = vst [vmem:[#allocation55_spill] sm:$0xff] %v28444_v12  ;;  %v8841_v23 = vcombine.low %v28355_v30, %v28405_v46  ;;  %33325 = vst [vmem:[#allocation57_spill] sm:$0xff] %v28463_v48  ;;  %v28470_v46 = vcombine.high %v28415_v47, %v28415_v47  ;;  %v23043_v30 = vld [vmem:[%s27678_s5 + $0xb1] sm:$0xff]  ;;  %v28489_v58 = vrot.slane %v8840_v25, %v27673_v11 }
  0xc3   : > { %25076 = vmatprep.mubr.msk.f32.mxu0 %vm27572_vm3, %v33293_v36  ;;  %33326 = vst [vmem:[#allocation58_spill] sm:$0xff] %v28466_v16  ;;  %33327 = vst [vmem:[#allocation59_spill] sm:$0xff] %v28474_v52  ;;  %v8857_v63 = vcombine.low %v28449_v35, %v28408_v9  ;;  %v8874_v20 = vcombine.low %v28457_v10, %v28415_v47  ;;  %v8199_v25 = vrot.slane %v23043_v30, %v27673_v11 }
  0xc4   : > { %33328 = vst [vmem:[#allocation60_spill] sm:$0xff] %v28477_v14  ;;  %33329 = vst [vmem:[#allocation61_spill] sm:$0xff] %v28480_v45  ;;  %v28496_v34 = vrot.slane %v8841_v23, %v27673_v11  ;;  %v8875_v7 = vcombine.low %v28470_v46, %v28466_v16  ;;  %v28516_v8 = vcombine.high %v28466_v16, %v28466_v16 }
  0xc5   : > { %33330 = vst [vmem:[#allocation62_spill] sm:$0xff] %v28489_v58  ;;  %v28520_v47 = vcombine.high %v28480_v45, %v28480_v45  ;;  %v28523_v3 = vrot.slane %v8175_v15, %v27673_v11  ;;  %v28528_v23 = vrot.slane %v8857_v63, %v27673_v11  ;;  %33336 = vst [vmem:[#allocation68_spill] sm:$0xff] %v28531_v41 }
  0xc6   : > { %25077 = vmatmul.mubr.msk.f32.gmra.mrb[60].mxu0 %vm2554_vm4, %v28056_v49  ;;  %33331 = vst [vmem:[#allocation63_spill] sm:$0xff] %v28496_v34  ;;  %v8858_v49 = vcombine.low %v28453_v32, %v28425_v31  ;;  %33332 = vst [vmem:[#allocation64_spill] sm:$0xff] %v28516_v8  ;;  %v8192_v14 = vcombine.high %v23043_v30, %v23043_v30  ;;  %v1125_v52 = vcombine.high %v1017_v29, %v1017_v29  ;;  %v22760_v30 = vld [vmem:[%s33113_s1 + $0x10] sm:$0xff] }
  0xc7   : > { %25079 = vmatprep.mubr.msk.f32.mxu0 %vm27572_vm3, %v33293_v36  ;;  %33333 = vst [vmem:[#allocation65_spill] sm:$0xff] %v28520_v47  ;;  %33334 = vst [vmem:[#allocation66_spill] sm:$0xff] %v28523_v3  ;;  %v1132_v48 = vrot.slane %v1017_v29, %v27673_v11  ;;  %v8207_v63 = vcombine.high %v8199_v25, %v8199_v25  ;;  %v22761_v29 = vld [vmem:[%s33113_s1 + $0x18] sm:$0xf]  ;;  %v28552_v12 = vrot.slane %v8875_v7, %v27673_v11  ;;  %v1018_v34 = vld [vmem:[%s27678_s5 + $0x9] sm:$0xff] }
  0xc8   : > { %33335 = vst [vmem:[#allocation67_spill] sm:$0xff] %v28528_v23  ;;  %v28540_v44 = vrot.slane %v8858_v49, %v27673_v11  ;;  %v26219_v27 = vpack.c.bf16 %v22761_v29, %v22760_v30  ;;  %v1139_v15 = vrot.slane %v1125_v52, %v27673_v11  ;;  %v8892_v58 = vcombine.low %v28480_v45, %v28520_v47 }
  0xc9   : > { %33339 = vst [vmem:[#allocation71_spill] sm:$0xff] %v28552_v12  ;;  %v1140_v49 = vcombine.high %v1132_v48, %v1132_v48  ;;  %v28562_v37 = vcombine.high %v28523_v3, %v28523_v3  ;;  %v8216_v5 = vcombine.high %v23045_v60, %v23045_v60  ;;  %v8206_v7 = vrot.slane %v8192_v14, %v27673_v11  ;;  %v23084_v14 = vld.sshfl [vmem:[%s27678_s5 + $0xb9] sm:$0x3 pattern:$0x76325410] }
  0xca   : > { %25080 = vmatmul.mubr.msk.f32.gmra.mrb[62].mxu0 %vm2554_vm4, %v28064_v57  ;;  %33337 = vst [vmem:[#allocation69_spill] sm:$0xff] %v28540_v44  ;;  %v28543_v57 = vrot.slane %v8874_v20, %v27673_v11  ;;  %v8891_v20 = vcombine.low %v28516_v8, %v28531_v41  ;;  %26221 = vmatpush3.bf16.msk.msra.mxu1 %vm27653_vm2, %v26219_v27  ;;  %v33341_v41 = vmov 0.0|0.0   ;;  %19178 = vst.msk [vmem:[#allocation2 + $0x198] sm:$0xff] %vm19125_vm5, %v33293_v36 }
  0xcb   : > { %25082 = vmatprep.mubr.msk.f32.mxu0 %vm27572_vm3, %v33293_v36  ;;  %33340 = vst [vmem:[#allocation72_spill] sm:$0xff] %v28562_v37  ;;  %v1141_v52 = vcombine.high %v1139_v15, %v1139_v15  ;;  %v1866_v30 = vcombine.low %v1132_v48, %v1140_v49  ;;  %v28573_v47 = vcombine.low %v8199_v25, %v8207_v63  ;;  %19179 = vst.msk [vmem:[#allocation2 + $0x1a0] sm:$0xff] %vm19125_vm5, %v33293_v36 }
  0xcc   : > { %33338 = vst [vmem:[#allocation70_spill] sm:$0xff] %v28543_v57  ;;  %v8223_v16 = vrot.slane %v23045_v60, %v27673_v11  ;;  %v1142_v8 = vcombine.high %v1018_v34, %v1018_v34  ;;  %v1149_v49 = vrot.slane %v1018_v34, %v27673_v11  ;;  %26222 = vmatprep.subr.bf16.mxu1 %v33341_v41  ;;  %19129 = vst.msk [vmem:[#allocation2 + $0x10] sm:$0x3] %vm19128_vm6, %v33293_v36 }
  0xcd   : > { %v1867_v27 = vcombine.low %v1139_v15, %v1141_v52  ;;  %v1874_v48 = vrot.slane %v1866_v30, %v27673_v11  ;;  %v28583_v25 = vrot.slane %v8891_v20, %v27673_v11  ;;  %v28586_v63 = vrot.slane %v8892_v58, %v27673_v11  ;;  %v23046_v52 = vld [vmem:[%s27678_s5 + $0xc9] sm:$0xff]  ;;  %v22742_v20 = vld.sshfl [vmem:[%s27678_s5 + $0x11] sm:$0x3 pattern:$0x76325410] }
  0xce   : > { %25083 = vmatmul.mubr.msk.f32.gmra.mrb[64].mxu0 %vm2554_vm4, %v28083_v61  ;;  %v8230_v60 = vrot.slane %v8216_v5, %v27673_v11  ;;  %v1156_v61 = vrot.slane %v1142_v8, %v27673_v11  ;;  %v8908_v15 = vcombine.low %v28523_v3, %v28562_v37  ;;  %v8208_v34 = vcombine.high %v8206_v7, %v8206_v7  ;;  %v23048_v8 = vld [vmem:[%s27678_s5 + $0xd9] sm:$0xff] }
  0xcf   : > { %25085 = vmatprep.mubr.msk.f32.mxu0 %vm27572_vm3, %v33293_v36  ;;  %v1881_v30 = vrot.slane %v1867_v27, %v27673_v11  ;;  %v1157_v29 = vcombine.high %v1149_v49, %v1149_v49  ;;  %v8923_v58 = vrot.slane %v28573_v47, %v27673_v11  ;;  %v8926_v5 = vcombine.low %v23084_v14, %v8223_v16 }
  0xd0   : > { %v1158_v12 = vcombine.high %v1156_v61, %v1156_v61  ;;  %v8231_v57 = vcombine.high %v8223_v16, %v8223_v16  ;;  %v1901_v41 = vcombine.low %v28130_v13, %v28111_v59  ;;  %v8232_v27 = vcombine.high %v8230_v60, %v8230_v60  ;;  %19180 = vst.msk [vmem:[#allocation2 + $0x1a8] sm:$0x3] %vm19128_vm6, %v33293_v36 }
  0xd1   : > { %v1882_v44 = vcombine.low %v1874_v48, %v1881_v30  ;;  %v1883_v23 = vcombine.low %v1149_v49, %v1157_v29  ;;  %v8240_v37 = vrot.slane %v23046_v52, %v27673_v11  ;;  %v8233_v3 = vcombine.high %v23046_v52, %v23046_v52 }
  0xd2   : > { %25086 = vmatmul.mubr.msk.f32.gmra.mrb[66].mxu0 %vm2554_vm4, %v28085_v19  ;;  %v1900_v19 = vcombine.low %v22742_v20, %v28107_v53  ;;  %v1884_v45 = vcombine.low %v1156_v61, %v1158_v12  ;;  %v8925_v47 = vcombine.low %v8206_v7, %v8208_v34  ;;  %v8257_v14 = vcombine.high %v23048_v8, %v23048_v8  ;;  %v23049_v61 = vld [vmem:[%s27678_s5 + $0xe1] sm:$0xff] }
  0xd3   : > { %25088 = vmatprep.mubr.msk.f32.mxu0 %vm27572_vm3, %v33293_v36  ;;  %24612 = vmatmul.mubr.msk.f32.vlgmr.msra.gmra.mrb[0].mxu1 %vm2554_vm4, %v1882_v44  ;;  %v1891_v53 = vrot.slane %v1883_v23, %v27673_v11  ;;  %v1915_v12 = vrot.slane %v1901_v41, %v27673_v11  ;;  %v8942_v16 = vcombine.low %v8231_v57, %v8230_v60 }
  0xd4   : > { %24614 = vmatprep.mubr.msk.f32.mxu1 %vm27572_vm3, %v33293_v36  ;;  %v1898_v59 = vrot.slane %v1884_v45, %v27673_v11  ;;  %v1908_v13 = vrot.slane %v1900_v19, %v27673_v11  ;;  %v8248_v7 = vcombine.high %v8240_v37, %v8240_v37  ;;  %v1917_v44 = vcombine.low %v28136_v54, %v28118_v62 }
  0xd5   : > { %v8943_v23 = vcombine.low %v8232_v27, %v8240_v37  ;;  %v8247_v29 = vrot.slane %v8233_v3, %v27673_v11  ;;  %v1918_v49 = vcombine.low %v28149_v24, %v28121_v26  ;;  %v8933_v41 = vrot.slane %v8925_v47, %v27673_v11 }
  0xd6   : > { %25089 = vmatmul.mubr.msk.f32.gmra.mrb[68].mxu0 %vm2554_vm4, %v28095_v39  ;;  %v8916_v39 = vrot.slane %v8908_v15, %v27673_v11  ;;  %v1899_v48 = vcombine.low %v1891_v53, %v1898_v59  ;;  %v8940_v45 = vrot.slane %v8926_v5, %v27673_v11  ;;  %v8264_v57 = vrot.slane %v23048_v8, %v27673_v11  ;;  %v23085_v8 = vld.sshfl [vmem:[%s27678_s5 + $0xd1] sm:$0x3 pattern:$0x76325410] }
  0xd7   : > { %25091 = vmatprep.mubr.msk.f32.mxu0 %vm27572_vm3, %v33293_v36  ;;  %v8271_v60 = vrot.slane %v8257_v14, %v27673_v11  ;;  %v1916_v62 = vcombine.low %v1908_v13, %v1915_v12  ;;  %v1925_v26 = vrot.slane %v1917_v44, %v27673_v11  ;;  %v1932_v54 = vrot.slane %v1918_v49, %v27673_v11 }
  0xd8   : > { %24615 = vmatmul.mubr.msk.f32.gmra.mrb[2].mxu1 %vm2554_vm4, %v1899_v48  ;;  %v8274_v24 = vcombine.high %v23049_v61, %v23049_v61  ;;  %v1934_v37 = vcombine.low %v28153_v28, %v28197_v56  ;;  %v1935_v3 = vcombine.low %v28139_v18, %v28185_v17  ;;  %v8957_v15 = vrot.slane %v8943_v23, %v27673_v11  ;;  %v23051_v18 = vld [vmem:[%s27678_s5 + $0xf1] sm:$0xff]  ;;  %v23052_v17 = vld [vmem:[%s27678_s5 + $0xf9] sm:$0xff] }
  0xd9   : > { %24617 = vmatprep.mubr.msk.f32.mxu1 %vm27572_vm3, %v33293_v36  ;;  %v8249_v34 = vcombine.high %v8247_v29, %v8247_v29  ;;  %v28643_v52 = vcombine.low %v8248_v7, %v8247_v29  ;;  %v8281_v30 = vrot.slane %v23049_v61, %v27673_v11  ;;  %v8907_v20 = vcombine.low %v28583_v25, %v28586_v63 }
  0xda   : > { %25092 = vmatmul.mubr.msk.f32.gmra.mrb[70].mxu0 %vm2554_vm4, %v28097_v40  ;;  %v8950_v40 = vrot.slane %v8942_v16, %v27673_v11  ;;  %v28650_v5 = vcombine.low %v8916_v39, %v8923_v58  ;;  %v8272_v28 = vcombine.high %v8264_v57, %v8264_v57  ;;  %v8273_v56 = vcombine.high %v8271_v60, %v8271_v60 }
  0xdb   : > { %25094 = vmatprep.mubr.msk.f32.mxu0 %vm27572_vm3, %v33293_v36  ;;  %v1933_v19 = vcombine.low %v1925_v26, %v1932_v54  ;;  %v1942_v27 = vrot.slane %v1934_v37, %v27673_v11  ;;  %v28660_v47 = vcombine.low %v8933_v41, %v8940_v45  ;;  %v8288_v58 = vrot.slane %v8274_v24, %v27673_v11  ;;  %v23086_v26 = vld.sshfl [vmem:[%s27678_s5 + $0xe9] sm:$0x3 pattern:$0x76325410] }
  0xdc   : > { %24618 = vmatmul.mubr.msk.f32.gmra.mrb[4].mxu1 %vm2554_vm4, %v1916_v62  ;;  %v1951_v14 = vcombine.low %v28172_v38, %v28201_v50  ;;  %v1952_v53 = vcombine.low %v28175_v42, %v28219_v1  ;;  %v28669_v59 = vcombine.low %v8950_v40, %v8957_v15  ;;  %v8960_v13 = vcombine.low %v8249_v34, %v23085_v8  ;;  %v23054_v38 = vld [vmem:[%s27678_s5 + $0x109] sm:$0xff]  ;;  %v33344_v8 = vld [vmem:[#allocation31_spill] sm:$0xff] }
  0xdd   : > { %24620 = vmatprep.mubr.msk.f32.mxu1 %vm27572_vm3, %v33293_v36  ;;  %v8967_v12 = vrot.slane %v28643_v52, %v27673_v11  ;;  %v8289_v39 = vcombine.high %v8281_v30, %v8281_v30  ;;  %v28675_v16 = vcombine.low %v8264_v57, %v8272_v28  ;;  %v28677_v7 = vcombine.low %v8271_v60, %v8273_v56  ;;  %v33342_v37 = vld [vmem:[#allocation21_spill] sm:$0xff]  ;;  %v33345_v56 = vld [vmem:[#allocation12_spill] sm:$0xff] }
  0xde   : > { %25095 = vmatmul.mubr.msk.f32.gmra.mrb[72].mxu0 %vm2554_vm4, %v28104_v51  ;;  %v1949_v51 = vrot.slane %v1935_v3, %v27673_v11  ;;  %v8298_v44 = vcombine.high %v23051_v18, %v23051_v18  ;;  %v8315_v23 = vcombine.high %v23052_v17, %v23052_v17  ;;  %v1959_v50 = vrot.slane %v1951_v14, %v27673_v11 }
  0xdf   : > { %25097 = vmatprep.mubr.msk.f32.mxu0 %vm27572_vm3, %v33293_v36  ;;  %v1966_v1 = vrot.slane %v1952_v53, %v27673_v11  ;;  %v8290_v29 = vcombine.high %v8288_v58, %v8288_v58  ;;  %v8322_v61 = vrot.slane %v23052_v17, %v27673_v11  ;;  %v1968_v48 = vcombine.low %v28215_v0, %v28251_v33 }
  0xe0   : > { %24621 = vmatmul.mubr.msk.f32.gmra.mrb[6].mxu1 %vm2554_vm4, %v1933_v19  ;;  %v1950_v42 = vcombine.low %v1942_v27, %v1949_v51  ;;  %v8974_v49 = vrot.slane %v8960_v13, %v27673_v11  ;;  %v28692_v41 = vcombine.low %v8281_v30, %v8289_v39  ;;  %v8346_v45 = vrot.slane %v23054_v38, %v27673_v11  ;;  %v33343_v30 = vld [vmem:[#allocation20_spill] sm:$0xff] }
  0xe1   : > { %24623 = vmatprep.mubr.msk.f32.mxu1 %vm27572_vm3, %v33293_v36  ;;  %v1969_v57 = vcombine.low %v28261_v55, %v28222_v2  ;;  %v8984_v60 = vrot.slane %v28675_v16, %v27673_v11  ;;  %v8991_v62 = vrot.slane %v28677_v7, %v27673_v11  ;;  %v8312_v0 = vrot.slane %v8298_v44, %v27673_v11  ;;  %v23087_v27 = vld.sshfl [vmem:[%s27678_s5 + $0x101] sm:$0x3 pattern:$0x76325410]  ;;  %v33346_v44 = vld [vmem:[#allocation25_spill] sm:$0xff] }
  0xe2   : > { %25098 = vmatmul.mubr.msk.f32.gmra.mrb[74].mxu0 %vm2554_vm4, %v28144_v22  ;;  %v8305_v22 = vrot.slane %v23051_v18, %v27673_v11  ;;  %v8329_v33 = vrot.slane %v8315_v23, %v27673_v11  ;;  %v1967_v2 = vcombine.low %v1959_v50, %v1966_v1  ;;  %v8330_v24 = vcombine.high %v8322_v61, %v8322_v61  ;;  %v33347_v23 = vld [vmem:[#allocation26_spill] sm:$0xff] }
  0xe3   : > { %25100 = vmatprep.mubr.msk.f32.mxu0 %vm27572_vm3, %v33293_v36  ;;  %v1983_v55 = vrot.slane %v1969_v57, %v27673_v11  ;;  %v8314_v40 = vcombine.high %v8312_v0, %v8312_v0  ;;  %v1985_v3 = vcombine.low %v33342_v37, %v28275_v6  ;;  %v8994_v15 = vcombine.low %v8288_v58, %v8290_v29  ;;  %v23055_v6 = vld [vmem:[%s27678_s5 + $0x111] sm:$0xff] }
  0xe4   : > { %24624 = vmatmul.mubr.msk.f32.gmra.mrb[8].mxu1 %vm2554_vm4, %v1950_v42  ;;  %v8313_v54 = vcombine.high %v8305_v22, %v8305_v22  ;;  %v8331_v34 = vcombine.high %v8329_v33, %v8329_v33  ;;  %v8354_v52 = vcombine.high %v8346_v45, %v8346_v45  ;;  %v1986_v28 = vcombine.low %v33344_v8, %v33343_v30  ;;  %v33348_v29 = vld [vmem:[#allocation34_spill] sm:$0xff] }
  0xe5   : > { %24626 = vmatprep.mubr.msk.f32.mxu1 %vm27572_vm3, %v33293_v36  ;;  %v28719_v18 = vcombine.low %v8967_v12, %v8974_v49  ;;  %v9001_v17 = vrot.slane %v28692_v41, %v27673_v11  ;;  %v9010_v19 = vcombine.low %v23086_v26, %v8305_v22  ;;  %v8339_v51 = vcombine.high %v23054_v38, %v23054_v38  ;;  %v33349_v22 = vld [vmem:[#allocation35_spill] sm:$0xff]  ;;  %v33350_v49 = vld [vmem:[#allocation13_spill] sm:$0xff] }
  0xe6   : > { %25101 = vmatmul.mubr.msk.f32.gmra.mrb[76].mxu0 %vm2554_vm4, %v28177_v43  ;;  %v1976_v43 = vrot.slane %v1968_v48, %v27673_v11  ;;  %v1993_v14 = vrot.slane %v1985_v3, %v27673_v11  ;;  %v2000_v53 = vrot.slane %v1986_v28, %v27673_v11  ;;  %v9011_v13 = vcombine.low %v8313_v54, %v8312_v0  ;;  %v33353_v3 = vld [vmem:[#allocation40_spill] sm:$0xff] }
  0xe7   : > { %25103 = vmatprep.mubr.msk.f32.mxu0 %vm27572_vm3, %v33293_v36  ;;  %v9027_v12 = vcombine.low %v8314_v40, %v8322_v61  ;;  %v9028_v39 = vcombine.low %v8330_v24, %v8329_v33  ;;  %v2002_v38 = vcombine.low %v33347_v23, %v33346_v44  ;;  %v9044_v42 = vcombine.low %v8331_v34, %v23087_v27  ;;  %v23057_v33 = vld [vmem:[%s27678_s5 + $0x121] sm:$0xff]  ;;  %v33357_v23 = vld [vmem:[#allocation43_spill] sm:$0xff] }
  0xe8   : > { %24627 = vmatmul.mubr.msk.f32.gmra.mrb[10].mxu1 %vm2554_vm4, %v1967_v2  ;;  %v1984_v58 = vcombine.low %v1976_v43, %v1983_v55  ;;  %v9045_v50 = vcombine.low %v8346_v45, %v8354_v52  ;;  %v8356_v1 = vcombine.high %v23055_v6, %v23055_v6  ;;  %v2003_v48 = vcombine.low %v33349_v22, %v33348_v29  ;;  %v23058_v45 = vld [vmem:[%s27678_s5 + $0x129] sm:$0xff]  ;;  %v33351_v40 = vld [vmem:[#allocation36_spill] sm:$0xff]  ;;  %v23088_v22 = vld.sshfl [vmem:[%s27678_s5 + $0x119] sm:$0x3 pattern:$0x76325410] }
  0xe9   : > { %24629 = vmatprep.mubr.msk.f32.mxu1 %vm27572_vm3, %v33293_v36  ;;  %v9008_v41 = vrot.slane %v8994_v15, %v27673_v11  ;;  %v9018_v61 = vrot.slane %v9010_v19, %v27673_v11  ;;  %v8353_v57 = vrot.slane %v8339_v51, %v27673_v11  ;;  %v8363_v0 = vrot.slane %v23055_v6, %v27673_v11  ;;  %v33352_v24 = vld [vmem:[#allocation29_spill] sm:$0xff]  ;;  %v33354_v15 = vld [vmem:[#allocation27_spill] sm:$0xff] }
  0xea   : > { %25104 = vmatmul.mubr.msk.f32.gmra.mrb[78].mxu0 %vm2554_vm4, %v33345_v56  ;;  %v2001_v26 = vcombine.low %v1993_v14, %v2000_v53  ;;  %v2010_v2 = vrot.slane %v2002_v38, %v27673_v11  ;;  %v2017_v43 = vrot.slane %v2003_v48, %v27673_v11  ;;  %v9025_v55 = vrot.slane %v9011_v13, %v27673_v11  ;;  %v33355_v56 = vld [vmem:[#allocation19_spill] sm:$0xff]  ;;  %v33358_v38 = vld [vmem:[#allocation30_spill] sm:$0xff] }
  0xeb   : > { %25106 = vmatprep.mubr.msk.f32.mxu0 %vm27572_vm3, %v33293_v36  ;;  %v9035_v54 = vrot.slane %v9027_v12, %v27673_v11  ;;  %v2019_v37 = vcombine.low %v33352_v24, %v33351_v40  ;;  %v2020_v34 = vcombine.low %v33354_v15, %v33353_v3  ;;  %v9042_v52 = vrot.slane %v9028_v39, %v27673_v11  ;;  %v33356_v39 = vld [vmem:[#allocation37_spill] sm:$0xff] }
  0xec   : > { %24630 = vmatmul.mubr.msk.f32.gmra.mrb[12].mxu1 %vm2554_vm4, %v1984_v58  ;;  %v9052_v30 = vrot.slane %v9044_v42, %v27673_v11  ;;  %v9059_v8 = vrot.slane %v9045_v50, %v27673_v11  ;;  %v8370_v28 = vrot.slane %v8356_v1, %v27673_v11  ;;  %v8355_v19 = vcombine.high %v8353_v57, %v8353_v57  ;;  %v33364_v40 = vld [vmem:[#allocation45_spill] sm:$0xff] }
  0xed   : > { %24632 = vmatprep.mubr.msk.f32.mxu1 %vm27572_vm3, %v33293_v36  ;;  %v8371_v27 = vcombine.high %v8363_v0, %v8363_v0  ;;  %v8380_v51 = vcombine.high %v23057_v33, %v23057_v33  ;;  %v8397_v6 = vcombine.high %v23058_v45, %v23058_v45  ;;  %v2018_v58 = vcombine.low %v2010_v2, %v2017_v43  ;;  %v33361_v2 = vld [vmem:[#allocation32_spill] sm:$0xff] }
  0xee   : > { %25107 = vmatmul.mubr.msk.f32.gmra.mrb[80].mxu0 %vm2554_vm4, %v33350_v49  ;;  %v2027_v14 = vrot.slane %v2019_v37, %v27673_v11  ;;  %v2034_v53 = vrot.slane %v2020_v34, %v27673_v11  ;;  %v28774_v13 = vcombine.low %v8984_v60, %v8991_v62  ;;  %v28776_v12 = vcombine.low %v9001_v17, %v9008_v41  ;;  %v33359_v62 = vld [vmem:[#allocation14_spill] sm:$0xff]  ;;  %v23060_v49 = vld [vmem:[%s27678_s5 + $0x139] sm:$0xff] }
  0xef   : > { %25109 = vmatprep.mubr.msk.f32.mxu0 %vm27572_vm3, %v33293_v36  ;;  %v2036_v44 = vcombine.low %v33356_v39, %v28364_v21  ;;  %v2037_v42 = vcombine.low %v33358_v38, %v33357_v23  ;;  %v28784_v50 = vcombine.low %v9018_v61, %v9025_v55  ;;  %v28786_v7 = vcombine.low %v9035_v54, %v9042_v52  ;;  %v33362_v43 = vld [vmem:[#allocation44_spill] sm:$0xff]  ;;  %v33363_v54 = vld [vmem:[#allocation33_spill] sm:$0xff]  ;;  %v33365_v34 = vld [vmem:[#allocation15_spill] sm:$0xff] }
  0xf0   : > { %24633 = vmatmul.mubr.msk.f32.gmra.mrb[14].mxu1 %vm2554_vm4, %v2001_v26  ;;  %v8372_v16 = vcombine.high %v8370_v28, %v8370_v28  ;;  %v8387_v60 = vrot.slane %v23057_v33, %v27673_v11  ;;  %v33360_v17 = vrot.slane %v33359_v62, %v27673_v11  ;;  %v28793_v1 = vcombine.low %v9052_v30, %v9059_v8  ;;  %v23061_v33 = vld [vmem:[%s27678_s5 + $0x141] sm:$0xff]  ;;  %v33371_v38 = vld [vmem:[#allocation38_spill] sm:$0xff]  ;;  %v33374_v62 = vld [vmem:[#allocation47_spill] sm:$0xff] }
  0xf1   : > { %24635 = vmatprep.mubr.msk.f32.mxu1 %vm27572_vm3, %v33293_v36  ;;  %v28795_v29 = vcombine.low %v8353_v57, %v8355_v19  ;;  %v28797_v21 = vcombine.low %v8363_v0, %v8371_v27  ;;  %v8394_v48 = vrot.slane %v8380_v51, %v27673_v11  ;;  %v8404_v41 = vrot.slane %v23058_v45, %v27673_v11  ;;  %v33366_v52 = vld [vmem:[#allocation16_spill] sm:$0xff]  ;;  %v33368_v51 = vld [vmem:[#allocation11_spill] sm:$0xff] }
  0xf2   : > { %25110 = vmatmul.mubr.msk.f32.gmra.mrb[82].mxu0 %vm2554_vm4, %v33355_v56  ;;  %v8411_v61 = vrot.slane %v8397_v6, %v27673_v11  ;;  %v2035_v26 = vcombine.low %v2027_v14, %v2034_v53  ;;  %v2044_v57 = vrot.slane %v2036_v44, %v27673_v11  ;;  %v2051_v0 = vrot.slane %v2037_v42, %v27673_v11  ;;  %v33369_v6 = vld [vmem:[#allocation10_spill] sm:$0xff] }
  0xf3   : > { %25112 = vmatprep.mubr.msk.f32.mxu0 %vm27572_vm3, %v33293_v36  ;;  %v2053_v55 = vcombine.low %v33362_v43, %v33361_v2  ;;  %v2054_v24 = vcombine.low %v33364_v40, %v33363_v54  ;;  %v28816_v45 = vcombine.low %v8370_v28, %v8372_v16  ;;  %v9079_v37 = vcombine.low %v23088_v22, %v8387_v60  ;;  %v23089_v44 = vld.sshfl [vmem:[%s27678_s5 + $0x131] sm:$0x3 pattern:$0x76325410] }
  0xf4   : > { %24636 = vmatmul.mubr.msk.f32.gmra.mrb[16].mxu1 %vm2554_vm4, %v2018_v58  ;;  %v8395_v3 = vcombine.high %v8387_v60, %v8387_v60  ;;  %v8421_v15 = vcombine.high %v23060_v49, %v23060_v49  ;;  %v33367_v30 = vcombine.low %v33365_v34, %v33366_v52  ;;  %v8396_v8 = vcombine.high %v8394_v48, %v8394_v48  ;;  %v33372_v42 = vld [vmem:[#allocation46_spill] sm:$0xff]  ;;  %v33373_v60 = vld [vmem:[#allocation41_spill] sm:$0xff] }
  0xf5   : > { %24638 = vmatprep.mubr.msk.f32.mxu1 %vm27572_vm3, %v33293_v36  ;;  %v8412_v56 = vcombine.high %v8404_v41, %v8404_v41  ;;  %v8428_v19 = vrot.slane %v23060_v49, %v27673_v11  ;;  %v8438_v27 = vcombine.high %v23061_v33, %v23061_v33  ;;  %v33370_v58 = vpack.c.bf16 %v33368_v51, %v33369_v6 }
  0xf6   : > { %25113 = vmatmul.mubr.msk.f32.gmra.mrb[84].mxu0 %vm2554_vm4, %v33360_v17  ;;  %v8413_v28 = vcombine.high %v8411_v61, %v8411_v61  ;;  %v2061_v14 = vrot.slane %v2053_v55, %v27673_v11  ;;  %v2068_v53 = vrot.slane %v2054_v24, %v27673_v11  ;;  %v9076_v39 = vrot.slane %v28797_v21, %v27673_v11 }
  0xf7   : > { %25119 = vmatprep.mubr.msk.f32.mxu0 %vm27572_vm3, %v33293_v36  ;;  %v2052_v23 = vcombine.low %v2044_v57, %v2051_v0  ;;  %v2070_v16 = vcombine.low %v33372_v42, %v33371_v38  ;;  %v2071_v17 = vcombine.low %v33374_v62, %v33373_v60  ;;  %v9069_v49 = vrot.slane %v28795_v29, %v27673_v11  ;;  %v33375_v57 = vld [vmem:[#allocation17_spill] sm:$0xff]  ;;  %v33376_v0 = vld [vmem:[#allocation18_spill] sm:$0xff] }
  0xf8   : > { %24639 = vmatmul.mubr.msk.f32.gmra.mrb[18].mxu1 %vm2554_vm4, %v2035_v26  ;;  %v9093_v2 = vrot.slane %v9079_v37, %v27673_v11  ;;  %v9095_v43 = vcombine.low %v8395_v3, %v8394_v48  ;;  %v8435_v21 = vrot.slane %v8421_v15, %v27673_v11  ;;  %v33377_v55 = vcombine.low %v33375_v57, %v33376_v0  ;;  %v23063_v29 = vld [vmem:[%s27678_s5 + $0x151] sm:$0xff]  ;;  %v23090_v60 = vld.sshfl [vmem:[%s27678_s5 + $0x149] sm:$0x3 pattern:$0x76325410] }
  0xf9   : > { %24641 = vmatprep.mubr.msk.f32.mxu1 %vm27572_vm3, %v33293_v36  ;;  %v9096_v54 = vcombine.low %v8396_v8, %v8404_v41  ;;  %v9112_v40 = vcombine.low %v8412_v56, %v8411_v61  ;;  %v8436_v24 = vcombine.high %v8428_v19, %v8428_v19  ;;  %v8445_v34 = vrot.slane %v23061_v33, %v27673_v11  ;;  %v33378_v61 = vld [vmem:[#allocation49_spill] sm:$0xff] }
  0xfa   : > { %25120 = vmatmul.mubr.msk.f32.vlgmr.msra.gmra.mrb[86].mxu0 %vm2554_vm4, %v33367_v30  ;;  %v9086_v48 = vrot.slane %v28816_v45, %v27673_v11  ;;  %v9113_v37 = vcombine.low %v8413_v28, %v23089_v44  ;;  %v8452_v3 = vrot.slane %v8438_v27, %v27673_v11  ;;  %v2069_v15 = vcombine.low %v2061_v14, %v2068_v53  ;;  %v33380_v28 = vld [vmem:[#allocation23_spill] sm:$0xff] }
  0xfb   : > { %26241 = vmatpush3.bf16.msk.msra.mxu0 %vm27653_vm2, %v33370_v58  ;;  %25122 = vmatprep.mubr.msk.f32.mxu0 %vm27572_vm3, %v33293_v36  ;;  %v2078_v52 = vrot.slane %v2070_v16, %v27673_v11  ;;  %v2085_v41 = vrot.slane %v2071_v17, %v27673_v11  ;;  %v2087_v33 = vcombine.low %v33378_v61, %v28449_v35  ;;  %v33379_v58 = vld [vmem:[#allocation22_spill] sm:$0xff] }
  0xfc   : > { %24642 = vmatmul.mubr.msk.f32.gmra.mrb[20].mxu1 %vm2554_vm4, %v2052_v23  ;;  %v2088_v30 = vcombine.low %v28408_v9, %v28453_v32  ;;  %v9103_v56 = vrot.slane %v9095_v43, %v27673_v11  ;;  %v8437_v45 = vcombine.high %v8435_v21, %v8435_v21  ;;  %v8462_v51 = vcombine.high %v23063_v29, %v23063_v29  ;;  %v33382_v17 = vld [vmem:[#allocation50_spill] sm:$0xff] }
  0xfd   : > { %v5642_v22 = vpop.f32.mrb[0].mxu0  ;;  %v8469_v27 = vrot.slane %v23063_v29, %v27673_v11  ;;  %24644 = vmatprep.mubr.msk.f32.mxu1 %vm27572_vm3, %v33293_v36  ;;  %v33381_v14 = vcombine.low %v33379_v58, %v33380_v28  ;;  %v9110_v35 = vrot.slane %v9096_v54, %v27673_v11  ;;  %v9120_v9 = vrot.slane %v9112_v40, %v27673_v11 }
  0xfe   : > { %v24867_v26 = vpop.f32.mrb[1].mxu0  ;;  %25123 = vmatmul.mubr.msk.f32.gmra.mrb[88].mxu0 %vm2554_vm4, %v33377_v55  ;;  %v9129_v32 = vcombine.low %v8428_v19, %v8436_v24  ;;  %v8453_v53 = vcombine.high %v8445_v34, %v8445_v34  ;;  %v9127_v44 = vrot.slane %v9113_v37, %v27673_v11  ;;  %v8454_v23 = vcombine.high %v8452_v3, %v8452_v3  ;;  %v33386_v37 = vld [vmem:[#allocation61_spill] sm:$0xff] }
  0xff   : > { %25125 = vmatprep.mubr.msk.f32.mxu0 %vm27572_vm3, %v33293_v36  ;;  %v2095_v38 = vrot.slane %v2087_v33, %v27673_v11  ;;  %v2102_v42 = vrot.slane %v2088_v30, %v27673_v11  ;;  %v28879_v16 = vcombine.low %v9069_v49, %v9076_v39  ;;  %v2086_v62 = vcombine.low %v2078_v52, %v2085_v41  ;;  %v33383_v39 = vld [vmem:[#allocation24_spill] sm:$0xff]  ;;  %v33389_v30 = vld [vmem:[#allocation42_spill] sm:$0xff] }
 0x100   : > { %24645 = vmatmul.mubr.msk.f32.gmra.mrb[22].mxu1 %vm2554_vm4, %v2069_v15  ;;  %v2104_v19 = vcombine.low %v28425_v31, %v28457_v10  ;;  %v2105_v22 = vcombine.low %v33382_v17, %v28470_v46  ;;  %v28887_v43 = vcombine.low %v9086_v48, %v9093_v2  ;;  %v9130_v26 = vcombine.low %v8435_v21, %v8437_v45  ;;  %v33384_v49 = vld [vmem:[#allocation28_spill] sm:$0xff] }
 0x101   : > { %v5647_v8 = vpop.f32.mrb[2].mxu0  ;;  %v8476_v57 = vrot.slane %v8462_v51, %v27673_v11  ;;  %v8477_v0 = vcombine.high %v8469_v27, %v8469_v27  ;;  %24647 = vmatprep.mubr.msk.f32.mxu1 %vm27572_vm3, %v33293_v36  ;;  %v33385_v55 = vcombine.low %v33383_v39, %v33384_v49  ;;  %v28896_v54 = vcombine.low %v9103_v56, %v9110_v35  ;;  %v23064_v10 = vld [vmem:[%s27678_s5 + $0x159] sm:$0xff] }
 0x102   : > { %v24870_v6 = vpop.f32.mrb[3].mxu0  ;;  %25126 = vmatmul.mubr.msk.f32.gmra.mrb[4].mxu0 %vm2554_vm4, %v33381_v14  ;;  %v9137_v31 = vrot.slane %v9129_v32, %v27673_v11  ;;  %v9146_v46 = vcombine.low %v8445_v34, %v8453_v53  ;;  %v28902_v2 = vcombine.low %v9120_v9, %v9127_v44  ;;  %v9147_v21 = vcombine.low %v8452_v3, %v8454_v23  ;;  %v33387_v15 = vld [vmem:[#allocation68_spill] sm:$0xff]  ;;  %v1039_v34 = vld [vmem:[%s27678_s5 + $0xb1] sm:$0xff] }
 0x103   : > { %25128 = vmatprep.mubr.msk.f32.mxu0 %vm27572_vm3, %v33293_v36  ;;  %v9163_v40 = vcombine.low %v23090_v60, %v8469_v27  ;;  %v2103_v24 = vcombine.low %v2095_v38, %v2102_v42  ;;  %v2112_v29 = vrot.slane %v2104_v19, %v27673_v11  ;;  %v2119_v48 = vrot.slane %v2105_v22, %v27673_v11  ;;  %v33388_v3 = vld [vmem:[#allocation39_spill] sm:$0xff]  ;;  %v23066_v6 = vld [vmem:[%s27678_s5 + $0x169] sm:$0xff]  ;;  %v33391_v35 = vld [vmem:[#allocation64_spill] sm:$0xff] }
 0x104   : > { %24648 = vmatmul.mubr.msk.f32.gmra.mrb[24].mxu1 %vm2554_vm4, %v2086_v62  ;;  %v2122_v52 = vcombine.low %v33387_v15, %v33386_v37  ;;  %v9144_v41 = vrot.slane %v9130_v26, %v27673_v11  ;;  %v9164_v61 = vcombine.low %v8477_v0, %v8476_v57  ;;  %v8479_v33 = vcombine.high %v23064_v10, %v23064_v10  ;;  %v33392_v9 = vld [vmem:[#allocation58_spill] sm:$0xff]  ;;  %v33394_v42 = vld [vmem:[#allocation65_spill] sm:$0xff]  ;;  %v33395_v62 = vld [vmem:[#allocation52_spill] sm:$0xff] }
 0x105   : > { %24650 = vmatprep.mubr.msk.f32.mxu1 %vm27572_vm3, %v33293_v36  ;;  %v33390_v8 = vcombine.low %v33388_v3, %v33389_v30  ;;  %v9154_v56 = vrot.slane %v9146_v46, %v27673_v11  ;;  %v8486_v45 = vrot.slane %v23064_v10, %v27673_v11  ;;  %v9161_v51 = vrot.slane %v9147_v21, %v27673_v11  ;;  %v33393_v38 = vld [vmem:[#allocation66_spill] sm:$0xff]  ;;  %v33396_v19 = vld [vmem:[#allocation48_spill] sm:$0xff] }
 0x106   : > { %25129 = vmatmul.mubr.msk.f32.gmra.mrb[6].mxu0 %vm2554_vm4, %v33385_v55  ;;  %v8478_v27 = vcombine.high %v8476_v57, %v8476_v57  ;;  %v1436_v58 = vrot.slane %v1039_v34, %v27673_v11  ;;  %v9171_v28 = vrot.slane %v9163_v40, %v27673_v11  ;;  %v2120_v14 = vcombine.low %v2112_v29, %v2119_v48  ;;  %v23067_v55 = vld [vmem:[%s27678_s5 + $0x171] sm:$0xff]  ;;  %v33398_v46 = vld [vmem:[#allocation72_spill] sm:$0xff] }
 0x107   : > { %25131 = vmatprep.mubr.msk.f32.mxu0 %vm27572_vm3, %v33293_v36  ;;  %v2121_v32 = vcombine.low %v33392_v9, %v33391_v35  ;;  %v2136_v53 = vrot.slane %v2122_v52, %v27673_v11  ;;  %v9178_v44 = vrot.slane %v9164_v61, %v27673_v11  ;;  %v8493_v23 = vrot.slane %v8479_v33, %v27673_v11  ;;  %v1041_v40 = vld [vmem:[%s27678_s5 + $0xc1] sm:$0xff]  ;;  %v33400_v33 = vld [vmem:[#allocation51_spill] sm:$0xff] }
 0x108   : > { %24651 = vmatmul.mubr.msk.f32.gmra.mrb[26].mxu1 %vm2554_vm4, %v2103_v24  ;;  %v2138_v60 = vcombine.low %v33394_v42, %v33393_v38  ;;  %v33397_v17 = vcombine.low %v33395_v62, %v33396_v19  ;;  %v28939_v22 = vcombine.low %v9137_v31, %v9144_v41  ;;  %v8494_v26 = vcombine.high %v8486_v45, %v8486_v45  ;;  %v23091_v52 = vld.sshfl [vmem:[%s27678_s5 + $0x161] sm:$0x3 pattern:$0x76325410]  ;;  %v33399_v61 = vld [vmem:[#allocation53_spill] sm:$0xff]  ;;  %v33403_v62 = vld [vmem:[#allocation55_spill] sm:$0xff] }
 0x109   : > { %24653 = vmatprep.mubr.msk.f32.mxu1 %vm27572_vm3, %v33293_v36  ;;  %v8510_v57 = vrot.slane %v23066_v6, %v27673_v11  ;;  %v2129_v0 = vrot.slane %v2121_v32, %v27673_v11  ;;  %v28945_v39 = vcombine.low %v8478_v27, %v8486_v45  ;;  %v8495_v49 = vcombine.high %v8493_v23, %v8493_v23  ;;  %v22749_v45 = vld.sshfl [vmem:[%s27678_s5 + $0xb9] sm:$0x3 pattern:$0x76325410] }
 0x10a   : > { %25132 = vmatmul.mubr.msk.f32.gmra.mrb[8].mxu0 %vm2554_vm4, %v33390_v8  ;;  %v2139_v10 = vcombine.low %v33398_v46, %v1436_v58  ;;  %v1429_v21 = vcombine.high %v1039_v34, %v1039_v34  ;;  %v8503_v31 = vcombine.high %v23066_v6, %v23066_v6  ;;  %v2146_v29 = vrot.slane %v2138_v60, %v27673_v11  ;;  %v33402_v60 = vld [vmem:[#allocation54_spill] sm:$0xff] }
 0x10b   : > { %25134 = vmatprep.mubr.msk.f32.mxu0 %vm27572_vm3, %v33293_v36  ;;  %v2137_v24 = vcombine.low %v2129_v0, %v2136_v53  ;;  %v1444_v48 = vcombine.high %v1436_v58, %v1436_v58  ;;  %v28952_v37 = vcombine.low %v9154_v56, %v9161_v51  ;;  %v28954_v15 = vcombine.low %v9171_v28, %v9178_v44 }
 0x10c   : > { %24654 = vmatmul.mubr.msk.f32.gmra.mrb[28].mxu1 %vm2554_vm4, %v2120_v14  ;;  %v2153_v34 = vrot.slane %v2139_v10, %v27673_v11  ;;  %v1443_v41 = vrot.slane %v1429_v21, %v27673_v11  ;;  %v33401_v3 = vcombine.low %v33399_v61, %v33400_v33  ;;  %v28965_v30 = vcombine.low %v8494_v26, %v8493_v23  ;;  %v1042_v14 = vld [vmem:[%s27678_s5 + $0xc9] sm:$0xff] }
 0x10d   : > { %24656 = vmatprep.mubr.msk.f32.mxu1 %vm27572_vm3, %v33293_v36  ;;  %v8518_v8 = vcombine.high %v8510_v57, %v8510_v57  ;;  %v8527_v56 = vrot.slane %v23067_v55, %v27673_v11  ;;  %v1453_v51 = vcombine.high %v1041_v40, %v1041_v40  ;;  %v9188_v27 = vrot.slane %v28945_v39, %v27673_v11 }
 0x10e   : > { %25135 = vmatmul.mubr.msk.f32.gmra.mrb[10].mxu0 %vm2554_vm4, %v33397_v17  ;;  %v1445_v6 = vcombine.high %v1443_v41, %v1443_v41  ;;  %v2155_v58 = vcombine.low %v1444_v48, %v1443_v41  ;;  %v1460_v28 = vrot.slane %v1041_v40, %v27673_v11  ;;  %v28975_v35 = vcombine.low %v8495_v49, %v23091_v52  ;;  %v1044_v48 = vld [vmem:[%s27678_s5 + $0xd9] sm:$0xff]  ;;  %v23070_v52 = vld [vmem:[%s27678_s5 + $0x189] sm:$0xff] }
 0x10f   : > { %25137 = vmatprep.mubr.msk.f32.mxu0 %vm27572_vm3, %v33293_v36  ;;  %v8517_v9 = vrot.slane %v8503_v31, %v27673_v11  ;;  %v8520_v32 = vcombine.high %v23067_v55, %v23067_v55  ;;  %v2154_v53 = vcombine.low %v2146_v29, %v2153_v34  ;;  %v1467_v38 = vrot.slane %v1453_v51, %v27673_v11  ;;  %v23069_v55 = vld [vmem:[%s27678_s5 + $0x181] sm:$0xff] }
 0x110   : > { %24657 = vmatmul.mubr.msk.f32.gmra.mrb[30].mxu1 %vm2554_vm4, %v2137_v24  ;;  %v2156_v44 = vcombine.low %v1445_v6, %v22749_v45  ;;  %v2163_v23 = vrot.slane %v2155_v58, %v27673_v11  ;;  %v1468_v42 = vcombine.high %v1460_v28, %v1460_v28  ;;  %v33404_v19 = vcombine.low %v33402_v60, %v33403_v62 }
 0x111   : > { %24659 = vmatprep.mubr.msk.f32.mxu1 %vm27572_vm3, %v33293_v36  ;;  %v9195_v17 = vrot.slane %v28965_v30, %v27673_v11  ;;  %v28989_v26 = vcombine.low %v8510_v57, %v8518_v8  ;;  %v8535_v0 = vcombine.high %v8527_v56, %v8527_v56  ;;  %v1470_v49 = vcombine.high %v1042_v14, %v1042_v14  ;;  %v33407_v30 = vld [vmem:[#allocation57_spill] sm:$0xff] }
 0x112   : > { %25138 = vmatmul.mubr.msk.f32.gmra.mrb[12].mxu0 %vm2554_vm4, %v33401_v3  ;;  %v2170_v46 = vrot.slane %v2156_v44, %v27673_v11  ;;  %v1469_v10 = vcombine.high %v1467_v38, %v1467_v38  ;;  %v2172_v21 = vcombine.low %v1460_v28, %v1468_v42  ;;  %v1477_v40 = vrot.slane %v1042_v14, %v27673_v11  ;;  %v33406_v3 = vld [vmem:[#allocation56_spill] sm:$0xff] }
 0x113   : > { %25140 = vmatprep.mubr.msk.f32.mxu0 %vm27572_vm3, %v33293_v36  ;;  %v8519_v31 = vcombine.high %v8517_v9, %v8517_v9  ;;  %v8534_v24 = vrot.slane %v8520_v32, %v27673_v11  ;;  %v1484_v57 = vrot.slane %v1470_v49, %v27673_v11  ;;  %v33405_v29 = vmov 0.0|0.0   ;;  %v33409_v49 = vld [vmem:[#allocation59_spill] sm:$0xff] }
 0x114   : > { %24660 = vmatmul.mubr.msk.f32.gmra.mrb[32].mxu1 %vm2554_vm4, %v2154_v53  ;;  %26242 = vmatprep.subr.bf16.mxu0 %v33405_v29  ;;  %v2171_v34 = vcombine.low %v2163_v23, %v2170_v46  ;;  %v2173_v41 = vcombine.low %v1467_v38, %v1469_v10  ;;  %v2180_v61 = vrot.slane %v2172_v21, %v27673_v11  ;;  %v22750_v53 = vld.sshfl [vmem:[%s27678_s5 + $0xd1] sm:$0x3 pattern:$0x76325410] }
 0x115   : > { %24662 = vmatprep.mubr.msk.f32.mxu1 %vm27572_vm3, %v33293_v36  ;;  %v1485_v33 = vcombine.high %v1477_v40, %v1477_v40  ;;  %v33408_v8 = vcombine.low %v33406_v3, %v33407_v30  ;;  %v9205_v45 = vrot.slane %v28975_v35, %v27673_v11  ;;  %v9215_v51 = vcombine.low %v8527_v56, %v8535_v0  ;;  %v23092_v38 = vld.sshfl [vmem:[%s27678_s5 + $0x179] sm:$0x3 pattern:$0x76325410]  ;;  %v33412_v30 = vld [vmem:[#allocation62_spill] sm:$0xff] }
 0x116   : > { %25141 = vmatmul.mubr.msk.f32.gmra.mrb[14].mxu0 %vm2554_vm4, %v33404_v19  ;;  %v29012_v6 = vrot.slane %v23069_v55, %v27673_v11  ;;  %v1486_v58 = vcombine.high %v1484_v57, %v1484_v57  ;;  %v8544_v28 = vcombine.high %v23069_v55, %v23069_v55  ;;  %v2187_v14 = vrot.slane %v2173_v41, %v27673_v11  ;;  %v33410_v55 = vld [vmem:[#allocation60_spill] sm:$0xff] }
 0x117   : > { %25143 = vmatprep.mubr.msk.f32.mxu0 %vm27572_vm3, %v33293_v36  ;;  %v2189_v32 = vcombine.low %v1477_v40, %v1485_v33  ;;  %v1494_v44 = vcombine.high %v1044_v48, %v1044_v48  ;;  %v9214_v23 = vcombine.low %v8517_v9, %v8519_v31  ;;  %v8561_v42 = vcombine.high %v23070_v52, %v23070_v52 }
 0x118   : > { %24663 = vmatmul.mubr.msk.f32.gmra.mrb[34].mxu1 %vm2554_vm4, %v2171_v34  ;;  %v2190_v35 = vcombine.low %v1484_v57, %v1486_v58  ;;  %v1501_v56 = vrot.slane %v1044_v48, %v27673_v11  ;;  %v8536_v60 = vcombine.high %v8534_v24, %v8534_v24  ;;  %v2188_v62 = vcombine.low %v2180_v61, %v2187_v14  ;;  %v23072_v14 = vld [vmem:[%s27678_s5 + $0x199] sm:$0xff] }
 0x119   : > { %24665 = vmatprep.mubr.msk.f32.mxu1 %vm27572_vm3, %v33293_v36  ;;  %v2197_v19 = vrot.slane %v2189_v32, %v27673_v11  ;;  %v1508_v0 = vrot.slane %v1494_v44, %v27673_v11  ;;  %v33411_v9 = vcombine.low %v33409_v49, %v33410_v55  ;;  %v9212_v46 = vrot.slane %v28989_v26, %v27673_v11  ;;  %v1045_v26 = vld [vmem:[%s27678_s5 + $0xe1] sm:$0xff] }
 0x11a   : > { %25144 = vmatmul.mubr.msk.f32.gmra.mrb[16].mxu0 %vm2554_vm4, %v33408_v8  ;;  %v2204_v10 = vrot.slane %v2190_v35, %v27673_v11  ;;  %v1509_v21 = vcombine.high %v1501_v56, %v1501_v56  ;;  %v2206_v40 = vcombine.low %v22750_v53, %v1501_v56  ;;  %v29037_v31 = vcombine.low %v9188_v27, %v9195_v17  ;;  %v33413_v8 = vld [vmem:[#allocation63_spill] sm:$0xff]  ;;  %v23093_v35 = vld.sshfl [vmem:[%s27678_s5 + $0x191] sm:$0x3 pattern:$0x76325410] }
 0x11b   : > { %25146 = vmatprep.mubr.msk.f32.mxu0 %vm27572_vm3, %v33293_v36  ;;  %v9232_v57 = vcombine.low %v23092_v38, %v29012_v6  ;;  %v8558_v48 = vrot.slane %v8544_v28, %v27673_v11  ;;  %v8568_v34 = vrot.slane %v23070_v52, %v27673_v11  ;;  %v8575_v41 = vrot.slane %v8561_v42, %v27673_v11  ;;  %v23073_v42 = vld [vmem:[%s27678_s5 + $0x1a1] sm:$0xff] }
 0x11c   : > { %24666 = vmatmul.mubr.msk.f32.gmra.mrb[36].mxu1 %vm2554_vm4, %v2188_v62  ;;  %v2205_v61 = vcombine.low %v2197_v19, %v2204_v10  ;;  %v2207_v33 = vcombine.low %v1509_v21, %v1508_v0  ;;  %v2214_v3 = vrot.slane %v2206_v40, %v27673_v11  ;;  %v9222_v39 = vrot.slane %v9214_v23, %v27673_v11  ;;  %v1047_v19 = vld [vmem:[%s27678_s5 + $0xf1] sm:$0xff]  ;;  %v33416_v10 = vld [vmem:[#allocation69_spill] sm:$0xff] }
 0x11d   : > { %v9229_v27 = vrot.slane %v9215_v51, %v27673_v11  ;;  %v9231_v17 = vcombine.low %v8534_v24, %v8536_v60  ;;  %24668 = vmatprep.mubr.msk.f32.mxu1 %vm27572_vm3, %v33293_v36  ;;  %v1510_v52 = vcombine.high %v1508_v0, %v1508_v0  ;;  %v33414_v58 = vcombine.low %v33412_v30, %v33413_v8 }
 0x11e   : > { %25147 = vmatmul.mubr.msk.f32.gmra.mrb[18].mxu0 %vm2554_vm4, %v33411_v9  ;;  %v8559_v28 = vcombine.high %v29012_v6, %v29012_v6  ;;  %v2221_v32 = vrot.slane %v2207_v33, %v27673_v11  ;;  %v1511_v53 = vcombine.high %v1045_v26, %v1045_v26  ;;  %v1518_v51 = vrot.slane %v1045_v26, %v27673_v11  ;;  %v22751_v9 = vld.sshfl [vmem:[%s27678_s5 + $0xe9] sm:$0x3 pattern:$0x76325410] }
 0x11f   : > { %25149 = vmatprep.mubr.msk.f32.mxu0 %vm27572_vm3, %v33293_v36  ;;  %v29061_v24 = vcombine.low %v9205_v45, %v9212_v46  ;;  %v9246_v44 = vrot.slane %v9232_v57, %v27673_v11  ;;  %v8560_v23 = vcombine.high %v8558_v48, %v8558_v48  ;;  %v8576_v38 = vcombine.high %v8568_v34, %v8568_v34  ;;  %v33415_v46 = vld [vmem:[#allocation67_spill] sm:$0xff] }
 0x120   : > { %v8577_v6 = vcombine.high %v8575_v41, %v8575_v41  ;;  %24669 = vmatmul.mubr.msk.f32.gmra.mrb[38].mxu1 %vm2554_vm4, %v2205_v61  ;;  %v2222_v56 = vcombine.low %v2214_v3, %v2221_v32  ;;  %v1525_v60 = vrot.slane %v1511_v53, %v27673_v11  ;;  %v1526_v62 = vcombine.high %v1518_v51, %v1518_v51 }
 0x121   : > { %v29069_v0 = vcombine.low %v9222_v39, %v9229_v27  ;;  %v9239_v45 = vrot.slane %v9231_v17, %v27673_v11  ;;  %v8585_v49 = vcombine.high %v23072_v14, %v23072_v14  ;;  %24671 = vmatprep.mubr.msk.f32.mxu1 %vm27572_vm3, %v33293_v36  ;;  %v2223_v55 = vcombine.low %v1510_v52, %v1518_v51  ;;  %v1048_v17 = vld [vmem:[%s27678_s5 + $0xf9] sm:$0xff]  ;;  %v33418_v51 = vld [vmem:[#allocation70_spill] sm:$0xff] }
 0x122   : > { %25150 = vmatmul.mubr.msk.f32.gmra.mrb[20].mxu0 %vm2554_vm4, %v33414_v58  ;;  %v33417_v21 = vcombine.low %v33415_v46, %v33416_v10  ;;  %v9248_v40 = vcombine.low %v8559_v28, %v8558_v48  ;;  %v8602_v57 = vcombine.high %v23073_v42, %v23073_v42  ;;  %v2224_v26 = vcombine.low %v1526_v62, %v1525_v60  ;;  %v1050_v46 = vld [vmem:[%s27678_s5 + $0x109] sm:$0xff] }
 0x123   : > { %25152 = vmatprep.mubr.msk.f32.mxu0 %vm27572_vm3, %v33293_v36  ;;  %v1527_v61 = vcombine.high %v1525_v60, %v1525_v60  ;;  %v9249_v33 = vcombine.low %v8560_v23, %v8568_v34  ;;  %v9265_v3 = vcombine.low %v8576_v38, %v8575_v41  ;;  %v2231_v39 = vrot.slane %v2223_v55, %v27673_v11  ;;  %v33419_v23 = vld [vmem:[#allocation71_spill] sm:$0xff] }
 0x124   : > { %v1542_v27 = vrot.slane %v1047_v19, %v27673_v11  ;;  %v9266_v52 = vcombine.low %v8577_v6, %v23093_v35  ;;  %v8592_v30 = vrot.slane %v23072_v14, %v27673_v11  ;;  %24672 = vmatmul.mubr.msk.f32.gmra.mrb[40].mxu1 %vm2554_vm4, %v2222_v56  ;;  %v2238_v48 = vrot.slane %v2224_v26, %v27673_v11 }
 0x125   : > { %v2240_v8 = vcombine.low %v1527_v61, %v22751_v9  ;;  %v8599_v28 = vrot.slane %v8585_v49, %v27673_v11  ;;  %v8609_v32 = vrot.slane %v23073_v42, %v27673_v11  ;;  %24674 = vmatprep.mubr.msk.f32.mxu1 %vm27572_vm3, %v33293_v36  ;;  %v1535_v41 = vcombine.high %v1047_v19, %v1047_v19 }
 0x126   : > { %25153 = vmatmul.mubr.msk.f32.gmra.mrb[26].mxu0 %vm2554_vm4, %v33417_v21  ;;  %v1550_v34 = vcombine.high %v1542_v27, %v1542_v27  ;;  %v33420_v14 = vcombine.low %v33418_v51, %v33419_v23  ;;  %v29095_v38 = vcombine.low %v9239_v45, %v9246_v44  ;;  %v8616_v35 = vrot.slane %v8602_v57, %v27673_v11  ;;  %v23075_v45 = vld [vmem:[%s27678_s5 + $0x1b1] sm:$0xff] }
 0x127   : > { %25155 = vmatprep.mubr.msk.f32.mxu0 %vm27572_vm3, %v33293_v36  ;;  %v2239_v6 = vcombine.low %v2231_v39, %v2238_v48  ;;  %v1559_v42 = vrot.slane %v1048_v17, %v27673_v11  ;;  %v9256_v56 = vrot.slane %v9248_v40, %v27673_v11  ;;  %v9263_v60 = vrot.slane %v9249_v33, %v27673_v11 }
 0x128   : > { %v2241_v62 = vcombine.low %v1542_v27, %v1550_v34  ;;  %v2248_v19 = vrot.slane %v2240_v8, %v27673_v11  ;;  %v9273_v49 = vrot.slane %v9265_v3, %v27673_v11  ;;  %v9280_v44 = vrot.slane %v9266_v52, %v27673_v11  ;;  %v22752_v27 = vld.sshfl [vmem:[%s27678_s5 + $0x101] sm:$0x3 pattern:$0x76325410] }
 0x129   : > { %v7576_v58 = vpop.f32.mrb[22].mxu0  ;;  %24675 = vmatmul.mubr.msk.f32.gmra.mrb[42].mxu1 %vm2554_vm4, %v2239_v6  ;;  %v1549_v55 = vrot.slane %v1535_v41, %v27673_v11  ;;  %v1567_v9 = vcombine.high %v1559_v42, %v1559_v42  ;;  %v8600_v21 = vcombine.high %v8592_v30, %v8592_v30  ;;  %v8601_v40 = vcombine.high %v8599_v28, %v8599_v28 }
 0x12a   : > { %v24994_v53 = vpop.f32.mrb[23].mxu0  ;;  %25156 = vmatmul.mubr.msk.f32.gmra.mrb[28].mxu0 %vm2554_vm4, %v33420_v14  ;;  %v8617_v57 = vcombine.high %v8609_v32, %v8609_v32  ;;  %24677 = vmatprep.mubr.msk.f32.mxu1 %vm27572_vm3, %v33293_v36  ;;  %v2255_v26 = vrot.slane %v2241_v62, %v27673_v11  ;;  %v8618_v33 = vcombine.high %v8616_v35, %v8616_v35  ;;  %v23076_v62 = vld [vmem:[%s27678_s5 + $0x1b9] sm:$0xff] }
 0x12b   : > { %25158 = vmatprep.mubr.msk.f32.mxu0 %vm27572_vm3, %v33293_v36  ;;  %v1551_v3 = vcombine.high %v1549_v55, %v1549_v55  ;;  %v2258_v39 = vcombine.low %v1559_v42, %v1567_v9  ;;  %v1552_v52 = vcombine.high %v1048_v17, %v1048_v17  ;;  %v8626_v48 = vcombine.high %v23075_v45, %v23075_v45 }
 0x12c   : > { %v8633_v8 = vrot.slane %v23075_v45, %v27673_v11  ;;  %v2256_v58 = vcombine.low %v2248_v19, %v2255_v26  ;;  %v1583_v34 = vrot.slane %v1050_v46, %v27673_v11  ;;  %v29122_v41 = vcombine.low %v9256_v56, %v9263_v60  ;;  %v1051_v56 = vld [vmem:[%s27678_s5 + $0x111] sm:$0xff] }
 0x12d   : > { %v7581_v10 = vpop.f32.mrb[24].mxu0  ;;  %v2257_v25 = vcombine.low %v1549_v55, %v1551_v3  ;;  %v2272_v63 = vrot.slane %v2258_v39, %v27673_v11  ;;  %v29126_v53 = vcombine.low %v9273_v49, %v9280_v44  ;;  %v9282_v17 = vcombine.low %v8592_v30, %v8600_v21  ;;  %v23094_v49 = vld.sshfl [vmem:[%s27678_s5 + $0x1a9] sm:$0x3 pattern:$0x76325410] }
 0x12e   : > { %v24997_v61 = vpop.f32.mrb[25].mxu0  ;;  %25159 = vmatmul.mubr.msk.f32.gmra.mrb[30].mxu0 %vm2554_vm4, %v8907_v20  ;;  %v1566_v20 = vrot.slane %v1552_v52, %v27673_v11  ;;  %v9283_v51 = vcombine.low %v8599_v28, %v8601_v40  ;;  %24678 = vmatmul.mubr.msk.f32.gmra.mrb[44].mxu1 %vm2554_vm4, %v2256_v58  ;;  %v2275_v23 = vcombine.low %v22752_v27, %v1583_v34 }
 0x12f   : > { %25161 = vmatprep.mubr.msk.f32.mxu0 %vm27572_vm3, %v33293_v36  ;;  %v9299_v14 = vcombine.low %v8609_v32, %v8617_v57  ;;  %24680 = vmatprep.mubr.msk.f32.mxu1 %vm27572_vm3, %v33293_v36  ;;  %v2265_v6 = vrot.slane %v2257_v25, %v27673_v11  ;;  %v9300_v30 = vcombine.low %v8616_v35, %v8618_v33 }
 0x130   : > { %v1568_v42 = vcombine.high %v1566_v20, %v1566_v20  ;;  %v8640_v28 = vrot.slane %v8626_v48, %v27673_v11  ;;  %v8641_v60 = vcombine.high %v8633_v8, %v8633_v8  ;;  %v1576_v19 = vcombine.high %v1050_v46, %v1050_v46  ;;  %v23140_v48 = vld [vmem:[%s27678_s5 + $0x1a] sm:$0xff] }
 0x131   : > { %v2273_v44 = vcombine.low %v2265_v6, %v2272_v63  ;;  %v2289_v32 = vrot.slane %v2275_v23, %v27673_v11  ;;  %v1591_v45 = vcombine.high %v1583_v34, %v1583_v34  ;;  %v9290_v55 = vrot.slane %v9282_v17, %v27673_v11  ;;  %v23141_v63 = vld [vmem:[%s27678_s5 + $0x22] sm:$0xff] }
 0x132   : > { %25162 = vmatmul.mubr.msk.f32.gmra.mrb[32].mxu0 %vm2554_vm4, %v28650_v5  ;;  %v2274_v5 = vcombine.low %v1566_v20, %v1568_v42  ;;  %v9297_v9 = vrot.slane %v9283_v51, %v27673_v11  ;;  %v1590_v10 = vrot.slane %v1576_v19, %v27673_v11  ;;  %v1600_v21 = vrot.slane %v1051_v56, %v27673_v11  ;;  %v1053_v17 = vld [vmem:[%s27678_s5 + $0x121] sm:$0xff] }
 0x133   : > { %25164 = vmatprep.mubr.msk.f32.mxu0 %vm27572_vm3, %v33293_v36  ;;  %v8643_v35 = vcombine.high %v23076_v62, %v23076_v62  ;;  %v8650_v46 = vrot.slane %v23076_v62, %v27673_v11  ;;  %24681 = vmatmul.mubr.msk.f32.gmra.mrb[46].mxu1 %vm2554_vm4, %v2273_v44  ;;  %v9307_v57 = vrot.slane %v9299_v14, %v27673_v11 }
 0x134   : > { %v2282_v40 = vrot.slane %v2274_v5, %v27673_v11  ;;  %v9316_v26 = vcombine.low %v23094_v49, %v8633_v8  ;;  %24683 = vmatprep.mubr.msk.f32.mxu1 %vm27572_vm3, %v33293_v36  ;;  %v1592_v61 = vcombine.high %v1590_v10, %v1590_v10  ;;  %v9317_v33 = vcombine.low %v8641_v60, %v8640_v28 }
 0x135   : > { %v2291_v39 = vcombine.low %v1591_v45, %v1590_v10  ;;  %v29156_v27 = vcombine.low %v9290_v55, %v9297_v9  ;;  %v8642_v52 = vcombine.high %v8640_v28, %v8640_v28  ;;  %v1593_v34 = vcombine.high %v1051_v56, %v1051_v56  ;;  %v22753_v56 = vld.sshfl [vmem:[%s27678_s5 + $0x119] sm:$0x3 pattern:$0x76325410]  ;;  %v1054_v10 = vld [vmem:[%s27678_s5 + $0x129] sm:$0xff] }
 0x136   : > { %25165 = vmatmul.mubr.msk.f32.gmra.mrb[34].mxu0 %vm2554_vm4, %v28660_v47  ;;  %v9314_v47 = vrot.slane %v9300_v30, %v27673_v11  ;;  %v2290_v3 = vcombine.low %v2282_v40, %v2289_v32  ;;  %v2292_v58 = vcombine.low %v1592_v61, %v1600_v21  ;;  %v8657_v8 = vrot.slane %v8643_v35, %v27673_v11  ;;  %v23095_v40 = vld.sshfl [vmem:[%s27678_s5 + $0x1c1] sm:$0x3 pattern:$0x76325410] }
 0x137   : > { %25167 = vmatprep.mubr.msk.f32.mxu0 %vm27572_vm3, %v33293_v36  ;;  %v8658_v25 = vcombine.high %v8650_v46, %v8650_v46  ;;  %v2299_v20 = vrot.slane %v2291_v39, %v27673_v11  ;;  %v9324_v51 = vrot.slane %v9316_v26, %v27673_v11  ;;  %v9331_v6 = vrot.slane %v9317_v33, %v27673_v11 }
 0x138   : > { %24684 = vmatmul.mubr.msk.f32.gmra.mrb[48].mxu1 %vm2554_vm4, %v2290_v3  ;;  %v2306_v23 = vrot.slane %v2292_v58, %v27673_v11  ;;  %v29173_v14 = vcombine.low %v9307_v57, %v9314_v47  ;;  %v9862_v42 = vcombine.high %v23140_v48, %v23140_v48  ;;  %v1608_v30 = vcombine.high %v1600_v21, %v1600_v21  ;;  %v23143_v58 = vld [vmem:[%s27678_s5 + $0x32] sm:$0xff] }
 0x139   : > { %24686 = vmatprep.mubr.msk.f32.mxu1 %vm27572_vm3, %v33293_v36  ;;  %v9879_v28 = vcombine.high %v23141_v63, %v23141_v63  ;;  %v1617_v19 = vcombine.high %v1053_v17, %v1053_v17  ;;  %v9333_v49 = vcombine.low %v8642_v52, %v8650_v46  ;;  %v9334_v44 = vcombine.low %v8658_v25, %v8657_v8 }
 0x13a   : > { %25168 = vmatmul.mubr.msk.f32.gmra.mrb[36].mxu0 %vm2554_vm4, %v28669_v59  ;;  %v1607_v59 = vrot.slane %v1593_v34, %v27673_v11  ;;  %v2307_v60 = vcombine.low %v2299_v20, %v2306_v23  ;;  %v1624_v32 = vrot.slane %v1053_v17, %v27673_v11  ;;  %v9869_v45 = vrot.slane %v23140_v48, %v27673_v11 }
 0x13b   : > { %25170 = vmatprep.mubr.msk.f32.mxu0 %vm27572_vm3, %v33293_v36  ;;  %v1631_v9 = vrot.slane %v1617_v19, %v27673_v11  ;;  %v8659_v21 = vcombine.high %v8657_v8, %v8657_v8  ;;  %v9886_v35 = vrot.slane %v23141_v63, %v27673_v11  ;;  %v9893_v57 = vrot.slane %v9879_v28, %v27673_v11 }
 0x13c   : > { %v1609_v62 = vcombine.high %v1607_v59, %v1607_v59  ;;  %v2308_v5 = vcombine.low %v1608_v30, %v1607_v59  ;;  %24687 = vmatmul.mubr.msk.f32.gmra.mrb[50].mxu1 %vm2554_vm4, %v2307_v60  ;;  %v1632_v61 = vcombine.high %v1624_v32, %v1624_v32  ;;  %v29196_v33 = vcombine.low %v9324_v51, %v9331_v6 }
 0x13d   : > { %24689 = vmatprep.mubr.msk.f32.mxu1 %vm27572_vm3, %v33293_v36  ;;  %v1633_v47 = vcombine.high %v1631_v9, %v1631_v9  ;;  %v9341_v3 = vrot.slane %v9333_v49, %v27673_v11  ;;  %v9348_v39 = vrot.slane %v9334_v44, %v27673_v11  ;;  %v1634_v52 = vcombine.high %v1054_v10, %v1054_v10 }
 0x13e   : > { %25171 = vmatmul.mubr.msk.f32.gmra.mrb[38].mxu0 %vm2554_vm4, %v28719_v18  ;;  %v2309_v55 = vcombine.low %v1609_v62, %v22753_v56  ;;  %v9876_v18 = vrot.slane %v9862_v42, %v27673_v11  ;;  %v2316_v46 = vrot.slane %v2308_v5, %v27673_v11  ;;  %v9877_v48 = vcombine.high %v9869_v45, %v9869_v45  ;;  %v1056_v42 = vld [vmem:[%s27678_s5 + $0x139] sm:$0xff]  ;;  %v22754_v5 = vld.sshfl [vmem:[%s27678_s5 + $0x131] sm:$0x3 pattern:$0x76325410] }
 0x13f   : > { %25173 = vmatprep.mubr.msk.f32.mxu0 %vm27572_vm3, %v33293_v36  ;;  %v2325_v8 = vcombine.low %v1624_v32, %v1632_v61  ;;  %v2326_v25 = vcombine.low %v1631_v9, %v1633_v47  ;;  %v29203_v63 = vcombine.low %v8659_v21, %v23095_v40  ;;  %v1648_v17 = vrot.slane %v1634_v52, %v27673_v11  ;;  %v23144_v21 = vld [vmem:[%s27678_s5 + $0x3a] sm:$0xff] }
 0x140   : > { %v2323_v26 = vrot.slane %v2309_v55, %v27673_v11  ;;  %v9878_v20 = vcombine.high %v9876_v18, %v9876_v18  ;;  %v9894_v51 = vcombine.high %v9886_v35, %v9886_v35  ;;  %v9895_v23 = vcombine.high %v9893_v57, %v9893_v57 }
 0x141   : > { %v2333_v59 = vrot.slane %v2325_v8, %v27673_v11  ;;  %v2340_v6 = vrot.slane %v2326_v25, %v27673_v11  ;;  %v29213_v56 = vcombine.low %v9341_v3, %v9348_v39  ;;  %v9903_v30 = vcombine.high %v23143_v58, %v23143_v58  ;;  %v1057_v39 = vld [vmem:[%s27678_s5 + $0x141] sm:$0xff] }
 0x142   : > { %25174 = vmatmul.mubr.msk.f32.gmra.mrb[40].mxu0 %vm2554_vm4, %v28774_v13  ;;  %v2324_v34 = vcombine.low %v2316_v46, %v2323_v26  ;;  %v1641_v13 = vrot.slane %v1054_v10, %v27673_v11  ;;  %v29219_v60 = vcombine.low %v9869_v45, %v9877_v48  ;;  %v9910_v62 = vrot.slane %v23143_v58, %v27673_v11 }
 0x143   : > { %25176 = vmatprep.mubr.msk.f32.mxu0 %vm27572_vm3, %v33293_v36  ;;  %v2341_v19 = vcombine.low %v2333_v59, %v2340_v6  ;;  %v1650_v49 = vcombine.high %v1648_v17, %v1648_v17  ;;  %v29222_v44 = vcombine.low %v9876_v18, %v9878_v20  ;;  %v1658_v32 = vcombine.high %v1056_v42, %v1056_v42  ;;  %v23146_v6 = vld [vmem:[%s27678_s5 + $0x4a] sm:$0xff] }
 0x144   : > { %24690 = vmatmul.mubr.msk.f32.gmra.mrb[52].mxu1 %vm2554_vm4, %v2324_v34  ;;  %v1649_v28 = vcombine.high %v1641_v13, %v1641_v13  ;;  %v1665_v55 = vrot.slane %v1056_v42, %v27673_v11  ;;  %v9357_v9 = vrot.slane %v29203_v63, %v27673_v11  ;;  %v29228_v10 = vcombine.low %v9886_v35, %v9894_v51 }
 0x145   : > { %24692 = vmatprep.mubr.msk.f32.mxu1 %vm27572_vm3, %v33293_v36  ;;  %v29230_v45 = vcombine.low %v9893_v57, %v9895_v23  ;;  %v2343_v46 = vcombine.low %v1648_v17, %v1650_v49  ;;  %v9917_v18 = vrot.slane %v9903_v30, %v27673_v11  ;;  %v1672_v35 = vrot.slane %v1658_v32, %v27673_v11  ;;  %v23194_v57 = vld.sshfl [vmem:[%s27678_s5 + $0x2a] sm:$0x3 pattern:$0x76325410]  ;;  %v29276_v49 = vld [vmem:[%s33113_s1 + $0x60] sm:$0xff] }
 0x146   : > { %25177 = vmatmul.mubr.msk.f32.gmra.mrb[42].mxu0 %vm2554_vm4, %v28776_v12  ;;  %v2342_v12 = vcombine.low %v1641_v13, %v1649_v28  ;;  %v9918_v26 = vcombine.high %v9910_v62, %v9910_v62  ;;  %v1673_v47 = vcombine.high %v1665_v55, %v1665_v55  ;;  %v2359_v3 = vcombine.low %v22754_v5, %v1665_v55  ;;  %v29267_v30 = vld [vmem:[%s33113_s1 + $0x68] sm:$0xf] }
 0x147   : > { %25179 = vmatprep.mubr.msk.f32.mxu0 %vm27572_vm3, %v33293_v36  ;;  %v2357_v61 = vrot.slane %v2343_v46, %v27673_v11  ;;  %v10618_v52 = vrot.slane %v29222_v44, %v27673_v11  ;;  %v9920_v48 = vcombine.high %v23144_v21, %v23144_v21  ;;  %v9927_v58 = vrot.slane %v23144_v21, %v27673_v11  ;;  %v22755_v55 = vld.sshfl [vmem:[%s27678_s5 + $0x149] sm:$0x3 pattern:$0x76325410] }
 0x148   : > { %24693 = vmatmul.mubr.msk.f32.gmra.mrb[54].mxu1 %vm2554_vm4, %v2341_v19  ;;  %v2350_v40 = vrot.slane %v2342_v12, %v27673_v11  ;;  %v2360_v8 = vcombine.low %v1673_v47, %v1672_v35  ;;  %v2367_v25 = vrot.slane %v2359_v3, %v27673_v11  ;;  %v1674_v20 = vcombine.high %v1672_v35, %v1672_v35 }
 0x149   : > { %24695 = vmatprep.mubr.msk.f32.mxu1 %vm27572_vm3, %v33293_v36  ;;  %v10628_v13 = vrot.slane %v29228_v10, %v27673_v11  ;;  %v10635_v17 = vrot.slane %v29230_v45, %v27673_v11  ;;  %v10637_v51 = vcombine.low %v23194_v57, %v9910_v62  ;;  %v1675_v23 = vcombine.high %v1057_v39, %v1057_v39  ;;  %v1059_v10 = vld [vmem:[%s27678_s5 + $0x151] sm:$0xff]  ;;  %v23195_v57 = vld.sshfl [vmem:[%s27678_s5 + $0x42] sm:$0x3 pattern:$0x76325410] }
 0x14a   : > { %25180 = vmatmul.mubr.msk.f32.gmra.mrb[44].mxu0 %vm2554_vm4, %v28784_v50  ;;  %v10611_v50 = vrot.slane %v29219_v60, %v27673_v11  ;;  %v2358_v34 = vcombine.low %v2350_v40, %v2357_v61  ;;  %v10638_v59 = vcombine.low %v9918_v26, %v9917_v18  ;;  %v2374_v42 = vrot.slane %v2360_v8, %v27673_v11 }
 0x14b   : > { %25182 = vmatprep.mubr.msk.f32.mxu0 %vm27572_vm3, %v33293_v36  ;;  %v9919_v28 = vcombine.high %v9917_v18, %v9917_v18  ;;  %v9934_v60 = vrot.slane %v9920_v48, %v27673_v11  ;;  %v9944_v62 = vcombine.high %v23146_v6, %v23146_v6  ;;  %v1689_v19 = vrot.slane %v1675_v23, %v27673_v11  ;;  %v29285_v18 = vld [vmem:[%s27678_s5 + $0x52] sm:$0xff] }
 0x14c   : > { %24696 = vmatmul.mubr.msk.f32.gmra.mrb[56].mxu1 %vm2554_vm4, %v2358_v34  ;;  %v9935_v44 = vcombine.high %v9927_v58, %v9927_v58  ;;  %v2375_v12 = vcombine.low %v2367_v25, %v2374_v42  ;;  %v10645_v45 = vrot.slane %v10637_v51, %v27673_v11  ;;  %v9951_v46 = vrot.slane %v23146_v6, %v27673_v11 }
 0x14d   : > { %24698 = vmatprep.mubr.msk.f32.mxu1 %vm27572_vm3, %v33293_v36  ;;  %v9936_v21 = vcombine.high %v9934_v60, %v9934_v60  ;;  %v1691_v40 = vcombine.high %v1689_v19, %v1689_v19  ;;  %v10652_v35 = vrot.slane %v10638_v59, %v27673_v11  ;;  %v26243_v61 = vpack.c.bf16 %v29267_v30, %v29276_v49  ;;  %v23168_v49 = vld [vmem:[%s27678_s5 + $0xfa] sm:$0xff] }
 0x14e   : > { %25183 = vmatmul.mubr.msk.f32.gmra.mrb[46].mxu0 %vm2554_vm4, %v28786_v7  ;;  %v1682_v7 = vrot.slane %v1057_v39, %v27673_v11  ;;  %v9958_v47 = vrot.slane %v9944_v62, %v27673_v11  ;;  %v1706_v3 = vrot.slane %v1059_v10, %v27673_v11  ;;  %v29299_v48 = vcombine.low %v9919_v28, %v9927_v58  ;;  %v23149_v62 = vld [vmem:[%s27678_s5 + $0x62] sm:$0xff] }
 0x14f   : > { %25185 = vmatprep.mubr.msk.f32.mxu0 %vm27572_vm3, %v33293_v36  ;;  %v2393_v39 = vcombine.low %v1691_v40, %v22755_v55  ;;  %v29301_v34 = vcombine.low %v9935_v44, %v9934_v60  ;;  %v9968_v8 = vrot.slane %v29285_v18, %v27673_v11  ;;  %v29309_v51 = vcombine.low %v10611_v50, %v10618_v52  ;;  %v22756_v40 = vld.sshfl [vmem:[%s27678_s5 + $0x161] sm:$0x3 pattern:$0x76325410] }
 0x150   : > { %v1690_v5 = vcombine.high %v1682_v7, %v1682_v7  ;;  %v2376_v32 = vcombine.low %v1674_v20, %v1682_v7  ;;  %24699 = vmatmul.mubr.msk.f32.gmra.mrb[58].mxu1 %vm2554_vm4, %v2375_v12  ;;  %v1060_v20 = vld [vmem:[%s27678_s5 + $0x159] sm:$0xff]  ;;  %v9959_v23 = vcombine.high %v9951_v46, %v9951_v46  ;;  %v29311_v59 = vcombine.low %v9936_v21, %v23195_v57  ;;  %v1062_v12 = vld [vmem:[%s27678_s5 + $0x169] sm:$0xff] }
 0x151   : > { %24701 = vmatprep.mubr.msk.f32.mxu1 %vm27572_vm3, %v33293_v36  ;;  %v1714_v6 = vcombine.high %v1706_v3, %v1706_v3  ;;  %v29315_v58 = vcombine.low %v10628_v13, %v10635_v17  ;;  %v29317_v42 = vcombine.low %v10645_v45, %v10652_v35  ;;  %v1699_v28 = vcombine.high %v1059_v10, %v1059_v10 }
 0x152   : > { %25186 = vmatmul.mubr.msk.f32.gmra.mrb[48].mxu0 %vm2554_vm4, %v28793_v1  ;;  %v2377_v26 = vcombine.low %v1690_v5, %v1689_v19  ;;  %v2384_v1 = vrot.slane %v2376_v32, %v27673_v11  ;;  %v9960_v60 = vcombine.high %v9958_v47, %v9958_v47  ;;  %v1723_v50 = vrot.slane %v1060_v20, %v27673_v11 }
 0x153   : > { %25188 = vmatprep.mubr.msk.f32.mxu0 %vm27572_vm3, %v33293_v36  ;;  %v2394_v19 = vcombine.low %v1706_v3, %v1714_v6  ;;  %v10662_v52 = vrot.slane %v29299_v48, %v27673_v11  ;;  %v10669_v44 = vrot.slane %v29301_v34, %v27673_v11  ;;  %v9976_v13 = vcombine.high %v9968_v8, %v9968_v8 }
 0x154   : > { %v2391_v25 = vrot.slane %v2377_v26, %v27673_v11  ;;  %v1713_v17 = vrot.slane %v1699_v28, %v27673_v11  ;;  %v29331_v5 = vcombine.low %v9951_v46, %v9959_v23  ;;  %v10679_v32 = vrot.slane %v29311_v59, %v27673_v11 }
 0x155   : > { %v2408_v55 = vrot.slane %v2394_v19, %v27673_v11  ;;  %v9961_v10 = vcombine.high %v29285_v18, %v29285_v18  ;;  %v29343_v45 = vrot.slane %v23149_v62, %v27673_v11  ;;  %v1731_v46 = vcombine.high %v1723_v50, %v1723_v50 }
 0x156   : > { %25189 = vmatmul.mubr.msk.f32.gmra.mrb[50].mxu0 %vm2554_vm4, %v28879_v16  ;;  %v2392_v7 = vcombine.low %v2384_v1, %v2391_v25  ;;  %v2401_v16 = vrot.slane %v2393_v39, %v27673_v11  ;;  %v1715_v21 = vcombine.high %v1713_v17, %v1713_v17  ;;  %v29347_v35 = vcombine.low %v9958_v47, %v9960_v60  ;;  %v23196_v39 = vld.sshfl [vmem:[%s27678_s5 + $0x5a] sm:$0x3 pattern:$0x76325410] }
 0x157   : > { %25191 = vmatprep.mubr.msk.f32.mxu0 %vm27572_vm3, %v33293_v36  ;;  %v1716_v26 = vcombine.high %v1060_v20, %v1060_v20  ;;  %v1747_v1 = vrot.slane %v1062_v12, %v27673_v11  ;;  %v29350_v3 = vcombine.low %v9968_v8, %v9976_v13  ;;  %v9985_v25 = vcombine.high %v23149_v62, %v23149_v62 }
 0x158   : > { %24702 = vmatmul.mubr.msk.f32.gmra.mrb[60].mxu1 %vm2554_vm4, %v2392_v7  ;;  %v2409_v57 = vcombine.low %v2401_v16, %v2408_v55  ;;  %v2410_v23 = vcombine.low %v1713_v17, %v1715_v21  ;;  %v2411_v18 = vcombine.low %v1723_v50, %v1731_v46  ;;  %v10686_v8 = vrot.slane %v29331_v5, %v27673_v11  ;;  %v1063_v16 = vld [vmem:[%s27678_s5 + $0x171] sm:$0xff] }
 0x159   : > { %24704 = vmatprep.mubr.msk.f32.mxu1 %vm27572_vm3, %v33293_v36  ;;  %v1730_v47 = vrot.slane %v1716_v26, %v27673_v11  ;;  %v2428_v7 = vcombine.low %v22756_v40, %v1747_v1  ;;  %v9975_v60 = vrot.slane %v9961_v10, %v27673_v11  ;;  %v10706_v62 = vcombine.low %v23196_v39, %v29343_v45 }
 0x15a   : > { %25192 = vmatmul.mubr.msk.f32.gmra.mrb[52].mxu0 %vm2554_vm4, %v28887_v43  ;;  %v23150_v43 = vld [vmem:[%s27678_s5 + $0x6a] sm:$0xff]  ;;  %v2418_v20 = vrot.slane %v2410_v23, %v27673_v11  ;;  %v2425_v28 = vrot.slane %v2411_v18, %v27673_v11  ;;  %v9999_v50 = vrot.slane %v9985_v25, %v27673_v11  ;;  %v1740_v17 = vcombine.high %v1062_v12, %v1062_v12  ;;  %v23197_v23 = vld.sshfl [vmem:[%s27678_s5 + $0x72] sm:$0x3 pattern:$0x76325410] }
 0x15b   : > { %25194 = vmatprep.mubr.msk.f32.mxu0 %vm27572_vm3, %v33293_v36  ;;  %v10002_v6 = vcombine.high %v23150_v43, %v23150_v43  ;;  %v1732_v19 = vcombine.high %v1730_v47, %v1730_v47  ;;  %v1755_v5 = vcombine.high %v1747_v1, %v1747_v1  ;;  %v10703_v55 = vrot.slane %v29350_v3, %v27673_v11 }
 0x15c   : > { %24705 = vmatmul.mubr.msk.f32.gmra.mrb[62].mxu1 %vm2554_vm4, %v2409_v57  ;;  %v2426_v13 = vcombine.low %v2418_v20, %v2425_v28  ;;  %v2442_v10 = vrot.slane %v2428_v7, %v27673_v11  ;;  %v10009_v40 = vrot.slane %v23150_v43, %v27673_v11  ;;  %v1754_v12 = vrot.slane %v1740_v17, %v27673_v11  ;;  %v23152_v7 = vld [vmem:[%s27678_s5 + $0x7a] sm:$0xff] }
 0x15d   : > { %24707 = vmatprep.mubr.msk.f32.mxu1 %vm27572_vm3, %v33293_v36  ;;  %v10016_v21 = vrot.slane %v10002_v6, %v27673_v11  ;;  %v2427_v46 = vcombine.low %v1730_v47, %v1732_v19  ;;  %v10000_v57 = vcombine.high %v29343_v45, %v29343_v45  ;;  %v1757_v1 = vcombine.high %v1063_v16, %v1063_v16 }
 0x15e   : > { %25195 = vmatmul.mubr.msk.f32.gmra.mrb[54].mxu0 %vm2554_vm4, %v28896_v54  ;;  %v10696_v54 = vrot.slane %v29347_v35, %v27673_v11  ;;  %v9977_v35 = vcombine.high %v9975_v60, %v9975_v60  ;;  %v10001_v3 = vcombine.high %v9999_v50, %v9999_v50  ;;  %v10017_v43 = vcombine.high %v10009_v40, %v10009_v40 }
 0x15f   : > { %25197 = vmatprep.mubr.msk.f32.mxu0 %vm27572_vm3, %v33293_v36  ;;  %v2435_v26 = vrot.slane %v2427_v46, %v27673_v11  ;;  %v1756_v39 = vcombine.high %v1754_v12, %v1754_v12  ;;  %v2444_v25 = vcombine.low %v1755_v5, %v1754_v12  ;;  %v29396_v45 = vcombine.low %v10662_v52, %v10669_v44  ;;  %v22757_v44 = vld.sshfl [vmem:[%s27678_s5 + $0x179] sm:$0x3 pattern:$0x76325410] }
 0x160   : > { %24708 = vmatmul.mubr.msk.f32.gmra.mrb[64].mxu1 %vm2554_vm4, %v2426_v13  ;;  %v10018_v18 = vcombine.high %v10016_v21, %v10016_v21  ;;  %v1771_v47 = vrot.slane %v1757_v1, %v27673_v11  ;;  %v10720_v34 = vrot.slane %v10706_v62, %v27673_v11  ;;  %v10705_v20 = vcombine.low %v9975_v60, %v9977_v35  ;;  %v1065_v13 = vld [vmem:[%s27678_s5 + $0x181] sm:$0xff] }
 0x161   : > { %24710 = vmatprep.mubr.msk.f32.mxu1 %vm27572_vm3, %v33293_v36  ;;  %v2443_v6 = vcombine.low %v2435_v26, %v2442_v10  ;;  %v2452_v52 = vrot.slane %v2444_v25, %v27673_v11  ;;  %v10722_v28 = vcombine.low %v10000_v57, %v9999_v50  ;;  %v29413_v17 = vcombine.low %v10696_v54, %v10703_v55  ;;  %v23153_v50 = vld [vmem:[%s27678_s5 + $0x82] sm:$0xff] }
 0x162   : > { %25198 = vmatmul.mubr.msk.f32.gmra.mrb[56].mxu0 %vm2554_vm4, %v28902_v2  ;;  %v1764_v2 = vrot.slane %v1063_v16, %v27673_v11  ;;  %v1773_v16 = vcombine.high %v1771_v47, %v1771_v47  ;;  %v10723_v59 = vcombine.low %v10001_v3, %v10009_v40  ;;  %v10740_v62 = vcombine.low %v10018_v18, %v23197_v23  ;;  %v1066_v3 = vld [vmem:[%s27678_s5 + $0x189] sm:$0xff] }
 0x163   : > { %25200 = vmatprep.mubr.msk.f32.mxu0 %vm27572_vm3, %v33293_v36  ;;  %v10026_v60 = vcombine.high %v23152_v7, %v23152_v7  ;;  %v10033_v54 = vrot.slane %v23152_v7, %v27673_v11  ;;  %v1788_v10 = vrot.slane %v1065_v13, %v27673_v11  ;;  %v10713_v40 = vrot.slane %v10705_v20, %v27673_v11 }
 0x164   : > { %v2445_v48 = vcombine.low %v1756_v39, %v1764_v2  ;;  %24711 = vmatmul.mubr.msk.f32.gmra.mrb[66].mxu1 %vm2554_vm4, %v2443_v6  ;;  %v1772_v19 = vcombine.high %v1764_v2, %v1764_v2  ;;  %v2462_v46 = vcombine.low %v1773_v16, %v22757_v44  ;;  %v10730_v12 = vrot.slane %v10722_v28, %v27673_v11 }
 0x165   : > { %24713 = vmatprep.mubr.msk.f32.mxu1 %vm27572_vm3, %v33293_v36  ;;  %v10737_v35 = vrot.slane %v10723_v59, %v27673_v11  ;;  %v10043_v57 = vcombine.high %v23153_v50, %v23153_v50  ;;  %v1796_v1 = vcombine.high %v1788_v10, %v1788_v10  ;;  %v10040_v39 = vrot.slane %v10026_v60, %v27673_v11 }
 0x166   : > { %25201 = vmatmul.mubr.msk.f32.gmra.mrb[58].mxu0 %vm2554_vm4, %v28939_v22  ;;  %v29405_v22 = vcombine.low %v10679_v32, %v10686_v8  ;;  %v10739_v32 = vcombine.low %v10017_v43, %v10016_v21  ;;  %v2459_v8 = vrot.slane %v2445_v48, %v27673_v11  ;;  %v2461_v5 = vcombine.low %v1772_v19, %v1771_v47  ;;  %v23155_v48 = vld [vmem:[%s27678_s5 + $0x92] sm:$0xff] }
 0x167   : > { %25203 = vmatprep.mubr.msk.f32.mxu0 %vm27572_vm3, %v33293_v36  ;;  %v1781_v21 = vcombine.high %v1065_v13, %v1065_v13  ;;  %v2476_v2 = vrot.slane %v2462_v46, %v27673_v11  ;;  %v10754_v23 = vrot.slane %v10740_v62, %v27673_v11  ;;  %v10041_v18 = vcombine.high %v10033_v54, %v10033_v54  ;;  %v1068_v13 = vld [vmem:[%s27678_s5 + $0x199] sm:$0xff] }
 0x168   : > { %v2460_v55 = vcombine.low %v2452_v52, %v2459_v8  ;;  %v10747_v43 = vrot.slane %v10739_v32, %v27673_v11  ;;  %v2478_v47 = vcombine.low %v1788_v10, %v1796_v1  ;;  %v29442_v7 = vcombine.low %v10713_v40, %v10720_v34 }
 0x169   : > { %v1795_v26 = vrot.slane %v1781_v21, %v27673_v11  ;;  %v1798_v52 = vcombine.high %v1066_v3, %v1066_v3  ;;  %v1805_v44 = vrot.slane %v1066_v3, %v27673_v11  ;;  %v29447_v20 = vcombine.low %v10730_v12, %v10737_v35 }
 0x16a   : > { %25204 = vmatmul.mubr.msk.f32.gmra.mrb[60].mxu0 %vm2554_vm4, %v28952_v37  ;;  %v2469_v37 = vrot.slane %v2461_v5, %v27673_v11  ;;  %24714 = vmatmul.mubr.msk.f32.gmra.mrb[68].mxu1 %vm2554_vm4, %v2460_v55  ;;  %v10057_v28 = vrot.slane %v10043_v57, %v27673_v11  ;;  %v2486_v16 = vrot.slane %v2478_v47, %v27673_v11 }
 0x16b   : > { %25206 = vmatprep.mubr.msk.f32.mxu0 %vm27572_vm3, %v33293_v36  ;;  %24716 = vmatprep.mubr.msk.f32.mxu1 %vm27572_vm3, %v33293_v36  ;;  %v1797_v6 = vcombine.high %v1795_v26, %v1795_v26  ;;  %v10042_v34 = vcombine.high %v10040_v39, %v10040_v39  ;;  %v1812_v59 = vrot.slane %v1798_v52, %v27673_v11 }
 0x16c   : > { %v2477_v25 = vcombine.low %v2469_v37, %v2476_v2  ;;  %v1813_v32 = vcombine.high %v1805_v44, %v1805_v44  ;;  %v29460_v8 = vcombine.low %v10747_v43, %v10754_v23  ;;  %v29462_v62 = vcombine.low %v10033_v54, %v10041_v18  ;;  %v22758_v37 = vld.sshfl [vmem:[%s27678_s5 + $0x191] sm:$0x3 pattern:$0x76325410] }
 0x16d   : > { %v2479_v19 = vcombine.low %v1795_v26, %v1797_v6  ;;  %v10067_v60 = vcombine.high %v23155_v48, %v23155_v48  ;;  %v1814_v46 = vcombine.high %v1812_v59, %v1812_v59  ;;  %v1822_v21 = vcombine.high %v1068_v13, %v1068_v13  ;;  %v29481_v43 = vld [vmem:[%s27678_s5 + $0xaa] sm:$0xff]  ;;  %v1069_v6 = vld [vmem:[%s27678_s5 + $0x1a1] sm:$0xff] }
 0x16e   : > { %25207 = vmatmul.mubr.msk.f32.gmra.mrb[62].mxu0 %vm2554_vm4, %v28954_v15  ;;  %v10050_v15 = vrot.slane %v23153_v50, %v27673_v11  ;;  %24717 = vmatmul.mubr.msk.f32.gmra.mrb[70].mxu1 %vm2554_vm4, %v2477_v25  ;;  %v2495_v55 = vcombine.low %v1805_v44, %v1813_v32  ;;  %v10059_v10 = vcombine.high %v10057_v28, %v10057_v28 }
 0x16f   : > { %25209 = vmatprep.mubr.msk.f32.mxu0 %vm27572_vm3, %v33293_v36  ;;  %24719 = vmatprep.mubr.msk.f32.mxu1 %vm27572_vm3, %v33293_v36  ;;  %v2493_v50 = vrot.slane %v2479_v19, %v27673_v11  ;;  %v29467_v40 = vrot.slane %v23155_v48, %v27673_v11  ;;  %v1829_v2 = vrot.slane %v1068_v13, %v27673_v11 }
 0x170   : > { %v10058_v5 = vcombine.high %v10050_v15, %v10050_v15  ;;  %v29473_v54 = vcombine.low %v10040_v39, %v10042_v34  ;;  %v2496_v35 = vcombine.low %v1812_v59, %v1814_v46  ;;  %v2503_v57 = vrot.slane %v2495_v55, %v27673_v11  ;;  %v23199_v46 = vld.sshfl [vmem:[%s27678_s5 + $0xa2] sm:$0x3 pattern:$0x76325410] }
 0x171   : > { %v2494_v12 = vcombine.low %v2486_v16, %v2493_v50  ;;  %v1836_v26 = vrot.slane %v1822_v21, %v27673_v11  ;;  %v10081_v1 = vrot.slane %v10067_v60, %v27673_v11  ;;  %v1837_v25 = vcombine.high %v1829_v2, %v1829_v2 }
 0x172   : > { %25210 = vmatmul.mubr.msk.f32.gmra.mrb[64].mxu0 %vm2554_vm4, %v29037_v31  ;;  %v23156_v31 = vld [vmem:[%s27678_s5 + $0x9a] sm:$0xff]  ;;  %v2510_v23 = vrot.slane %v2496_v35, %v27673_v11  ;;  %v2512_v18 = vcombine.low %v22758_v37, %v1829_v2  ;;  %v10774_v47 = vcombine.low %v10057_v28, %v10059_v10  ;;  %v10082_v48 = vcombine.high %v29467_v40, %v29467_v40  ;;  %v23198_v28 = vld.sshfl [vmem:[%s27678_s5 + $0x8a] sm:$0x3 pattern:$0x76325410] }
 0x173   : > { %25212 = vmatprep.mubr.msk.f32.mxu0 %vm27572_vm3, %v33293_v36  ;;  %v10084_v3 = vcombine.high %v23156_v31, %v23156_v31  ;;  %24720 = vmatmul.mubr.msk.f32.gmra.mrb[72].mxu1 %vm2554_vm4, %v2494_v12  ;;  %v10091_v39 = vrot.slane %v23156_v31, %v27673_v11  ;;  %v10083_v52 = vcombine.high %v10081_v1, %v10081_v1  ;;  %v1016_v37 = vld [vmem:[%s33113_s1 + $0x8] sm:$0xf] }
 0x174   : > { %24722 = vmatprep.mubr.msk.f32.mxu1 %vm27572_vm3, %v33293_v36  ;;  %v2513_v44 = vcombine.low %v1837_v25, %v1836_v26  ;;  %v2511_v19 = vcombine.low %v2503_v57, %v2510_v23  ;;  %v2520_v16 = vrot.slane %v2512_v18, %v27673_v11  ;;  %v1838_v13 = vcombine.high %v1836_v26, %v1836_v26  ;;  %v22759_v26 = vld.sshfl [vmem:[%s27678_s5 + $0x1a9] sm:$0x3 pattern:$0x76325410] }
 0x175   : > { %v10098_v34 = vrot.slane %v10084_v3, %v27673_v11  ;;  %v1839_v32 = vcombine.high %v1069_v6, %v1069_v6  ;;  %v1846_v60 = vrot.slane %v1069_v6, %v27673_v11  ;;  %v10771_v50 = vrot.slane %v29473_v54, %v27673_v11 }
 0x176   : > { %25213 = vmatmul.mubr.msk.f32.gmra.mrb[66].mxu0 %vm2554_vm4, %v29061_v24  ;;  %v10773_v24 = vcombine.low %v10050_v15, %v10058_v5  ;;  %v10115_v15 = vrot.slane %v29481_v43, %v27673_v11  ;;  %v2527_v59 = vrot.slane %v2513_v44, %v27673_v11  ;;  %v10099_v31 = vcombine.high %v10091_v39, %v10091_v39  ;;  %v169_v44 = vld [vmem:[%s27678_s5] sm:$0xff] }
 0x177   : > { %25215 = vmatprep.mubr.msk.f32.mxu0 %vm27572_vm3, %v33293_v36  ;;  %24723 = vmatmul.mubr.msk.f32.gmra.mrb[74].mxu1 %vm2554_vm4, %v2511_v19  ;;  %v10100_v55 = vcombine.high %v10098_v34, %v10098_v34  ;;  %v1853_v10 = vrot.slane %v1839_v32, %v27673_v11  ;;  %v1854_v12 = vcombine.high %v1846_v60, %v1846_v60 }
 0x178   : > { %v10781_v5 = vrot.slane %v10773_v24, %v27673_v11  ;;  %24725 = vmatprep.mubr.msk.f32.mxu1 %vm27572_vm3, %v33293_v36  ;;  %v2528_v21 = vcombine.low %v2520_v16, %v2527_v59  ;;  %v10788_v2 = vrot.slane %v10774_v47, %v27673_v11  ;;  %v10790_v54 = vcombine.low %v23198_v28, %v29467_v40  ;;  %v29526_v24 = vld [vmem:[%s27678_s5 + $0xb2] sm:$0xff] }
 0x179   : > { %v10123_v35 = vcombine.high %v10115_v15, %v10115_v15  ;;  %v2529_v57 = vcombine.low %v1838_v13, %v1846_v60  ;;  %v10791_v3 = vcombine.low %v10082_v48, %v10081_v1  ;;  %v10807_v25 = vcombine.low %v10083_v52, %v10091_v39  ;;  %v170_v13 = vld [vmem:[%s27678_s5 + $0x8] sm:$0xff] }
 0x17a   : > { %25216 = vmatmul.mubr.msk.f32.gmra.mrb[68].mxu0 %vm2554_vm4, %v29069_v0  ;;  %v10764_v0 = vrot.slane %v29462_v62, %v27673_v11  ;;  %v1015_v62 = vld [vmem:[%s33113_s1] sm:$0xff]  ;;  %v2530_v23 = vcombine.low %v1854_v12, %v1853_v10  ;;  %v1855_v18 = vcombine.high %v1853_v10, %v1853_v10  ;;  %v10808_v6 = vcombine.low %v10099_v31, %v10098_v34 }
 0x17b   : > { %25218 = vmatprep.mubr.msk.f32.mxu0 %vm27572_vm3, %v33293_v36  ;;  %24726 = vmatmul.mubr.msk.f32.gmra.mrb[76].mxu1 %vm2554_vm4, %v2528_v21  ;;  %v2537_v40 = vrot.slane %v2529_v57, %v27673_v11  ;;  %v26223_v47 = vpack.c.bf16 %v1016_v37, %v1015_v62  ;;  %v10824_v16 = vcombine.low %v10100_v55, %v23199_v46 }
 0x17c   : > { %v29533_v19 = vcombine.low %v10764_v0, %v10771_v50  ;;  %24728 = vmatprep.mubr.msk.f32.mxu1 %vm27572_vm3, %v33293_v36  ;;  %v2544_v1 = vrot.slane %v2530_v23, %v27673_v11  ;;  %v2546_v39 = vcombine.low %v1855_v18, %v22759_v26  ;;  %v10825_v48 = vcombine.low %v10115_v15, %v10123_v35  ;;  %v23161_v0 = vld [vmem:[%s27678_s5 + $0xc2] sm:$0xff]  ;;  %v29580_v23 = vld.sshfl [vmem:[%s27678_s5 + $0xba] sm:$0x3 pattern:$0x76325410] }
 0x17d   : > { %v10132_v52 = vrot.slane %v29526_v24, %v27673_v11  ;;  %26225 = vmatpush3.bf16.msk.msra.mxu1 %vm27653_vm2, %v26223_v47  ;;  %v10798_v28 = vrot.slane %v10790_v54, %v27673_v11  ;;  %v10805_v34 = vrot.slane %v10791_v3, %v27673_v11  ;;  %v277_v32 = vcombine.high %v169_v44, %v169_v44 }
 0x17e   : > { %25219 = vmatmul.mubr.msk.f32.gmra.mrb[70].mxu0 %vm2554_vm4, %v29095_v38  ;;  %v10108_v38 = vcombine.high %v29481_v43, %v29481_v43  ;;  %v29540_v43 = vcombine.low %v10781_v5, %v10788_v2  ;;  %v2545_v59 = vcombine.low %v2537_v40, %v2544_v1  ;;  %v10822_v15 = vrot.slane %v10808_v6, %v27673_v11  ;;  %v172_v6 = vld [vmem:[%s27678_s5 + $0x18] sm:$0xff] }
 0x17f   : > { %25221 = vmatprep.mubr.msk.f32.mxu0 %vm27572_vm3, %v33293_v36  ;;  %v284_v50 = vrot.slane %v169_v44, %v27673_v11  ;;  %26290 = vmatprep.subr.bf16.mxu1 %v33405_v29  ;;  %v10832_v5 = vrot.slane %v10824_v16, %v27673_v11  ;;  %v2553_v31 = vrot.slane %v2546_v39, %v27673_v11  ;;  %v23162_v16 = vld [vmem:[%s27678_s5 + $0xca] sm:$0xff]  ;;  %v23164_v1 = vld [vmem:[%s27678_s5 + $0xda] sm:$0xff] }
 0x180   : > { %v10122_v60 = vrot.slane %v10108_v38, %v27673_v11  ;;  %24729 = vmatmul.mubr.msk.f32.gmra.mrb[78].mxu1 %vm2554_vm4, %v2545_v59  ;;  %v291_v46 = vrot.slane %v277_v32, %v27673_v11  ;;  %v294_v55 = vcombine.high %v170_v13, %v170_v13  ;;  %v10839_v21 = vrot.slane %v10825_v48, %v27673_v11 }
 0x181   : > { %v10140_v10 = vcombine.high %v10132_v52, %v10132_v52  ;;  %24731 = vmatprep.mubr.msk.f32.mxu1 %vm27572_vm3, %v33293_v36  ;;  %v292_v12 = vcombine.high %v284_v50, %v284_v50  ;;  %v10125_v62 = vcombine.high %v29526_v24, %v29526_v24  ;;  %v29571_v37 = vrot.slane %v23161_v0, %v27673_v11 }
 0x182   : > { %25222 = vmatmul.mubr.msk.f32.gmra.mrb[72].mxu0 %vm2554_vm4, %v29122_v41  ;;  %v10815_v41 = vrot.slane %v10807_v25, %v27673_v11  ;;  %v293_v2 = vcombine.high %v291_v46, %v291_v46  ;;  %v10124_v54 = vcombine.high %v10122_v60, %v10122_v60  ;;  %v10149_v35 = vcombine.high %v23161_v0, %v23161_v0 }
 0x183   : > { %25224 = vmatprep.mubr.msk.f32.mxu0 %vm27572_vm3, %v33293_v36  ;;  %v2911_v57 = vcombine.low %v284_v50, %v292_v12  ;;  %v308_v26 = vrot.slane %v294_v55, %v27673_v11  ;;  %v29575_v3 = vcombine.low %v10798_v28, %v10805_v34  ;;  %v29586_v38 = vcombine.low %v10832_v5, %v10839_v21  ;;  %v22724_v34 = vld.sshfl [vmem:[%s27678_s5 + $0x10] sm:$0x3 pattern:$0x76325410] }
 0x184   : > { %v29577_v25 = vcombine.low %v10815_v41, %v10822_v15  ;;  %24732 = vmatmul.mubr.msk.f32.gmra.mrb[80].mxu1 %vm2554_vm4, %v2553_v31  ;;  %v2912_v24 = vcombine.low %v291_v46, %v293_v2  ;;  %v29588_v40 = vcombine.low %v10132_v52, %v10140_v10  ;;  %v10139_v44 = vrot.slane %v10125_v62, %v27673_v11  ;;  %v173_v2 = vld [vmem:[%s27678_s5 + $0x20] sm:$0xff] }
 0x185   : > { %24738 = vmatprep.mubr.msk.f32.mxu1 %vm27572_vm3, %v33293_v36  ;;  %v2919_v47 = vrot.slane %v2911_v57, %v27673_v11  ;;  %v310_v48 = vcombine.high %v308_v26, %v308_v26  ;;  %v10859_v52 = vcombine.low %v29580_v23, %v29571_v37  ;;  %v10163_v28 = vrot.slane %v10149_v35, %v27673_v11 }
 0x186   : > { %25225 = vmatmul.mubr.msk.f32.gmra.mrb[74].mxu0 %vm2554_vm4, %v29126_v53  ;;  %v301_v53 = vrot.slane %v170_v13, %v27673_v11  ;;  %v2926_v39 = vrot.slane %v2912_v24, %v27673_v11  ;;  %v29599_v13 = vcombine.low %v10122_v60, %v10124_v54  ;;  %v318_v59 = vcombine.high %v172_v6, %v172_v6 }
 0x187   : > { %25227 = vmatprep.mubr.msk.f32.mxu0 %vm27572_vm3, %v33293_v36  ;;  %v2929_v41 = vcombine.low %v308_v26, %v310_v48  ;;  %v325_v0 = vrot.slane %v172_v6, %v27673_v11  ;;  %v10856_v60 = vrot.slane %v29588_v40, %v27673_v11  ;;  %v10166_v50 = vcombine.high %v23162_v16, %v23162_v16  ;;  %v33421_v26 = vld [vmem:[#allocation7_spill] sm:$0xff] }
 0x188   : > { %v309_v18 = vcombine.high %v301_v53, %v301_v53  ;;  %v2927_v32 = vcombine.low %v2919_v47, %v2926_v39  ;;  %v10190_v5 = vcombine.high %v23164_v1, %v23164_v1  ;;  %v332_v31 = vrot.slane %v318_v59, %v27673_v11  ;;  %v175_v59 = vld [vmem:[%s27678_s5 + $0x30] sm:$0xff] }
 0x189   : > { %v2943_v46 = vrot.slane %v2929_v41, %v27673_v11  ;;  %v333_v55 = vcombine.high %v325_v0, %v325_v0  ;;  %v2945_v21 = vcombine.low %v22724_v34, %v325_v0  ;;  %v10141_v10 = vcombine.high %v10139_v44, %v10139_v44  ;;  %v23201_v0 = vld.sshfl [vmem:[%s27678_s5 + $0xd2] sm:$0x3 pattern:$0x76325410] }
 0x18a   : > { %25228 = vmatmul.mubr.msk.f32.gmra.mrb[76].mxu0 %vm2554_vm4, %v29156_v27  ;;  %v2928_v27 = vcombine.low %v301_v53, %v309_v18  ;;  %24739 = vmatmul.mubr.msk.f32.vlgmr.msra.gmra.mrb[82].mxu1 %vm2554_vm4, %v2927_v32  ;;  %v10165_v12 = vcombine.high %v10163_v28, %v10163_v28  ;;  %v10173_v62 = vrot.slane %v23162_v16, %v27673_v11 }
 0x18b   : > { %25230 = vmatprep.mubr.msk.f32.mxu0 %vm27572_vm3, %v33293_v36  ;;  %24741 = vmatprep.mubr.msk.f32.mxu1 %vm27572_vm3, %v33293_v36  ;;  %v2946_v54 = vcombine.low %v333_v55, %v332_v31  ;;  %v2953_v35 = vrot.slane %v2945_v21, %v27673_v11  ;;  %v334_v57 = vcombine.high %v332_v31, %v332_v31  ;;  %v23165_v55 = vld [vmem:[%s27678_s5 + $0xe2] sm:$0xff] }
 0x18c   : > { %v2936_v15 = vrot.slane %v2928_v27, %v27673_v11  ;;  %26291 = vmatpush3.bf16.msk.msra.mxu1 %vm27653_vm2, %v33421_v26  ;;  %v10180_v23 = vrot.slane %v10166_v50, %v27673_v11  ;;  %v10197_v24 = vrot.slane %v23164_v1, %v27673_v11  ;;  %v10204_v18 = vrot.slane %v10190_v5, %v27673_v11 }
 0x18d   : > { %v2960_v6 = vrot.slane %v2946_v54, %v27673_v11  ;;  %v335_v40 = vcombine.high %v173_v2, %v173_v2  ;;  %v10858_v47 = vcombine.low %v10139_v44, %v10141_v10  ;;  %v10876_v39 = vcombine.low %v10165_v12, %v10173_v62  ;;  %v176_v10 = vld [vmem:[%s27678_s5 + $0x38] sm:$0xff] }
 0x18e   : > { %25231 = vmatmul.mubr.msk.f32.gmra.mrb[78].mxu0 %vm2554_vm4, %v29173_v14  ;;  %v10164_v14 = vcombine.high %v29571_v37, %v29571_v37  ;;  %v2944_v53 = vcombine.low %v2936_v15, %v2943_v46  ;;  %v10849_v37 = vrot.slane %v29599_v13, %v27673_v11  ;;  %v10181_v48 = vcombine.high %v10173_v62, %v10173_v62  ;;  %v22725_v15 = vld.sshfl [vmem:[%s27678_s5 + $0x28] sm:$0x3 pattern:$0x76325410] }
 0x18f   : > { %25233 = vmatprep.mubr.msk.f32.mxu0 %vm27572_vm3, %v33293_v36  ;;  %v2961_v1 = vcombine.low %v2953_v35, %v2960_v6  ;;  %v349_v27 = vrot.slane %v335_v40, %v27673_v11  ;;  %v10873_v32 = vrot.slane %v10859_v52, %v27673_v11  ;;  %v10182_v44 = vcombine.high %v10180_v23, %v10180_v23 }
 0x190   : > { %24742 = vmatmul.mubr.msk.f32.gmra.mrb[84].mxu1 %vm2554_vm4, %v2944_v53  ;;  %v10875_v16 = vcombine.low %v10164_v14, %v10163_v28  ;;  %v10205_v28 = vcombine.high %v10197_v24, %v10197_v24  ;;  %v10206_v41 = vcombine.high %v10204_v18, %v10204_v18  ;;  %v29651_v46 = vcombine.low %v10849_v37, %v10856_v60 }
 0x191   : > { %24744 = vmatprep.mubr.msk.f32.mxu1 %vm27572_vm3, %v33293_v36  ;;  %v351_v31 = vcombine.high %v349_v27, %v349_v27  ;;  %v366_v21 = vrot.slane %v175_v59, %v27673_v11  ;;  %v10890_v14 = vrot.slane %v10876_v39, %v27673_v11  ;;  %v10892_v12 = vcombine.low %v10181_v48, %v10180_v23  ;;  %v23167_v39 = vld [vmem:[%s27678_s5 + $0xf2] sm:$0xff] }
 0x192   : > { %25234 = vmatmul.mubr.msk.f32.gmra.mrb[80].mxu0 %vm2554_vm4, %v29196_v33  ;;  %v342_v33 = vrot.slane %v173_v2, %v27673_v11  ;;  %v10883_v52 = vrot.slane %v10875_v16, %v27673_v11  ;;  %v10893_v60 = vcombine.low %v10182_v44, %v23201_v0  ;;  %v10909_v53 = vcombine.low %v10197_v24, %v10205_v28 }
 0x193   : > { %25236 = vmatprep.mubr.msk.f32.mxu0 %vm27572_vm3, %v33293_v36  ;;  %v2979_v2 = vcombine.low %v351_v31, %v22725_v15  ;;  %v374_v54 = vcombine.high %v366_v21, %v366_v21  ;;  %v359_v35 = vcombine.high %v175_v59, %v175_v59  ;;  %v10207_v26 = vcombine.high %v23165_v55, %v23165_v55 }
 0x194   : > { %v350_v13 = vcombine.high %v342_v33, %v342_v33  ;;  %v2962_v34 = vcombine.low %v334_v57, %v342_v33  ;;  %24745 = vmatmul.mubr.msk.f32.gmra.mrb[4].mxu1 %vm2554_vm4, %v2961_v1  ;;  %v10910_v57 = vcombine.low %v10204_v18, %v10206_v41  ;;  %v383_v23 = vrot.slane %v176_v10, %v27673_v11  ;;  %v22726_v41 = vld.sshfl [vmem:[%s27678_s5 + $0x40] sm:$0x3 pattern:$0x76325410] }
 0x195   : > { %24747 = vmatprep.mubr.msk.f32.mxu1 %vm27572_vm3, %v33293_v36  ;;  %v10214_v6 = vrot.slane %v23165_v55, %v27673_v11  ;;  %v2980_v40 = vcombine.low %v366_v21, %v374_v54  ;;  %v2987_v63 = vrot.slane %v2979_v2, %v27673_v11  ;;  %v29674_v33 = vcombine.low %v10883_v52, %v10890_v14  ;;  %v29720_v52 = vld [vmem:[%s27678_s5 + $0x10a] sm:$0xff] }
 0x196   : > { %25237 = vmatmul.mubr.msk.f32.gmra.mrb[90].mxu0 %vm2554_vm4, %v29213_v56  ;;  %v2963_v50 = vcombine.low %v350_v13, %v349_v27  ;;  %v2970_v5 = vrot.slane %v2962_v34, %v27673_v11  ;;  %v10866_v56 = vrot.slane %v10858_v47, %v27673_v11  ;;  %v10900_v47 = vrot.slane %v10892_v12, %v27673_v11  ;;  %v178_v27 = vld [vmem:[%s27678_s5 + $0x48] sm:$0xff] }
 0x197   : > { %25239 = vmatprep.mubr.msk.f32.mxu0 %vm27572_vm3, %v33293_v36  ;;  %v391_v18 = vcombine.high %v383_v23, %v383_v23  ;;  %v10907_v16 = vrot.slane %v10893_v60, %v27673_v11  ;;  %v29685_v48 = vrot.slane %v2980_v40, %v27673_v11  ;;  %v10924_v13 = vrot.slane %v10910_v57, %v27673_v11 }
 0x198   : > { %v2977_v62 = vrot.slane %v2963_v50, %v27673_v11  ;;  %v29672_v24 = vcombine.low %v10866_v56, %v10873_v32  ;;  %v10221_v59 = vrot.slane %v10207_v26, %v27673_v11  ;;  %v10222_v32 = vcombine.high %v10214_v6, %v10214_v6 }
 0x199   : > { %33422 = vst [vmem:[#allocation21_spill] sm:$0xff] %v29685_v48  ;;  %v2997_v34 = vcombine.low %v383_v23, %v391_v18  ;;  %v2995_v44 = vcombine.low %v2987_v63, %v29685_v48  ;;  %v10231_v30 = vcombine.high %v23167_v39, %v23167_v39  ;;  %v376_v15 = vcombine.high %v176_v10, %v176_v10 }
 0x19a   : > { %25240 = vmatmul.mubr.msk.f32.gmra.mrb[92].mxu0 %vm2554_vm4, %v9357_v9  ;;  %v2978_v37 = vcombine.low %v2970_v5, %v2977_v62  ;;  %v373_v9 = vrot.slane %v359_v35, %v27673_v11  ;;  %v407_v0 = vrot.slane %v178_v27, %v27673_v11  ;;  %v29708_v50 = vcombine.low %v10900_v47, %v10907_v16 }
 0x19b   : > { %25246 = vmatprep.mubr.msk.f32.mxu0 %vm27572_vm3, %v33293_v36  ;;  %v10238_v5 = vrot.slane %v23167_v39, %v27673_v11  ;;  %v10223_v21 = vcombine.high %v10221_v59, %v10221_v59  ;;  %v29725_v10 = vcombine.low %v10214_v6, %v10222_v32  ;;  %v10248_v14 = vcombine.high %v23168_v49, %v23168_v49 }
 0x19c   : > { %24748 = vmatmul.mubr.msk.f32.gmra.mrb[6].mxu1 %vm2554_vm4, %v2978_v37  ;;  %v375_v1 = vcombine.high %v373_v9, %v373_v9  ;;  %v3014_v55 = vcombine.low %v22726_v41, %v407_v0  ;;  %v10245_v62 = vrot.slane %v10231_v30, %v27673_v11  ;;  %v10255_v2 = vrot.slane %v23168_v49, %v27673_v11  ;;  %v23202_v37 = vld.sshfl [vmem:[%s27678_s5 + $0xea] sm:$0x3 pattern:$0x76325410] }
 0x19d   : > { %24750 = vmatprep.mubr.msk.f32.mxu1 %vm27572_vm3, %v33293_v36  ;;  %v400_v54 = vcombine.high %v178_v27, %v178_v27  ;;  %v10246_v35 = vcombine.high %v10238_v5, %v10238_v5  ;;  %v10279_v57 = vrot.slane %v29720_v52, %v27673_v11  ;;  %v415_v26 = vcombine.high %v407_v0, %v407_v0 }
 0x19e   : > { %25247 = vmatmul.mubr.msk.f32.vlgmr.msra.gmra.mrb[94].mxu0 %vm2554_vm4, %v29309_v51  ;;  %v10917_v51 = vrot.slane %v10909_v53, %v27673_v11  ;;  %v2996_v28 = vcombine.low %v373_v9, %v375_v1  ;;  %v179_v53 = vld [vmem:[%s27678_s5 + $0x50] sm:$0xff]  ;;  %v29743_v6 = vrot.slane %v3014_v55, %v27673_v11  ;;  %v10927_v40 = vcombine.low %v10221_v59, %v10223_v21 }
 0x19f   : > { %26245 = vmatpush3.bf16.msk.msra.mxu0 %vm27653_vm2, %v26243_v61  ;;  %25249 = vmatprep.mubr.msk.f32.mxu0 %vm27572_vm3, %v33293_v36  ;;  %v29703_v61 = vrot.slane %v2997_v34, %v27673_v11  ;;  %v10247_v63 = vcombine.high %v10245_v62, %v10245_v62  ;;  %v10262_v9 = vrot.slane %v10248_v14, %v27673_v11 }
 0x1a0   : > { %26246 = vmatprep.subr.bf16.mxu0 %v33405_v29  ;;  %24751 = vmatmul.mubr.msk.f32.gmra.mrb[8].mxu1 %vm2554_vm4, %v2995_v44  ;;  %v29713_v31 = vrot.slane %v2996_v28, %v27673_v11  ;;  %v29717_v56 = vcombine.low %v10917_v51, %v10924_v13  ;;  %v424_v47 = vrot.slane %v179_v53, %v27673_v11  ;;  %v23203_v44 = vld.sshfl [vmem:[%s27678_s5 + $0x102] sm:$0x3 pattern:$0x76325410] }
 0x1a1   : > { %33423 = vst [vmem:[#allocation20_spill] sm:$0xff] %v29703_v61  ;;  %24753 = vmatprep.mubr.msk.f32.mxu1 %vm27572_vm3, %v33293_v36  ;;  %v10263_v18 = vcombine.high %v10255_v2, %v10255_v2  ;;  %v10943_v51 = vcombine.low %v23202_v37, %v10238_v5  ;;  %v10944_v13 = vcombine.low %v10246_v35, %v10245_v62 }
 0x1a2   : > { %25250 = vmatmul.mubr.msk.f32.gmra.mrb[96].mxu0 %vm2554_vm4, %v29315_v58  ;;  %33424 = vst [vmem:[#allocation31_spill] sm:$0xff] %v29713_v31  ;;  %v390_v58 = vrot.slane %v376_v15, %v27673_v11  ;;  %v3012_v12 = vcombine.low %v29713_v31, %v29703_v61  ;;  %v10264_v34 = vcombine.high %v10262_v9, %v10262_v9 }
 0x1a3   : > { %25252 = vmatprep.mubr.msk.f32.mxu0 %vm27572_vm3, %v33293_v36  ;;  %v417_v59 = vcombine.high %v179_v53, %v179_v53  ;;  %v10287_v28 = vcombine.high %v10279_v57, %v10279_v57  ;;  %v10941_v15 = vrot.slane %v10927_v40, %v27673_v11  ;;  %v10960_v0 = vcombine.low %v10247_v63, %v10255_v2 }
 0x1a4   : > { %v392_v60 = vcombine.high %v390_v58, %v390_v58  ;;  %24754 = vmatmul.mubr.msk.f32.gmra.mrb[10].mxu1 %vm2554_vm4, %v3012_v12  ;;  %v10272_v55 = vcombine.high %v29720_v52, %v29720_v52  ;;  %v432_v14 = vcombine.high %v424_v47, %v424_v47  ;;  %v181_v12 = vld [vmem:[%s27678_s5 + $0x60] sm:$0xff]  ;;  %v10958_v62 = vrot.slane %v10944_v13, %v27673_v11  ;;  %v22727_v52 = vld.sshfl [vmem:[%s27678_s5 + $0x58] sm:$0x3 pattern:$0x76325410] }
 0x1a5   : > { %24756 = vmatprep.mubr.msk.f32.mxu1 %vm27572_vm3, %v33293_v36  ;;  %v431_v5 = vrot.slane %v417_v59, %v27673_v11  ;;  %v10977_v2 = vcombine.low %v10264_v34, %v23203_v44  ;;  %v10978_v53 = vcombine.low %v10279_v57, %v10287_v28  ;;  %v441_v40 = vcombine.high %v181_v12, %v181_v12  ;;  %v23174_v28 = vld [vmem:[%s27678_s5 + $0x12a] sm:$0xff] }
 0x1a6   : > { %25253 = vmatmul.mubr.msk.f32.gmra.mrb[4].mxu0 %vm2554_vm4, %v29317_v42  ;;  %v3013_v23 = vcombine.low %v390_v58, %v392_v60  ;;  %v414_v42 = vrot.slane %v400_v54, %v27673_v11  ;;  %v2707_v27 = vpop.f32.mrb[0].mxu1  ;;  %v10961_v58 = vcombine.low %v10263_v18, %v10262_v9  ;;  %v448_v63 = vrot.slane %v181_v12, %v27673_v11 }
 0x1a7   : > { %25255 = vmatprep.mubr.msk.f32.mxu0 %vm27572_vm3, %v33293_v36  ;;  %v24613_v32 = vpop.f32.mrb[1].mxu1  ;;  %v433_v35 = vcombine.high %v431_v5, %v431_v5  ;;  %v455_v27 = vrot.slane %v441_v40, %v27673_v11  ;;  %v10985_v13 = vrot.slane %v10977_v2, %v27673_v11  ;;  %v10992_v34 = vrot.slane %v10978_v53, %v27673_v11 }
 0x1a8   : > { %v29749_v16 = vrot.slane %v3013_v23, %v27673_v11  ;;  %v416_v39 = vcombine.high %v414_v42, %v414_v42  ;;  %v3030_v1 = vcombine.low %v415_v26, %v414_v42  ;;  %v10968_v23 = vrot.slane %v10960_v0, %v27673_v11  ;;  %v23171_v42 = vld [vmem:[%s27678_s5 + $0x112] sm:$0xff]  ;;  %v23173_v32 = vld [vmem:[%s27678_s5 + $0x122] sm:$0xff] }
 0x1a9   : > { %v10975_v9 = vrot.slane %v10961_v58, %v27673_v11  ;;  %v3048_v57 = vcombine.low %v433_v35, %v22727_v52  ;;  %v10296_v59 = vrot.slane %v23171_v42, %v27673_v11  ;;  %v10289_v44 = vcombine.high %v23171_v42, %v23171_v42 }
 0x1aa   : > { %33425 = vst [vmem:[#allocation12_spill] sm:$0xff] %v29749_v16  ;;  %25256 = vmatmul.mubr.msk.f32.gmra.mrb[6].mxu0 %vm2554_vm4, %v29396_v45  ;;  %v3029_v41 = vcombine.low %v29749_v16, %v29743_v6  ;;  %v3031_v30 = vcombine.low %v416_v39, %v424_v47  ;;  %v29759_v49 = vrot.slane %v3030_v1, %v27673_v11  ;;  %v182_v39 = vld [vmem:[%s27678_s5 + $0x68] sm:$0xff] }
 0x1ab   : > { %25258 = vmatprep.mubr.msk.f32.mxu0 %vm27572_vm3, %v33293_v36  ;;  %v10934_v45 = vrot.slane %v29725_v10, %v27673_v11  ;;  %v10951_v10 = vrot.slane %v10943_v51, %v27673_v11  ;;  %v2712_v60 = vpop.f32.mrb[2].mxu1  ;;  %v10286_v47 = vrot.slane %v10272_v55, %v27673_v11  ;;  %v456_v51 = vcombine.high %v448_v63, %v448_v63 }
 0x1ac   : > { %33426 = vst [vmem:[#allocation25_spill] sm:$0xff] %v29759_v49  ;;  %24757 = vmatmul.mubr.msk.f32.gmra.mrb[12].mxu1 %vm2554_vm4, %v3029_v41  ;;  %v29769_v21 = vrot.slane %v3031_v30, %v27673_v11  ;;  %v24616_v26 = vpop.f32.mrb[3].mxu1  ;;  %v457_v41 = vcombine.high %v455_v27, %v455_v27  ;;  %v465_v58 = vrot.slane %v182_v39, %v27673_v11 }
 0x1ad   : > { %24759 = vmatprep.mubr.msk.f32.mxu1 %vm27572_vm3, %v33293_v36  ;;  %v29783_v37 = vcombine.low %v10934_v45, %v10941_v15  ;;  %v29797_v1 = vcombine.low %v10951_v10, %v10958_v62  ;;  %v3064_v30 = vcombine.low %v448_v63, %v456_v51  ;;  %v458_v45 = vcombine.high %v182_v39, %v182_v39  ;;  %v184_v62 = vld [vmem:[%s27678_s5 + $0x78] sm:$0xff] }
 0x1ae   : > { %25259 = vmatmul.mubr.msk.f32.gmra.mrb[8].mxu0 %vm2554_vm4, %v29405_v22  ;;  %v3046_v54 = vcombine.low %v29759_v49, %v29769_v21  ;;  %v3047_v22 = vcombine.low %v432_v14, %v431_v5  ;;  %v29812_v15 = vcombine.low %v10968_v23, %v10975_v9  ;;  %v10288_v0 = vcombine.high %v10286_v47, %v10286_v47  ;;  %v22728_v23 = vld.sshfl [vmem:[%s27678_s5 + $0x70] sm:$0x3 pattern:$0x76325410] }
 0x1af   : > { %25261 = vmatprep.mubr.msk.f32.mxu0 %vm27572_vm3, %v33293_v36  ;;  %v10313_v55 = vcombine.high %v23173_v32, %v23173_v32  ;;  %v3065_v14 = vcombine.low %v455_v27, %v457_v41  ;;  %v29820_v12 = vrot.slane %v3064_v30, %v27673_v11  ;;  %v472_v10 = vrot.slane %v458_v45, %v27673_v11  ;;  %v23204_v30 = vld.sshfl [vmem:[%s27678_s5 + $0x11a] sm:$0x3 pattern:$0x76325410] }
 0x1b0   : > { %24760 = vmatmul.mubr.msk.f32.gmra.mrb[14].mxu1 %vm2554_vm4, %v3046_v54  ;;  %v29792_v18 = vrot.slane %v3047_v22, %v27673_v11  ;;  %v29826_v2 = vcombine.low %v10985_v13, %v10992_v34  ;;  %v10330_v52 = vcombine.high %v23174_v28, %v23174_v28  ;;  %v473_v60 = vcombine.high %v465_v58, %v465_v58 }
 0x1b1   : > { %24762 = vmatprep.mubr.msk.f32.mxu1 %vm27572_vm3, %v33293_v36  ;;  %33429 = vst [vmem:[#allocation35_spill] sm:$0xff] %v29820_v12  ;;  %v10303_v53 = vrot.slane %v10289_v44, %v27673_v11  ;;  %v29833_v54 = vrot.slane %v3065_v14, %v27673_v11  ;;  %v474_v35 = vcombine.high %v472_v10, %v472_v10 }
 0x1b2   : > { %33427 = vst [vmem:[#allocation26_spill] sm:$0xff] %v29792_v18  ;;  %25262 = vmatmul.mubr.msk.f32.gmra.mrb[10].mxu0 %vm2554_vm4, %v29413_v17  ;;  %v29809_v17 = vrot.slane %v3048_v57, %v27673_v11  ;;  %v29835_v22 = vcombine.low %v10286_v47, %v10288_v0  ;;  %v3081_v26 = vcombine.low %v465_v58, %v473_v60  ;;  %v23176_v57 = vld [vmem:[%s27678_s5 + $0x13a] sm:$0xff] }
 0x1b3   : > { %25264 = vmatprep.mubr.msk.f32.mxu0 %vm27572_vm3, %v33293_v36  ;;  %33430 = vst [vmem:[#allocation13_spill] sm:$0xff] %v29833_v54  ;;  %v482_v42 = vcombine.high %v184_v62, %v184_v62  ;;  %v489_v40 = vrot.slane %v184_v62, %v27673_v11  ;;  %v29842_v63 = vrot.slane %v23173_v32, %v27673_v11  ;;  %v185_v58 = vld [vmem:[%s27678_s5 + $0x80] sm:$0xff] }
 0x1b4   : > { %33428 = vst [vmem:[#allocation34_spill] sm:$0xff] %v29809_v17  ;;  %v3063_v5 = vcombine.low %v29792_v18, %v29809_v17  ;;  %v10327_v9 = vrot.slane %v10313_v55, %v27673_v11  ;;  %v3080_v39 = vcombine.low %v29820_v12, %v29833_v54  ;;  %v3082_v47 = vcombine.low %v472_v10, %v474_v35  ;;  %v23205_v35 = vld.sshfl [vmem:[%s27678_s5 + $0x132] sm:$0x3 pattern:$0x76325410]  ;;  %v206_v54 = vld [vmem:[%s27678_s5 + $0x128] sm:$0xff] }
 0x1b5   : > { %v10344_v27 = vrot.slane %v10330_v52, %v27673_v11  ;;  %v29852_v51 = vrot.slane %v3081_v26, %v27673_v11  ;;  %v497_v13 = vcombine.high %v489_v40, %v489_v40  ;;  %v10305_v32 = vcombine.high %v10303_v53, %v10303_v53 }
 0x1b6   : > { %25265 = vmatmul.mubr.msk.f32.gmra.mrb[12].mxu0 %vm2554_vm4, %v29442_v7  ;;  %24763 = vmatmul.mubr.msk.f32.gmra.mrb[16].mxu1 %vm2554_vm4, %v3063_v5  ;;  %v10304_v7 = vcombine.high %v10296_v59, %v10296_v59  ;;  %v29859_v44 = vrot.slane %v3082_v47, %v27673_v11  ;;  %v3098_v41 = vcombine.low %v22728_v23, %v489_v40  ;;  %v29888_v40 = vld [vmem:[%s27678_s5 + $0x90] sm:$0xff] }
 0x1b7   : > { %25267 = vmatprep.mubr.msk.f32.mxu0 %vm27572_vm3, %v33293_v36  ;;  %24765 = vmatprep.mubr.msk.f32.mxu1 %vm27572_vm3, %v33293_v36  ;;  %33431 = vst [vmem:[#allocation36_spill] sm:$0xff] %v29852_v51  ;;  %v10328_v45 = vcombine.high %v29842_v63, %v29842_v63  ;;  %v10337_v0 = vrot.slane %v23174_v28, %v27673_v11 }
 0x1b8   : > { %v29855_v34 = vcombine.low %v10296_v59, %v10304_v7  ;;  %v10354_v5 = vcombine.high %v23176_v57, %v23176_v57  ;;  %v10329_v55 = vcombine.high %v10327_v9, %v10327_v9  ;;  %v3097_v14 = vcombine.low %v29852_v51, %v29859_v44 }
 0x1b9   : > { %v29873_v10 = vrot.slane %v3098_v41, %v27673_v11  ;;  %v11002_v28 = vrot.slane %v29835_v22, %v27673_v11  ;;  %v10345_v52 = vcombine.high %v10337_v0, %v10337_v0  ;;  %v10346_v60 = vcombine.high %v10344_v27, %v10344_v27 }
 0x1ba   : > { %25268 = vmatmul.mubr.msk.f32.gmra.mrb[14].mxu0 %vm2554_vm4, %v29447_v20  ;;  %v496_v20 = vrot.slane %v482_v42, %v27673_v11  ;;  %24766 = vmatmul.mubr.msk.f32.gmra.mrb[18].mxu1 %vm2554_vm4, %v3080_v39  ;;  %v10361_v26 = vrot.slane %v23176_v57, %v27673_v11  ;;  %v499_v23 = vcombine.high %v185_v58, %v185_v58 }
 0x1bb   : > { %25270 = vmatprep.mubr.msk.f32.mxu0 %vm27572_vm3, %v33293_v36  ;;  %24768 = vmatprep.mubr.msk.f32.mxu1 %vm27572_vm3, %v33293_v36  ;;  %v506_v42 = vrot.slane %v185_v58, %v27673_v11  ;;  %v11011_v39 = vcombine.low %v10303_v53, %v10305_v32  ;;  %v11028_v22 = vcombine.low %v10328_v45, %v10327_v9 }
 0x1bc   : > { %v3099_v59 = vcombine.low %v497_v13, %v496_v20  ;;  %v498_v62 = vcombine.high %v496_v20, %v496_v20  ;;  %v10368_v47 = vrot.slane %v10354_v5, %v27673_v11  ;;  %v11029_v57 = vcombine.low %v10329_v55, %v10337_v0 }
 0x1bd   : > { %v513_v20 = vrot.slane %v499_v23, %v27673_v11  ;;  %v514_v13 = vcombine.high %v506_v42, %v506_v42  ;;  %v11009_v53 = vrot.slane %v29855_v34, %v27673_v11  ;;  %v11045_v9 = vcombine.low %v10345_v52, %v10344_v27 }
 0x1be   : > { %25271 = vmatmul.mubr.msk.f32.gmra.mrb[16].mxu0 %vm2554_vm4, %v29460_v8  ;;  %v29880_v7 = vrot.slane %v3099_v59, %v27673_v11  ;;  %v11012_v8 = vcombine.low %v23204_v30, %v29842_v63  ;;  %24769 = vmatmul.mubr.msk.f32.gmra.mrb[20].mxu1 %vm2554_vm4, %v3097_v14  ;;  %v3115_v41 = vcombine.low %v498_v62, %v506_v42  ;;  %v22729_v30 = vld.sshfl [vmem:[%s27678_s5 + $0x88] sm:$0x3 pattern:$0x76325410] }
 0x1bf   : > { %25273 = vmatprep.mubr.msk.f32.mxu0 %vm27572_vm3, %v33293_v36  ;;  %24771 = vmatprep.mubr.msk.f32.mxu1 %vm27572_vm3, %v33293_v36  ;;  %v11046_v32 = vcombine.low %v10346_v60, %v23205_v35  ;;  %v530_v45 = vrot.slane %v29888_v40, %v27673_v11  ;;  %v10369_v5 = vcombine.high %v10361_v26, %v10361_v26  ;;  %v23177_v14 = vld [vmem:[%s27678_s5 + $0x142] sm:$0xff] }
 0x1c0   : > { %33432 = vst [vmem:[#allocation29_spill] sm:$0xff] %v29880_v7  ;;  %v3114_v63 = vcombine.low %v29873_v10, %v29880_v7  ;;  %v29907_v0 = vrot.slane %v3115_v41, %v27673_v11  ;;  %v515_v59 = vcombine.high %v513_v20, %v513_v20  ;;  %v11019_v55 = vrot.slane %v11011_v39, %v27673_v11  ;;  %v208_v7 = vld [vmem:[%s27678_s5 + $0x138] sm:$0xff] }
 0x1c1   : > { %v11026_v34 = vrot.slane %v11012_v8, %v27673_v11  ;;  %v10370_v27 = vcombine.high %v10368_v47, %v10368_v47  ;;  %v538_v62 = vcombine.high %v530_v45, %v530_v45  ;;  %v11036_v60 = vrot.slane %v11028_v22, %v27673_v11  ;;  %v188_v8 = vld [vmem:[%s27678_s5 + $0x98] sm:$0xff] }
 0x1c2   : > { %25274 = vmatmul.mubr.msk.f32.gmra.mrb[18].mxu0 %vm2554_vm4, %v29533_v19  ;;  %24772 = vmatmul.mubr.msk.f32.gmra.mrb[22].mxu1 %vm2554_vm4, %v3114_v63  ;;  %v3116_v19 = vcombine.low %v514_v13, %v513_v20  ;;  %33433 = vst [vmem:[#allocation40_spill] sm:$0xff] %v29907_v0  ;;  %v11043_v35 = vrot.slane %v11029_v57, %v27673_v11 }
 0x1c3   : > { %25276 = vmatprep.mubr.msk.f32.mxu0 %vm27572_vm3, %v33293_v36  ;;  %24774 = vmatprep.mubr.msk.f32.mxu1 %vm27572_vm3, %v33293_v36  ;;  %v3132_v42 = vcombine.low %v515_v59, %v22729_v30  ;;  %v29924_v39 = vcombine.low %v11002_v28, %v11009_v53  ;;  %v11053_v63 = vrot.slane %v11045_v9, %v27673_v11  ;;  %v23179_v28 = vld [vmem:[%s27678_s5 + $0x152] sm:$0xff]  ;;  %v190_v59 = vld [vmem:[%s27678_s5 + $0xa8] sm:$0xff] }
 0x1c4   : > { %v29919_v23 = vrot.slane %v3116_v19, %v27673_v11  ;;  %v11060_v20 = vrot.slane %v11046_v32, %v27673_v11  ;;  %v29928_v13 = vcombine.low %v10361_v26, %v10369_v5  ;;  %v10371_v22 = vcombine.high %v23177_v14, %v23177_v14 }
 0x1c5   : > { %v7771_v58 = vpop.f32.mrb[82].mxu0  ;;  %v29933_v41 = vrot.slane %v3132_v42, %v27673_v11  ;;  %v29935_v19 = vcombine.low %v10368_v47, %v10370_v27  ;;  %v523_v9 = vcombine.high %v29888_v40, %v29888_v40  ;;  %v547_v26 = vrot.slane %v188_v8, %v27673_v11  ;;  %v22730_v42 = vld.sshfl [vmem:[%s27678_s5 + $0xa0] sm:$0x3 pattern:$0x76325410] }
 0x1c6   : > { %v25111_v52 = vpop.f32.mrb[83].mxu0  ;;  %25277 = vmatmul.mubr.msk.f32.gmra.mrb[20].mxu0 %vm2554_vm4, %v29540_v43  ;;  %33434 = vst [vmem:[#allocation27_spill] sm:$0xff] %v29919_v23  ;;  %v3133_v43 = vcombine.low %v530_v45, %v538_v62  ;;  %v3131_v57 = vcombine.low %v29907_v0, %v29919_v23  ;;  %v29946_v45 = vcombine.low %v11019_v55, %v11026_v34 }
 0x1c7   : > { %25279 = vmatprep.mubr.msk.f32.mxu0 %vm27572_vm3, %v33293_v36  ;;  %33435 = vst [vmem:[#allocation19_spill] sm:$0xff] %v29933_v41  ;;  %v29948_v5 = vcombine.low %v11036_v60, %v11043_v35  ;;  %v10378_v47 = vrot.slane %v23177_v14, %v27673_v11  ;;  %v29955_v40 = vcombine.low %v11053_v63, %v11060_v20  ;;  %v23180_v14 = vld [vmem:[%s27678_s5 + $0x15a] sm:$0xff] }
 0x1c8   : > { %v29939_v53 = vrot.slane %v3133_v43, %v27673_v11  ;;  %24775 = vmatmul.mubr.msk.f32.gmra.mrb[24].mxu1 %vm2554_vm4, %v3131_v57  ;;  %v537_v58 = vrot.slane %v523_v9, %v27673_v11  ;;  %v10385_v34 = vrot.slane %v10371_v22, %v27673_v11  ;;  %v10395_v27 = vcombine.high %v23179_v28, %v23179_v28  ;;  %v29976_v22 = vld [vmem:[%s27678_s5 + $0x16a] sm:$0xff] }
 0x1c9   : > { %v7776_v30 = vpop.f32.mrb[84].mxu0  ;;  %33436 = vst [vmem:[#allocation37_spill] sm:$0xff] %v29948_v5  ;;  %33437 = vst [vmem:[#allocation43_spill] sm:$0xff] %v29955_v40  ;;  %24777 = vmatprep.mubr.msk.f32.mxu1 %vm27572_vm3, %v33293_v36  ;;  %v555_v62 = vcombine.high %v547_v26, %v547_v26  ;;  %v540_v63 = vcombine.high %v188_v8, %v188_v8  ;;  %v571_v20 = vrot.slane %v190_v59, %v27673_v11 }
 0x1ca   : > { %v25114_v32 = vpop.f32.mrb[85].mxu0  ;;  %25280 = vmatmul.mubr.msk.f32.gmra.mrb[26].mxu0 %vm2554_vm4, %v29575_v3  ;;  %v3148_v3 = vcombine.low %v29933_v41, %v29939_v53  ;;  %v539_v35 = vcombine.high %v537_v58, %v537_v58  ;;  %v10386_v57 = vcombine.high %v10378_v47, %v10378_v47  ;;  %v29973_v30 = vrot.slane %v23179_v28, %v27673_v11 }
 0x1cb   : > { %25282 = vmatprep.mubr.msk.f32.mxu0 %vm27572_vm3, %v33293_v36  ;;  %v3150_v9 = vcombine.low %v547_v26, %v555_v62  ;;  %v10412_v8 = vcombine.high %v23180_v14, %v23180_v14  ;;  %v10409_v28 = vrot.slane %v10395_v27, %v27673_v11  ;;  %v10419_v26 = vrot.slane %v23180_v14, %v27673_v11  ;;  %v23206_v14 = vld.sshfl [vmem:[%s27678_s5 + $0x14a] sm:$0x3 pattern:$0x76325410] }
 0x1cc   : > { %24778 = vmatmul.mubr.msk.f32.gmra.mrb[26].mxu1 %vm2554_vm4, %v3148_v3  ;;  %v3149_v32 = vcombine.low %v537_v58, %v539_v35  ;;  %v3167_v3 = vcombine.low %v22730_v42, %v571_v20  ;;  %v10443_v62 = vrot.slane %v29976_v22, %v27673_v11  ;;  %v191_v35 = vld [vmem:[%s27678_s5 + $0xb0] sm:$0xff]  ;;  %v29997_v27 = vcombine.low %v10378_v47, %v10386_v57 }
 0x1cd   : > { %v9509_v52 = vpop.f32.mrb[86].mxu0  ;;  %24780 = vmatprep.mubr.msk.f32.mxu1 %vm27572_vm3, %v33293_v36  ;;  %v10410_v42 = vcombine.high %v29973_v30, %v29973_v30  ;;  %v579_v4 = vcombine.high %v571_v20, %v571_v20  ;;  %v10427_v61 = vcombine.high %v10419_v26, %v10419_v26 }
 0x1ce   : > { %v25121_v43 = vpop.f32.mrb[87].mxu0  ;;  %25283 = vmatmul.mubr.msk.f32.gmra.mrb[28].mxu0 %vm2554_vm4, %v29577_v25  ;;  %v554_v25 = vrot.slane %v540_v63, %v27673_v11  ;;  %v10387_v52 = vcombine.high %v10385_v34, %v10385_v34  ;;  %v29992_v60 = vrot.slane %v3149_v32, %v27673_v11  ;;  %v10426_v32 = vrot.slane %v10412_v8, %v27673_v11 }
 0x1cf   : > { %25285 = vmatprep.mubr.msk.f32.mxu0 %vm27572_vm3, %v33293_v36  ;;  %v29986_v43 = vrot.slane %v3150_v9, %v27673_v11  ;;  %v564_v9 = vcombine.high %v190_v59, %v190_v59  ;;  %v588_v59 = vrot.slane %v191_v35, %v27673_v11  ;;  %v10451_v48 = vcombine.high %v10443_v62, %v10443_v62 }
 0x1d0   : > { %33438 = vst [vmem:[#allocation30_spill] sm:$0xff] %v29992_v60  ;;  %v556_v58 = vcombine.high %v554_v25, %v554_v25  ;;  %v11080_v47 = vcombine.low %v10385_v34, %v10387_v52  ;;  %v10428_v16 = vcombine.high %v10426_v32, %v10426_v32  ;;  %v11096_v34 = vcombine.low %v23206_v14, %v29973_v30 }
 0x1d1   : > { %v9514_v55 = vpop.f32.mrb[88].mxu0  ;;  %v578_v57 = vrot.slane %v564_v9, %v27673_v11  ;;  %v30029_v9 = vld [vmem:[%s27678_s5 + $0x172] sm:$0xff]  ;;  %v596_v31 = vcombine.high %v588_v59, %v588_v59  ;;  %v11114_v40 = vcombine.low %v10427_v61, %v10426_v32  ;;  %v10436_v61 = vcombine.high %v29976_v22, %v29976_v22 }
 0x1d2   : > { %v25124_v63 = vpop.f32.mrb[89].mxu0  ;;  %25286 = vmatmul.mubr.msk.f32.gmra.mrb[30].mxu0 %vm2554_vm4, %v29586_v38  ;;  %v10411_v55 = vcombine.high %v10409_v28, %v10409_v28  ;;  %v3166_v29 = vcombine.low %v554_v25, %v556_v58  ;;  %v30008_v38 = vrot.slane %v3167_v3, %v27673_v11  ;;  %v23207_v25 = vld.sshfl [vmem:[%s27678_s5 + $0x162] sm:$0x3 pattern:$0x76325410]  ;;  %v11087_v3 = vrot.slane %v29997_v27, %v27673_v11 }
 0x1d3   : > { %25288 = vmatprep.mubr.msk.f32.mxu0 %vm27572_vm3, %v33293_v36  ;;  %v3165_v63 = vcombine.low %v29992_v60, %v29986_v43  ;;  %v580_v20 = vcombine.high %v578_v57, %v578_v57  ;;  %v3183_v52 = vcombine.low %v579_v4, %v578_v57  ;;  %v193_v4 = vld [vmem:[%s27678_s5 + $0xc0] sm:$0xff]  ;;  %v11094_v57 = vrot.slane %v11080_v47, %v27673_v11  ;;  %v33455_v60 = vld [vmem:[#allocation37_spill] sm:$0xff] }
 0x1d4   : > { %v30014_v8 = vrot.slane %v3166_v29, %v27673_v11  ;;  %v11097_v29 = vcombine.low %v10410_v42, %v10409_v28  ;;  %v11113_v58 = vcombine.low %v10411_v55, %v10419_v26  ;;  %v11130_v5 = vcombine.low %v10428_v16, %v23207_v25  ;;  %v22731_v16 = vld.sshfl [vmem:[%s27678_s5 + $0xb8] sm:$0x3 pattern:$0x76325410] }
 0x1d5   : > { %24781 = vmatmul.mubr.msk.f32.gmra.mrb[28].mxu1 %vm2554_vm4, %v3165_v63  ;;  %v3184_v30 = vcombine.low %v580_v20, %v588_v59  ;;  %v30032_v14 = vrot.slane %v3183_v52, %v27673_v11  ;;  %v581_v63 = vcombine.high %v191_v35, %v191_v35  ;;  %v11131_v27 = vcombine.low %v10443_v62, %v10451_v48 }
 0x1d6   : > { %25289 = vmatmul.mubr.msk.f32.gmra.mrb[32].mxu0 %vm2554_vm4, %v29651_v46  ;;  %24783 = vmatprep.mubr.msk.f32.mxu1 %vm27572_vm3, %v33293_v36  ;;  %v3182_v46 = vcombine.low %v30014_v8, %v30008_v38  ;;  %v11104_v28 = vrot.slane %v11096_v34, %v27673_v11  ;;  %v11111_v48 = vrot.slane %v11097_v29, %v27673_v11  ;;  %v194_v29 = vld [vmem:[%s27678_s5 + $0xc8] sm:$0xff] }
 0x1d7   : > { %25291 = vmatprep.mubr.msk.f32.mxu0 %vm27572_vm3, %v33293_v36  ;;  %33439 = vst [vmem:[#allocation14_spill] sm:$0xff] %v30032_v14  ;;  %v30043_v26 = vrot.slane %v3184_v30, %v27673_v11  ;;  %v595_v35 = vrot.slane %v581_v63, %v27673_v11  ;;  %v605_v62 = vcombine.high %v193_v4, %v193_v4 }
 0x1d8   : > { %v11121_v42 = vrot.slane %v11113_v58, %v27673_v11  ;;  %v11128_v59 = vrot.slane %v11114_v40, %v27673_v11  ;;  %v11138_v34 = vrot.slane %v11130_v5, %v27673_v11  ;;  %v11145_v25 = vrot.slane %v11131_v27, %v27673_v11 }
 0x1d9   : > { %24784 = vmatmul.mubr.msk.f32.gmra.mrb[30].mxu1 %vm2554_vm4, %v3182_v46  ;;  %33440 = vst [vmem:[#allocation32_spill] sm:$0xff] %v30043_v26  ;;  %v3199_v55 = vcombine.low %v30032_v14, %v30043_v26  ;;  %v597_v32 = vcombine.high %v595_v35, %v595_v35  ;;  %v3200_v47 = vcombine.low %v596_v31, %v595_v35 }
 0x1da   : > { %25292 = vmatmul.mubr.msk.f32.gmra.mrb[34].mxu0 %vm2554_vm4, %v29672_v24  ;;  %24786 = vmatprep.mubr.msk.f32.mxu1 %vm27572_vm3, %v33293_v36  ;;  %v10460_v24 = vrot.slane %v30029_v9, %v27673_v11  ;;  %v612_v22 = vrot.slane %v193_v4, %v27673_v11  ;;  %v619_v31 = vrot.slane %v605_v62, %v27673_v11 }
 0x1db   : > { %25294 = vmatprep.mubr.msk.f32.mxu0 %vm27572_vm3, %v33293_v36  ;;  %v3201_v20 = vcombine.low %v597_v32, %v22731_v16  ;;  %v30065_v52 = vrot.slane %v3200_v47, %v27673_v11  ;;  %v33442_v5 = vrot.slane %v29935_v19, %v27673_v11  ;;  %v33443_v40 = vrot.slane %v29928_v13, %v27673_v11  ;;  %v196_v16 = vld [vmem:[%s27678_s5 + $0xd8] sm:$0xff]  ;;  %v197_v47 = vld [vmem:[%s27678_s5 + $0xe0] sm:$0xff] }
 0x1dc   : > { %v30080_v58 = vrot.slane %v10436_v61, %v27673_v11  ;;  %v10468_v46 = vcombine.high %v10460_v24, %v10460_v24  ;;  %v30084_v30 = vcombine.low %v11087_v3, %v11094_v57  ;;  %v620_v4 = vcombine.high %v612_v22, %v612_v22  ;;  %v30100_v57 = vld [vmem:[%s27678_s5 + $0x182] sm:$0xff] }
 0x1dd   : > { %24787 = vmatmul.mubr.msk.f32.gmra.mrb[32].mxu1 %vm2554_vm4, %v3199_v55  ;;  %33441 = vst [vmem:[#allocation44_spill] sm:$0xff] %v30065_v52  ;;  %v30087_v63 = vrot.slane %v3201_v20, %v27673_v11  ;;  %v621_v19 = vcombine.high %v619_v31, %v619_v31  ;;  %v30089_v27 = vcombine.low %v11104_v28, %v11111_v48 }
 0x1de   : > { %25295 = vmatmul.mubr.msk.f32.gmra.mrb[36].mxu0 %vm2554_vm4, %v29674_v33  ;;  %v30077_v33 = vcombine.low %v33443_v40, %v33442_v5  ;;  %24789 = vmatprep.mubr.msk.f32.mxu1 %vm27572_vm3, %v33293_v36  ;;  %v30091_v13 = vcombine.low %v11121_v42, %v11128_v59  ;;  %v622_v35 = vcombine.high %v194_v29, %v194_v29  ;;  %v22734_v59 = vld.sshfl [vmem:[%s27678_s5 + $0x100] sm:$0x3 pattern:$0x76325410] }
 0x1df   : > { %25297 = vmatprep.mubr.msk.f32.mxu0 %vm27572_vm3, %v33293_v36  ;;  %33444 = vst [vmem:[#allocation33_spill] sm:$0xff] %v30087_v63  ;;  %v629_v61 = vrot.slane %v194_v29, %v27673_v11  ;;  %v30097_v3 = vcombine.low %v11138_v34, %v11145_v25  ;;  %v3216_v62 = vcombine.low %v30065_v52, %v30087_v63 }
 0x1e0   : > { %v3217_v28 = vcombine.low %v612_v22, %v620_v4  ;;  %v3218_v48 = vcombine.low %v619_v31, %v621_v19  ;;  %v10452_v42 = vcombine.high %v30080_v58, %v30080_v58  ;;  %v30108_v55 = vcombine.low %v10460_v24, %v10468_v46  ;;  %v22732_v22 = vld.sshfl [vmem:[%s27678_s5 + $0xd0] sm:$0x3 pattern:$0x76325410] }
 0x1e1   : > { %v637_v32 = vcombine.high %v629_v61, %v629_v61  ;;  %24790 = vmatmul.mubr.msk.f32.gmra.mrb[34].mxu1 %vm2554_vm4, %v3216_v62  ;;  %v646_v20 = vcombine.high %v196_v16, %v196_v16  ;;  %v30124_v24 = vrot.slane %v30100_v57, %v27673_v11  ;;  %v653_v5 = vrot.slane %v196_v16, %v27673_v11 }
 0x1e2   : > { %25298 = vmatmul.mubr.msk.f32.gmra.mrb[38].mxu0 %vm2554_vm4, %v29708_v50  ;;  %v636_v50 = vrot.slane %v622_v35, %v27673_v11  ;;  %v30116_v34 = vrot.slane %v3217_v28, %v27673_v11  ;;  %v30119_v25 = vrot.slane %v3218_v48, %v27673_v11  ;;  %24792 = vmatprep.mubr.msk.f32.mxu1 %vm27572_vm3, %v33293_v36  ;;  %v199_v35 = vld [vmem:[%s27678_s5 + $0xf0] sm:$0xff] }
 0x1e3   : > { %25300 = vmatprep.mubr.msk.f32.mxu0 %vm27572_vm3, %v33293_v36  ;;  %v3234_v29 = vcombine.low %v629_v61, %v637_v32  ;;  %v660_v46 = vrot.slane %v646_v20, %v27673_v11  ;;  %v663_v4 = vcombine.high %v197_v47, %v197_v47  ;;  %v670_v19 = vrot.slane %v197_v47, %v27673_v11 }
 0x1e4   : > { %33445 = vst [vmem:[#allocation45_spill] sm:$0xff] %v30116_v34  ;;  %v638_v31 = vcombine.high %v636_v50, %v636_v50  ;;  %v3233_v40 = vcombine.low %v30116_v34, %v30119_v25  ;;  %v661_v62 = vcombine.high %v653_v5, %v653_v5 }
 0x1e5   : > { %v30139_v16 = vrot.slane %v3234_v29, %v27673_v11  ;;  %v662_v28 = vcombine.high %v660_v46, %v660_v46  ;;  %v677_v48 = vrot.slane %v663_v4, %v27673_v11  ;;  %v678_v32 = vcombine.high %v670_v19, %v670_v19 }
 0x1e6   : > { %25301 = vmatmul.mubr.msk.f32.gmra.mrb[40].mxu0 %vm2554_vm4, %v29717_v56  ;;  %v3235_v61 = vcombine.low %v636_v50, %v638_v31  ;;  %v3251_v56 = vcombine.low %v22732_v22, %v653_v5  ;;  %24793 = vmatmul.mubr.msk.f32.gmra.mrb[36].mxu1 %vm2554_vm4, %v3233_v40  ;;  %v3252_v50 = vcombine.low %v661_v62, %v660_v46  ;;  %v22733_v22 = vld.sshfl [vmem:[%s27678_s5 + $0xe8] sm:$0x3 pattern:$0x76325410]  ;;  %v200_v5 = vld [vmem:[%s27678_s5 + $0xf8] sm:$0xff] }
 0x1e7   : > { %25303 = vmatprep.mubr.msk.f32.mxu0 %vm27572_vm3, %v33293_v36  ;;  %33446 = vst [vmem:[#allocation15_spill] sm:$0xff] %v30139_v16  ;;  %24795 = vmatprep.mubr.msk.f32.mxu1 %vm27572_vm3, %v33293_v36  ;;  %v694_v29 = vrot.slane %v199_v35, %v27673_v11  ;;  %v3268_v40 = vcombine.low %v662_v28, %v670_v19 }
 0x1e8   : > { %v30148_v20 = vrot.slane %v3235_v61, %v27673_v11  ;;  %v30151_v31 = vrot.slane %v3251_v56, %v27673_v11  ;;  %v3269_v4 = vcombine.low %v678_v32, %v677_v48  ;;  %v679_v47 = vcombine.high %v677_v48, %v677_v48  ;;  %v202_v48 = vld [vmem:[%s27678_s5 + $0x108] sm:$0xff] }
 0x1e9   : > { %v30165_v61 = vrot.slane %v3252_v50, %v27673_v11  ;;  %v702_v62 = vcombine.high %v694_v29, %v694_v29  ;;  %v687_v56 = vcombine.high %v199_v35, %v199_v35  ;;  %v30168_v49 = vrot.slane %v3268_v40, %v27673_v11 }
 0x1ea   : > { %25304 = vmatmul.mubr.msk.f32.gmra.mrb[42].mxu0 %vm2554_vm4, %v29783_v37  ;;  %v3250_v46 = vcombine.low %v30139_v16, %v30148_v20  ;;  %v30171_v37 = vrot.slane %v3269_v4, %v27673_v11  ;;  %v3285_v19 = vcombine.low %v679_v47, %v22733_v22  ;;  %v711_v28 = vrot.slane %v200_v5, %v27673_v11 }
 0x1eb   : > { %25306 = vmatprep.mubr.msk.f32.mxu0 %vm27572_vm3, %v33293_v36  ;;  %33447 = vst [vmem:[#allocation16_spill] sm:$0xff] %v30165_v61  ;;  %33448 = vst [vmem:[#allocation11_spill] sm:$0xff] %v30168_v49  ;;  %v3267_v32 = vcombine.low %v30151_v31, %v30165_v61  ;;  %v3286_v50 = vcombine.low %v694_v29, %v702_v62  ;;  %v701_v35 = vrot.slane %v687_v56, %v27673_v11  ;;  %v23208_v29 = vld.sshfl [vmem:[%s27678_s5 + $0x17a] sm:$0x3 pattern:$0x76325410] }
 0x1ec   : > { %33449 = vst [vmem:[#allocation10_spill] sm:$0xff] %v30171_v37  ;;  %24796 = vmatmul.mubr.msk.f32.gmra.mrb[38].mxu1 %vm2554_vm4, %v3250_v46  ;;  %v30184_v47 = vcombine.low %v30080_v58, %v10452_v42  ;;  %v719_v4 = vcombine.high %v711_v28, %v711_v28  ;;  %v30194_v46 = vrot.slane %v3285_v19, %v27673_v11  ;;  %v203_v58 = vld [vmem:[%s27678_s5 + $0x110] sm:$0xff] }
 0x1ed   : > { %24798 = vmatprep.mubr.msk.f32.mxu1 %vm27572_vm3, %v33293_v36  ;;  %v703_v62 = vcombine.high %v701_v35, %v701_v35  ;;  %v704_v56 = vcombine.high %v200_v5, %v200_v5  ;;  %v30199_v42 = vrot.slane %v3286_v50, %v27673_v11  ;;  %v728_v12 = vcombine.high %v202_v48, %v202_v48  ;;  %v215_v61 = vld [vmem:[%s27678_s5 + $0x170] sm:$0xff] }
 0x1ee   : > { %25307 = vmatmul.mubr.msk.f32.gmra.mrb[44].mxu0 %vm2554_vm4, %v29797_v1  ;;  %33450 = vst [vmem:[#allocation38_spill] sm:$0xff] %v30194_v46  ;;  %v735_v1 = vrot.slane %v202_v48, %v27673_v11  ;;  %v3303_v40 = vcombine.low %v711_v28, %v719_v4  ;;  %v33451_v19 = vcombine.high %v30029_v9, %v30029_v9 }
 0x1ef   : > { %25309 = vmatprep.mubr.msk.f32.mxu0 %vm27572_vm3, %v33293_v36  ;;  %v3284_v5 = vcombine.low %v30168_v49, %v30171_v37  ;;  %v3302_v18 = vcombine.low %v701_v35, %v703_v62  ;;  %v718_v50 = vrot.slane %v704_v56, %v27673_v11  ;;  %v11165_v28 = vcombine.low %v23208_v29, %v30124_v24 }
 0x1f0   : > { %v10467_v17 = vrot.slane %v33451_v19, %v27673_v11  ;;  %24799 = vmatmul.mubr.msk.f32.gmra.mrb[40].mxu1 %vm2554_vm4, %v3267_v32  ;;  %v742_v48 = vrot.slane %v728_v12, %v27673_v11  ;;  %v752_v9 = vrot.slane %v203_v58, %v27673_v11  ;;  %v205_v32 = vld [vmem:[%s27678_s5 + $0x120] sm:$0xff]  ;;  %v3320_v4 = vcombine.low %v22734_v59, %v735_v1 }
 0x1f1   : > { %24801 = vmatprep.mubr.msk.f32.mxu1 %vm27572_vm3, %v33293_v36  ;;  %v720_v35 = vcombine.high %v718_v50, %v718_v50  ;;  %v743_v62 = vcombine.high %v735_v1, %v735_v1  ;;  %v3301_v29 = vcombine.low %v30194_v46, %v30199_v42  ;;  %v30227_v56 = vrot.slane %v3302_v18, %v27673_v11  ;;  %v217_v46 = vld [vmem:[%s27678_s5 + $0x180] sm:$0xff] }
 0x1f2   : > { %25310 = vmatmul.mubr.msk.f32.gmra.mrb[46].mxu0 %vm2554_vm4, %v29812_v15  ;;  %v30230_v12 = vrot.slane %v3303_v40, %v27673_v11  ;;  %v745_v19 = vcombine.high %v203_v58, %v203_v58  ;;  %v744_v51 = vcombine.high %v742_v48, %v742_v48  ;;  %v769_v1 = vcombine.high %v205_v32, %v205_v32 }
 0x1f3   : > { %25312 = vmatprep.mubr.msk.f32.mxu0 %vm27572_vm3, %v33293_v36  ;;  %v3319_v22 = vcombine.low %v718_v50, %v720_v35  ;;  %v11155_v18 = vrot.slane %v30184_v47, %v27673_v11  ;;  %v10477_v40 = vcombine.high %v30100_v57, %v30100_v57  ;;  %v30248_v50 = vrot.slane %v3320_v4, %v27673_v11 }
 0x1f4   : > { %33452 = vst [vmem:[#allocation46_spill] sm:$0xff] %v30230_v12  ;;  %24802 = vmatmul.mubr.msk.f32.gmra.mrb[42].mxu1 %vm2554_vm4, %v3284_v5  ;;  %v759_v58 = vrot.slane %v745_v19, %v27673_v11  ;;  %v10469_v5 = vcombine.high %v10467_v17, %v10467_v17  ;;  %v760_v35 = vcombine.high %v752_v9, %v752_v9 }
 0x1f5   : > { %24804 = vmatprep.mubr.msk.f32.mxu1 %vm27572_vm3, %v33293_v36  ;;  %v776_v57 = vrot.slane %v205_v32, %v27673_v11  ;;  %v783_v59 = vrot.slane %v769_v1, %v27673_v11  ;;  %v786_v15 = vcombine.high %v206_v54, %v206_v54  ;;  %v3318_v19 = vcombine.low %v30227_v56, %v30230_v12  ;;  %v22739_v12 = vld.sshfl [vmem:[%s27678_s5 + $0x178] sm:$0x3 pattern:$0x76325410] }
 0x1f6   : > { %25313 = vmatmul.mubr.msk.f32.gmra.mrb[48].mxu0 %vm2554_vm4, %v29826_v2  ;;  %v3336_v2 = vcombine.low %v743_v62, %v742_v48  ;;  %v30258_v4 = vrot.slane %v3319_v22, %v27673_v11  ;;  %v3337_v0 = vcombine.low %v744_v51, %v752_v9  ;;  %v761_v48 = vcombine.high %v759_v58, %v759_v58  ;;  %v23186_v9 = vld [vmem:[%s27678_s5 + $0x18a] sm:$0xff] }
 0x1f7   : > { %25315 = vmatprep.mubr.msk.f32.mxu0 %vm27572_vm3, %v33293_v36  ;;  %v11179_v32 = vrot.slane %v11165_v28, %v27673_v11  ;;  %v10492_v62 = vcombine.high %v30124_v24, %v30124_v24  ;;  %v793_v1 = vrot.slane %v206_v54, %v27673_v11  ;;  %v33454_v51 = vrot.slane %v30108_v55, %v27673_v11 }
 0x1f8   : > { %24805 = vmatmul.mubr.msk.f32.gmra.mrb[44].mxu1 %vm2554_vm4, %v3301_v29  ;;  %33453 = vst [vmem:[#allocation41_spill] sm:$0xff] %v30258_v4  ;;  %v22735_v29 = vld.sshfl [vmem:[%s27678_s5 + $0x118] sm:$0x3 pattern:$0x76325410]  ;;  %v10491_v28 = vrot.slane %v10477_v40, %v27673_v11  ;;  %v800_v24 = vrot.slane %v786_v15, %v27673_v11  ;;  %v30280_v47 = vrot.slane %v3336_v2, %v27673_v11 }
 0x1f9   : > { %24807 = vmatprep.mubr.msk.f32.mxu1 %vm27572_vm3, %v33293_v36  ;;  %v30274_v22 = vcombine.low %v11155_v18, %v33454_v51  ;;  %v784_v41 = vcombine.high %v776_v57, %v776_v57  ;;  %v785_v23 = vcombine.high %v783_v59, %v783_v59  ;;  %v3335_v55 = vcombine.low %v30258_v4, %v30248_v50 }
 0x1fa   : > { %25316 = vmatmul.mubr.msk.f32.gmra.mrb[50].mxu0 %vm2554_vm4, %v29924_v39  ;;  %v11164_v39 = vcombine.low %v10467_v17, %v10469_v5  ;;  %v30289_v17 = vrot.slane %v3337_v0, %v27673_v11  ;;  %v3353_v18 = vcombine.low %v760_v35, %v759_v58  ;;  %v3354_v40 = vcombine.low %v761_v48, %v22735_v29 }
 0x1fb   : > { %25318 = vmatprep.mubr.msk.f32.mxu0 %vm27572_vm3, %v33293_v36  ;;  %v10501_v15 = vrot.slane %v23186_v9, %v27673_v11  ;;  %v10494_v5 = vcombine.high %v23186_v9, %v23186_v9  ;;  %v801_v2 = vcombine.high %v793_v1, %v793_v1  ;;  %v802_v51 = vcombine.high %v800_v24, %v800_v24 }
 0x1fc   : > { %24808 = vmatmul.mubr.msk.f32.gmra.mrb[46].mxu1 %vm2554_vm4, %v3318_v19  ;;  %v11172_v19 = vrot.slane %v11164_v39, %v27673_v11  ;;  %v810_v0 = vcombine.high %v208_v7, %v208_v7  ;;  %v817_v58 = vrot.slane %v208_v7, %v27673_v11  ;;  %v10493_v35 = vcombine.high %v10491_v28, %v10491_v28 }
 0x1fd   : > { %24810 = vmatprep.mubr.msk.f32.mxu1 %vm27572_vm3, %v33293_v36  ;;  %v3370_v48 = vcombine.low %v776_v57, %v784_v41  ;;  %v3352_v9 = vcombine.low %v30280_v47, %v30289_v17  ;;  %v30306_v54 = vrot.slane %v3353_v18, %v27673_v11  ;;  %v30309_v39 = vrot.slane %v3354_v40, %v27673_v11  ;;  %v209_v57 = vld [vmem:[%s27678_s5 + $0x140] sm:$0xff] }
 0x1fe   : > { %25319 = vmatmul.mubr.msk.f32.gmra.mrb[52].mxu0 %vm2554_vm4, %v29946_v45  ;;  %v3371_v45 = vcombine.low %v783_v59, %v785_v23  ;;  %v30315_v23 = vcombine.low %v10492_v62, %v10491_v28  ;;  %v10508_v41 = vrot.slane %v10494_v5, %v27673_v11  ;;  %v3387_v59 = vcombine.low %v793_v1, %v801_v2  ;;  %v22736_v2 = vld.sshfl [vmem:[%s27678_s5 + $0x130] sm:$0x3 pattern:$0x76325410] }
 0x1ff   : > { %25321 = vmatprep.mubr.msk.f32.mxu0 %vm27572_vm3, %v33293_v36  ;;  %v824_v18 = vrot.slane %v810_v0, %v27673_v11  ;;  %v825_v40 = vcombine.high %v817_v58, %v817_v58  ;;  %v30326_v62 = vcombine.low %v11172_v19, %v11179_v32  ;;  %v10509_v28 = vcombine.high %v10501_v15, %v10501_v15  ;;  %v211_v32 = vld [vmem:[%s27678_s5 + $0x150] sm:$0xff] }
 0x200   : > { %24811 = vmatmul.mubr.msk.f32.gmra.mrb[48].mxu1 %vm2554_vm4, %v3335_v55  ;;  %v3388_v55 = vcombine.low %v800_v24, %v802_v51  ;;  %v30329_v5 = vrot.slane %v3370_v48, %v27673_v11  ;;  %v30332_v1 = vrot.slane %v3371_v45, %v27673_v11  ;;  %v3369_v24 = vcombine.low %v30306_v54, %v30309_v39 }
 0x201   : > { %24813 = vmatprep.mubr.msk.f32.mxu1 %vm27572_vm3, %v33293_v36  ;;  %v827_v51 = vcombine.high %v209_v57, %v209_v57  ;;  %v834_v0 = vrot.slane %v209_v57, %v27673_v11  ;;  %v30344_v48 = vcombine.low %v10493_v35, %v10501_v15  ;;  %v10510_v7 = vcombine.high %v10508_v41, %v10508_v41  ;;  %v23188_v57 = vld [vmem:[%s27678_s5 + $0x19a] sm:$0xff] }
 0x202   : > { %25322 = vmatmul.mubr.msk.f32.gmra.mrb[54].mxu0 %vm2554_vm4, %v33455_v60  ;;  %v33456_v60 = vld [vmem:[#allocation43_spill] sm:$0xff]  ;;  %v30355_v19 = vrot.slane %v3387_v59, %v27673_v11  ;;  %v3404_v15 = vcombine.low %v22736_v2, %v817_v58  ;;  %v3405_v35 = vcombine.low %v825_v40, %v824_v18  ;;  %v11198_v29 = vcombine.low %v10509_v28, %v10508_v41 }
 0x203   : > { %25324 = vmatprep.mubr.msk.f32.mxu0 %vm27572_vm3, %v33293_v36  ;;  %v826_v45 = vcombine.high %v824_v18, %v824_v18  ;;  %v858_v34 = vrot.slane %v211_v32, %v27673_v11  ;;  %v3386_v52 = vcombine.low %v30329_v5, %v30332_v1  ;;  %v841_v59 = vrot.slane %v827_v51, %v27673_v11 }
 0x204   : > { %24814 = vmatmul.mubr.msk.f32.gmra.mrb[50].mxu1 %vm2554_vm4, %v3352_v9  ;;  %v23209_v9 = vld.sshfl [vmem:[%s27678_s5 + $0x192] sm:$0x3 pattern:$0x76325410]  ;;  %v842_v26 = vcombine.high %v834_v0, %v834_v0  ;;  %v851_v14 = vcombine.high %v211_v32, %v211_v32  ;;  %v10518_v41 = vcombine.high %v23188_v57, %v23188_v57  ;;  %v10525_v18 = vrot.slane %v23188_v57, %v27673_v11 }
 0x205   : > { %24816 = vmatprep.mubr.msk.f32.mxu1 %vm27572_vm3, %v33293_v36  ;;  %v11199_v58 = vcombine.low %v10510_v7, %v23209_v9  ;;  %v30378_v28 = vrot.slane %v3404_v15, %v27673_v11  ;;  %v30381_v2 = vrot.slane %v3405_v35, %v27673_v11  ;;  %v3421_v7 = vcombine.low %v826_v45, %v834_v0 }
 0x206   : > { %25325 = vmatmul.mubr.msk.f32.gmra.mrb[56].mxu0 %vm2554_vm4, %v33456_v60  ;;  %v30358_v60 = vrot.slane %v3388_v55, %v27673_v11  ;;  %v212_v55 = vld [vmem:[%s27678_s5 + $0x158] sm:$0xff]  ;;  %v866_v51 = vcombine.high %v858_v34, %v858_v34  ;;  %v3422_v57 = vcombine.low %v842_v26, %v841_v59  ;;  %v865_v15 = vrot.slane %v851_v14, %v27673_v11  ;;  %v214_v26 = vld [vmem:[%s27678_s5 + $0x168] sm:$0xff] }
 0x207   : > { %25327 = vmatprep.mubr.msk.f32.mxu0 %vm27572_vm3, %v33293_v36  ;;  %33458 = vst [vmem:[#allocation17_spill] sm:$0xff] %v30378_v28  ;;  %33459 = vst [vmem:[#allocation18_spill] sm:$0xff] %v30381_v2  ;;  %v875_v32 = vrot.slane %v212_v55, %v27673_v11  ;;  %v868_v63 = vcombine.high %v212_v55, %v212_v55  ;;  %v11196_v0 = vrot.slane %v30344_v48, %v27673_v11 }
 0x208   : > { %33457 = vst [vmem:[#allocation47_spill] sm:$0xff] %v30358_v60  ;;  %24817 = vmatmul.mubr.msk.f32.gmra.mrb[52].mxu1 %vm2554_vm4, %v3369_v24  ;;  %v3403_v40 = vcombine.low %v30355_v19, %v30358_v60  ;;  %v22737_v24 = vld.sshfl [vmem:[%s27678_s5 + $0x148] sm:$0x3 pattern:$0x76325410]  ;;  %v11206_v45 = vrot.slane %v11198_v29, %v27673_v11  ;;  %v10532_v16 = vrot.slane %v10518_v41, %v27673_v11 }
 0x209   : > { %24819 = vmatprep.mubr.msk.f32.mxu1 %vm27572_vm3, %v33293_v36  ;;  %v11213_v14 = vrot.slane %v11199_v58, %v27673_v11  ;;  %v30407_v29 = vrot.slane %v3421_v7, %v27673_v11  ;;  %v3439_v55 = vcombine.low %v858_v34, %v866_v51  ;;  %v883_v41 = vcombine.high %v875_v32, %v875_v32 }
 0x20a   : > { %25328 = vmatmul.mubr.msk.f32.gmra.mrb[58].mxu0 %vm2554_vm4, %v30077_v33  ;;  %v843_v33 = vcombine.high %v841_v59, %v841_v59  ;;  %v23189_v59 = vld [vmem:[%s27678_s5 + $0x1a2] sm:$0xff]  ;;  %v30413_v9 = vrot.slane %v3422_v57, %v27673_v11  ;;  %v867_v58 = vcombine.high %v865_v15, %v865_v15  ;;  %v882_v49 = vrot.slane %v868_v63, %v27673_v11 }
 0x20b   : > { %25330 = vmatprep.mubr.msk.f32.mxu0 %vm27572_vm3, %v33293_v36  ;;  %33460 = vst [vmem:[#allocation49_spill] sm:$0xff] %v30407_v29  ;;  %v33461_v34 = vrot.slane %v30315_v23, %v27673_v11  ;;  %v30428_v63 = vcombine.low %v11206_v45, %v11213_v14  ;;  %v30435_v23 = vrot.slane %v3439_v55, %v27673_v11 }
 0x20c   : > { %24820 = vmatmul.mubr.msk.f32.gmra.mrb[54].mxu1 %vm2554_vm4, %v3386_v52  ;;  %v10533_v52 = vcombine.high %v10525_v18, %v10525_v18  ;;  %v3438_v48 = vcombine.low %v843_v33, %v22737_v24  ;;  %v892_v33 = vcombine.high %v214_v26, %v214_v26  ;;  %v10534_v24 = vcombine.high %v10532_v16, %v10532_v16 }
 0x20d   : > { %24822 = vmatprep.mubr.msk.f32.mxu1 %vm27572_vm3, %v33293_v36  ;;  %v30422_v7 = vcombine.low %v33461_v34, %v11196_v0  ;;  %v3456_v0 = vcombine.low %v875_v32, %v883_v41  ;;  %v22738_v34 = vld.sshfl [vmem:[%s27678_s5 + $0x160] sm:$0x3 pattern:$0x76325410]  ;;  %v909_v35 = vcombine.high %v215_v61, %v215_v61  ;;  %v3455_v45 = vcombine.low %v865_v15, %v867_v58 }
 0x20e   : > { %25331 = vmatmul.mubr.msk.f32.gmra.mrb[60].mxu0 %vm2554_vm4, %v30084_v30  ;;  %v3420_v30 = vcombine.low %v30378_v28, %v30381_v2  ;;  %v11215_v51 = vcombine.low %v10525_v18, %v10533_v52  ;;  %v30431_v57 = vrot.slane %v3438_v48, %v27673_v11  ;;  %v3437_v18 = vcombine.low %v30407_v29, %v30413_v9  ;;  %v3969_v2 = vld [vmem:[%s27678_s5 + $0x7a] sm:$0xff] }
 0x20f   : > { %25333 = vmatprep.mubr.msk.f32.mxu0 %vm27572_vm3, %v33293_v36  ;;  %v884_v14 = vcombine.high %v882_v49, %v882_v49  ;;  %v906_v52 = vrot.slane %v892_v33, %v27673_v11  ;;  %v10542_v32 = vrot.slane %v23189_v59, %v27673_v11  ;;  %v933_v55 = vcombine.high %v217_v46, %v217_v46 }
 0x210   : > { %24823 = vmatmul.mubr.msk.f32.gmra.mrb[56].mxu1 %vm2554_vm4, %v3403_v40  ;;  %v10535_v40 = vcombine.high %v23189_v59, %v23189_v59  ;;  %v923_v58 = vrot.slane %v909_v35, %v27673_v11  ;;  %v30464_v33 = vrot.slane %v3455_v45, %v27673_v11  ;;  %v218_v35 = vld [vmem:[%s27678_s5 + $0x188] sm:$0xff] }
 0x211   : > { %24825 = vmatprep.mubr.msk.f32.mxu1 %vm27572_vm3, %v33293_v36  ;;  %v10550_v41 = vcombine.high %v10542_v32, %v10542_v32 }
 0x212   : > { %25334 = vmatmul.mubr.msk.f32.gmra.mrb[62].mxu0 %vm2554_vm4, %v30089_v27  ;;  %v899_v27 = vrot.slane %v214_v26, %v27673_v11  ;;  %v11216_v26 = vcombine.low %v10532_v16, %v10534_v24  ;;  %v10549_v48 = vrot.slane %v10535_v40, %v27673_v11  ;;  %v30459_v16 = vrot.slane %v3456_v0, %v27673_v11 }
 0x213   : > { %25336 = vmatprep.mubr.msk.f32.mxu0 %vm27572_vm3, %v33293_v36  ;;  %v3472_v24 = vcombine.low %v882_v49, %v884_v14  ;;  %v908_v40 = vcombine.high %v906_v52, %v906_v52 }
 0x214   : > { %24826 = vmatmul.mubr.msk.f32.gmra.mrb[58].mxu1 %vm2554_vm4, %v3420_v30  ;;  %v11223_v30 = vrot.slane %v11215_v51, %v27673_v11  ;;  %v3473_v15 = vcombine.low %v22738_v34, %v899_v27  ;;  %v907_v59 = vcombine.high %v899_v27, %v899_v27  ;;  %v916_v51 = vrot.slane %v215_v61, %v27673_v11  ;;  %v23191_v27 = vld [vmem:[%s27678_s5 + $0x1b2] sm:$0xff] }
 0x215   : > { %24828 = vmatprep.mubr.msk.f32.mxu1 %vm27572_vm3, %v33293_v36  ;;  %v11230_v34 = vrot.slane %v11216_v26, %v27673_v11  ;;  %v10551_v0 = vcombine.high %v10549_v48, %v10549_v48  ;;  %v940_v61 = vrot.slane %v217_v46, %v27673_v11  ;;  %v925_v26 = vcombine.high %v923_v58, %v923_v58 }
 0x216   : > { %25337 = vmatmul.mubr.msk.f32.gmra.mrb[64].mxu0 %vm2554_vm4, %v30091_v13  ;;  %v3454_v13 = vcombine.low %v30431_v57, %v30435_v23  ;;  %v30477_v49 = vrot.slane %v3473_v15, %v27673_v11  ;;  %v3489_v45 = vcombine.low %v907_v59, %v906_v52  ;;  %v924_v14 = vcombine.high %v916_v51, %v916_v51 }
 0x217   : > { %25339 = vmatprep.mubr.msk.f32.mxu0 %vm27572_vm3, %v33293_v36  ;;  %v3471_v4 = vcombine.low %v30464_v33, %v30459_v16  ;;  %v30489_v15 = vrot.slane %v3472_v24, %v27673_v11  ;;  %v3490_v46 = vcombine.low %v908_v40, %v916_v51  ;;  %v30494_v52 = vcombine.low %v10542_v32, %v10550_v41 }
 0x218   : > { %24829 = vmatmul.mubr.msk.f32.gmra.mrb[60].mxu1 %vm2554_vm4, %v3437_v18  ;;  %33462 = vst [vmem:[#allocation22_spill] sm:$0xff] %v30477_v49  ;;  %v10559_v59 = vcombine.high %v23191_v27, %v23191_v27  ;;  %v30502_v24 = vcombine.low %v11223_v30, %v11230_v34  ;;  %v10566_v40 = vrot.slane %v23191_v27, %v27673_v11 }
 0x219   : > { %24831 = vmatprep.mubr.msk.f32.mxu1 %vm27572_vm3, %v33293_v36  ;;  %v948_v51 = vcombine.high %v940_v61, %v940_v61  ;;  %v3506_v32 = vcombine.low %v924_v14, %v923_v58  ;;  %v3507_v41 = vcombine.low %v925_v26, %v22739_v12  ;;  %v30514_v30 = vrot.slane %v3490_v46, %v27673_v11 }
 0x21a   : > { %25340 = vmatmul.mubr.msk.f32.gmra.mrb[66].mxu0 %vm2554_vm4, %v30097_v3  ;;  %v947_v3 = vrot.slane %v933_v55, %v27673_v11  ;;  %v950_v55 = vcombine.high %v218_v35, %v218_v35  ;;  %v957_v34 = vrot.slane %v218_v35, %v27673_v11  ;;  %v11233_v12 = vcombine.low %v10549_v48, %v10551_v0  ;;  %v23192_v35 = vld [vmem:[%s27678_s5 + $0x1ba] sm:$0xff] }
 0x21b   : > { %25342 = vmatprep.mubr.msk.f32.mxu0 %vm27572_vm3, %v33293_v36  ;;  %33464 = vst [vmem:[#allocation50_spill] sm:$0xff] %v30514_v30  ;;  %v11240_v58 = vrot.slane %v30494_v52, %v27673_v11  ;;  %v10574_v14 = vcombine.high %v10566_v40, %v10566_v40  ;;  %v3523_v26 = vcombine.low %v940_v61, %v948_v51 }
 0x21c   : > { %24832 = vmatmul.mubr.msk.f32.gmra.mrb[62].mxu1 %vm2554_vm4, %v3454_v13  ;;  %v949_v37 = vcombine.high %v947_v3, %v947_v3  ;;  %v3488_v13 = vcombine.low %v30489_v15, %v30477_v49  ;;  %v964_v27 = vrot.slane %v950_v55, %v27673_v11  ;;  %v30533_v48 = vrot.slane %v3506_v32, %v27673_v11  ;;  %v3973_v49 = vld [vmem:[%s27678_s5 + $0x9a] sm:$0xff] }
 0x21d   : > { %24834 = vmatprep.mubr.msk.f32.mxu1 %vm27572_vm3, %v33293_v36  ;;  %v30536_v0 = vrot.slane %v3507_v41, %v27673_v11  ;;  %v11247_v32 = vrot.slane %v11233_v12, %v27673_v11  ;;  %v10576_v41 = vcombine.high %v23192_v35, %v23192_v35  ;;  %v10583_v55 = vrot.slane %v23192_v35, %v27673_v11 }
 0x21e   : > { %25343 = vmatmul.mubr.msk.f32.gmra.mrb[68].mxu0 %vm2554_vm4, %v30274_v22  ;;  %v30506_v22 = vrot.slane %v3489_v45, %v27673_v11  ;;  %v220_v45 = vld [vmem:[%s27678_s5 + $0x198] sm:$0xff]  ;;  %v3524_v46 = vcombine.low %v947_v3, %v949_v37  ;;  %33465 = vst [vmem:[#allocation24_spill] sm:$0xff] %v30533_v48  ;;  %v965_v37 = vcombine.high %v957_v34, %v957_v34 }
 0x21f   : > { %25345 = vmatprep.mubr.msk.f32.mxu0 %vm27572_vm3, %v33293_v36  ;;  %33466 = vst [vmem:[#allocation28_spill] sm:$0xff] %v30536_v0  ;;  %v974_v52 = vcombine.high %v220_v45, %v220_v45  ;;  %v966_v3 = vcombine.high %v964_v27, %v964_v27  ;;  %v30554_v51 = vrot.slane %v3523_v26, %v27673_v11 }
 0x220   : > { %33463 = vst [vmem:[#allocation23_spill] sm:$0xff] %v30506_v22  ;;  %24835 = vmatmul.mubr.msk.f32.gmra.mrb[64].mxu1 %vm2554_vm4, %v3471_v4  ;;  %v10573_v4 = vrot.slane %v10559_v59, %v27673_v11  ;;  %v981_v59 = vrot.slane %v220_v45, %v27673_v11  ;;  %v3505_v61 = vcombine.low %v30506_v22, %v30514_v30 }
 0x221   : > { %24837 = vmatprep.mubr.msk.f32.mxu1 %vm27572_vm3, %v33293_v36  ;;  %33467 = vst [vmem:[#allocation61_spill] sm:$0xff] %v30554_v51  ;;  %v3522_v12 = vcombine.low %v30533_v48, %v30536_v0  ;;  %v988_v35 = vrot.slane %v974_v52, %v27673_v11  ;;  %v3540_v28 = vcombine.low %v957_v34, %v965_v37  ;;  %v33469_v0 = vld [vmem:[#allocation21_spill] sm:$0xff] }
 0x222   : > { %25346 = vmatmul.mubr.msk.f32.gmra.mrb[70].mxu0 %vm2554_vm4, %v30326_v62  ;;  %v23210_v62 = vld.sshfl [vmem:[%s27678_s5 + $0x1aa] sm:$0x3 pattern:$0x76325410]  ;;  %v11250_v18 = vcombine.low %v10574_v14, %v10573_v4  ;;  %v989_v29 = vcombine.high %v981_v59, %v981_v59  ;;  %v10590_v60 = vrot.slane %v10576_v41, %v27673_v11  ;;  %v10591_v52 = vcombine.high %v10583_v55, %v10583_v55 }
 0x223   : > { %25348 = vmatprep.mubr.msk.f32.mxu0 %vm27572_vm3, %v33293_v36  ;;  %v11249_v45 = vcombine.low %v23210_v62, %v10566_v40  ;;  %v3541_v40 = vcombine.low %v964_v27, %v966_v3  ;;  %v22740_v14 = vld.sshfl [vmem:[%s27678_s5 + $0x190] sm:$0x3 pattern:$0x76325410]  ;;  %v30582_v41 = vrot.slane %v3540_v28, %v27673_v11  ;;  %v3972_v28 = vld [vmem:[%s27678_s5 + $0x92] sm:$0xff] }
 0x224   : > { %24838 = vmatmul.mubr.msk.f32.gmra.mrb[66].mxu1 %vm2554_vm4, %v3488_v13  ;;  %v221_v13 = vld [vmem:[%s27678_s5 + $0x1a0] sm:$0xff]  ;;  %v11264_v27 = vrot.slane %v11250_v18, %v27673_v11  ;;  %v3557_v37 = vcombine.low %v22740_v14, %v981_v59 }
 0x225   : > { %24840 = vmatprep.mubr.msk.f32.mxu1 %vm27572_vm3, %v33293_v36  ;;  %v991_v62 = vcombine.high %v221_v13, %v221_v13  ;;  %v998_v26 = vrot.slane %v221_v13, %v27673_v11  ;;  %v11257_v34 = vrot.slane %v11249_v45, %v27673_v11  ;;  %v30585_v13 = vrot.slane %v3541_v40, %v27673_v11 }
 0x226   : > { %25349 = vmatmul.mubr.msk.f32.gmra.mrb[72].mxu0 %vm2554_vm4, %v30422_v7  ;;  %v30557_v7 = vrot.slane %v3524_v46, %v27673_v11  ;;  %v10575_v46 = vcombine.high %v10573_v4, %v10573_v4  ;;  %v990_v4 = vcombine.high %v988_v35, %v988_v35 }
 0x227   : > { %25351 = vmatprep.mubr.msk.f32.mxu0 %vm27572_vm3, %v33293_v36  ;;  %v1005_v45 = vrot.slane %v991_v62, %v27673_v11  ;;  %v1006_v18 = vcombine.high %v998_v26, %v998_v26  ;;  %v4274_v62 = vrot.slane %v3969_v2, %v27673_v11 }
 0x228   : > { %24841 = vmatmul.mubr.msk.f32.gmra.mrb[68].mxu1 %vm2554_vm4, %v3505_v61  ;;  %v3539_v61 = vcombine.low %v30554_v51, %v30557_v7  ;;  %v11266_v59 = vcombine.low %v10575_v46, %v10583_v55  ;;  %v11265_v55 = vcombine.low %v11257_v34, %v11264_v27  ;;  %v23211_v34 = vld.sshfl [vmem:[%s27678_s5 + $0x1c2] sm:$0x3 pattern:$0x76325410]  ;;  %v33468_v51 = vld [vmem:[#allocation31_spill] sm:$0xff] }
 0x229   : > { %24843 = vmatprep.mubr.msk.f32.mxu1 %vm27572_vm3, %v33293_v36  ;;  %v3575_v14 = vcombine.low %v1006_v18, %v1005_v45  ;;  %v12553_v48 = vcombine.low %v33469_v0, %v33468_v51 }
 0x22a   : > { %25352 = vmatmul.mubr.msk.f32.gmra.mrb[74].mxu0 %vm2554_vm4, %v30428_v63  ;;  %v3558_v63 = vcombine.low %v989_v29, %v988_v35  ;;  %v11248_v29 = vcombine.low %v11240_v58, %v11247_v32  ;;  %v11267_v35 = vcombine.low %v10591_v52, %v10590_v60  ;;  %v4267_v58 = vcombine.high %v3969_v2, %v3969_v2 }
 0x22b   : > { %25354 = vmatprep.mubr.msk.f32.mxu0 %vm27572_vm3, %v33293_v36  ;;  %v3556_v32 = vcombine.low %v30582_v41, %v30585_v13  ;;  %v11274_v46 = vrot.slane %v11266_v59, %v27673_v11  ;;  %v30627_v18 = vrot.slane %v3575_v14, %v27673_v11  ;;  %v4282_v59 = vcombine.high %v4274_v62, %v4274_v62 }
 0x22c   : > { %24844 = vmatmul.mubr.msk.f32.gmra.mrb[70].mxu1 %vm2554_vm4, %v3522_v12  ;;  %v30598_v12 = vrot.slane %v3557_v37, %v27673_v11  ;;  %v30601_v40 = vrot.slane %v3558_v63, %v27673_v11  ;;  %v11281_v52 = vrot.slane %v11267_v35, %v27673_v11  ;;  %v10592_v37 = vcombine.high %v10590_v60, %v10590_v60  ;;  %v22741_v63 = vld.sshfl [vmem:[%s27678_s5 + $0x1a8] sm:$0x3 pattern:$0x76325410] }
 0x22d   : > { %24846 = vmatprep.mubr.msk.f32.mxu1 %vm27572_vm3, %v33293_v36  ;;  %v1007_v60 = vcombine.high %v1005_v45, %v1005_v45  ;;  %v4308_v45 = vcombine.high %v3972_v28, %v3972_v28 }
 0x22e   : > { %25355 = vmatmul.mubr.msk.f32.gmra.mrb[76].mxu0 %vm2554_vm4, %v30502_v24  ;;  %v3574_v24 = vcombine.low %v990_v4, %v998_v26  ;;  %v3970_v26 = vld [vmem:[%s27678_s5 + $0x82] sm:$0xff]  ;;  %v3573_v27 = vcombine.low %v30598_v12, %v30601_v40  ;;  %v4281_v4 = vrot.slane %v4267_v58, %v27673_v11  ;;  %v11283_v3 = vcombine.low %v10592_v37, %v23211_v34 }
 0x22f   : > { %25357 = vmatprep.mubr.msk.f32.mxu0 %vm27572_vm3, %v33293_v36  ;;  %v4284_v35 = vcombine.high %v3970_v26, %v3970_v26  ;;  %v4291_v2 = vrot.slane %v3970_v26, %v27673_v11  ;;  %v4315_v26 = vrot.slane %v3972_v28, %v27673_v11  ;;  %v4322_v28 = vrot.slane %v4308_v45, %v27673_v11 }
 0x230   : > { %24847 = vmatmul.mubr.msk.f32.gmra.mrb[72].mxu1 %vm2554_vm4, %v3539_v61  ;;  %v30621_v61 = vrot.slane %v3574_v24, %v27673_v11  ;;  %v11282_v24 = vcombine.low %v11274_v46, %v11281_v52  ;;  %v4283_v22 = vcombine.high %v4281_v4, %v4281_v4  ;;  %v4991_v46 = vcombine.low %v4282_v59, %v4281_v4 }
 0x231   : > { %24849 = vmatprep.mubr.msk.f32.mxu1 %vm27572_vm3, %v33293_v36  ;;  %v4298_v52 = vrot.slane %v4284_v35, %v27673_v11  ;;  %v4299_v37 = vcombine.high %v4291_v2, %v4291_v2  ;;  %v11290_v34 = vrot.slane %v11283_v3, %v27673_v11  ;;  %v23445_v3 = vld [vmem:[%s33113_s1 + $0x78] sm:$0xf]  ;;  %v4323_v59 = vcombine.high %v4315_v26, %v4315_v26 }
 0x232   : > { %25358 = vmatmul.mubr.msk.f32.gmra.mrb[78].mxu0 %vm2554_vm4, %v11248_v29  ;;  %v22850_v29 = vld.sshfl [vmem:[%s27678_s5 + $0x72] sm:$0x3 pattern:$0x76325410]  ;;  %v5007_v4 = vcombine.low %v4283_v22, %v4291_v2  ;;  %v4325_v58 = vcombine.high %v3973_v49, %v3973_v49  ;;  %v3975_v22 = vld [vmem:[%s27678_s5 + $0xaa] sm:$0xff] }
 0x233   : > { %25360 = vmatprep.mubr.msk.f32.mxu0 %vm27572_vm3, %v33293_v36  ;;  %v4990_v14 = vcombine.low %v22850_v29, %v4274_v62  ;;  %v4332_v62 = vrot.slane %v3973_v49, %v27673_v11  ;;  %v4300_v29 = vcombine.high %v4298_v52, %v4298_v52  ;;  %v5008_v45 = vcombine.low %v4299_v37, %v4298_v52 }
 0x234   : > { %24850 = vmatmul.mubr.msk.f32.gmra.mrb[74].mxu1 %vm2554_vm4, %v3556_v32  ;;  %v3591_v32 = vcombine.low %v1007_v60, %v22741_v63  ;;  %v23444_v63 = vld [vmem:[%s33113_s1 + $0x70] sm:$0xff]  ;;  %v5015_v49 = vrot.slane %v5007_v4, %v27673_v11  ;;  %v5025_v52 = vcombine.low %v4315_v26, %v4323_v59  ;;  %v4339_v37 = vrot.slane %v4325_v58, %v27673_v11 }
 0x235   : > { %24852 = vmatprep.mubr.msk.f32.mxu1 %vm27572_vm3, %v33293_v36  ;;  %v4998_v35 = vrot.slane %v4990_v14, %v27673_v11  ;;  %v26247_v2 = vpack.c.bf16 %v23445_v3, %v23444_v63  ;;  %v4340_v14 = vcombine.high %v4332_v62, %v4332_v62  ;;  %v5022_v51 = vrot.slane %v5008_v45, %v27673_v11  ;;  %v33470_v63 = vld [vmem:[#allocation12_spill] sm:$0xff] }
 0x236   : > { %25361 = vmatmul.mubr.msk.f32.gmra.mrb[80].mxu0 %vm2554_vm4, %v11265_v55  ;;  %v3590_v55 = vcombine.low %v30621_v61, %v30627_v18  ;;  %v30662_v60 = vrot.slane %v3591_v32, %v27673_v11  ;;  %v4324_v32 = vcombine.high %v4322_v28, %v4322_v28  ;;  %v33471_v3 = vld [vmem:[#allocation20_spill] sm:$0xff]  ;;  %v4356_v26 = vrot.slane %v3975_v22, %v27673_v11 }
 0x237   : > { %25363 = vmatprep.mubr.msk.f32.mxu0 %vm27572_vm3, %v33293_v36  ;;  %v12570_v30 = vcombine.low %v33471_v3, %v33470_v63  ;;  %v33473_v45 = vmov 0.0|0.0   ;;  %v4341_v63 = vcombine.high %v4339_v37, %v4339_v37 }
 0x238   : > { %24853 = vmatmul.mubr.msk.f32.gmra.mrb[76].mxu1 %vm2554_vm4, %v3573_v27  ;;  %v22851_v27 = vld.sshfl [vmem:[%s27678_s5 + $0x8a] sm:$0x3 pattern:$0x76325410]  ;;  %v5041_v58 = vcombine.low %v4322_v28, %v4324_v32 }
 0x239   : > { %24855 = vmatprep.mubr.msk.f32.mxu1 %vm27572_vm3, %v33293_v36 }
 0x23a   : > { %25364 = vmatmul.mubr.msk.f32.gmra.mrb[98].mxu0 %vm2554_vm4, %v11282_v24  ;;  %v5005_v24 = vrot.slane %v4991_v46, %v27673_v11  ;;  %v5024_v46 = vcombine.low %v4300_v29, %v22851_v27  ;;  %v3976_v27 = vld [vmem:[%s27678_s5 + $0xb2] sm:$0xff]  ;;  %v5042_v29 = vcombine.low %v4332_v62, %v4340_v14  ;;  %v5049_v28 = vrot.slane %v5041_v58, %v27673_v11  ;;  %v33474_v58 = vld [vmem:[#allocation25_spill] sm:$0xff] }
 0x23b   : > { %25366 = vmatprep.mubr.msk.f32.mxu0 %vm27572_vm3, %v33293_v36  ;;  %v4366_v3 = vcombine.high %v3976_v27, %v3976_v27  ;;  %v13131_v14 = vcombine.low %v30601_v40, %v30621_v61 }
 0x23c   : > { %24856 = vmatmul.mubr.msk.f32.gmra.mrb[86].mxu1 %vm2554_vm4, %v3590_v55  ;;  %v5006_v0 = vcombine.low %v4998_v35, %v5005_v24  ;;  %v5032_v59 = vrot.slane %v5024_v46, %v27673_v11  ;;  %v5039_v35 = vrot.slane %v5025_v52, %v27673_v11  ;;  %v22852_v24 = vld.sshfl [vmem:[%s27678_s5 + $0xa2] sm:$0x3 pattern:$0x76325410]  ;;  %v5056_v62 = vrot.slane %v5042_v29, %v27673_v11 }
 0x23d   : > { %24858 = vmatprep.mubr.msk.f32.mxu1 %vm27572_vm3, %v33293_v36  ;;  %v3978_v55 = vld [vmem:[%s27678_s5 + $0xc2] sm:$0xff]  ;;  %v5059_v32 = vcombine.low %v22852_v24, %v4356_v26  ;;  %v4364_v46 = vcombine.high %v4356_v26, %v4356_v26 }
 0x23e   : > { %25367 = vmatmul.mubr.msk.f32.gmra.mrb[100].mxu0 %vm2554_vm4, %v11290_v34  ;;  %v4349_v34 = vcombine.high %v3975_v22, %v3975_v22  ;;  %v5023_v22 = vcombine.low %v5015_v49, %v5022_v51  ;;  %v5040_v49 = vcombine.low %v5032_v59, %v5039_v35  ;;  %v4390_v52 = vcombine.high %v3978_v55, %v3978_v55 }
 0x23f   : > { %25373 = vmatprep.mubr.msk.f32.mxu0 %vm27572_vm3, %v33293_v36  ;;  %v4373_v51 = vrot.slane %v3976_v27, %v27673_v11  ;;  %v5057_v26 = vcombine.low %v5049_v28, %v5056_v62  ;;  %v13148_v27 = vcombine.low %v30627_v18, %v30662_v60  ;;  %v4397_v59 = vrot.slane %v3978_v55, %v27673_v11  ;;  %v22853_v55 = vld.sshfl [vmem:[%s27678_s5 + $0xba] sm:$0x3 pattern:$0x76325410] }
 0x240   : > { %24859 = vmatmul.mubr.msk.f32.gmra.mrb[88].mxu1 %vm2554_vm4, %v30662_v60 }
 0x241   : > { %24898 = vmatprep.mubr.msk.f32.mxu1 %vm27572_vm3, %v33293_v36  ;;  %v4381_v29 = vcombine.high %v4373_v51, %v4373_v51 }
 0x242   : > { %25374 = vmatmul.mubr.msk.f32.vlgmr.msra.gmra.mrb[102].mxu0 %vm2554_vm4, %v12553_v48  ;;  %v33475_v48 = vcombine.low %v29743_v6, %v33474_v58  ;;  %v4404_v6 = vrot.slane %v4390_v52, %v27673_v11  ;;  %v33479_v58 = vld [vmem:[#allocation35_spill] sm:$0xff] }
 0x243   : > { %26249 = vmatpush3.bf16.msk.msra.mxu0 %vm27653_vm2, %v26247_v2  ;;  %25376 = vmatprep.mubr.msk.f32.mxu0 %vm27572_vm3, %v33293_v36  ;;  %v4363_v2 = vrot.slane %v4349_v34, %v27673_v11  ;;  %v4380_v34 = vrot.slane %v4366_v3, %v27673_v11  ;;  %v33476_v3 = vld [vmem:[#allocation26_spill] sm:$0xff] }
 0x244   : > { %26250 = vmatprep.subr.bf16.mxu0 %v33473_v45  ;;  %24899 = vmatmul.mubr.msk.f32.vlgmr.msra.gmra.mrb[22].mxu1 %vm2554_vm4, %v5006_v0  ;;  %v3979_v45 = vld [vmem:[%s27678_s5 + $0xca] sm:$0xff]  ;;  %v33477_v28 = vcombine.low %v29769_v21, %v33476_v3 }
 0x245   : > { %24901 = vmatprep.mubr.msk.f32.mxu1 %vm27572_vm3, %v33293_v36  ;;  %v4365_v0 = vcombine.high %v4363_v2, %v4363_v2  ;;  %v4407_v35 = vcombine.high %v3979_v45, %v3979_v45  ;;  %v5075_v24 = vcombine.low %v4364_v46, %v4363_v2  ;;  %v4414_v62 = vrot.slane %v3979_v45, %v27673_v11 }
 0x246   : > { %25377 = vmatmul.mubr.msk.f32.gmra.mrb[104].mxu0 %vm2554_vm4, %v12570_v30  ;;  %v5058_v30 = vcombine.low %v4339_v37, %v4341_v63  ;;  %v5073_v37 = vrot.slane %v5059_v32, %v27673_v11  ;;  %v4382_v63 = vcombine.high %v4380_v34, %v4380_v34  ;;  %v5092_v32 = vcombine.low %v4381_v29, %v4380_v34  ;;  %v3981_v34 = vld [vmem:[%s27678_s5 + $0xda] sm:$0xff] }
 0x247   : > { %25379 = vmatprep.mubr.msk.f32.mxu0 %vm27572_vm3, %v33293_v36  ;;  %v4406_v2 = vcombine.high %v4404_v6, %v4404_v6  ;;  %v4421_v46 = vrot.slane %v4407_v35, %v27673_v11  ;;  %v5083_v52 = vrot.slane %v5075_v24, %v27673_v11  ;;  %v4422_v45 = vcombine.high %v4414_v62, %v4414_v62 }
 0x248   : > { %24902 = vmatmul.mubr.msk.f32.gmra.mrb[24].mxu1 %vm2554_vm4, %v5023_v22  ;;  %v5076_v22 = vcombine.low %v4365_v0, %v4373_v51  ;;  %v5093_v0 = vcombine.low %v4382_v63, %v22853_v55  ;;  %v33478_v51 = vld [vmem:[#allocation34_spill] sm:$0xff]  ;;  %v4438_v63 = vrot.slane %v3981_v34, %v27673_v11  ;;  %v33481_v55 = vld [vmem:[#allocation13_spill] sm:$0xff] }
 0x249   : > { %24904 = vmatprep.mubr.msk.f32.mxu1 %vm27572_vm3, %v33293_v36  ;;  %v33480_v3 = vcombine.low %v33478_v51, %v33479_v58  ;;  %v5110_v29 = vcombine.low %v4404_v6, %v4406_v2  ;;  %v4423_v35 = vcombine.high %v4421_v46, %v4421_v46  ;;  %v33482_v51 = vld [vmem:[#allocation36_spill] sm:$0xff] }
 0x24a   : > { %25380 = vmatmul.mubr.msk.f32.gmra.mrb[4].mxu0 %vm2554_vm4, %v33475_v48  ;;  %v5066_v48 = vrot.slane %v5058_v30, %v27673_v11  ;;  %v5090_v30 = vrot.slane %v5076_v22, %v27673_v11  ;;  %v5107_v24 = vrot.slane %v5093_v0, %v27673_v11  ;;  %v4431_v22 = vcombine.high %v3981_v34, %v3981_v34 }
 0x24b   : > { %25382 = vmatprep.mubr.msk.f32.mxu0 %vm27572_vm3, %v33293_v36  ;;  %v33483_v58 = vcombine.low %v33481_v55, %v33482_v51  ;;  %v5124_v0 = vrot.slane %v5110_v29, %v27673_v11  ;;  %v4446_v34 = vcombine.high %v4438_v63, %v4438_v63 }
 0x24c   : > { %24905 = vmatmul.mubr.msk.f32.gmra.mrb[26].mxu1 %vm2554_vm4, %v5040_v49  ;;  %v4405_v49 = vcombine.high %v4397_v59, %v4397_v59  ;;  %v5074_v21 = vcombine.low %v5066_v48, %v5073_v37  ;;  %v5091_v48 = vcombine.low %v5083_v52, %v5090_v30 }
 0x24d   : > { %24907 = vmatprep.mubr.msk.f32.mxu1 %vm27572_vm3, %v33293_v36 }
 0x24e   : > { %25383 = vmatmul.mubr.msk.f32.gmra.mrb[6].mxu0 %vm2554_vm4, %v33477_v28  ;;  %v5109_v37 = vcombine.low %v4397_v59, %v4405_v49  ;;  %v3982_v28 = vld [vmem:[%s27678_s5 + $0xe2] sm:$0xff]  ;;  %v5126_v59 = vcombine.low %v4414_v62, %v4422_v45  ;;  %v22854_v49 = vld.sshfl [vmem:[%s27678_s5 + $0xd2] sm:$0x3 pattern:$0x76325410]  ;;  %v33484_v62 = vcombine.low %v29859_v44, %v29873_v10  ;;  %v3985_v44 = vld [vmem:[%s27678_s5 + $0xfa] sm:$0xff] }
 0x24f   : > { %25385 = vmatprep.mubr.msk.f32.mxu0 %vm27572_vm3, %v33293_v36  ;;  %v4448_v2 = vcombine.high %v3982_v28, %v3982_v28 }
 0x250   : > { %24908 = vmatmul.mubr.msk.f32.gmra.mrb[28].mxu1 %vm2554_vm4, %v5057_v26  ;;  %v5100_v26 = vrot.slane %v5092_v32, %v27673_v11  ;;  %v5117_v6 = vrot.slane %v5109_v37, %v27673_v11  ;;  %v5127_v32 = vcombine.low %v4421_v46, %v4423_v35  ;;  %v3984_v46 = vld [vmem:[%s27678_s5 + $0xf2] sm:$0xff]  ;;  %v5134_v45 = vrot.slane %v5126_v59, %v27673_v11  ;;  %v33486_v59 = vld [vmem:[#allocation40_spill] sm:$0xff] }
 0x251   : > { %24910 = vmatprep.mubr.msk.f32.mxu1 %vm27572_vm3, %v33293_v36  ;;  %v4472_v37 = vcombine.high %v3984_v46, %v3984_v46  ;;  %v4479_v51 = vrot.slane %v3984_v46, %v27673_v11  ;;  %v4489_v46 = vcombine.high %v3985_v44, %v3985_v44 }
 0x252   : > { %25386 = vmatmul.mubr.msk.f32.gmra.mrb[8].mxu0 %vm2554_vm4, %v33480_v3  ;;  %v5108_v30 = vcombine.low %v5100_v26, %v5107_v24  ;;  %v4445_v3 = vrot.slane %v4431_v22, %v27673_v11  ;;  %v5143_v26 = vcombine.low %v22854_v49, %v4438_v63  ;;  %v5141_v29 = vrot.slane %v5127_v32, %v27673_v11 }
 0x253   : > { %25388 = vmatprep.mubr.msk.f32.mxu0 %vm27572_vm3, %v33293_v36  ;;  %v2902_v52 = vpop.f32.mrb[78].mxu1  ;;  %v5125_v22 = vcombine.low %v5117_v6, %v5124_v0  ;;  %v4486_v32 = vrot.slane %v4472_v37, %v27673_v11  ;;  %v4496_v6 = vrot.slane %v3985_v44, %v27673_v11 }
 0x254   : > { %24911 = vmatmul.mubr.msk.f32.gmra.mrb[30].mxu1 %vm2554_vm4, %v5074_v21  ;;  %v4455_v21 = vrot.slane %v3982_v28, %v27673_v11  ;;  %v24730_v55 = vpop.f32.mrb[79].mxu1  ;;  %v4447_v35 = vcombine.high %v4445_v3, %v4445_v3  ;;  %v5144_v28 = vcombine.low %v4446_v34, %v4445_v3  ;;  %v33485_v52 = vld [vmem:[#allocation29_spill] sm:$0xff]  ;;  %v5142_v49 = vcombine.low %v5134_v45, %v5141_v29 }
 0x255   : > { %24913 = vmatprep.mubr.msk.f32.mxu1 %vm27572_vm3, %v33293_v36  ;;  %v33487_v63 = vcombine.low %v33485_v52, %v33486_v59  ;;  %v4487_v55 = vcombine.high %v4479_v51, %v4479_v51  ;;  %v22855_v45 = vld.sshfl [vmem:[%s27678_s5 + $0xea] sm:$0x3 pattern:$0x76325410]  ;;  %v4504_v37 = vcombine.high %v4496_v6, %v4496_v6  ;;  %v4503_v59 = vrot.slane %v4489_v46, %v27673_v11 }
 0x256   : > { %25389 = vmatmul.mubr.msk.f32.gmra.mrb[10].mxu0 %vm2554_vm4, %v33483_v58  ;;  %v4463_v24 = vcombine.high %v4455_v21, %v4455_v21  ;;  %v5158_v3 = vrot.slane %v5144_v28, %v27673_v11 }
 0x257   : > { %25391 = vmatprep.mubr.msk.f32.mxu0 %vm27572_vm3, %v33293_v36  ;;  %v2907_v10 = vpop.f32.mrb[80].mxu1  ;;  %v5178_v28 = vcombine.low %v4479_v51, %v4487_v55 }
 0x258   : > { %24914 = vmatmul.mubr.msk.f32.gmra.mrb[32].mxu1 %vm2554_vm4, %v5091_v48  ;;  %v4462_v48 = vrot.slane %v4448_v2, %v27673_v11  ;;  %v24733_v58 = vpop.f32.mrb[81].mxu1  ;;  %v5151_v2 = vrot.slane %v5143_v26, %v27673_v11  ;;  %v33488_v10 = vld [vmem:[#allocation27_spill] sm:$0xff]  ;;  %v4488_v26 = vcombine.high %v4486_v32, %v4486_v32 }
 0x259   : > { %24916 = vmatprep.mubr.msk.f32.mxu1 %vm27572_vm3, %v33293_v36  ;;  %v33489_v58 = vld [vmem:[#allocation19_spill] sm:$0xff]  ;;  %v5192_v46 = vrot.slane %v5178_v28, %v27673_v11 }
 0x25a   : > { %25392 = vmatmul.mubr.msk.f32.gmra.mrb[12].mxu0 %vm2554_vm4, %v33484_v62  ;;  %v5161_v0 = vcombine.low %v4463_v24, %v4462_v48  ;;  %v4464_v34 = vcombine.high %v4462_v48, %v4462_v48  ;;  %v3987_v62 = vld [vmem:[%s27678_s5 + $0x10a] sm:$0xff]  ;;  %v33490_v52 = vcombine.low %v33488_v10, %v33489_v58  ;;  %v5159_v44 = vcombine.low %v5151_v2, %v5158_v3 }
 0x25b   : > { %25394 = vmatprep.mubr.msk.f32.mxu0 %vm27572_vm3, %v33293_v36  ;;  %v4513_v24 = vcombine.high %v3987_v62, %v3987_v62  ;;  %v33491_v10 = vld [vmem:[#allocation30_spill] sm:$0xff]  ;;  %v5195_v2 = vcombine.low %v4496_v6, %v4504_v37  ;;  %v22856_v6 = vld.sshfl [vmem:[%s27678_s5 + $0x102] sm:$0x3 pattern:$0x76325410] }
 0x25c   : > { %24917 = vmatmul.mubr.msk.f32.gmra.mrb[34].mxu1 %vm2554_vm4, %v5108_v30  ;;  %v5160_v30 = vcombine.low %v4447_v35, %v4455_v21  ;;  %v5175_v48 = vrot.slane %v5161_v0, %v27673_v11  ;;  %v33492_v58 = vcombine.low %v29939_v53, %v33491_v10 }
 0x25d   : > { %24919 = vmatprep.mubr.msk.f32.mxu1 %vm27572_vm3, %v33293_v36  ;;  %v3750_v21 = vpop.f32.mrb[82].mxu1  ;;  %v4527_v3 = vrot.slane %v4513_v24, %v27673_v11 }
 0x25e   : > { %25395 = vmatmul.mubr.msk.f32.gmra.mrb[14].mxu0 %vm2554_vm4, %v33487_v63  ;;  %v24740_v29 = vpop.f32.mrb[83].mxu1  ;;  %v5168_v35 = vrot.slane %v5160_v30, %v27673_v11  ;;  %v3988_v63 = vld [vmem:[%s27678_s5 + $0x112] sm:$0xff] }
 0x25f   : > { %25397 = vmatprep.mubr.msk.f32.mxu0 %vm27572_vm3, %v33293_v36  ;;  %v5209_v29 = vrot.slane %v5195_v2, %v27673_v11 }
 0x260   : > { %24920 = vmatmul.mubr.msk.f32.gmra.mrb[36].mxu1 %vm2554_vm4, %v5125_v22  ;;  %v5177_v22 = vcombine.low %v4464_v34, %v22855_v45  ;;  %v5176_v0 = vcombine.low %v5168_v35, %v5175_v48  ;;  %v4530_v34 = vcombine.high %v3988_v63, %v3988_v63  ;;  %v4520_v45 = vrot.slane %v3987_v62, %v27673_v11 }
 0x261   : > { %24922 = vmatprep.mubr.msk.f32.mxu1 %vm27572_vm3, %v33293_v36  ;;  %v4529_v62 = vcombine.high %v4527_v3, %v4527_v3  ;;  %v4537_v48 = vrot.slane %v3988_v63, %v27673_v11 }
 0x262   : > { %25398 = vmatmul.mubr.msk.f32.gmra.mrb[16].mxu0 %vm2554_vm4, %v33490_v52  ;;  %v5185_v53 = vrot.slane %v5177_v22, %v27673_v11  ;;  %v4505_v52 = vcombine.high %v4503_v59, %v4503_v59  ;;  %v4528_v35 = vcombine.high %v4520_v45, %v4520_v45  ;;  %v5212_v28 = vcombine.low %v22856_v6, %v4520_v45  ;;  %v33497_v6 = vld [vmem:[#allocation44_spill] sm:$0xff] }
 0x263   : > { %25400 = vmatprep.mubr.msk.f32.mxu0 %vm27572_vm3, %v33293_v36  ;;  %v3755_v30 = vpop.f32.mrb[84].mxu1 }
 0x264   : > { %24923 = vmatmul.mubr.msk.f32.gmra.mrb[38].mxu1 %vm2554_vm4, %v5142_v49  ;;  %v5194_v49 = vcombine.low %v4486_v32, %v4488_v26  ;;  %v24743_v51 = vpop.f32.mrb[85].mxu1  ;;  %v33493_v32 = vcombine.low %v29986_v43, %v30014_v8  ;;  %v3990_v26 = vld [vmem:[%s27678_s5 + $0x122] sm:$0xff]  ;;  %v4544_v43 = vrot.slane %v4530_v34, %v27673_v11  ;;  %v3991_v8 = vld [vmem:[%s27678_s5 + $0x12a] sm:$0xff]  ;;  %v5211_v22 = vcombine.low %v4503_v59, %v4505_v52 }
 0x265   : > { %24925 = vmatprep.mubr.msk.f32.mxu1 %vm27572_vm3, %v33293_v36  ;;  %v4554_v10 = vcombine.high %v3990_v26, %v3990_v26  ;;  %v33494_v30 = vld [vmem:[#allocation14_spill] sm:$0xff]  ;;  %v4571_v2 = vcombine.high %v3991_v8, %v3991_v8  ;;  %v5228_v51 = vcombine.low %v4528_v35, %v4527_v3  ;;  %v4545_v59 = vcombine.high %v4537_v48, %v4537_v48 }
 0x266   : > { %25401 = vmatmul.mubr.msk.f32.gmra.mrb[18].mxu0 %vm2554_vm4, %v33492_v58  ;;  %v5202_v37 = vrot.slane %v5194_v49, %v27673_v11  ;;  %v33495_v49 = vcombine.low %v30008_v38, %v33494_v30  ;;  %v4546_v34 = vcombine.high %v4544_v43, %v4544_v43  ;;  %v5226_v38 = vrot.slane %v5212_v28, %v27673_v11  ;;  %v33500_v30 = vld [vmem:[#allocation45_spill] sm:$0xff] }
 0x267   : > { %25403 = vmatprep.mubr.msk.f32.mxu0 %vm27572_vm3, %v33293_v36  ;;  %v4561_v52 = vrot.slane %v3990_v26, %v27673_v11  ;;  %v4568_v45 = vrot.slane %v4554_v10, %v27673_v11  ;;  %v4578_v3 = vrot.slane %v3991_v8, %v27673_v11  ;;  %v5236_v26 = vrot.slane %v5228_v51, %v27673_v11  ;;  %v3993_v8 = vld [vmem:[%s27678_s5 + $0x13a] sm:$0xff] }
 0x268   : > { %24926 = vmatmul.mubr.msk.f32.gmra.mrb[40].mxu1 %vm2554_vm4, %v5159_v44  ;;  %v5193_v44 = vcombine.low %v5185_v53, %v5192_v46  ;;  %v5210_v63 = vcombine.low %v5202_v37, %v5209_v29  ;;  %v5219_v53 = vrot.slane %v5211_v22, %v27673_v11  ;;  %v22857_v46 = vld.sshfl [vmem:[%s27678_s5 + $0x11a] sm:$0x3 pattern:$0x76325410]  ;;  %v4585_v29 = vrot.slane %v4571_v2, %v27673_v11 }
 0x269   : > { %v9704_v55 = vpop.f32.mrb[90].mxu0  ;;  %24928 = vmatprep.mubr.msk.f32.mxu1 %vm27572_vm3, %v33293_v36  ;;  %v4569_v22 = vcombine.high %v4561_v52, %v4561_v52  ;;  %v4570_v28 = vcombine.high %v4568_v45, %v4568_v45 }
 0x26a   : > { %v25238_v21 = vpop.f32.mrb[91].mxu0  ;;  %25404 = vmatmul.mubr.msk.f32.gmra.mrb[20].mxu0 %vm2554_vm4, %v33493_v32  ;;  %v33496_v32 = vld [vmem:[#allocation32_spill] sm:$0xff]  ;;  %v4587_v2 = vcombine.high %v4585_v29, %v4585_v29 }
 0x26b   : > { %25406 = vmatprep.mubr.msk.f32.mxu0 %vm27572_vm3, %v33293_v36  ;;  %v33498_v37 = vcombine.low %v33496_v32, %v33497_v6 }
 0x26c   : > { %24929 = vmatmul.mubr.msk.f32.gmra.mrb[42].mxu1 %vm2554_vm4, %v5176_v0  ;;  %v5229_v0 = vcombine.low %v4529_v62, %v4537_v48  ;;  %v5245_v62 = vcombine.low %v4545_v59, %v4544_v43  ;;  %v5246_v48 = vcombine.low %v4546_v34, %v22857_v46  ;;  %v4586_v43 = vcombine.high %v4578_v3, %v4578_v3  ;;  %v33502_v46 = vld [vmem:[#allocation15_spill] sm:$0xff] }
 0x26d   : > { %v9709_v24 = vpop.f32.mrb[92].mxu0  ;;  %24931 = vmatprep.mubr.msk.f32.mxu1 %vm27572_vm3, %v33293_v36  ;;  %v5262_v59 = vcombine.low %v4561_v52, %v4569_v22  ;;  %v5263_v34 = vcombine.low %v4568_v45, %v4570_v28  ;;  %v5280_v6 = vcombine.low %v4585_v29, %v4587_v2  ;;  %v22858_v45 = vld.sshfl [vmem:[%s27678_s5 + $0x132] sm:$0x3 pattern:$0x76325410] }
 0x26e   : > { %v25241_v58 = vpop.f32.mrb[93].mxu0  ;;  %25407 = vmatmul.mubr.msk.f32.gmra.mrb[26].mxu0 %vm2554_vm4, %v33495_v49  ;;  %v5243_v35 = vrot.slane %v5229_v0, %v27673_v11  ;;  %v5253_v51 = vrot.slane %v5245_v62, %v27673_v11  ;;  %v5260_v0 = vrot.slane %v5246_v48, %v27673_v11  ;;  %v5279_v32 = vcombine.low %v4578_v3, %v4586_v43  ;;  %v33506_v43 = vld [vmem:[#allocation11_spill] sm:$0xff] }
 0x26f   : > { %25409 = vmatprep.mubr.msk.f32.mxu0 %vm27572_vm3, %v33293_v36  ;;  %v33499_v58 = vld [vmem:[#allocation33_spill] sm:$0xff]  ;;  %v5294_v29 = vrot.slane %v5280_v6, %v27673_v11 }
 0x270   : > { %24932 = vmatmul.mubr.msk.f32.gmra.mrb[44].mxu1 %vm2554_vm4, %v5193_v44  ;;  %v5227_v44 = vcombine.low %v5219_v53, %v5226_v38  ;;  %v33501_v49 = vcombine.low %v33499_v58, %v33500_v30  ;;  %v4602_v53 = vrot.slane %v3993_v8, %v27673_v11  ;;  %v3994_v38 = vld [vmem:[%s27678_s5 + $0x142] sm:$0xff]  ;;  %v5261_v52 = vcombine.low %v5253_v51, %v5260_v0 }
 0x271   : > { %v11442_v55 = vpop.f32.mrb[94].mxu0  ;;  %24934 = vmatprep.mubr.msk.f32.mxu1 %vm27572_vm3, %v33293_v36  ;;  %v5287_v3 = vrot.slane %v5279_v32, %v27673_v11 }
 0x272   : > { %v25248_v21 = vpop.f32.mrb[95].mxu0  ;;  %25410 = vmatmul.mubr.msk.f32.gmra.mrb[28].mxu0 %vm2554_vm4, %v33498_v37  ;;  %v4595_v55 = vcombine.high %v3993_v8, %v3993_v8  ;;  %v4612_v37 = vcombine.high %v3994_v38, %v3994_v38  ;;  %v4610_v48 = vcombine.high %v4602_v53, %v4602_v53  ;;  %v5296_v22 = vcombine.low %v22858_v45, %v4602_v53  ;;  %v33505_v8 = vld [vmem:[#allocation16_spill] sm:$0xff]  ;;  %v33508_v45 = vld [vmem:[#allocation10_spill] sm:$0xff] }
 0x273   : > { %25412 = vmatprep.mubr.msk.f32.mxu0 %vm27572_vm3, %v33293_v36  ;;  %v33503_v21 = vcombine.low %v30119_v25, %v33502_v46  ;;  %v5277_v25 = vrot.slane %v5263_v34, %v27673_v11  ;;  %v33507_v2 = vcombine.low %v33505_v8, %v33506_v43  ;;  %v5295_v51 = vcombine.low %v5287_v3, %v5294_v29 }
 0x274   : > { %24935 = vmatmul.mubr.msk.f32.gmra.mrb[46].mxu1 %vm2554_vm4, %v5210_v63  ;;  %v5244_v63 = vcombine.low %v5236_v26, %v5243_v35  ;;  %v4619_v26 = vrot.slane %v3994_v38, %v27673_v11  ;;  %v5270_v35 = vrot.slane %v5262_v59, %v27673_v11  ;;  %v4609_v62 = vrot.slane %v4595_v55, %v27673_v11  ;;  %v3999_v38 = vld [vmem:[%s27678_s5 + $0x16a] sm:$0xff] }
 0x275   : > { %v11447_v24 = vpop.f32.mrb[96].mxu0  ;;  %24937 = vmatprep.mubr.msk.f32.mxu1 %vm27572_vm3, %v33293_v36  ;;  %v5304_v0 = vrot.slane %v5296_v22, %v27673_v11  ;;  %v4684_v43 = vrot.slane %v3999_v38, %v27673_v11 }
 0x276   : > { %v25251_v10 = vpop.f32.mrb[97].mxu0  ;;  %25413 = vmatmul.mubr.msk.f32.gmra.mrb[30].mxu0 %vm2554_vm4, %v33501_v49  ;;  %v3996_v24 = vld [vmem:[%s27678_s5 + $0x152] sm:$0xff]  ;;  %v4611_v28 = vcombine.high %v4609_v62, %v4609_v62  ;;  %v4627_v58 = vcombine.high %v4619_v26, %v4619_v26  ;;  %v5297_v30 = vcombine.low %v4610_v48, %v4609_v62 }
 0x277   : > { %25415 = vmatprep.mubr.msk.f32.mxu0 %vm27572_vm3, %v33293_v36  ;;  %v4626_v10 = vrot.slane %v4612_v37, %v27673_v11  ;;  %v4636_v49 = vcombine.high %v3996_v24, %v3996_v24  ;;  %v33509_v37 = vld [vmem:[#allocation38_spill] sm:$0xff] }
 0x278   : > { %24938 = vmatmul.mubr.msk.f32.gmra.mrb[48].mxu1 %vm2554_vm4, %v5227_v44  ;;  %v33504_v44 = vcombine.low %v30148_v20, %v30151_v31  ;;  %v4643_v20 = vrot.slane %v3996_v24, %v27673_v11  ;;  %v5278_v31 = vcombine.low %v5270_v35, %v5277_v25  ;;  %v5313_v59 = vcombine.low %v4611_v28, %v4619_v26  ;;  %v4000_v28 = vld [vmem:[%s27678_s5 + $0x172] sm:$0xff] }
 0x279   : > { %24940 = vmatprep.mubr.msk.f32.mxu1 %vm27572_vm3, %v33293_v36  ;;  %v5314_v34 = vcombine.low %v4627_v58, %v4626_v10  ;;  %v4628_v55 = vcombine.high %v4626_v10, %v4626_v10  ;;  %v5311_v46 = vrot.slane %v5297_v30, %v27673_v11  ;;  %v4650_v32 = vrot.slane %v4636_v49, %v27673_v11 }
 0x27a   : > { %25416 = vmatmul.mubr.msk.f32.gmra.mrb[32].mxu0 %vm2554_vm4, %v33503_v21  ;;  %v4651_v53 = vcombine.high %v4643_v20, %v4643_v20  ;;  %v22859_v21 = vld.sshfl [vmem:[%s27678_s5 + $0x14a] sm:$0x3 pattern:$0x76325410]  ;;  %v33510_v35 = vcombine.low %v33508_v45, %v33509_v37  ;;  %v4677_v26 = vcombine.high %v3999_v38, %v3999_v38  ;;  %v5321_v25 = vrot.slane %v5313_v59, %v27673_v11 }
 0x27b   : > { %25418 = vmatprep.mubr.msk.f32.mxu0 %vm27572_vm3, %v33293_v36  ;;  %v5328_v62 = vrot.slane %v5314_v34, %v27673_v11  ;;  %v5330_v48 = vcombine.low %v4628_v55, %v22859_v21  ;;  %v4652_v3 = vcombine.high %v4650_v32, %v4650_v32  ;;  %v33511_v10 = vcombine.low %v30199_v42, %v30227_v56  ;;  %v22860_v59 = vld.sshfl [vmem:[%s27678_s5 + $0x162] sm:$0x3 pattern:$0x76325410] }
 0x27c   : > { %24941 = vmatmul.mubr.msk.f32.gmra.mrb[50].mxu1 %vm2554_vm4, %v5244_v63  ;;  %v3997_v63 = vld [vmem:[%s27678_s5 + $0x15a] sm:$0xff]  ;;  %v5331_v24 = vcombine.low %v4643_v20, %v4651_v53  ;;  %v4691_v58 = vrot.slane %v4677_v26, %v27673_v11  ;;  %v4694_v49 = vcombine.high %v4000_v28, %v4000_v28  ;;  %v4692_v34 = vcombine.high %v4684_v43, %v4684_v43 }
 0x27d   : > { %24943 = vmatprep.mubr.msk.f32.mxu1 %vm27572_vm3, %v33293_v36  ;;  %v4660_v6 = vrot.slane %v3997_v63, %v27673_v11  ;;  %v5329_v20 = vcombine.low %v5321_v25, %v5328_v62  ;;  %v5347_v42 = vcombine.low %v4650_v32, %v4652_v3  ;;  %v4701_v53 = vrot.slane %v4000_v28, %v27673_v11 }
 0x27e   : > { %25419 = vmatmul.mubr.msk.f32.gmra.mrb[34].mxu0 %vm2554_vm4, %v33504_v44  ;;  %v5312_v44 = vcombine.low %v5304_v0, %v5311_v46  ;;  %v5345_v30 = vrot.slane %v5331_v24, %v27673_v11  ;;  %v4693_v55 = vcombine.high %v4691_v58, %v4691_v58  ;;  %v4708_v38 = vrot.slane %v4694_v49, %v27673_v11 }
 0x27f   : > { %25421 = vmatprep.mubr.msk.f32.mxu0 %vm27572_vm3, %v33293_v36  ;;  %v4668_v29 = vcombine.high %v4660_v6, %v4660_v6  ;;  %v5355_v32 = vrot.slane %v5347_v42, %v27673_v11  ;;  %v5365_v45 = vcombine.low %v22860_v59, %v4684_v43  ;;  %v33515_v37 = vcombine.low %v30248_v50, %v30280_v47 }
 0x280   : > { %24944 = vmatmul.mubr.msk.f32.gmra.mrb[52].mxu1 %vm2554_vm4, %v5261_v52  ;;  %v4653_v52 = vcombine.high %v3997_v63, %v3997_v63  ;;  %v33512_v63 = vld [vmem:[#allocation46_spill] sm:$0xff]  ;;  %v5381_v26 = vcombine.low %v4692_v34, %v4691_v58  ;;  %v5382_v25 = vcombine.low %v4693_v55, %v4701_v53  ;;  %v4709_v62 = vcombine.high %v4701_v53, %v4701_v53 }
 0x281   : > { %24946 = vmatprep.mubr.msk.f32.mxu1 %vm27572_vm3, %v33293_v36  ;;  %v5348_v56 = vcombine.low %v4660_v6, %v4668_v29  ;;  %v5379_v3 = vrot.slane %v5365_v45, %v27673_v11  ;;  %v22861_v29 = vld.sshfl [vmem:[%s27678_s5 + $0x17a] sm:$0x3 pattern:$0x76325410]  ;;  %v33516_v28 = vcombine.low %v30289_v17, %v30306_v54  ;;  %v33518_v55 = vcombine.low %v30332_v1, %v30355_v19 }
 0x282   : > { %25422 = vmatmul.mubr.msk.f32.gmra.mrb[36].mxu0 %vm2554_vm4, %v33507_v2  ;;  %v4667_v22 = vrot.slane %v4653_v52, %v27673_v11  ;;  %v4002_v2 = vld [vmem:[%s27678_s5 + $0x182] sm:$0xff]  ;;  %v5396_v58 = vrot.slane %v5382_v25, %v27673_v11  ;;  %v33519_v19 = vld [vmem:[#allocation47_spill] sm:$0xff] }
 0x283   : > { %25424 = vmatprep.mubr.msk.f32.mxu0 %vm27572_vm3, %v33293_v36  ;;  %v4718_v21 = vcombine.high %v4002_v2, %v4002_v2  ;;  %v5362_v6 = vrot.slane %v5348_v56, %v27673_v11  ;;  %v4725_v24 = vrot.slane %v4002_v2, %v27673_v11  ;;  %v33517_v56 = vcombine.low %v30309_v39, %v30329_v5 }
 0x284   : > { %24947 = vmatmul.mubr.msk.f32.gmra.mrb[54].mxu1 %vm2554_vm4, %v5278_v31  ;;  %v5338_v31 = vrot.slane %v5330_v48, %v27673_v11  ;;  %v4669_v8 = vcombine.high %v4667_v22, %v4667_v22  ;;  %v4710_v48 = vcombine.high %v4708_v38, %v4708_v38 }
 0x285   : > { %24949 = vmatprep.mubr.msk.f32.mxu1 %vm27572_vm3, %v33293_v36  ;;  %v5363_v50 = vcombine.low %v5355_v32, %v5362_v6 }
 0x286   : > { %25425 = vmatmul.mubr.msk.f32.gmra.mrb[38].mxu0 %vm2554_vm4, %v33510_v35  ;;  %v5346_v46 = vcombine.low %v5338_v31, %v5345_v30  ;;  %v5364_v52 = vcombine.low %v4667_v22, %v4669_v8  ;;  %v4003_v35 = vld [vmem:[%s27678_s5 + $0x18a] sm:$0xff]  ;;  %v5399_v31 = vcombine.low %v4710_v48, %v22861_v29  ;;  %v4733_v30 = vcombine.high %v4725_v24, %v4725_v24  ;;  %v4005_v8 = vld [vmem:[%s27678_s5 + $0x19a] sm:$0xff] }
 0x287   : > { %25427 = vmatprep.mubr.msk.f32.mxu0 %vm27572_vm3, %v33293_v36  ;;  %v4735_v22 = vcombine.high %v4003_v35, %v4003_v35  ;;  %v4742_v17 = vrot.slane %v4003_v35, %v27673_v11  ;;  %v4759_v5 = vcombine.high %v4005_v8, %v4005_v8  ;;  %v4766_v34 = vrot.slane %v4005_v8, %v27673_v11 }
 0x288   : > { %24950 = vmatmul.mubr.msk.f32.gmra.mrb[56].mxu1 %vm2554_vm4, %v5295_v51  ;;  %v33513_v51 = vld [vmem:[#allocation41_spill] sm:$0xff]  ;;  %v5372_v47 = vrot.slane %v5364_v52, %v27673_v11 }
 0x289   : > { %24952 = vmatprep.mubr.msk.f32.mxu1 %vm27572_vm3, %v33293_v36  ;;  %v33514_v0 = vcombine.low %v33512_v63, %v33513_v51  ;;  %v4749_v42 = vrot.slane %v4735_v22, %v27673_v11  ;;  %v5413_v63 = vrot.slane %v5399_v31, %v27673_v11  ;;  %v5415_v51 = vcombine.low %v4725_v24, %v4733_v30  ;;  %v33520_v52 = vld [vmem:[#allocation17_spill] sm:$0xff]  ;;  %v33522_v24 = vld [vmem:[#allocation18_spill] sm:$0xff]  ;;  %v23305_v30 = vld [vmem:[%s27678_s5 + $0x1b8] sm:$0xff] }
 0x28a   : > { %25428 = vmatmul.mubr.msk.f32.gmra.mrb[40].mxu0 %vm2554_vm4, %v33511_v10  ;;  %v5389_v10 = vrot.slane %v5381_v26, %v27673_v11  ;;  %v5380_v54 = vcombine.low %v5372_v47, %v5379_v3  ;;  %v4750_v59 = vcombine.high %v4742_v17, %v4742_v17  ;;  %v31024_v6 = vrot.slane %v4759_v5, %v27673_v11 }
 0x28b   : > { %25430 = vmatprep.mubr.msk.f32.mxu0 %vm27572_vm3, %v33293_v36  ;;  %v4751_v39 = vcombine.high %v4749_v42, %v4749_v42  ;;  %v4774_v1 = vcombine.high %v4766_v34, %v4766_v34  ;;  %v33521_v45 = vcombine.low %v33519_v19, %v33520_v52  ;;  %v33525_v22 = vcombine.low %v30413_v9, %v30431_v57  ;;  %v33528_v57 = vld [vmem:[#allocation22_spill] sm:$0xff] }
 0x28c   : > { %24953 = vmatmul.mubr.msk.f32.gmra.mrb[58].mxu1 %vm2554_vm4, %v5312_v44  ;;  %v4732_v44 = vrot.slane %v4718_v21, %v27673_v11  ;;  %v5397_v43 = vcombine.low %v5389_v10, %v5396_v58  ;;  %v5432_v21 = vcombine.low %v4742_v17, %v4750_v59  ;;  %v33526_v10 = vcombine.low %v30435_v23, %v30464_v33  ;;  %v33529_v23 = vld [vmem:[#allocation23_spill] sm:$0xff]  ;;  %v23304_v58 = vld [vmem:[%s27678_s5 + $0x1b0] sm:$0xff]  ;;  %v23307_v59 = vld [vmem:[%s27678_s5 + $0x1c8] sm:$0xff] }
 0x28d   : > { %24955 = vmatprep.mubr.msk.f32.mxu1 %vm27572_vm3, %v33293_v36  ;;  %v5433_v32 = vcombine.low %v4749_v42, %v4751_v39  ;;  %v5450_v48 = vcombine.low %v4774_v1, %v31024_v6  ;;  %v33527_v9 = vcombine.low %v30459_v16, %v30489_v15  ;;  %v33530_v33 = vcombine.low %v33528_v57, %v33529_v23  ;;  %v33531_v16 = vld [vmem:[#allocation50_spill] sm:$0xff]  ;;  %v33532_v15 = vld [vmem:[#allocation24_spill] sm:$0xff] }
 0x28e   : > { %25431 = vmatmul.mubr.msk.f32.gmra.mrb[42].mxu0 %vm2554_vm4, %v33514_v0  ;;  %v4734_v49 = vcombine.high %v4732_v44, %v4732_v44  ;;  %v5440_v26 = vrot.slane %v5432_v21, %v27673_v11  ;;  %v33533_v31 = vcombine.low %v33531_v16, %v33532_v15  ;;  %v12469_v17 = vcombine.high %v23305_v30, %v23305_v30  ;;  %v33534_v42 = vld [vmem:[#allocation28_spill] sm:$0xff] }
 0x28f   : > { %25433 = vmatprep.mubr.msk.f32.mxu0 %vm27572_vm3, %v33293_v36  ;;  %v5447_v25 = vrot.slane %v5433_v32, %v27673_v11  ;;  %v5464_v29 = vrot.slane %v5450_v48, %v27673_v11 }
 0x290   : > { %24956 = vmatmul.mubr.msk.f32.gmra.mrb[60].mxu1 %vm2554_vm4, %v5329_v20  ;;  %v5398_v20 = vcombine.low %v4709_v62, %v4708_v38  ;;  %v5416_v0 = vcombine.low %v4732_v44, %v4734_v49  ;;  %v33523_v44 = vld [vmem:[#allocation49_spill] sm:$0xff]  ;;  %v12459_v49 = vrot.slane %v23304_v58, %v27673_v11 }
 0x291   : > { %24958 = vmatprep.mubr.msk.f32.mxu1 %vm27572_vm3, %v33293_v36  ;;  %v5448_v47 = vcombine.low %v5440_v26, %v5447_v25 }
 0x292   : > { %25434 = vmatmul.mubr.msk.f32.gmra.mrb[44].mxu0 %vm2554_vm4, %v33515_v37  ;;  %v5406_v2 = vrot.slane %v5398_v20, %v27673_v11  ;;  %v5430_v38 = vrot.slane %v5416_v0, %v27673_v11  ;;  %v22862_v37 = vld.sshfl [vmem:[%s27678_s5 + $0x192] sm:$0x3 pattern:$0x76325410]  ;;  %v12452_v20 = vcombine.high %v23304_v58, %v23304_v58  ;;  %v33537_v0 = vcombine.low %v30557_v7, %v30582_v41  ;;  %v31112_v41 = vpop.f32.mrb[4].mxu1 }
 0x293   : > { %25436 = vmatprep.mubr.msk.f32.mxu0 %vm27572_vm3, %v33293_v36  ;;  %v5449_v62 = vcombine.low %v22862_v37, %v4766_v34  ;;  %v12500_v7 = vrot.slane %v23307_v59, %v27673_v11  ;;  %v24746_v21 = vpop.f32.mrb[5].mxu1 }
 0x294   : > { %24959 = vmatmul.mubr.msk.f32.gmra.mrb[62].mxu1 %vm2554_vm4, %v5346_v46  ;;  %v5414_v53 = vcombine.low %v5406_v2, %v5413_v63  ;;  %v5423_v46 = vrot.slane %v5415_v51, %v27673_v11  ;;  %v12476_v63 = vrot.slane %v23305_v30, %v27673_v11  ;;  %v12483_v51 = vrot.slane %v12469_v17, %v27673_v11  ;;  %v31127_v25 = vpop.f32.mrb[6].mxu1 }
 0x295   : > { %24961 = vmatprep.mubr.msk.f32.mxu1 %vm27572_vm3, %v33293_v36  ;;  %v5457_v3 = vrot.slane %v5449_v62, %v27673_v11  ;;  %v12508_v37 = vcombine.high %v12500_v7, %v12500_v7  ;;  %v24749_v62 = vpop.f32.mrb[7].mxu1 }
 0x296   : > { %25437 = vmatmul.mubr.msk.f32.gmra.mrb[46].mxu0 %vm2554_vm4, %v33516_v28  ;;  %v5431_v35 = vcombine.low %v5423_v46, %v5430_v38  ;;  %v12484_v34 = vcombine.high %v12476_v63, %v12476_v63  ;;  %v12493_v46 = vcombine.high %v23307_v59, %v23307_v59  ;;  %v23308_v38 = vld [vmem:[%s27678_s5 + $0x1d0] sm:$0xff] }
 0x297   : > { %25439 = vmatprep.mubr.msk.f32.mxu0 %vm27572_vm3, %v33293_v36  ;;  %v5465_v28 = vcombine.low %v5457_v3, %v5464_v29  ;;  %v12517_v26 = vrot.slane %v23308_v38, %v27673_v11  ;;  %v23373_v29 = vld [vmem:[%s27678_s5 + $0x39] sm:$0xff] }
 0x298   : > { %24962 = vmatmul.mubr.msk.f32.gmra.mrb[64].mxu1 %vm2554_vm4, %v5363_v50  ;;  %v33524_v50 = vcombine.low %v33522_v24, %v33523_v44  ;;  %v13166_v19 = vcombine.low %v12476_v63, %v12484_v34  ;;  %v13746_v18 = vcombine.high %v23373_v29, %v23373_v29  ;;  %v13753_v30 = vrot.slane %v23373_v29, %v27673_v11 }
 0x299   : > { %24964 = vmatprep.mubr.msk.f32.mxu1 %vm27572_vm3, %v33293_v36  ;;  %v12525_v3 = vcombine.high %v12517_v26, %v12517_v26 }
 0x29a   : > { %25440 = vmatmul.mubr.msk.f32.gmra.mrb[48].mxu0 %vm2554_vm4, %v33517_v56  ;;  %v33535_v56 = vld [vmem:[#allocation61_spill] sm:$0xff]  ;;  %v13174_v40 = vrot.slane %v13166_v19, %v27673_v11  ;;  %v13761_v59 = vcombine.high %v13753_v30, %v13753_v30 }
 0x29b   : > { %25442 = vmatprep.mubr.msk.f32.mxu0 %vm27572_vm3, %v33293_v36  ;;  %v33536_v8 = vcombine.low %v33534_v42, %v33535_v56  ;;  %v23327_v56 = vld.sshfl [vmem:[%s27678_s5 + $0x1d8] sm:$0x3 pattern:$0x76325410] }
 0x29c   : > { %24965 = vmatmul.mubr.msk.f32.gmra.mrb[66].mxu1 %vm2554_vm4, %v5380_v54  ;;  %v12466_v54 = vrot.slane %v12452_v20, %v27673_v11 }
 0x29d   : > { %24967 = vmatprep.mubr.msk.f32.mxu1 %vm27572_vm3, %v33293_v36 }
 0x29e   : > { %25443 = vmatmul.mubr.msk.f32.gmra.mrb[50].mxu0 %vm2554_vm4, %v33518_v55  ;;  %v12468_v2 = vcombine.high %v12466_v54, %v12466_v54  ;;  %v12485_v55 = vcombine.high %v12483_v51, %v12483_v51 }
 0x29f   : > { %25445 = vmatprep.mubr.msk.f32.mxu0 %vm27572_vm3, %v33293_v36 }
 0x2a0   : > { %24968 = vmatmul.mubr.msk.f32.gmra.mrb[68].mxu1 %vm2554_vm4, %v5397_v43  ;;  %v12467_v43 = vcombine.high %v12459_v49, %v12459_v49  ;;  %v13150_v5 = vcombine.low %v12466_v54, %v12468_v2  ;;  %v13167_v52 = vcombine.low %v12483_v51, %v12485_v55 }
 0x2a1   : > { %24970 = vmatprep.mubr.msk.f32.mxu1 %vm27572_vm3, %v33293_v36 }
 0x2a2   : > { %25446 = vmatmul.mubr.msk.f32.gmra.mrb[52].mxu0 %vm2554_vm4, %v33521_v45  ;;  %v13149_v39 = vcombine.low %v12459_v49, %v12467_v43  ;;  %v13164_v1 = vrot.slane %v13150_v5, %v27673_v11  ;;  %v23372_v45 = vld [vmem:[%s27678_s5 + $0x31] sm:$0xff]  ;;  %v13181_v61 = vrot.slane %v13167_v52, %v27673_v11  ;;  %v13760_v49 = vrot.slane %v13746_v18, %v27673_v11  ;;  %v23375_v43 = vld [vmem:[%s27678_s5 + $0x49] sm:$0xff]  ;;  %v23378_v52 = vld [vmem:[%s27678_s5 + $0x61] sm:$0xff] }
 0x2a3   : > { %25448 = vmatprep.mubr.msk.f32.mxu0 %vm27572_vm3, %v33293_v36  ;;  %v13729_v48 = vcombine.high %v23372_v45, %v23372_v45  ;;  %v13770_v34 = vcombine.high %v23375_v43, %v23375_v43  ;;  %v13777_v55 = vrot.slane %v23375_v43, %v27673_v11  ;;  %v23381_v43 = vld [vmem:[%s27678_s5 + $0x79] sm:$0xff] }
 0x2a4   : > { %24971 = vmatmul.mubr.msk.f32.gmra.mrb[70].mxu1 %vm2554_vm4, %v5414_v53  ;;  %v33538_v53 = vcombine.low %v30585_v13, %v30598_v12  ;;  %v13157_v32 = vrot.slane %v13149_v39, %v27673_v11  ;;  %v23326_v13 = vld.sshfl [vmem:[%s27678_s5 + $0x1c0] sm:$0x3 pattern:$0x76325410]  ;;  %v12507_v12 = vrot.slane %v12493_v46, %v27673_v11  ;;  %v13182_v57 = vcombine.low %v13174_v40, %v13181_v61  ;;  %v23376_v46 = vld [vmem:[%s27678_s5 + $0x51] sm:$0xff] }
 0x2a5   : > { %24973 = vmatprep.mubr.msk.f32.mxu1 %vm27572_vm3, %v33293_v36  ;;  %v13762_v39 = vcombine.high %v13760_v49, %v13760_v49  ;;  %v23561_v40 = vld [vmem:[%s33113_s1 + $0x88] sm:$0xf]  ;;  %v13818_v61 = vrot.slane %v23378_v52, %v27673_v11 }
 0x2a6   : > { %25449 = vmatmul.mubr.msk.f32.gmra.mrb[54].mxu0 %vm2554_vm4, %v33524_v50  ;;  %v13165_v24 = vcombine.low %v13157_v32, %v13164_v1  ;;  %v13184_v44 = vcombine.low %v12508_v37, %v12507_v12  ;;  %v12509_v50 = vcombine.high %v12507_v12, %v12507_v12  ;;  %v14487_v1 = vcombine.low %v13753_v30, %v13761_v59 }
 0x2a7   : > { %25451 = vmatprep.mubr.msk.f32.mxu0 %vm27572_vm3, %v33293_v36  ;;  %v14488_v19 = vcombine.low %v13760_v49, %v13762_v39  ;;  %v13785_v12 = vcombine.high %v13777_v55, %v13777_v55  ;;  %v13787_v37 = vcombine.high %v23376_v46, %v23376_v46  ;;  %v23382_v39 = vld [vmem:[%s27678_s5 + $0x81] sm:$0xff] }
 0x2a8   : > { %24974 = vmatmul.mubr.msk.f32.gmra.mrb[72].mxu1 %vm2554_vm4, %v5431_v35  ;;  %v12510_v35 = vcombine.high %v23308_v38, %v23308_v38  ;;  %v13200_v23 = vcombine.low %v12509_v50, %v12517_v26 }
 0x2a9   : > { %24976 = vmatprep.mubr.msk.f32.mxu1 %vm27572_vm3, %v33293_v36 }
 0x2aa   : > { %25452 = vmatmul.mubr.msk.f32.gmra.mrb[56].mxu0 %vm2554_vm4, %v33525_v22  ;;  %v31139_v22 = vpop.f32.mrb[8].mxu1  ;;  %v13208_v17 = vrot.slane %v13200_v23, %v27673_v11  ;;  %v13826_v23 = vcombine.high %v13818_v61, %v13818_v61 }
 0x2ab   : > { %25454 = vmatprep.mubr.msk.f32.mxu0 %vm27572_vm3, %v33293_v36 }
 0x2ac   : > { %24977 = vmatmul.mubr.msk.f32.gmra.mrb[74].mxu1 %vm2554_vm4, %v5448_v47  ;;  %v12524_v47 = vrot.slane %v12510_v35, %v27673_v11  ;;  %v13794_v35 = vrot.slane %v23376_v46, %v27673_v11 }
 0x2ad   : > { %24979 = vmatprep.mubr.msk.f32.mxu1 %vm27572_vm3, %v33293_v36 }
 0x2ae   : > { %25455 = vmatmul.mubr.msk.f32.gmra.mrb[58].mxu0 %vm2554_vm4, %v33526_v10  ;;  %v13736_v10 = vrot.slane %v23372_v45, %v27673_v11  ;;  %v23426_v45 = vld.sshfl [vmem:[%s27678_s5 + $0x41] sm:$0x3 pattern:$0x76325410] }
 0x2af   : > { %25457 = vmatprep.mubr.msk.f32.mxu0 %vm27572_vm3, %v33293_v36  ;;  %v14504_v50 = vcombine.low %v23426_v45, %v13777_v55  ;;  %v13852_v55 = vcombine.high %v23381_v43, %v23381_v43  ;;  %v23428_v45 = vld.sshfl [vmem:[%s27678_s5 + $0x71] sm:$0x3 pattern:$0x76325410] }
 0x2b0   : > { %24980 = vmatmul.mubr.msk.f32.gmra.mrb[76].mxu1 %vm2554_vm4, %v5465_v28  ;;  %v24752_v28 = vpop.f32.mrb[9].mxu1  ;;  %v13744_v16 = vcombine.high %v13736_v10, %v13736_v10 }
 0x2b1   : > { %24982 = vmatprep.mubr.msk.f32.mxu1 %vm27572_vm3, %v33293_v36  ;;  %v31148_v58 = vpop.f32.mrb[10].mxu1  ;;  %v13801_v28 = vrot.slane %v13787_v37, %v27673_v11 }
 0x2b2   : > { %25458 = vmatmul.mubr.msk.f32.gmra.mrb[60].mxu0 %vm2554_vm4, %v33527_v9  ;;  %v13743_v9 = vrot.slane %v13729_v48, %v27673_v11  ;;  %v24755_v20 = vpop.f32.mrb[11].mxu1  ;;  %v14470_v63 = vcombine.low %v13736_v10, %v13744_v16  ;;  %v13802_v10 = vcombine.high %v13794_v35, %v13794_v35  ;;  %v23427_v16 = vld.sshfl [vmem:[%s27678_s5 + $0x59] sm:$0x3 pattern:$0x76325410] }
 0x2b3   : > { %25460 = vmatprep.mubr.msk.f32.mxu0 %vm27572_vm3, %v33293_v36 }
 0x2b4   : > { %v13745_v15 = vcombine.high %v13743_v9, %v13743_v9  ;;  %v14478_v38 = vrot.slane %v14470_v63, %v27673_v11  ;;  %v14539_v63 = vcombine.low %v13818_v61, %v13826_v23 }
 0x2b6   : > { %25461 = vmatmul.mubr.msk.f32.gmra.mrb[62].mxu0 %vm2554_vm4, %v33530_v33  ;;  %v13201_v33 = vcombine.low %v12525_v3, %v12524_v47  ;;  %v14471_v51 = vcombine.low %v13743_v9, %v13745_v15  ;;  %v23379_v9 = vld [vmem:[%s27678_s5 + $0x69] sm:$0xff] }
 0x2b7   : > { %25463 = vmatprep.mubr.msk.f32.mxu0 %vm27572_vm3, %v33293_v36  ;;  %v13828_v30 = vcombine.high %v23379_v9, %v23379_v9 }
 0x2b8   : > { %v13215_v42 = vrot.slane %v13201_v33, %v27673_v11  ;;  %v14485_v21 = vrot.slane %v14471_v51, %v27673_v11 }
 0x2b9   : > { %v13842_v59 = vrot.slane %v13828_v30, %v27673_v11 }
 0x2ba   : > { %25464 = vmatmul.mubr.msk.f32.gmra.mrb[64].mxu0 %vm2554_vm4, %v33533_v31  ;;  %v12526_v31 = vcombine.high %v12524_v47, %v12524_v47  ;;  %v13216_v5 = vcombine.low %v13208_v17, %v13215_v42  ;;  %v14486_v48 = vcombine.low %v14478_v38, %v14485_v21  ;;  %v13811_v47 = vcombine.high %v23378_v52, %v23378_v52 }
 0x2bb   : > { %25466 = vmatprep.mubr.msk.f32.mxu0 %vm27572_vm3, %v33293_v36  ;;  %v13869_v38 = vcombine.high %v23382_v39, %v23382_v39 }
 0x2bc   : > { %v13825_v15 = vrot.slane %v13811_v47, %v27673_v11  ;;  %v23385_v47 = vld [vmem:[%s27678_s5 + $0x99] sm:$0xff] }
 0x2be   : > { %25467 = vmatmul.mubr.msk.f32.gmra.mrb[66].mxu0 %vm2554_vm4, %v33536_v8  ;;  %v31158_v8 = vpop.f32.mrb[12].mxu1  ;;  %v13827_v51 = vcombine.high %v13825_v15, %v13825_v15 }
 0x2bf   : > { %25469 = vmatprep.mubr.msk.f32.mxu0 %vm27572_vm3, %v33293_v36  ;;  %v24758_v2 = vpop.f32.mrb[13].mxu1 }
 0x2c0   : > { %v14555_v21 = vcombine.low %v13825_v15, %v13827_v51 }
 0x2c2   : > { %25470 = vmatmul.mubr.msk.f32.gmra.mrb[68].mxu0 %vm2554_vm4, %v33537_v0  ;;  %v13217_v0 = vcombine.low %v12526_v31, %v23327_v56  ;;  %v13835_v31 = vrot.slane %v23379_v9, %v27673_v11  ;;  %v14522_v56 = vcombine.low %v13802_v10, %v13801_v28 }
 0x2c3   : > { %25472 = vmatprep.mubr.msk.f32.mxu0 %vm27572_vm3, %v33293_v36 }
 0x2c4   : > { %v13224_v32 = vrot.slane %v13217_v0, %v27673_v11  ;;  %v13843_v0 = vcombine.high %v13835_v31, %v13835_v31  ;;  %v14536_v4 = vrot.slane %v14522_v56, %v27673_v11 }
 0x2c6   : > { %25473 = vmatmul.mubr.msk.f32.gmra.mrb[70].mxu0 %vm2554_vm4, %v33538_v53  ;;  %v31165_v53 = vpop.f32.mrb[14].mxu1 }
 0x2c7   : > { %25475 = vmatprep.mubr.msk.f32.mxu0 %vm27572_vm3, %v33293_v36 }
 0x2ca   : > { %25476 = vmatmul.mubr.msk.f32.gmra.mrb[72].mxu0 %vm2554_vm4, %v13131_v14  ;;  %v13183_v14 = vcombine.low %v23326_v13, %v12500_v7  ;;  %v24761_v7 = vpop.f32.mrb[15].mxu1  ;;  %v13784_v13 = vrot.slane %v13770_v34, %v27673_v11 }
 0x2cb   : > { %25478 = vmatprep.mubr.msk.f32.mxu0 %vm27572_vm3, %v33293_v36  ;;  %v31178_v26 = vpop.f32.mrb[16].mxu1  ;;  %v14553_v7 = vrot.slane %v14539_v63, %v27673_v11 }
 0x2cc   : > { %v13191_v60 = vrot.slane %v13183_v14, %v27673_v11  ;;  %v24764_v62 = vpop.f32.mrb[17].mxu1  ;;  %v14495_v14 = vrot.slane %v14487_v1, %v27673_v11  ;;  %v14505_v3 = vcombine.low %v13785_v12, %v13784_v13  ;;  %v13786_v29 = vcombine.high %v13784_v13, %v13784_v13  ;;  %v23384_v12 = vld [vmem:[%s27678_s5 + $0x91] sm:$0xff] }
 0x2cd   : > { %v13844_v1 = vcombine.high %v13842_v59, %v13842_v59  ;;  %v13866_v13 = vrot.slane %v13852_v55, %v27673_v11  ;;  %v14563_v62 = vrot.slane %v14555_v21, %v27673_v11 }
 0x2ce   : > { %25479 = vmatmul.mubr.msk.f32.gmra.mrb[74].mxu0 %vm2554_vm4, %v13148_v27  ;;  %v13198_v27 = vrot.slane %v13184_v44, %v27673_v11  ;;  %v14502_v44 = vrot.slane %v14488_v19, %v27673_v11  ;;  %v14519_v17 = vrot.slane %v14505_v3, %v27673_v11  ;;  %v14521_v42 = vcombine.low %v13786_v29, %v13794_v35 }
 0x2cf   : > { %25481 = vmatprep.mubr.msk.f32.mxu0 %vm27572_vm3, %v33293_v36  ;;  %v13859_v19 = vrot.slane %v23381_v43, %v27673_v11  ;;  %v13883_v35 = vrot.slane %v13869_v38, %v27673_v11 }
 0x2d0   : > { %v13199_v54 = vcombine.low %v13191_v60, %v13198_v27  ;;  %v13803_v27 = vcombine.high %v13801_v28, %v13801_v28  ;;  %v14503_v20 = vcombine.low %v14495_v14, %v14502_v44  ;;  %v14529_v34 = vrot.slane %v14521_v42, %v27673_v11 }
 0x2d1   : > { %v13867_v61 = vcombine.high %v13859_v19, %v13859_v19  ;;  %v13868_v14 = vcombine.high %v13866_v13, %v13866_v13  ;;  %v13876_v44 = vrot.slane %v23382_v39, %v27673_v11  ;;  %v13885_v29 = vcombine.high %v13883_v35, %v13883_v35 }
 0x2d2   : > { %25482 = vmatmul.mubr.msk.f32.gmra.mrb[76].mxu0 %vm2554_vm4, %v13165_v24  ;;  %v23560_v24 = vld [vmem:[%s33113_s1 + $0x80] sm:$0xff]  ;;  %v14538_v2 = vcombine.low %v13803_v27, %v23427_v16  ;;  %v14537_v52 = vcombine.low %v14529_v34, %v14536_v4 }
 0x2d3   : > { %25484 = vmatprep.mubr.msk.f32.mxu0 %vm27572_vm3, %v33293_v36  ;;  %v26251_v18 = vpack.c.bf16 %v23561_v40, %v23560_v24  ;;  %v14572_v24 = vcombine.low %v13842_v59, %v13844_v1  ;;  %v14573_v40 = vcombine.low %v23428_v45, %v13859_v19  ;;  %v13884_v3 = vcombine.high %v13876_v44, %v13876_v44 }
 0x2d4   : > { %v14546_v46 = vrot.slane %v14538_v2, %v27673_v11  ;;  %v14589_v27 = vcombine.low %v13867_v61, %v13866_v13  ;;  %v14590_v23 = vcombine.low %v13868_v14, %v13876_v44  ;;  %v23387_v2 = vld [vmem:[%s27678_s5 + $0xa9] sm:$0xff] }
 0x2d5   : > { %v14580_v10 = vrot.slane %v14572_v24, %v27673_v11  ;;  %v14587_v9 = vrot.slane %v14573_v40, %v27673_v11  ;;  %v14606_v15 = vcombine.low %v13884_v3, %v13883_v35  ;;  %v13934_v39 = vcombine.high %v23387_v2, %v23387_v2  ;;  %v23391_v3 = vld [vmem:[%s27678_s5 + $0xc9] sm:$0xff] }
 0x2d6   : > { %25485 = vmatmul.mubr.msk.f32.gmra.mrb[78].mxu0 %vm2554_vm4, %v13182_v57  ;;  %v31194_v57 = vpop.f32.mrb[18].mxu1  ;;  %v14554_v37 = vcombine.low %v14546_v46, %v14553_v7  ;;  %v14604_v42 = vrot.slane %v14590_v23, %v27673_v11  ;;  %v23388_v46 = vld [vmem:[%s27678_s5 + $0xb1] sm:$0xff] }
 0x2d7   : > { %25487 = vmatprep.mubr.msk.f32.mxu0 %vm27572_vm3, %v33293_v36  ;;  %v24767_v60 = vpop.f32.mrb[19].mxu1  ;;  %v14588_v30 = vcombine.low %v14580_v10, %v14587_v9  ;;  %v14614_v63 = vrot.slane %v14606_v15, %v27673_v11  ;;  %v13948_v1 = vrot.slane %v13934_v39, %v27673_v11  ;;  %v13951_v13 = vcombine.high %v23388_v46, %v23388_v46  ;;  %v23432_v39 = vld.sshfl [vmem:[%s27678_s5 + $0xd1] sm:$0x3 pattern:$0x76325410] }
 0x2d8   : > { %v31198_v33 = vpop.f32.mrb[20].mxu1  ;;  %v13910_v60 = vcombine.high %v23385_v47, %v23385_v47 }
 0x2d9   : > { %v24770_v49 = vpop.f32.mrb[21].mxu1  ;;  %v13965_v44 = vrot.slane %v13951_v13, %v27673_v11 }
 0x2da   : > { %25488 = vmatmul.mubr.msk.f32.gmra.mrb[80].mxu0 %vm2554_vm4, %v13199_v54  ;;  %v14512_v54 = vrot.slane %v14504_v50, %v27673_v11  ;;  %v13893_v50 = vcombine.high %v23384_v12, %v23384_v12  ;;  %v13917_v49 = vrot.slane %v23385_v47, %v27673_v11 }
 0x2db   : > { %25490 = vmatprep.mubr.msk.f32.mxu0 %vm27572_vm3, %v33293_v36  ;;  %v13967_v10 = vcombine.high %v13965_v44, %v13965_v44 }
 0x2dc   : > { %v13907_v16 = vrot.slane %v13893_v50, %v27673_v11 }
 0x2de   : > { %25491 = vmatmul.mubr.msk.f32.gmra.mrb[106].mxu0 %vm2554_vm4, %v13216_v5  ;;  %v14520_v5 = vcombine.low %v14512_v54, %v14519_v17  ;;  %v13924_v54 = vrot.slane %v13910_v60, %v27673_v11  ;;  %v14597_v17 = vrot.slane %v14589_v27, %v27673_v11  ;;  %v13909_v43 = vcombine.high %v13907_v16, %v13907_v16 }
 0x2df   : > { %25493 = vmatprep.mubr.msk.f32.mxu0 %vm27572_vm3, %v33293_v36  ;;  %v13992_v60 = vcombine.high %v23391_v3, %v23391_v3 }
 0x2e0   : > { %v13926_v59 = vcombine.high %v13924_v54, %v13924_v54  ;;  %v14605_v34 = vcombine.low %v14597_v17, %v14604_v42  ;;  %v14624_v55 = vcombine.low %v13907_v16, %v13909_v43  ;;  %v23431_v16 = vld.sshfl [vmem:[%s27678_s5 + $0xb9] sm:$0x3 pattern:$0x76325410] }
 0x2e2   : > { %25494 = vmatmul.mubr.msk.f32.gmra.mrb[108].mxu0 %vm2554_vm4, %v13224_v32  ;;  %v14556_v32 = vcombine.low %v13835_v31, %v13843_v0  ;;  %v13925_v0 = vcombine.high %v13917_v49, %v13917_v49  ;;  %v14641_v21 = vcombine.low %v13924_v54, %v13926_v59  ;;  %v14638_v45 = vrot.slane %v14624_v55, %v27673_v11  ;;  %v23394_v59 = vld [vmem:[%s27678_s5 + $0xe1] sm:$0xff] }
 0x2e3   : > { %25500 = vmatprep.mubr.msk.f32.mxu0 %vm27572_vm3, %v33293_v36  ;;  %v14691_v54 = vcombine.low %v13967_v10, %v23431_v16  ;;  %v14033_v13 = vcombine.high %v23394_v59, %v23394_v59 }
 0x2e4   : > { %v14640_v38 = vcombine.low %v13917_v49, %v13925_v0  ;;  %v14655_v24 = vrot.slane %v14641_v21, %v27673_v11  ;;  %v23396_v21 = vld [vmem:[%s27678_s5 + $0xf1] sm:$0xff] }
 0x2e5   : > { %v14699_v55 = vrot.slane %v14691_v54, %v27673_v11  ;;  %v14064_v10 = vrot.slane %v23396_v21, %v27673_v11 }
 0x2e6   : > { %25501 = vmatmul.mubr.msk.f32.vlgmr.msra.gmra.mrb[110].mxu0 %vm2554_vm4, %v14486_v48  ;;  %v14570_v48 = vrot.slane %v14556_v32, %v27673_v11  ;;  %v23430_v32 = vld.sshfl [vmem:[%s27678_s5 + $0xa1] sm:$0x3 pattern:$0x76325410] }
 0x2e7   : > { %26253 = vmatpush3.bf16.msk.msra.mxu0 %vm27653_vm2, %v26251_v18  ;;  %25503 = vmatprep.mubr.msk.f32.mxu0 %vm27572_vm3, %v33293_v36  ;;  %v23429_v18 = vld.sshfl [vmem:[%s27678_s5 + $0x89] sm:$0x3 pattern:$0x76325410] }
 0x2e8   : > { %v14571_v28 = vcombine.low %v14563_v62, %v14570_v48  ;;  %v14607_v31 = vcombine.low %v13885_v29, %v23429_v18  ;;  %v13950_v62 = vcombine.high %v13948_v1, %v13948_v1  ;;  %v14648_v48 = vrot.slane %v14640_v38, %v27673_v11 }
 0x2e9   : > { %v13999_v18 = vrot.slane %v23391_v3, %v27673_v11  ;;  %v14040_v3 = vrot.slane %v23394_v59, %v27673_v11 }
 0x2ea   : > { %25504 = vmatmul.mubr.msk.f32.gmra.mrb[112].mxu0 %vm2554_vm4, %v14503_v20  ;;  %v13900_v20 = vrot.slane %v23384_v12, %v27673_v11  ;;  %v14621_v51 = vrot.slane %v14607_v31, %v27673_v11  ;;  %v13958_v12 = vrot.slane %v23388_v46, %v27673_v11  ;;  %v14656_v27 = vcombine.low %v14648_v48, %v14655_v24  ;;  %v23393_v31 = vld [vmem:[%s27678_s5 + $0xd9] sm:$0xff] }
 0x2eb   : > { %25506 = vmatprep.mubr.msk.f32.mxu0 %vm27572_vm3, %v33293_v36  ;;  %v14007_v42 = vcombine.high %v13999_v18, %v13999_v18  ;;  %v14016_v0 = vcombine.high %v23393_v31, %v23393_v31 }
 0x2ec   : > { %v13908_v56 = vcombine.high %v13900_v20, %v13900_v20  ;;  %v14622_v7 = vcombine.low %v14614_v63, %v14621_v51  ;;  %v13966_v50 = vcombine.high %v13958_v12, %v13958_v12 }
 0x2ee   : > { %25507 = vmatmul.mubr.msk.f32.gmra.mrb[4].mxu0 %vm2554_vm4, %v14520_v5  ;;  %v13941_v5 = vrot.slane %v23387_v2, %v27673_v11  ;;  %v14623_v4 = vcombine.low %v13900_v20, %v13908_v56  ;;  %v14675_v20 = vcombine.low %v13966_v50, %v13965_v44  ;;  %v14006_v56 = vrot.slane %v13992_v60, %v27673_v11 }
 0x2ef   : > { %25509 = vmatprep.mubr.msk.f32.mxu0 %vm27572_vm3, %v33293_v36 }
 0x2f0   : > { %v13949_v19 = vcombine.high %v13941_v5, %v13941_v5  ;;  %v14657_v35 = vcombine.low %v23430_v32, %v13941_v5  ;;  %v14689_v63 = vrot.slane %v14675_v20, %v27673_v11  ;;  %v14023_v5 = vrot.slane %v23393_v31, %v27673_v11 }
 0x2f1   : > { %v14008_v38 = vcombine.high %v14006_v56, %v14006_v56 }
 0x2f2   : > { %25510 = vmatmul.mubr.msk.f32.gmra.mrb[6].mxu0 %vm2554_vm4, %v14537_v52  ;;  %v14631_v52 = vrot.slane %v14623_v4, %v27673_v11  ;;  %v14658_v40 = vcombine.low %v13949_v19, %v13948_v1  ;;  %v14665_v29 = vrot.slane %v14657_v35, %v27673_v11 }
 0x2f3   : > { %25512 = vmatprep.mubr.msk.f32.mxu0 %vm27572_vm3, %v33293_v36 }
 0x2f4   : > { %v14639_v14 = vcombine.low %v14631_v52, %v14638_v45  ;;  %v14672_v23 = vrot.slane %v14658_v40, %v27673_v11  ;;  %v14030_v45 = vrot.slane %v14016_v0, %v27673_v11  ;;  %v14725_v40 = vcombine.low %v14006_v56, %v14008_v38 }
 0x2f5   : > { %v14072_v56 = vcombine.high %v14064_v10, %v14064_v10 }
 0x2f6   : > { %25513 = vmatmul.mubr.msk.f32.gmra.mrb[8].mxu0 %vm2554_vm4, %v14554_v37  ;;  %v23390_v37 = vld [vmem:[%s27678_s5 + $0xc1] sm:$0xff]  ;;  %v14673_v2 = vcombine.low %v14665_v29, %v14672_v23  ;;  %v14047_v29 = vrot.slane %v14033_v13, %v27673_v11  ;;  %v14733_v23 = vrot.slane %v14725_v40, %v27673_v11 }
 0x2f7   : > { %25515 = vmatprep.mubr.msk.f32.mxu0 %vm27572_vm3, %v33293_v36  ;;  %v13975_v61 = vcombine.high %v23390_v37, %v23390_v37  ;;  %v13982_v47 = vrot.slane %v23390_v37, %v27673_v11  ;;  %v14057_v37 = vcombine.high %v23396_v21, %v23396_v21 }
 0x2f8   : > { %v14049_v54 = vcombine.high %v14047_v29, %v14047_v29 }
 0x2f9   : > { %v13989_v9 = vrot.slane %v13975_v61, %v27673_v11  ;;  %v13990_v15 = vcombine.high %v13982_v47, %v13982_v47  ;;  %v14031_v61 = vcombine.high %v14023_v5, %v14023_v5 }
 0x2fa   : > { %25516 = vmatmul.mubr.msk.f32.gmra.mrb[10].mxu0 %vm2554_vm4, %v14571_v28  ;;  %v14674_v28 = vcombine.low %v13950_v62, %v13958_v12  ;;  %v14726_v12 = vcombine.low %v23432_v39, %v14023_v5 }
 0x2fb   : > { %25518 = vmatprep.mubr.msk.f32.mxu0 %vm27572_vm3, %v33293_v36  ;;  %v13991_v17 = vcombine.high %v13989_v9, %v13989_v9  ;;  %v14692_v51 = vcombine.low %v13982_v47, %v13990_v15  ;;  %v14032_v47 = vcombine.high %v14030_v45, %v14030_v45  ;;  %v14742_v16 = vcombine.low %v14031_v61, %v14030_v45 }
 0x2fc   : > { %v14740_v20 = vrot.slane %v14726_v12, %v27673_v11 }
 0x2fd   : > { %v14708_v46 = vcombine.low %v13989_v9, %v13991_v17  ;;  %v14706_v52 = vrot.slane %v14692_v51, %v27673_v11  ;;  %v14071_v9 = vrot.slane %v14057_v37, %v27673_v11  ;;  %v14750_v51 = vrot.slane %v14742_v16, %v27673_v11  ;;  %v23400_v37 = vld [vmem:[%s27678_s5 + $0x111] sm:$0xff] }
 0x2fe   : > { %25519 = vmatmul.mubr.msk.f32.gmra.mrb[12].mxu0 %vm2554_vm4, %v14588_v30  ;;  %v14682_v30 = vrot.slane %v14674_v28, %v27673_v11  ;;  %v23397_v28 = vld [vmem:[%s27678_s5 + $0xf9] sm:$0xff] }
 0x2ff   : > { %25521 = vmatprep.mubr.msk.f32.mxu0 %vm27572_vm3, %v33293_v36  ;;  %v14716_v48 = vrot.slane %v14708_v46, %v27673_v11  ;;  %v14707_v50 = vcombine.low %v14699_v55, %v14706_v52  ;;  %v14074_v17 = vcombine.high %v23397_v28, %v23397_v28  ;;  %v14081_v0 = vrot.slane %v23397_v28, %v27673_v11  ;;  %v23399_v55 = vld [vmem:[%s27678_s5 + $0x109] sm:$0xff] }
 0x300   : > { %v14690_v19 = vcombine.low %v14682_v30, %v14689_v63  ;;  %v14743_v30 = vcombine.low %v14032_v47, %v14040_v3  ;;  %v14741_v63 = vcombine.low %v14733_v23, %v14740_v20  ;;  %v14776_v46 = vcombine.low %v14064_v10, %v14072_v56 }
 0x301   : > { %v14089_v21 = vcombine.high %v14081_v0, %v14081_v0  ;;  %v14122_v28 = vrot.slane %v23400_v37, %v27673_v11 }
 0x302   : > { %25522 = vmatmul.mubr.msk.f32.gmra.mrb[14].mxu0 %vm2554_vm4, %v14605_v34  ;;  %v14757_v39 = vrot.slane %v14743_v30, %v27673_v11 }
 0x303   : > { %25524 = vmatprep.mubr.msk.f32.mxu0 %vm27572_vm3, %v33293_v36 }
 0x304   : > { %v14758_v52 = vcombine.low %v14750_v51, %v14757_v39 }
 0x306   : > { %25525 = vmatmul.mubr.msk.f32.gmra.mrb[16].mxu0 %vm2554_vm4, %v14622_v7  ;;  %v14709_v7 = vcombine.low %v13999_v18, %v14007_v42  ;;  %v23433_v42 = vld.sshfl [vmem:[%s27678_s5 + $0xe9] sm:$0x3 pattern:$0x76325410] }
 0x307   : > { %25527 = vmatprep.mubr.msk.f32.mxu0 %vm27572_vm3, %v33293_v36 }
 0x308   : > { %v14723_v24 = vrot.slane %v14709_v7, %v27673_v11 }
 0x30a   : > { %25528 = vmatmul.mubr.msk.f32.gmra.mrb[18].mxu0 %vm2554_vm4, %v14639_v14 }
 0x30b   : > { %25530 = vmatprep.mubr.msk.f32.mxu0 %vm27572_vm3, %v33293_v36 }
 0x30d   : > { %v11637_v49 = vpop.f32.mrb[98].mxu0 }
 0x30e   : > { %v25365_v43 = vpop.f32.mrb[99].mxu0  ;;  %25531 = vmatmul.mubr.msk.f32.gmra.mrb[20].mxu0 %vm2554_vm4, %v14656_v27  ;;  %v14724_v27 = vcombine.low %v14716_v48, %v14723_v24  ;;  %v14048_v49 = vcombine.high %v14040_v3, %v14040_v3  ;;  %v14793_v24 = vcombine.low %v14081_v0, %v14089_v21  ;;  %v23434_v3 = vld.sshfl [vmem:[%s27678_s5 + $0x101] sm:$0x3 pattern:$0x76325410] }
 0x30f   : > { %25533 = vmatprep.mubr.msk.f32.mxu0 %vm27572_vm3, %v33293_v36  ;;  %v3945_v34 = vpop.f32.mrb[86].mxu1  ;;  %v14073_v43 = vcombine.high %v14071_v9, %v14071_v9  ;;  %v23435_v0 = vld.sshfl [vmem:[%s27678_s5 + $0x119] sm:$0x3 pattern:$0x76325410] }
 0x310   : > { %v24857_v32 = vpop.f32.mrb[87].mxu1  ;;  %v14759_v5 = vcombine.low %v14048_v49, %v14047_v29  ;;  %v14760_v34 = vcombine.low %v14049_v54, %v23433_v42  ;;  %v14115_v29 = vcombine.high %v23400_v37, %v23400_v37  ;;  %v14130_v54 = vcombine.high %v14122_v28, %v14122_v28 }
 0x311   : > { %v11642_v4 = vpop.f32.mrb[100].mxu0  ;;  %v14777_v7 = vcombine.low %v14071_v9, %v14073_v43  ;;  %v14098_v32 = vcombine.high %v23399_v55, %v23399_v55 }
 0x312   : > { %v25368_v1 = vpop.f32.mrb[101].mxu0  ;;  %25534 = vmatmul.mubr.msk.f32.gmra.mrb[26].mxu0 %vm2554_vm4, %v14673_v2  ;;  %v14088_v4 = vrot.slane %v14074_v17, %v27673_v11  ;;  %v14767_v45 = vrot.slane %v14759_v5, %v27673_v11  ;;  %v14774_v13 = vrot.slane %v14760_v34, %v27673_v11  ;;  %v14129_v49 = vrot.slane %v14115_v29, %v27673_v11  ;;  %v23403_v17 = vld [vmem:[%s27678_s5 + $0x129] sm:$0xff]  ;;  %v23408_v29 = vld [vmem:[%s27678_s5 + $0x151] sm:$0xff] }
 0x313   : > { %25536 = vmatprep.mubr.msk.f32.mxu0 %vm27572_vm3, %v33293_v36  ;;  %v3950_v35 = vpop.f32.mrb[88].mxu1  ;;  %v14105_v1 = vrot.slane %v23399_v55, %v27673_v11  ;;  %v14112_v40 = vrot.slane %v14098_v32, %v27673_v11  ;;  %v14163_v39 = vrot.slane %v23403_v17, %v27673_v11 }
 0x314   : > { %v24860_v14 = vpop.f32.mrb[89].mxu1  ;;  %v14090_v12 = vcombine.high %v14088_v4, %v14088_v4  ;;  %v14784_v35 = vrot.slane %v14776_v46, %v27673_v11  ;;  %v14131_v42 = vcombine.high %v14129_v49, %v14129_v49  ;;  %v14828_v55 = vcombine.low %v14130_v54, %v14129_v49 }
 0x315   : > { %v13376_v62 = vpop.f32.mrb[102].mxu0  ;;  %v14113_v61 = vcombine.high %v14105_v1, %v14105_v1  ;;  %v23402_v14 = vld [vmem:[%s27678_s5 + $0x121] sm:$0xff]  ;;  %v14810_v23 = vcombine.low %v23434_v3, %v14105_v1  ;;  %v14114_v30 = vcombine.high %v14112_v40, %v14112_v40  ;;  %v14156_v46 = vcombine.high %v23403_v17, %v23403_v17 }
 0x316   : > { %v25375_v44 = vpop.f32.mrb[103].mxu0  ;;  %25537 = vmatmul.mubr.msk.f32.gmra.mrb[28].mxu0 %vm2554_vm4, %v14690_v19  ;;  %v14791_v62 = vrot.slane %v14777_v7, %v27673_v11  ;;  %v14794_v47 = vcombine.low %v14088_v4, %v14090_v12  ;;  %v14146_v9 = vrot.slane %v23402_v14, %v27673_v11  ;;  %v14139_v16 = vcombine.high %v23402_v14, %v23402_v14  ;;  %v23405_v7 = vld [vmem:[%s27678_s5 + $0x139] sm:$0xff] }
 0x317   : > { %25539 = vmatprep.mubr.msk.f32.mxu0 %vm27572_vm3, %v33293_v36  ;;  %v31310_v18 = vpop.f32.mrb[22].mxu1  ;;  %v14811_v20 = vcombine.low %v14113_v61, %v14112_v40  ;;  %v14827_v4 = vcombine.low %v14114_v30, %v14122_v28  ;;  %v14844_v21 = vcombine.low %v14131_v42, %v23435_v0  ;;  %v14842_v37 = vrot.slane %v14828_v55, %v27673_v11  ;;  %v23409_v0 = vld [vmem:[%s27678_s5 + $0x159] sm:$0xff] }
 0x318   : > { %v24900_v15 = vpop.f32.mrb[23].mxu1  ;;  %v14792_v10 = vcombine.low %v14784_v35, %v14791_v62  ;;  %v14154_v56 = vcombine.high %v14146_v9, %v14146_v9  ;;  %v14170_v35 = vrot.slane %v14156_v46, %v27673_v11  ;;  %v23406_v62 = vld [vmem:[%s27678_s5 + $0x141] sm:$0xff]  ;;  %v14238_v46 = vcombine.high %v23409_v0, %v23409_v0 }
 0x319   : > { %v13381_v60 = vpop.f32.mrb[104].mxu0  ;;  %v14825_v51 = vrot.slane %v14811_v20, %v27673_v11  ;;  %v14835_v12 = vrot.slane %v14827_v4, %v27673_v11  ;;  %v14852_v40 = vrot.slane %v14844_v21, %v27673_v11  ;;  %v14197_v3 = vcombine.high %v23406_v62, %v23406_v62 }
 0x31a   : > { %v25378_v31 = vpop.f32.mrb[105].mxu0  ;;  %25540 = vmatmul.mubr.msk.f32.gmra.mrb[30].mxu0 %vm2554_vm4, %v14707_v50  ;;  %v14775_v50 = vcombine.low %v14767_v45, %v14774_v13  ;;  %v14845_v32 = vcombine.low %v14146_v9, %v14154_v56  ;;  %v14171_v45 = vcombine.high %v14163_v39, %v14163_v39  ;;  %v23436_v9 = vld.sshfl [vmem:[%s27678_s5 + $0x131] sm:$0x3 pattern:$0x76325410] }
 0x31b   : > { %25542 = vmatprep.mubr.msk.f32.mxu0 %vm27572_vm3, %v33293_v36  ;;  %v31318_v2 = vpop.f32.mrb[24].mxu1  ;;  %v14808_v31 = vrot.slane %v14794_v47, %v27673_v11  ;;  %v14187_v47 = vrot.slane %v23405_v7, %v27673_v11  ;;  %v14211_v54 = vrot.slane %v14197_v3, %v27673_v11  ;;  %v23411_v3 = vld [vmem:[%s27678_s5 + $0x169] sm:$0xff] }
 0x31c   : > { %v24903_v59 = vpop.f32.mrb[25].mxu1  ;;  %v14859_v61 = vrot.slane %v14845_v32, %v27673_v11 }
 0x31d   : > { %v14153_v59 = vrot.slane %v14139_v16, %v27673_v11  ;;  %v14221_v16 = vcombine.high %v23408_v29, %v23408_v29  ;;  %v14879_v49 = vcombine.low %v23436_v9, %v14187_v47  ;;  %v14195_v56 = vcombine.high %v14187_v47, %v14187_v47 }
 0x31e   : > { %25543 = vmatmul.mubr.msk.f32.gmra.mrb[32].mxu0 %vm2554_vm4, %v14724_v27  ;;  %v14801_v27 = vrot.slane %v14793_v24, %v27673_v11  ;;  %v14180_v24 = vcombine.high %v23405_v7, %v23405_v7  ;;  %v14860_v20 = vcombine.low %v14852_v40, %v14859_v61  ;;  %v14213_v55 = vcombine.high %v14211_v54, %v14211_v54 }
 0x31f   : > { %25545 = vmatprep.mubr.msk.f32.mxu0 %vm27572_vm3, %v33293_v36  ;;  %v31328_v38 = vpop.f32.mrb[26].mxu1  ;;  %v14893_v32 = vrot.slane %v14879_v49, %v27673_v11  ;;  %v14252_v40 = vrot.slane %v14238_v46, %v27673_v11  ;;  %v14269_v49 = vrot.slane %v23411_v3, %v27673_v11 }
 0x320   : > { %v24906_v19 = vpop.f32.mrb[27].mxu1  ;;  %v14809_v34 = vcombine.low %v14801_v27, %v14808_v31  ;;  %v14172_v27 = vcombine.high %v14170_v35, %v14170_v35 }
 0x322   : > { %25546 = vmatmul.mubr.msk.f32.gmra.mrb[34].mxu0 %vm2554_vm4, %v14741_v63  ;;  %v14818_v63 = vrot.slane %v14810_v23, %v27673_v11  ;;  %v14194_v23 = vrot.slane %v14180_v24, %v27673_v11  ;;  %v14878_v42 = vcombine.low %v14170_v35, %v14172_v27  ;;  %v14245_v24 = vrot.slane %v23409_v0, %v27673_v11 }
 0x323   : > { %25548 = vmatprep.mubr.msk.f32.mxu0 %vm27572_vm3, %v33293_v36  ;;  %v31339_v48 = vpop.f32.mrb[28].mxu1 }
 0x324   : > { %v24909_v44 = vpop.f32.mrb[29].mxu1  ;;  %v14826_v19 = vcombine.low %v14818_v63, %v14825_v51  ;;  %v14196_v63 = vcombine.high %v14194_v23, %v14194_v23  ;;  %v14204_v51 = vrot.slane %v23406_v62, %v27673_v11  ;;  %v14886_v21 = vrot.slane %v14878_v42, %v27673_v11 }
 0x326   : > { %25549 = vmatmul.mubr.msk.f32.gmra.mrb[36].mxu0 %vm2554_vm4, %v14758_v52  ;;  %v14155_v52 = vcombine.high %v14153_v59, %v14153_v59  ;;  %v14212_v4 = vcombine.high %v14204_v51, %v14204_v51 }
 0x327   : > { %25551 = vmatprep.mubr.msk.f32.mxu0 %vm27572_vm3, %v33293_v36  ;;  %v31349_v60 = vpop.f32.mrb[30].mxu1 }
 0x328   : > { %v24912_v15 = vpop.f32.mrb[31].mxu1  ;;  %v14861_v44 = vcombine.low %v14153_v59, %v14155_v52  ;;  %v14228_v59 = vrot.slane %v23408_v29, %v27673_v11  ;;  %v14896_v52 = vcombine.low %v14196_v63, %v14204_v51  ;;  %v14912_v35 = vcombine.low %v14212_v4, %v14211_v54  ;;  %v23412_v54 = vld [vmem:[%s27678_s5 + $0x171] sm:$0xff] }
 0x329   : > { %v14279_v46 = vcombine.high %v23412_v54, %v23412_v54 }
 0x32a   : > { %25552 = vmatmul.mubr.msk.f32.gmra.mrb[38].mxu0 %vm2554_vm4, %v14775_v50  ;;  %v14862_v50 = vcombine.low %v14163_v39, %v14171_v45  ;;  %v14869_v31 = vrot.slane %v14861_v44, %v27673_v11  ;;  %v14235_v39 = vrot.slane %v14221_v16, %v27673_v11  ;;  %v23437_v45 = vld.sshfl [vmem:[%s27678_s5 + $0x149] sm:$0x3 pattern:$0x76325410]  ;;  %v14894_v44 = vcombine.low %v14886_v21, %v14893_v32 }
 0x32b   : > { %25554 = vmatprep.mubr.msk.f32.mxu0 %vm27572_vm3, %v33293_v36  ;;  %v31358_v43 = vpop.f32.mrb[32].mxu1  ;;  %v14913_v62 = vcombine.low %v14213_v55, %v23437_v45  ;;  %v14910_v47 = vrot.slane %v14896_v52, %v27673_v11  ;;  %v14920_v9 = vrot.slane %v14912_v35, %v27673_v11  ;;  %v14277_v55 = vcombine.high %v14269_v49, %v14269_v49 }
 0x32c   : > { %v24915_v5 = vpop.f32.mrb[33].mxu1  ;;  %v14876_v30 = vrot.slane %v14862_v50, %v27673_v11 }
 0x32d   : > { %v14927_v27 = vrot.slane %v14913_v62, %v27673_v11 }
 0x32e   : > { %25555 = vmatmul.mubr.msk.f32.gmra.mrb[40].mxu0 %vm2554_vm4, %v14792_v10  ;;  %v14843_v10 = vcombine.low %v14835_v12, %v14842_v37  ;;  %v14237_v12 = vcombine.high %v14235_v39, %v14235_v39 }
 0x32f   : > { %25557 = vmatprep.mubr.msk.f32.mxu0 %vm27572_vm3, %v33293_v36  ;;  %v31369_v1 = vpop.f32.mrb[34].mxu1  ;;  %v14928_v63 = vcombine.low %v14920_v9, %v14927_v27 }
 0x330   : > { %v24918_v13 = vpop.f32.mrb[35].mxu1 }
 0x331   : > { %v14236_v13 = vcombine.high %v14228_v59, %v14228_v59 }
 0x332   : > { %25558 = vmatmul.mubr.msk.f32.gmra.mrb[42].mxu0 %vm2554_vm4, %v14809_v34  ;;  %v14877_v34 = vcombine.low %v14869_v31, %v14876_v30  ;;  %v14262_v30 = vcombine.high %v23411_v3, %v23411_v3 }
 0x333   : > { %25560 = vmatprep.mubr.msk.f32.mxu0 %vm27572_vm3, %v33293_v36  ;;  %v31380_v14 = vpop.f32.mrb[36].mxu1  ;;  %v14929_v29 = vcombine.low %v14228_v59, %v14236_v13  ;;  %v23414_v59 = vld [vmem:[%s27678_s5 + $0x181] sm:$0xff] }
 0x334   : > { %v24921_v28 = vpop.f32.mrb[37].mxu1  ;;  %v14276_v4 = vrot.slane %v14262_v30, %v27673_v11  ;;  %v14310_v32 = vrot.slane %v23414_v59, %v27673_v11 }
 0x335   : > { %v14930_v28 = vcombine.low %v14235_v39, %v14237_v12  ;;  %v14303_v12 = vcombine.high %v23414_v59, %v23414_v59 }
 0x336   : > { %25561 = vmatmul.mubr.msk.f32.gmra.mrb[44].mxu0 %vm2554_vm4, %v14826_v19  ;;  %v14895_v19 = vcombine.low %v14195_v56, %v14194_v23  ;;  %v14253_v23 = vcombine.high %v14245_v24, %v14245_v24  ;;  %v14964_v62 = vcombine.low %v14277_v55, %v14276_v4 }
 0x337   : > { %25563 = vmatprep.mubr.msk.f32.mxu0 %vm27572_vm3, %v33293_v36  ;;  %v31389_v15 = vpop.f32.mrb[38].mxu1  ;;  %v14944_v42 = vrot.slane %v14930_v28, %v27673_v11  ;;  %v23439_v28 = vld.sshfl [vmem:[%s27678_s5 + $0x179] sm:$0x3 pattern:$0x76325410]  ;;  %v14317_v9 = vrot.slane %v14303_v12, %v27673_v11 }
 0x338   : > { %v24924_v17 = vpop.f32.mrb[39].mxu1  ;;  %v14903_v50 = vrot.slane %v14895_v19, %v27673_v11  ;;  %v14946_v51 = vcombine.low %v14245_v24, %v14253_v23  ;;  %v14278_v24 = vcombine.high %v14276_v4, %v14276_v4 }
 0x339   : > { %v14937_v17 = vrot.slane %v14929_v29, %v27673_v11 }
 0x33a   : > { %25564 = vmatmul.mubr.msk.f32.gmra.mrb[46].mxu0 %vm2554_vm4, %v14843_v10  ;;  %v14911_v31 = vcombine.low %v14903_v50, %v14910_v47  ;;  %v14954_v52 = vrot.slane %v14946_v51, %v27673_v11  ;;  %v14318_v47 = vcombine.high %v14310_v32, %v14310_v32  ;;  %v14319_v51 = vcombine.high %v14317_v9, %v14317_v9 }
 0x33b   : > { %25566 = vmatprep.mubr.msk.f32.mxu0 %vm27572_vm3, %v33293_v36  ;;  %v31401_v5 = vpop.f32.mrb[40].mxu1  ;;  %v14945_v21 = vcombine.low %v14937_v17, %v14944_v42 }
 0x33c   : > { %v24927_v7 = vpop.f32.mrb[41].mxu1  ;;  %v14998_v42 = vcombine.low %v14310_v32, %v14318_v47 }
 0x33d   : > { %v14286_v7 = vrot.slane %v23412_v54, %v27673_v11  ;;  %v23417_v54 = vld [vmem:[%s27678_s5 + $0x199] sm:$0xff] }
 0x33e   : > { %25567 = vmatmul.mubr.msk.f32.gmra.mrb[48].mxu0 %vm2554_vm4, %v14860_v20  ;;  %v14254_v20 = vcombine.high %v14252_v40, %v14252_v40  ;;  %v15012_v32 = vrot.slane %v14998_v42, %v27673_v11 }
 0x33f   : > { %25569 = vmatprep.mubr.msk.f32.mxu0 %vm27572_vm3, %v33293_v36  ;;  %v31409_v37 = vpop.f32.mrb[42].mxu1  ;;  %v14980_v30 = vcombine.low %v14278_v24, %v14286_v7 }
 0x340   : > { %v24930_v61 = vpop.f32.mrb[43].mxu1  ;;  %v14947_v0 = vcombine.low %v14252_v40, %v14254_v20  ;;  %v14293_v40 = vrot.slane %v14279_v46, %v27673_v11 }
 0x341   : > { %v14294_v61 = vcombine.high %v14286_v7, %v14286_v7  ;;  %v14988_v55 = vrot.slane %v14980_v30, %v27673_v11  ;;  %v14344_v7 = vcombine.high %v23417_v54, %v23417_v54 }
 0x342   : > { %25570 = vmatmul.mubr.msk.f32.gmra.mrb[50].mxu0 %vm2554_vm4, %v14877_v34  ;;  %v23438_v34 = vld.sshfl [vmem:[%s27678_s5 + $0x161] sm:$0x3 pattern:$0x76325410]  ;;  %v14961_v45 = vrot.slane %v14947_v0, %v27673_v11  ;;  %v14295_v50 = vcombine.high %v14293_v40, %v14293_v40 }
 0x343   : > { %25572 = vmatprep.mubr.msk.f32.mxu0 %vm27572_vm3, %v33293_v36  ;;  %v31419_v10 = vpop.f32.mrb[44].mxu1  ;;  %v14963_v13 = vcombine.low %v23438_v34, %v14269_v49  ;;  %v14981_v49 = vcombine.low %v14294_v61, %v14293_v40  ;;  %v14351_v40 = vrot.slane %v23417_v54, %v27673_v11  ;;  %v14358_v61 = vrot.slane %v14344_v7, %v27673_v11 }
 0x344   : > { %v24933_v16 = vpop.f32.mrb[45].mxu1  ;;  %v14962_v29 = vcombine.low %v14954_v52, %v14961_v45  ;;  %v14997_v17 = vcombine.low %v14295_v50, %v23439_v28  ;;  %v23440_v50 = vld.sshfl [vmem:[%s27678_s5 + $0x191] sm:$0x3 pattern:$0x76325410] }
 0x345   : > { %v14971_v16 = vrot.slane %v14963_v13, %v27673_v11  ;;  %v14995_v46 = vrot.slane %v14981_v49, %v27673_v11  ;;  %v15014_v13 = vcombine.low %v14317_v9, %v14319_v51  ;;  %v14359_v30 = vcombine.high %v14351_v40, %v14351_v40 }
 0x346   : > { %25573 = vmatmul.mubr.msk.f32.gmra.mrb[52].mxu0 %vm2554_vm4, %v14894_v44  ;;  %v23415_v44 = vld [vmem:[%s27678_s5 + $0x189] sm:$0xff]  ;;  %v14360_v49 = vcombine.high %v14358_v61, %v14358_v61 }
 0x347   : > { %25575 = vmatprep.mubr.msk.f32.mxu0 %vm27572_vm3, %v33293_v36  ;;  %v31430_v56 = vpop.f32.mrb[46].mxu1  ;;  %v14327_v27 = vrot.slane %v23415_v44, %v27673_v11  ;;  %v14320_v23 = vcombine.high %v23415_v44, %v23415_v44  ;;  %v14996_v24 = vcombine.low %v14988_v55, %v14995_v46  ;;  %v23420_v44 = vld [vmem:[%s27678_s5 + $0x1b1] sm:$0xff]  ;;  %v15022_v9 = vrot.slane %v15014_v13, %v27673_v11 }
 0x348   : > { %v24936_v39 = vpop.f32.mrb[47].mxu1 }
 0x349   : > { %v14335_v0 = vcombine.high %v14327_v27, %v14327_v27  ;;  %v14334_v59 = vrot.slane %v14320_v23, %v27673_v11  ;;  %v23418_v39 = vld [vmem:[%s27678_s5 + $0x1a1] sm:$0xff] }
 0x34a   : > { %25576 = vmatmul.mubr.msk.f32.gmra.mrb[54].mxu0 %vm2554_vm4, %v14911_v31  ;;  %v14978_v31 = vrot.slane %v14964_v62, %v27673_v11  ;;  %v14361_v52 = vcombine.high %v23418_v39, %v23418_v39  ;;  %v14368_v54 = vrot.slane %v23418_v39, %v27673_v11 }
 0x34b   : > { %25578 = vmatprep.mubr.msk.f32.mxu0 %vm27572_vm3, %v33293_v36  ;;  %v31440_v19 = vpop.f32.mrb[48].mxu1  ;;  %v15015_v12 = vcombine.low %v14327_v27, %v14335_v0 }
 0x34c   : > { %v24939_v35 = vpop.f32.mrb[49].mxu1  ;;  %v14979_v4 = vcombine.low %v14971_v16, %v14978_v31  ;;  %v15032_v31 = vcombine.low %v23440_v50, %v14351_v40  ;;  %v14376_v42 = vcombine.high %v14368_v54, %v14368_v54 }
 0x34d   : > { %v14336_v35 = vcombine.high %v14334_v59, %v14334_v59  ;;  %v15029_v27 = vrot.slane %v15015_v12, %v27673_v11 }
 0x34e   : > { %25579 = vmatmul.mubr.msk.f32.gmra.mrb[56].mxu0 %vm2554_vm4, %v14928_v63 }
 0x34f   : > { %25581 = vmatprep.mubr.msk.f32.mxu0 %vm27572_vm3, %v33293_v36  ;;  %v31449_v3 = vpop.f32.mrb[50].mxu1  ;;  %v15031_v23 = vcombine.low %v14334_v59, %v14336_v35  ;;  %v14392_v59 = vrot.slane %v23420_v44, %v27673_v11 }
 0x350   : > { %v24942_v20 = vpop.f32.mrb[51].mxu1 }
 0x351   : > { %v14385_v20 = vcombine.high %v23420_v44, %v23420_v44  ;;  %v15039_v39 = vrot.slane %v15031_v23, %v27673_v11 }
 0x352   : > { %25582 = vmatmul.mubr.msk.f32.gmra.mrb[58].mxu0 %vm2554_vm4, %v14945_v21  ;;  %v15005_v21 = vrot.slane %v14997_v17, %v27673_v11  ;;  %v23421_v17 = vld [vmem:[%s27678_s5 + $0x1b9] sm:$0xff] }
 0x353   : > { %25584 = vmatprep.mubr.msk.f32.mxu0 %vm27572_vm3, %v33293_v36  ;;  %v31460_v63 = vpop.f32.mrb[52].mxu1  ;;  %v14399_v55 = vrot.slane %v14385_v20, %v27673_v11  ;;  %v14402_v46 = vcombine.high %v23421_v17, %v23421_v17  ;;  %v14409_v40 = vrot.slane %v23421_v17, %v27673_v11 }
 0x354   : > { %v24945_v34 = vpop.f32.mrb[53].mxu1  ;;  %v15013_v47 = vcombine.low %v15005_v21, %v15012_v32  ;;  %v15046_v21 = vrot.slane %v15032_v31, %v27673_v11  ;;  %v15048_v32 = vcombine.low %v14359_v30, %v14358_v61 }
 0x355   : > { %v15030_v34 = vcombine.low %v15022_v9, %v15029_v27  ;;  %v14416_v44 = vrot.slane %v14402_v46, %v27673_v11  ;;  %v14417_v30 = vcombine.high %v14409_v40, %v14409_v40 }
 0x356   : > { %25585 = vmatmul.mubr.msk.f32.gmra.mrb[60].mxu0 %vm2554_vm4, %v14962_v29  ;;  %v14375_v29 = vrot.slane %v14361_v52, %v27673_v11  ;;  %v15049_v52 = vcombine.low %v14360_v49, %v14368_v54  ;;  %v15056_v61 = vrot.slane %v15048_v32, %v27673_v11 }
 0x357   : > { %25587 = vmatprep.mubr.msk.f32.mxu0 %vm27572_vm3, %v33293_v36  ;;  %v31471_v45 = vpop.f32.mrb[54].mxu1  ;;  %v14418_v49 = vcombine.high %v14416_v44, %v14416_v44 }
 0x358   : > { %v24948_v62 = vpop.f32.mrb[55].mxu1  ;;  %v14377_v51 = vcombine.high %v14375_v29, %v14375_v29  ;;  %v15065_v13 = vcombine.low %v14376_v42, %v14375_v29  ;;  %v15063_v9 = vrot.slane %v15049_v52, %v27673_v11  ;;  %v23423_v29 = vld [vmem:[%s27678_s5 + $0x1c9] sm:$0xff]  ;;  %v23442_v52 = vld.sshfl [vmem:[%s27678_s5 + $0x1c1] sm:$0x3 pattern:$0x76325410] }
 0x359   : > { %v14400_v62 = vcombine.high %v14392_v59, %v14392_v59  ;;  %v14426_v42 = vcombine.high %v23423_v29, %v23423_v29 }
 0x35a   : > { %25588 = vmatmul.mubr.msk.f32.gmra.mrb[62].mxu0 %vm2554_vm4, %v14979_v4  ;;  %v23441_v4 = vld.sshfl [vmem:[%s27678_s5 + $0x1a9] sm:$0x3 pattern:$0x76325410]  ;;  %v15073_v27 = vrot.slane %v15065_v13, %v27673_v11  ;;  %v15064_v17 = vcombine.low %v15056_v61, %v15063_v9 }
 0x35b   : > { %25590 = vmatprep.mubr.msk.f32.mxu0 %vm27572_vm3, %v33293_v36  ;;  %v31481_v28 = vpop.f32.mrb[56].mxu1  ;;  %v15066_v12 = vcombine.low %v14377_v51, %v23441_v4  ;;  %v14433_v51 = vrot.slane %v23423_v29, %v27673_v11  ;;  %v14440_v13 = vrot.slane %v14426_v42, %v27673_v11 }
 0x35c   : > { %v24951_v16 = vpop.f32.mrb[57].mxu1 }
 0x35d   : > { %v15080_v23 = vrot.slane %v15066_v12, %v27673_v11  ;;  %v15082_v16 = vcombine.low %v14392_v59, %v14400_v62  ;;  %v14441_v12 = vcombine.high %v14433_v51, %v14433_v51  ;;  %v15116_v9 = vcombine.low %v23442_v52, %v14433_v51 }
 0x35e   : > { %25591 = vmatmul.mubr.msk.f32.gmra.mrb[64].mxu0 %vm2554_vm4, %v14996_v24  ;;  %v14401_v24 = vcombine.high %v14399_v55, %v14399_v55 }
 0x35f   : > { %25593 = vmatprep.mubr.msk.f32.mxu0 %vm27572_vm3, %v33293_v36  ;;  %v31490_v0 = vpop.f32.mrb[58].mxu1  ;;  %v15081_v4 = vcombine.low %v15073_v27, %v15080_v23  ;;  %v15090_v59 = vrot.slane %v15082_v16, %v27673_v11  ;;  %v15117_v27 = vcombine.low %v14441_v12, %v14440_v13  ;;  %v14442_v23 = vcombine.high %v14440_v13, %v14440_v13 }
 0x360   : > { %v24954_v7 = vpop.f32.mrb[59].mxu1  ;;  %v15083_v31 = vcombine.low %v14399_v55, %v14401_v24 }
 0x361   : > { %v15099_v7 = vcombine.low %v14409_v40, %v14417_v30  ;;  %v23489_v30 = vld [vmem:[%s27678_s5 + $0x3a] sm:$0xff] }
 0x362   : > { %25594 = vmatmul.mubr.msk.f32.gmra.mrb[66].mxu0 %vm2554_vm4, %v15013_v47  ;;  %v15047_v47 = vcombine.low %v15039_v39, %v15046_v21  ;;  %v15097_v55 = vrot.slane %v15083_v31, %v27673_v11  ;;  %v15100_v39 = vcombine.low %v14416_v44, %v14418_v49  ;;  %v23488_v21 = vld [vmem:[%s27678_s5 + $0x32] sm:$0xff]  ;;  %v15679_v51 = vcombine.high %v23489_v30, %v23489_v30 }
 0x363   : > { %25596 = vmatprep.mubr.msk.f32.mxu0 %vm27572_vm3, %v33293_v36  ;;  %v31500_v35 = vpop.f32.mrb[60].mxu1  ;;  %v15107_v44 = vrot.slane %v15099_v7, %v27673_v11  ;;  %v15669_v49 = vrot.slane %v23488_v21, %v27673_v11  ;;  %v15686_v52 = vrot.slane %v23489_v30, %v27673_v11 }
 0x364   : > { %v24957_v50 = vpop.f32.mrb[61].mxu1  ;;  %v15098_v40 = vcombine.low %v15090_v59, %v15097_v55  ;;  %v15114_v61 = vrot.slane %v15100_v39, %v27673_v11  ;;  %v15131_v59 = vrot.slane %v15117_v27, %v27673_v11  ;;  %v15693_v13 = vrot.slane %v15679_v51, %v27673_v11 }
 0x365   : > { %v15662_v50 = vcombine.high %v23488_v21, %v23488_v21  ;;  %v15677_v39 = vcombine.high %v15669_v49, %v15669_v49 }
 0x366   : > { %25597 = vmatmul.mubr.msk.f32.gmra.mrb[68].mxu0 %vm2554_vm4, %v15030_v34  ;;  %v23424_v34 = vld [vmem:[%s27678_s5 + $0x1d1] sm:$0xff]  ;;  %v15115_v42 = vcombine.low %v15107_v44, %v15114_v61  ;;  %v23443_v61 = vld.sshfl [vmem:[%s27678_s5 + $0x1d9] sm:$0x3 pattern:$0x76325410] }
 0x367   : > { %25599 = vmatprep.mubr.msk.f32.mxu0 %vm27572_vm3, %v33293_v36  ;;  %v31512_v20 = vpop.f32.mrb[62].mxu1  ;;  %v14443_v62 = vcombine.high %v23424_v34, %v23424_v34  ;;  %v14450_v24 = vrot.slane %v23424_v34, %v27673_v11  ;;  %v23491_v44 = vld [vmem:[%s27678_s5 + $0x4a] sm:$0xff] }
 0x368   : > { %v24960_v54 = vpop.f32.mrb[63].mxu1  ;;  %v15703_v30 = vcombine.high %v23491_v44, %v23491_v44 }
 0x369   : > { %v14457_v16 = vrot.slane %v14443_v62, %v27673_v11  ;;  %v14458_v31 = vcombine.high %v14450_v24, %v14450_v24  ;;  %v15676_v54 = vrot.slane %v15662_v50, %v27673_v11  ;;  %v15133_v55 = vcombine.low %v14442_v23, %v14450_v24 }
 0x36a   : > { %25600 = vmatmul.mubr.msk.f32.gmra.mrb[70].mxu0 %vm2554_vm4, %v15047_v47  ;;  %v15694_v23 = vcombine.high %v15686_v52, %v15686_v52 }
 0x36b   : > { %25602 = vmatprep.mubr.msk.f32.mxu0 %vm27572_vm3, %v33293_v36  ;;  %v31519_v46 = vpop.f32.mrb[64].mxu1  ;;  %v15134_v7 = vcombine.low %v14458_v31, %v14457_v16  ;;  %v15678_v21 = vcombine.high %v15676_v54, %v15676_v54  ;;  %v15141_v50 = vrot.slane %v15133_v55, %v27673_v11  ;;  %v15695_v31 = vcombine.high %v15693_v13, %v15693_v13 }
 0x36c   : > { %v24963_v32 = vpop.f32.mrb[65].mxu1  ;;  %v16420_v55 = vcombine.low %v15686_v52, %v15694_v23 }
 0x36d   : > { %v15148_v24 = vrot.slane %v15134_v7, %v27673_v11  ;;  %v16421_v7 = vcombine.low %v15693_v13, %v15695_v31 }
 0x36e   : > { %25603 = vmatmul.mubr.msk.f32.gmra.mrb[72].mxu0 %vm2554_vm4, %v15064_v17 }
 0x36f   : > { %25605 = vmatprep.mubr.msk.f32.mxu0 %vm27572_vm3, %v33293_v36  ;;  %v31530_v47 = vpop.f32.mrb[66].mxu1 }
 0x370   : > { %v24966_v29 = vpop.f32.mrb[67].mxu1 }
 0x371   : > { %v16404_v29 = vcombine.low %v15676_v54, %v15678_v21 }
 0x372   : > { %25606 = vmatmul.mubr.msk.f32.gmra.mrb[74].mxu0 %vm2554_vm4, %v15081_v4  ;;  %v15124_v4 = vrot.slane %v15116_v9, %v27673_v11  ;;  %v16403_v9 = vcombine.low %v15669_v49, %v15677_v39  ;;  %v15717_v39 = vrot.slane %v15703_v30, %v27673_v11  ;;  %v23495_v30 = vld [vmem:[%s27678_s5 + $0x6a] sm:$0xff] }
 0x373   : > { %25608 = vmatprep.mubr.msk.f32.mxu0 %vm27572_vm3, %v33293_v36  ;;  %v31541_v17 = vpop.f32.mrb[68].mxu1  ;;  %v16418_v54 = vrot.slane %v16404_v29, %v27673_v11  ;;  %v16435_v29 = vrot.slane %v16421_v7, %v27673_v11 }
 0x374   : > { %33539 = vst [vmem:[#allocation68_spill] sm:$0xff] %v31541_v17  ;;  %v24969_v34 = vpop.f32.mrb[69].mxu1  ;;  %v15132_v62 = vcombine.low %v15124_v4, %v15131_v59  ;;  %v23492_v4 = vld [vmem:[%s27678_s5 + $0x52] sm:$0xff]  ;;  %v16411_v49 = vrot.slane %v16403_v9, %v27673_v11  ;;  %v16428_v9 = vrot.slane %v16420_v55, %v27673_v11 }
 0x375   : > { %v23555_v17 = vld.sshfl [vmem:[%s27678_s5 + $0x17a] sm:$0x3 pattern:$0x76325410] }
 0x376   : > { %25609 = vmatmul.mubr.msk.f32.gmra.mrb[76].mxu0 %vm2554_vm4, %v15098_v40  ;;  %v14459_v40 = vcombine.high %v14457_v16, %v14457_v16  ;;  %v15149_v16 = vcombine.low %v15141_v50, %v15148_v24  ;;  %v23542_v50 = vld.sshfl [vmem:[%s27678_s5 + $0x42] sm:$0x3 pattern:$0x76325410]  ;;  %v15720_v24 = vcombine.high %v23492_v4, %v23492_v4  ;;  %v16436_v55 = vcombine.low %v16428_v9, %v16435_v29 }
 0x377   : > { %25611 = vmatprep.mubr.msk.f32.mxu0 %vm27572_vm3, %v33293_v36  ;;  %v31548_v32 = vpop.f32.mrb[70].mxu1 }
 0x378   : > { %33540 = vst [vmem:[#allocation39_spill] sm:$0xff] %v31548_v32  ;;  %v24972_v12 = vpop.f32.mrb[71].mxu1  ;;  %v15150_v34 = vcombine.low %v14459_v40, %v23443_v61  ;;  %v15727_v40 = vrot.slane %v23492_v4, %v27673_v11  ;;  %v16419_v61 = vcombine.low %v16411_v49, %v16418_v54 }
 0x37a   : > { %25612 = vmatmul.mubr.msk.f32.gmra.mrb[78].mxu0 %vm2554_vm4, %v15115_v42  ;;  %v15710_v42 = vrot.slane %v23491_v44, %v27673_v11  ;;  %v23494_v44 = vld [vmem:[%s27678_s5 + $0x62] sm:$0xff]  ;;  %v15735_v4 = vcombine.high %v15727_v40, %v15727_v40 }
 0x37b   : > { %25614 = vmatprep.mubr.msk.f32.mxu0 %vm27572_vm3, %v33293_v36  ;;  %v31559_v27 = vpop.f32.mrb[72].mxu1  ;;  %v15744_v52 = vcombine.high %v23494_v44, %v23494_v44  ;;  %v15751_v49 = vrot.slane %v23494_v44, %v27673_v11  ;;  %v23497_v44 = vld [vmem:[%s27678_s5 + $0x7a] sm:$0xff] }
 0x37c   : > { %33541 = vst [vmem:[#allocation42_spill] sm:$0xff] %v31559_v27  ;;  %v24975_v51 = vpop.f32.mrb[73].mxu1  ;;  %v15718_v21 = vcombine.high %v15710_v42, %v15710_v42  ;;  %v16437_v23 = vcombine.low %v23542_v50, %v15710_v42  ;;  %v15768_v42 = vrot.slane %v23495_v30, %v27673_v11 }
 0x37d   : > { %v15758_v54 = vrot.slane %v15744_v52, %v27673_v11  ;;  %v23543_v52 = vld.sshfl [vmem:[%s27678_s5 + $0x5a] sm:$0x3 pattern:$0x76325410] }
 0x37e   : > { %25615 = vmatmul.mubr.msk.f32.gmra.mrb[80].mxu0 %vm2554_vm4, %v15132_v62  ;;  %v15157_v62 = vrot.slane %v15150_v34, %v27673_v11  ;;  %v16438_v31 = vcombine.low %v15718_v21, %v15717_v39  ;;  %v15734_v34 = vrot.slane %v15720_v24, %v27673_v11  ;;  %v16445_v7 = vrot.slane %v16437_v23, %v27673_v11 }
 0x37f   : > { %25617 = vmatprep.mubr.msk.f32.mxu0 %vm27572_vm3, %v33293_v36  ;;  %v31568_v59 = vpop.f32.mrb[74].mxu1  ;;  %v15759_v24 = vcombine.high %v15751_v49, %v15751_v49  ;;  %v15776_v9 = vcombine.high %v15768_v42, %v15768_v42 }
 0x380   : > { %33542 = vst [vmem:[#allocation64_spill] sm:$0xff] %v31568_v59  ;;  %v24978_v12 = vpop.f32.mrb[75].mxu1  ;;  %v16452_v21 = vrot.slane %v16438_v31, %v27673_v11  ;;  %v15736_v50 = vcombine.high %v15734_v34, %v15734_v34  ;;  %v15785_v31 = vcombine.high %v23497_v44, %v23497_v44 }
 0x382   : > { %25618 = vmatmul.mubr.msk.f32.gmra.mrb[114].mxu0 %vm2554_vm4, %v15149_v16  ;;  %v15719_v16 = vcombine.high %v15717_v39, %v15717_v39  ;;  %v15761_v39 = vcombine.high %v23495_v30, %v23495_v30  ;;  %v16453_v29 = vcombine.low %v16445_v7, %v16452_v21  ;;  %v16471_v30 = vcombine.low %v15736_v50, %v23543_v52  ;;  %v23544_v21 = vld.sshfl [vmem:[%s27678_s5 + $0x72] sm:$0x3 pattern:$0x76325410] }
 0x383   : > { %25620 = vmatprep.mubr.msk.f32.mxu0 %vm27572_vm3, %v33293_v36  ;;  %v31578_v13 = vpop.f32.mrb[76].mxu1  ;;  %v15792_v7 = vrot.slane %v23497_v44, %v27673_v11 }
 0x384   : > { %33543 = vst [vmem:[#allocation58_spill] sm:$0xff] %v31578_v13  ;;  %v24981_v51 = vpop.f32.mrb[77].mxu1  ;;  %v16454_v12 = vcombine.low %v15719_v16, %v15727_v40  ;;  %v15775_v23 = vrot.slane %v15761_v39, %v27673_v11  ;;  %v16472_v16 = vcombine.low %v15751_v49, %v15759_v24  ;;  %v16489_v13 = vcombine.low %v15768_v42, %v15776_v9 }
 0x385   : > { %v15760_v51 = vcombine.high %v15758_v54, %v15758_v54  ;;  %v16506_v44 = vcombine.low %v23544_v21, %v15792_v7 }
 0x386   : > { %25621 = vmatmul.mubr.msk.f32.gmra.mrb[116].mxu0 %vm2554_vm4, %v15157_v62  ;;  %v16455_v62 = vcombine.low %v15735_v4, %v15734_v34  ;;  %v16462_v40 = vrot.slane %v16454_v12, %v27673_v11  ;;  %v23498_v34 = vld [vmem:[%s27678_s5 + $0x82] sm:$0xff]  ;;  %v15777_v39 = vcombine.high %v15775_v23, %v15775_v23  ;;  %v16486_v49 = vrot.slane %v16472_v16, %v27673_v11 }
 0x387   : > { %25627 = vmatprep.mubr.msk.f32.mxu0 %vm27572_vm3, %v33293_v36  ;;  %v16488_v4 = vcombine.low %v15758_v54, %v15760_v51  ;;  %v15802_v50 = vcombine.high %v23498_v34, %v23498_v34  ;;  %v23500_v54 = vld [vmem:[%s27678_s5 + $0x92] sm:$0xff]  ;;  %v16503_v24 = vrot.slane %v16489_v13, %v27673_v11  ;;  %v15800_v51 = vcombine.high %v15792_v7, %v15792_v7 }
 0x388   : > { %v16505_v52 = vcombine.low %v15775_v23, %v15777_v39  ;;  %v16520_v23 = vrot.slane %v16506_v44, %v27673_v11 }
 0x389   : > { %v16496_v42 = vrot.slane %v16488_v4, %v27673_v11 }
 0x38a   : > { %25628 = vmatmul.mubr.msk.f32.vlgmr.msra.gmra.mrb[118].mxu0 %vm2554_vm4, %v16419_v61  ;;  %v16469_v61 = vrot.slane %v16455_v62, %v27673_v11  ;;  %v16479_v62 = vrot.slane %v16471_v30, %v27673_v11  ;;  %v15826_v30 = vcombine.high %v23500_v54, %v23500_v54  ;;  %v16513_v13 = vrot.slane %v16505_v52, %v27673_v11 }
 0x38b   : > { %25630 = vmatprep.mubr.msk.f32.mxu0 %vm27572_vm3, %v33293_v36  ;;  %v16504_v16 = vcombine.low %v16496_v42, %v16503_v24 }
 0x38c   : > { %v16470_v12 = vcombine.low %v16462_v40, %v16469_v61  ;;  %v16487_v40 = vcombine.low %v16479_v62, %v16486_v49  ;;  %v15816_v61 = vrot.slane %v15802_v50, %v27673_v11  ;;  %v15840_v62 = vrot.slane %v15826_v30, %v27673_v11  ;;  %v23545_v49 = vld.sshfl [vmem:[%s27678_s5 + $0x8a] sm:$0x3 pattern:$0x76325410] }
 0x38d   : > { %v16521_v24 = vcombine.low %v16513_v13, %v16520_v23 }
 0x38e   : > { %25631 = vmatmul.mubr.msk.f32.gmra.mrb[120].mxu0 %vm2554_vm4, %v16436_v55  ;;  %v15799_v55 = vrot.slane %v15785_v31, %v27673_v11  ;;  %v23501_v31 = vld [vmem:[%s27678_s5 + $0x9a] sm:$0xff]  ;;  %v15818_v39 = vcombine.high %v15816_v61, %v15816_v61 }
 0x38f   : > { %25633 = vmatprep.mubr.msk.f32.mxu0 %vm27572_vm3, %v33293_v36  ;;  %v15843_v4 = vcombine.high %v23501_v31, %v23501_v31  ;;  %v15850_v50 = vrot.slane %v23501_v31, %v27673_v11 }
 0x390   : > { %v15801_v9 = vcombine.high %v15799_v55, %v15799_v55  ;;  %v16522_v7 = vcombine.low %v15800_v51, %v15799_v55 }
 0x391   : > { %v15857_v42 = vrot.slane %v15843_v4, %v27673_v11  ;;  %v15858_v31 = vcombine.high %v15850_v50, %v15850_v50 }
 0x392   : > { %25634 = vmatmul.mubr.msk.f32.gmra.mrb[4].mxu0 %vm2554_vm4, %v16453_v29  ;;  %v15809_v29 = vrot.slane %v23498_v34, %v27673_v11  ;;  %v16530_v55 = vrot.slane %v16522_v7, %v27673_v11 }
 0x393   : > { %25636 = vmatprep.mubr.msk.f32.mxu0 %vm27572_vm3, %v33293_v36 }
 0x394   : > { %v16523_v21 = vcombine.low %v15801_v9, %v15809_v29  ;;  %v15817_v34 = vcombine.high %v15809_v29, %v15809_v29  ;;  %v15842_v9 = vcombine.high %v15840_v62, %v15840_v62  ;;  %v23503_v29 = vld [vmem:[%s27678_s5 + $0xaa] sm:$0xff] }
 0x395   : > { %v15867_v4 = vcombine.high %v23503_v29, %v23503_v29  ;;  %v15874_v13 = vrot.slane %v23503_v29, %v27673_v11 }
 0x396   : > { %25637 = vmatmul.mubr.msk.f32.gmra.mrb[6].mxu0 %vm2554_vm4, %v16470_v12  ;;  %v15833_v12 = vrot.slane %v23500_v54, %v27673_v11  ;;  %v16537_v44 = vrot.slane %v16523_v21, %v27673_v11  ;;  %v16539_v52 = vcombine.low %v15817_v34, %v15816_v61  ;;  %v16540_v54 = vcombine.low %v15818_v39, %v23545_v49  ;;  %v23504_v21 = vld [vmem:[%s27678_s5 + $0xb2] sm:$0xff]  ;;  %v23546_v49 = vld.sshfl [vmem:[%s27678_s5 + $0xa2] sm:$0x3 pattern:$0x76325410] }
 0x397   : > { %25639 = vmatprep.mubr.msk.f32.mxu0 %vm27572_vm3, %v33293_v36  ;;  %v16557_v7 = vcombine.low %v15840_v62, %v15842_v9  ;;  %v16573_v34 = vcombine.low %v15850_v50, %v15858_v31  ;;  %v15884_v29 = vcombine.high %v23504_v21, %v23504_v21  ;;  %v23506_v50 = vld [vmem:[%s27678_s5 + $0xc2] sm:$0xff] }
 0x398   : > { %v15841_v51 = vcombine.high %v15833_v12, %v15833_v12  ;;  %v16538_v30 = vcombine.low %v16530_v55, %v16537_v44  ;;  %v16554_v61 = vrot.slane %v16540_v54, %v27673_v11  ;;  %v15881_v55 = vrot.slane %v15867_v4, %v27673_v11 }
 0x399   : > { %v15882_v44 = vcombine.high %v15874_v13, %v15874_v13  ;;  %v16571_v62 = vrot.slane %v16557_v7, %v27673_v11 }
 0x39a   : > { %25640 = vmatmul.mubr.msk.f32.gmra.mrb[8].mxu0 %vm2554_vm4, %v16487_v40  ;;  %v15859_v40 = vcombine.high %v15857_v42, %v15857_v42  ;;  %v16556_v23 = vcombine.low %v15833_v12, %v15841_v51  ;;  %v16590_v51 = vcombine.low %v23546_v49, %v15874_v13  ;;  %v15883_v31 = vcombine.high %v15881_v55, %v15881_v55 }
 0x39b   : > { %25642 = vmatprep.mubr.msk.f32.mxu0 %vm27572_vm3, %v33293_v36  ;;  %v16591_v9 = vcombine.low %v15882_v44, %v15881_v55 }
 0x39c   : > { %v16574_v39 = vcombine.low %v15857_v42, %v15859_v40  ;;  %v16564_v12 = vrot.slane %v16556_v23, %v27673_v11  ;;  %v16581_v42 = vrot.slane %v16573_v34, %v27673_v11  ;;  %v15898_v40 = vrot.slane %v15884_v29, %v27673_v11  ;;  %v23507_v23 = vld [vmem:[%s27678_s5 + $0xca] sm:$0xff] }
 0x39d   : > { %v16598_v13 = vrot.slane %v16590_v51, %v27673_v11  ;;  %v16605_v34 = vrot.slane %v16591_v9, %v27673_v11 }
 0x39e   : > { %25643 = vmatmul.mubr.msk.f32.gmra.mrb[10].mxu0 %vm2554_vm4, %v16504_v16  ;;  %v16547_v16 = vrot.slane %v16539_v52, %v27673_v11  ;;  %v16588_v54 = vrot.slane %v16574_v39, %v27673_v11  ;;  %v16572_v4 = vcombine.low %v16564_v12, %v16571_v62  ;;  %v15900_v55 = vcombine.high %v15898_v40, %v15898_v40  ;;  %v23509_v12 = vld [vmem:[%s27678_s5 + $0xda] sm:$0xff] }
 0x39f   : > { %25645 = vmatprep.mubr.msk.f32.mxu0 %vm27572_vm3, %v33293_v36  ;;  %v23547_v62 = vld.sshfl [vmem:[%s27678_s5 + $0xba] sm:$0x3 pattern:$0x76325410]  ;;  %v15949_v9 = vcombine.high %v23509_v12, %v23509_v12 }
 0x3a0   : > { %v16555_v52 = vcombine.low %v16547_v16, %v16554_v61  ;;  %v15915_v16 = vrot.slane %v23506_v50, %v27673_v11  ;;  %v15908_v61 = vcombine.high %v23506_v50, %v23506_v50  ;;  %v16589_v7 = vcombine.low %v16581_v42, %v16588_v54 }
 0x3a1   : > { %v16606_v54 = vcombine.low %v16598_v13, %v16605_v34  ;;  %v15956_v13 = vrot.slane %v23509_v12, %v27673_v11  ;;  %v23512_v12 = vld [vmem:[%s27678_s5 + $0xf2] sm:$0xff] }
 0x3a2   : > { %25646 = vmatmul.mubr.msk.f32.gmra.mrb[12].mxu0 %vm2554_vm4, %v16521_v24  ;;  %v15891_v24 = vrot.slane %v23504_v21, %v27673_v11  ;;  %v15925_v21 = vcombine.high %v23507_v23, %v23507_v23  ;;  %v15923_v44 = vcombine.high %v15915_v16, %v15915_v16  ;;  %v15922_v29 = vrot.slane %v15908_v61, %v27673_v11 }
 0x3a3   : > { %25648 = vmatprep.mubr.msk.f32.mxu0 %vm27572_vm3, %v33293_v36 }
 0x3a4   : > { %v16607_v39 = vcombine.low %v15883_v31, %v15891_v24  ;;  %v15939_v50 = vrot.slane %v15925_v21, %v27673_v11 }
 0x3a6   : > { %25649 = vmatmul.mubr.msk.f32.gmra.mrb[14].mxu0 %vm2554_vm4, %v16538_v30  ;;  %v15899_v30 = vcombine.high %v15891_v24, %v15891_v24  ;;  %v16615_v24 = vrot.slane %v16607_v39, %v27673_v11  ;;  %v15941_v21 = vcombine.high %v15939_v50, %v15939_v50 }
 0x3a7   : > { %25651 = vmatprep.mubr.msk.f32.mxu0 %vm27572_vm3, %v33293_v36 }
 0x3a8   : > { %v16608_v49 = vcombine.low %v15899_v30, %v15898_v40  ;;  %v16624_v40 = vcombine.low %v15900_v55, %v23547_v62  ;;  %v16625_v30 = vcombine.low %v15915_v16, %v15923_v44  ;;  %v16658_v62 = vcombine.low %v15939_v50, %v15941_v21  ;;  %v23513_v50 = vld [vmem:[%s27678_s5 + $0xfa] sm:$0xff] }
 0x3aa   : > { %25652 = vmatmul.mubr.msk.f32.gmra.mrb[16].mxu0 %vm2554_vm4, %v16555_v52  ;;  %v15932_v52 = vrot.slane %v23507_v23, %v27673_v11  ;;  %v16622_v51 = vrot.slane %v16608_v49, %v27673_v11  ;;  %v23510_v23 = vld [vmem:[%s27678_s5 + $0xe2] sm:$0xff]  ;;  %v15963_v49 = vrot.slane %v15949_v9, %v27673_v11  ;;  %v16632_v16 = vrot.slane %v16624_v40, %v27673_v11 }
 0x3ab   : > { %25654 = vmatprep.mubr.msk.f32.mxu0 %vm27572_vm3, %v33293_v36 }
 0x3ac   : > { %v15940_v61 = vcombine.high %v15932_v52, %v15932_v52  ;;  %v16623_v39 = vcombine.low %v16615_v24, %v16622_v51  ;;  %v15965_v9 = vcombine.high %v15963_v49, %v15963_v49 }
 0x3ae   : > { %25655 = vmatmul.mubr.msk.f32.gmra.mrb[18].mxu0 %vm2554_vm4, %v16572_v4  ;;  %v15924_v4 = vcombine.high %v15922_v29, %v15922_v29  ;;  %v16642_v44 = vcombine.low %v15932_v52, %v15940_v61 }
 0x3af   : > { %25657 = vmatprep.mubr.msk.f32.mxu0 %vm27572_vm3, %v33293_v36 }
 0x3b0   : > { %v16641_v55 = vcombine.low %v15922_v29, %v15924_v4  ;;  %v16656_v52 = vrot.slane %v16642_v44, %v27673_v11  ;;  %v16666_v4 = vrot.slane %v16658_v62, %v27673_v11  ;;  %v16007_v44 = vcombine.high %v23513_v50, %v23513_v50 }
 0x3b1   : > { %v13571_v42 = vpop.f32.mrb[106].mxu0 }
 0x3b2   : > { %v25492_v31 = vpop.f32.mrb[107].mxu0  ;;  %25658 = vmatmul.mubr.msk.f32.gmra.mrb[20].mxu0 %vm2554_vm4, %v16589_v7  ;;  %v23548_v42 = vld.sshfl [vmem:[%s27678_s5 + $0xd2] sm:$0x3 pattern:$0x76325410]  ;;  %v16639_v7 = vrot.slane %v16625_v30, %v27673_v11  ;;  %v16649_v29 = vrot.slane %v16641_v55, %v27673_v11  ;;  %v15990_v30 = vcombine.high %v23512_v12, %v23512_v12 }
 0x3b3   : > { %25660 = vmatprep.mubr.msk.f32.mxu0 %vm27572_vm3, %v33293_v36  ;;  %v15966_v31 = vcombine.high %v23510_v23, %v23510_v23  ;;  %v16659_v24 = vcombine.low %v23548_v42, %v15956_v13 }
 0x3b4   : > { %v16640_v40 = vcombine.low %v16632_v16, %v16639_v7  ;;  %v23549_v16 = vld.sshfl [vmem:[%s27678_s5 + $0xea] sm:$0x3 pattern:$0x76325410]  ;;  %v15997_v7 = vrot.slane %v23512_v12, %v27673_v11  ;;  %v16004_v55 = vrot.slane %v15990_v30, %v27673_v11  ;;  %v16014_v12 = vrot.slane %v23513_v50, %v27673_v11 }
 0x3b5   : > { %v13576_v34 = vpop.f32.mrb[108].mxu0  ;;  %v16673_v61 = vrot.slane %v16659_v24, %v27673_v11 }
 0x3b6   : > { %v25495_v59 = vpop.f32.mrb[109].mxu0  ;;  %25661 = vmatmul.mubr.msk.f32.gmra.mrb[26].mxu0 %vm2554_vm4, %v16606_v54  ;;  %v15964_v34 = vcombine.high %v15956_v13, %v15956_v13  ;;  %v15980_v54 = vrot.slane %v15966_v31, %v27673_v11  ;;  %v16657_v31 = vcombine.low %v16649_v29, %v16656_v52  ;;  %v16021_v29 = vrot.slane %v16007_v44, %v27673_v11 }
 0x3b7   : > { %25663 = vmatprep.mubr.msk.f32.mxu0 %vm27572_vm3, %v33293_v36  ;;  %v15973_v59 = vrot.slane %v23510_v23, %v27673_v11  ;;  %v16674_v62 = vcombine.low %v16666_v4, %v16673_v61 }
 0x3b8   : > { %v16675_v21 = vcombine.low %v15964_v34, %v15963_v49  ;;  %v16023_v50 = vcombine.high %v16021_v29, %v16021_v29 }
 0x3b9   : > { %v15309_v51 = vpop.f32.mrb[110].mxu0  ;;  %v15981_v13 = vcombine.high %v15973_v59, %v15973_v59 }
 0x3ba   : > { %v25502_v27 = vpop.f32.mrb[111].mxu0  ;;  %25664 = vmatmul.mubr.msk.f32.gmra.mrb[28].mxu0 %vm2554_vm4, %v16623_v39  ;;  %v15982_v39 = vcombine.high %v15980_v54, %v15980_v54  ;;  %v16683_v49 = vrot.slane %v16675_v21, %v27673_v11 }
 0x3bb   : > { %25666 = vmatprep.mubr.msk.f32.mxu0 %vm27572_vm3, %v33293_v36  ;;  %v16676_v27 = vcombine.low %v15965_v9, %v15973_v59  ;;  %v16692_v51 = vcombine.low %v15981_v13, %v15980_v54  ;;  %v23515_v9 = vld [vmem:[%s27678_s5 + $0x10a] sm:$0xff]  ;;  %v16005_v59 = vcombine.high %v15997_v7, %v15997_v7  ;;  %v23516_v13 = vld [vmem:[%s27678_s5 + $0x112] sm:$0xff] }
 0x3bc   : > { %v16693_v34 = vcombine.low %v15982_v39, %v23549_v16  ;;  %v16031_v52 = vcombine.high %v23515_v9, %v23515_v9  ;;  %v16038_v30 = vrot.slane %v23515_v9, %v27673_v11  ;;  %v23550_v16 = vld.sshfl [vmem:[%s27678_s5 + $0x102] sm:$0x3 pattern:$0x76325410]  ;;  %v16048_v44 = vcombine.high %v23516_v13, %v23516_v13 }
 0x3bd   : > { %v15314_v23 = vpop.f32.mrb[112].mxu0  ;;  %v16690_v24 = vrot.slane %v16676_v27, %v27673_v11  ;;  %v16700_v54 = vrot.slane %v16692_v51, %v27673_v11  ;;  %v16022_v27 = vcombine.high %v16014_v12, %v16014_v12  ;;  %v23518_v51 = vld [vmem:[%s27678_s5 + $0x122] sm:$0xff] }
 0x3be   : > { %v25505_v42 = vpop.f32.mrb[113].mxu0  ;;  %25667 = vmatmul.mubr.msk.f32.gmra.mrb[30].mxu0 %vm2554_vm4, %v16640_v40  ;;  %v16006_v40 = vcombine.high %v16004_v55, %v16004_v55  ;;  %v16707_v61 = vrot.slane %v16693_v34, %v27673_v11  ;;  %v16709_v23 = vcombine.low %v15997_v7, %v16005_v59  ;;  %v16045_v39 = vrot.slane %v16031_v52, %v27673_v11 }
 0x3bf   : > { %25669 = vmatprep.mubr.msk.f32.mxu0 %vm27572_vm3, %v33293_v36  ;;  %v16691_v4 = vcombine.low %v16683_v49, %v16690_v24  ;;  %v16046_v42 = vcombine.high %v16038_v30, %v16038_v30  ;;  %v16055_v49 = vrot.slane %v23516_v13, %v27673_v11  ;;  %v16727_v24 = vcombine.low %v16021_v29, %v16023_v50 }
 0x3c0   : > { %v16710_v21 = vcombine.low %v16004_v55, %v16006_v40  ;;  %v16717_v7 = vrot.slane %v16709_v23, %v27673_v11  ;;  %v16743_v34 = vcombine.low %v23550_v16, %v16038_v30  ;;  %v16047_v59 = vcombine.high %v16045_v39, %v16045_v39  ;;  %v23519_v23 = vld [vmem:[%s27678_s5 + $0x12a] sm:$0xff] }
 0x3c1   : > { %v16744_v9 = vcombine.low %v16046_v42, %v16045_v39  ;;  %v16062_v40 = vrot.slane %v16048_v44, %v27673_v11  ;;  %v16063_v52 = vcombine.high %v16055_v49, %v16055_v49  ;;  %v16079_v29 = vrot.slane %v23518_v51, %v27673_v11  ;;  %v23521_v42 = vld [vmem:[%s27678_s5 + $0x13a] sm:$0xff] }
 0x3c2   : > { %25670 = vmatmul.mubr.msk.f32.gmra.mrb[32].mxu0 %vm2554_vm4, %v16657_v31  ;;  %v16708_v31 = vcombine.low %v16700_v54, %v16707_v61  ;;  %v16724_v55 = vrot.slane %v16710_v21, %v27673_v11  ;;  %v16072_v54 = vcombine.high %v23518_v51, %v23518_v51  ;;  %v16751_v30 = vrot.slane %v16743_v34, %v27673_v11 }
 0x3c3   : > { %25672 = vmatprep.mubr.msk.f32.mxu0 %vm27572_vm3, %v33293_v36  ;;  %v16758_v21 = vrot.slane %v16744_v9, %v27673_v11  ;;  %v16761_v50 = vcombine.low %v16063_v52, %v16062_v40  ;;  %v16096_v39 = vrot.slane %v23519_v23, %v27673_v11  ;;  %v16064_v16 = vcombine.high %v16062_v40, %v16062_v40  ;;  %v23605_v40 = vld [vmem:[%s33114_s2 + $0x18] sm:$0xff] }
 0x3c4   : > { %v16086_v13 = vrot.slane %v16072_v54, %v27673_v11  ;;  %v16087_v44 = vcombine.high %v16079_v29, %v16079_v29 }
 0x3c5   : > { %v16775_v51 = vrot.slane %v16761_v50, %v27673_v11  ;;  %v16104_v9 = vcombine.high %v16096_v39, %v16096_v39 }
 0x3c6   : > { %25673 = vmatmul.mubr.msk.f32.gmra.mrb[34].mxu0 %vm2554_vm4, %v16674_v62  ;;  %v16726_v62 = vcombine.low %v16014_v12, %v16022_v27  ;;  %v16741_v12 = vrot.slane %v16727_v24, %v27673_v11  ;;  %v16760_v27 = vcombine.low %v16047_v59, %v16055_v49  ;;  %v16113_v24 = vcombine.high %v23521_v42, %v23521_v42  ;;  %v23604_v59 = vld [vmem:[%s33114_s2 + $0x10] sm:$0xff] }
 0x3c7   : > { %25675 = vmatprep.mubr.msk.f32.mxu0 %vm27572_vm3, %v33293_v36  ;;  %v16088_v34 = vcombine.high %v16086_v13, %v16086_v13  ;;  %v16778_v54 = vcombine.low %v16079_v29, %v16087_v44  ;;  %v16120_v44 = vrot.slane %v23521_v42, %v27673_v11 }
 0x3c8   : > { %v16734_v61 = vrot.slane %v16726_v62, %v27673_v11  ;;  %v16759_v62 = vcombine.low %v16751_v30, %v16758_v21  ;;  %v16768_v49 = vrot.slane %v16760_v27, %v27673_v11  ;;  %v16795_v27 = vcombine.low %v16096_v39, %v16104_v9 }
 0x3c9   : > { %v16794_v21 = vcombine.low %v16086_v13, %v16088_v34 }
 0x3ca   : > { %25676 = vmatmul.mubr.msk.f32.gmra.mrb[36].mxu0 %vm2554_vm4, %v16691_v4  ;;  %v16725_v4 = vcombine.low %v16717_v7, %v16724_v55  ;;  %v16089_v7 = vcombine.high %v23519_v23, %v23519_v23  ;;  %v23551_v55 = vld.sshfl [vmem:[%s27678_s5 + $0x11a] sm:$0x3 pattern:$0x76325410]  ;;  %v16127_v23 = vrot.slane %v16113_v24, %v27673_v11  ;;  %v16776_v30 = vcombine.low %v16768_v49, %v16775_v51 }
 0x3cb   : > { %25678 = vmatprep.mubr.msk.f32.mxu0 %vm27572_vm3, %v33293_v36  ;;  %v16777_v52 = vcombine.low %v16064_v16, %v23551_v55  ;;  %v23524_v55 = vld [vmem:[%s27678_s5 + $0x152] sm:$0xff]  ;;  %v16128_v24 = vcombine.high %v16120_v44, %v16120_v44  ;;  %v16802_v49 = vrot.slane %v16794_v21, %v27673_v11 }
 0x3cc   : > { %v16129_v13 = vcombine.high %v16127_v23, %v16127_v23 }
 0x3cd   : > { %v16785_v29 = vrot.slane %v16777_v52, %v27673_v11  ;;  %v16828_v52 = vcombine.low %v16128_v24, %v16127_v23 }
 0x3ce   : > { %25679 = vmatmul.mubr.msk.f32.gmra.mrb[38].mxu0 %vm2554_vm4, %v16708_v31  ;;  %v16742_v31 = vcombine.low %v16734_v61, %v16741_v12  ;;  %v23522_v61 = vld [vmem:[%s27678_s5 + $0x142] sm:$0xff]  ;;  %v26254_v12 = vpack.c.bf16 %v23605_v40, %v23604_v59  ;;  %v16154_v59 = vcombine.high %v23524_v55, %v23524_v55  ;;  %v23525_v40 = vld [vmem:[%s27678_s5 + $0x15a] sm:$0xff] }
 0x3cf   : > { %25681 = vmatprep.mubr.msk.f32.mxu0 %vm27572_vm3, %v33293_v36  ;;  %v16130_v50 = vcombine.high %v23522_v61, %v23522_v61  ;;  %v16137_v39 = vrot.slane %v23522_v61, %v27673_v11  ;;  %v16171_v32 = vcombine.high %v23525_v40, %v23525_v40  ;;  %v16836_v23 = vrot.slane %v16828_v52, %v27673_v11 }
 0x3d0   : > { %26255 = vmatprep.subr.bf16.mxu1 %v26254_v12 }
 0x3d1   : > { %26257 = vmatpush3.bf16.msra.mxu1 %v26254_v12  ;;  %v16144_v51 = vrot.slane %v16130_v50, %v27673_v11  ;;  %v16145_v12 = vcombine.high %v16137_v39, %v16137_v39  ;;  %v16161_v50 = vrot.slane %v23524_v55, %v27673_v11  ;;  %v16185_v24 = vrot.slane %v16171_v32, %v27673_v11 }
 0x3d2   : > { %25682 = vmatmul.mubr.msk.f32.gmra.mrb[40].mxu0 %vm2554_vm4, %v16725_v4  ;;  %v16103_v4 = vrot.slane %v16089_v7, %v27673_v11  ;;  %v23552_v7 = vld.sshfl [vmem:[%s27678_s5 + $0x132] sm:$0x3 pattern:$0x76325410] }
 0x3d3   : > { %25684 = vmatprep.mubr.msk.f32.mxu0 %vm27572_vm3, %v33293_v36  ;;  %v16812_v9 = vcombine.low %v23552_v7, %v16120_v44  ;;  %v16146_v21 = vcombine.high %v16144_v51, %v16144_v51  ;;  %v16178_v7 = vrot.slane %v23525_v40, %v27673_v11  ;;  %v16169_v55 = vcombine.high %v16161_v50, %v16161_v50 }
 0x3d4   : > { %v16105_v16 = vcombine.high %v16103_v4, %v16103_v4 }
 0x3d5   : > { %v16862_v32 = vcombine.low %v16161_v50, %v16169_v55  ;;  %v23534_v55 = vld [vmem:[%s27678_s5 + $0x1a2] sm:$0xff] }
 0x3d6   : > { %25685 = vmatmul.mubr.msk.f32.gmra.mrb[42].mxu0 %vm2554_vm4, %v16742_v31  ;;  %v16792_v31 = vrot.slane %v16778_v54, %v27673_v11  ;;  %v16811_v42 = vcombine.low %v16103_v4, %v16105_v16  ;;  %v16829_v54 = vcombine.low %v16129_v13, %v16137_v39  ;;  %v23553_v4 = vld.sshfl [vmem:[%s27678_s5 + $0x14a] sm:$0x3 pattern:$0x76325410]  ;;  %v16845_v16 = vcombine.low %v16145_v12, %v16144_v51 }
 0x3d7   : > { %25687 = vmatprep.mubr.msk.f32.mxu0 %vm27572_vm3, %v33293_v36  ;;  %v16846_v44 = vcombine.low %v16146_v21, %v23553_v4  ;;  %v23530_v4 = vld [vmem:[%s27678_s5 + $0x182] sm:$0xff]  ;;  %v16870_v50 = vrot.slane %v16862_v32, %v27673_v11  ;;  %v16294_v32 = vcombine.high %v23534_v55, %v23534_v55 }
 0x3d8   : > { %v16793_v34 = vcombine.low %v16785_v29, %v16792_v31  ;;  %v16168_v29 = vrot.slane %v16154_v59, %v27673_v11  ;;  %v16843_v31 = vrot.slane %v16829_v54, %v27673_v11  ;;  %v23528_v59 = vld [vmem:[%s27678_s5 + $0x172] sm:$0xff] }
 0x3d9   : > { %v16860_v51 = vrot.slane %v16846_v44, %v27673_v11  ;;  %v16219_v12 = vrot.slane %v23528_v59, %v27673_v11 }
 0x3da   : > { %25688 = vmatmul.mubr.msk.f32.gmra.mrb[44].mxu0 %vm2554_vm4, %v16759_v62  ;;  %v16809_v62 = vrot.slane %v16795_v27, %v27673_v11  ;;  %v16819_v27 = vrot.slane %v16811_v42, %v27673_v11  ;;  %v16170_v39 = vcombine.high %v16168_v29, %v16168_v29  ;;  %v16186_v42 = vcombine.high %v16178_v7, %v16178_v7 }
 0x3db   : > { %25690 = vmatprep.mubr.msk.f32.mxu0 %vm27572_vm3, %v33293_v36 }
 0x3dc   : > { %v16810_v61 = vcombine.low %v16802_v49, %v16809_v62  ;;  %v23527_v49 = vld [vmem:[%s27678_s5 + $0x16a] sm:$0xff]  ;;  %v16844_v62 = vcombine.low %v16836_v23, %v16843_v31  ;;  %v16863_v40 = vcombine.low %v16168_v29, %v16170_v39 }
 0x3dd   : > { %v16195_v52 = vcombine.high %v23527_v49, %v23527_v49  ;;  %v16202_v54 = vrot.slane %v23527_v49, %v27673_v11 }
 0x3de   : > { %25691 = vmatmul.mubr.msk.f32.gmra.mrb[46].mxu0 %vm2554_vm4, %v16776_v30  ;;  %v16826_v30 = vrot.slane %v16812_v9, %v27673_v11  ;;  %v16187_v9 = vcombine.high %v16185_v24, %v16185_v24  ;;  %v16877_v29 = vrot.slane %v16863_v40, %v27673_v11 }
 0x3df   : > { %25693 = vmatprep.mubr.msk.f32.mxu0 %vm27572_vm3, %v33293_v36  ;;  %v16209_v23 = vrot.slane %v16195_v52, %v27673_v11  ;;  %v16210_v31 = vcombine.high %v16202_v54, %v16202_v54 }
 0x3e0   : > { %v16827_v13 = vcombine.low %v16819_v27, %v16826_v30  ;;  %v16879_v27 = vcombine.low %v16178_v7, %v16186_v42  ;;  %v16880_v30 = vcombine.low %v16185_v24, %v16187_v9  ;;  %v16227_v7 = vcombine.high %v16219_v12, %v16219_v12  ;;  %v23531_v42 = vld [vmem:[%s27678_s5 + $0x18a] sm:$0xff] }
 0x3e1   : > { %v16211_v44 = vcombine.high %v16209_v23, %v16209_v23  ;;  %v16243_v24 = vrot.slane %v23530_v4, %v27673_v11  ;;  %v16236_v9 = vcombine.high %v23530_v4, %v23530_v4 }
 0x3e2   : > { %25694 = vmatmul.mubr.msk.f32.gmra.mrb[48].mxu0 %vm2554_vm4, %v16793_v34  ;;  %v16853_v34 = vrot.slane %v16845_v16, %v27673_v11  ;;  %v23554_v16 = vld.sshfl [vmem:[%s27678_s5 + $0x162] sm:$0x3 pattern:$0x76325410]  ;;  %v16887_v39 = vrot.slane %v16879_v27, %v27673_v11  ;;  %v16894_v49 = vrot.slane %v16880_v30, %v27673_v11 }
 0x3e3   : > { %25696 = vmatprep.mubr.msk.f32.mxu0 %vm27572_vm3, %v33293_v36  ;;  %v16913_v40 = vcombine.low %v16211_v44, %v16219_v12  ;;  %v16251_v27 = vcombine.high %v16243_v24, %v16243_v24  ;;  %v16253_v12 = vcombine.high %v23531_v42, %v23531_v42 }
 0x3e4   : > { %v16861_v21 = vcombine.low %v16853_v34, %v16860_v51  ;;  %v16896_v34 = vcombine.low %v23554_v16, %v16202_v54  ;;  %v16897_v51 = vcombine.low %v16210_v31, %v16209_v23  ;;  %v16895_v30 = vcombine.low %v16887_v39, %v16894_v49  ;;  %v23533_v23 = vld [vmem:[%s27678_s5 + $0x19a] sm:$0xff] }
 0x3e5   : > { %v16308_v31 = vrot.slane %v16294_v32, %v27673_v11  ;;  %v16921_v16 = vrot.slane %v16913_v40, %v27673_v11  ;;  %v16277_v39 = vcombine.high %v23533_v23, %v23533_v23 }
 0x3e6   : > { %25697 = vmatmul.mubr.msk.f32.gmra.mrb[50].mxu0 %vm2554_vm4, %v16810_v61  ;;  %v16212_v61 = vcombine.high %v23528_v59, %v23528_v59  ;;  %v31815_v59 = vrot.slane %v23534_v55, %v27673_v11  ;;  %v16904_v4 = vrot.slane %v16896_v34, %v27673_v11 }
 0x3e7   : > { %25699 = vmatprep.mubr.msk.f32.mxu0 %vm27572_vm3, %v33293_v36 }
 0x3e8   : > { %v16309_v54 = vcombine.high %v31815_v59, %v31815_v59 }
 0x3ea   : > { %25700 = vmatmul.mubr.msk.f32.gmra.mrb[52].mxu0 %vm2554_vm4, %v16827_v13  ;;  %v16226_v13 = vrot.slane %v16212_v61, %v27673_v11  ;;  %v16998_v49 = vcombine.low %v16309_v54, %v16308_v31 }
 0x3eb   : > { %25702 = vmatprep.mubr.msk.f32.mxu0 %vm27572_vm3, %v33293_v36 }
 0x3ec   : > { %v16914_v52 = vcombine.low %v16227_v7, %v16226_v13  ;;  %v16228_v61 = vcombine.high %v16226_v13, %v16226_v13  ;;  %v16931_v7 = vcombine.low %v16243_v24, %v16251_v27  ;;  %v31843_v27 = vrot.slane %v16998_v49, %v27673_v11 }
 0x3ee   : > { %25703 = vmatmul.mubr.msk.f32.gmra.mrb[54].mxu0 %vm2554_vm4, %v16844_v62  ;;  %v16878_v62 = vcombine.low %v16870_v50, %v16877_v29  ;;  %v16911_v50 = vrot.slane %v16897_v51, %v27673_v11  ;;  %v16250_v29 = vrot.slane %v16236_v9, %v27673_v11  ;;  %v16928_v44 = vrot.slane %v16914_v52, %v27673_v11 }
 0x3ef   : > { %25705 = vmatprep.mubr.msk.f32.mxu0 %vm27572_vm3, %v33293_v36  ;;  %v16930_v13 = vcombine.low %v16228_v61, %v23555_v17  ;;  %v16310_v9 = vcombine.high %v16308_v31, %v16308_v31  ;;  %v16945_v40 = vrot.slane %v16931_v7, %v27673_v11  ;;  %v16291_v61 = vrot.slane %v16277_v39, %v27673_v11  ;;  %v23556_v31 = vld.sshfl [vmem:[%s27678_s5 + $0x192] sm:$0x3 pattern:$0x76325410] }
 0x3f0   : > { %v16912_v34 = vcombine.low %v16904_v4, %v16911_v50  ;;  %v16252_v51 = vcombine.high %v16250_v29, %v16250_v29  ;;  %v16929_v24 = vcombine.low %v16921_v16, %v16928_v44  ;;  %v16284_v50 = vrot.slane %v23533_v23, %v27673_v11 }
 0x3f1   : > { %v16938_v32 = vrot.slane %v16930_v13, %v27673_v11  ;;  %v16293_v13 = vcombine.high %v16291_v61, %v16291_v61 }
 0x3f2   : > { %25706 = vmatmul.mubr.msk.f32.gmra.mrb[56].mxu0 %vm2554_vm4, %v16861_v21  ;;  %v16260_v21 = vrot.slane %v23531_v42, %v27673_v11  ;;  %v16267_v42 = vrot.slane %v16253_v12, %v27673_v11  ;;  %v16947_v54 = vcombine.low %v16250_v29, %v16252_v51  ;;  %v23536_v12 = vld [vmem:[%s27678_s5 + $0x1b2] sm:$0xff]  ;;  %v16292_v44 = vcombine.high %v16284_v50, %v16284_v50 }
 0x3f3   : > { %25708 = vmatprep.mubr.msk.f32.mxu0 %vm27572_vm3, %v33293_v36  ;;  %v16946_v23 = vcombine.low %v16938_v32, %v16945_v40  ;;  %v16318_v7 = vcombine.high %v23536_v12, %v23536_v12  ;;  %v16965_v49 = vcombine.low %v23556_v31, %v16284_v50 }
 0x3f4   : > { %v16268_v55 = vcombine.high %v16260_v21, %v16260_v21  ;;  %v16269_v4 = vcombine.high %v16267_v42, %v16267_v42  ;;  %v16981_v51 = vcombine.low %v16292_v44, %v16291_v61 }
 0x3f5   : > { %v16979_v40 = vrot.slane %v16965_v49, %v27673_v11 }
 0x3f6   : > { %25709 = vmatmul.mubr.msk.f32.gmra.mrb[58].mxu0 %vm2554_vm4, %v16878_v62  ;;  %v4775_v62 = vcombine.high %v31024_v6, %v31024_v6  ;;  %v23557_v6 = vld.sshfl [vmem:[%s27678_s5 + $0x1aa] sm:$0x3 pattern:$0x76325410]  ;;  %v16948_v52 = vcombine.low %v16260_v21, %v16268_v55  ;;  %v16955_v55 = vrot.slane %v16947_v54, %v27673_v11  ;;  %v16964_v39 = vcombine.low %v16267_v42, %v16269_v4 }
 0x3f7   : > { %25711 = vmatprep.mubr.msk.f32.mxu0 %vm27572_vm3, %v33293_v36  ;;  %v16999_v21 = vcombine.low %v16310_v9, %v23557_v6  ;;  %v16982_v9 = vcombine.low %v16293_v13, %v31815_v59  ;;  %v16989_v61 = vrot.slane %v16981_v51, %v27673_v11 }
 0x3f8   : > { %v5466_v17 = vcombine.low %v4775_v62, %v31815_v59  ;;  %v16962_v16 = vrot.slane %v16948_v52, %v27673_v11  ;;  %v16972_v32 = vrot.slane %v16964_v39, %v27673_v11  ;;  %v19215_v52 = vld [vmem:[#allocation2 + $0x1] sm:$0xff]  ;;  %v19216_v59 = vld [vmem:[#allocation2 + $0x9] sm:$0xff] }
 0x3f9   : > { %v17013_v62 = vrot.slane %v16999_v21, %v27673_v11  ;;  %v23539_v21 = vld [vmem:[%s27678_s5 + $0x1ca] sm:$0xff] }
 0x3fa   : > { %25712 = vmatmul.mubr.msk.f32.gmra.mrb[60].mxu0 %vm2554_vm4, %v16895_v30  ;;  %v5474_v30 = vrot.slane %v5466_v17, %v27673_v11  ;;  %v16325_v17 = vrot.slane %v23536_v12, %v27673_v11  ;;  %v16963_v42 = vcombine.low %v16955_v55, %v16962_v16  ;;  %v16980_v50 = vcombine.low %v16972_v32, %v16979_v40 }
 0x3fb   : > { %25714 = vmatprep.mubr.msk.f32.mxu0 %vm27572_vm3, %v33293_v36  ;;  %v16366_v55 = vrot.slane %v23539_v21, %v27673_v11  ;;  %v17014_v39 = vcombine.low %v31843_v27, %v17013_v62 }
 0x3fc   : > { %v5482_v29 = vcombine.low %v5474_v30, %v31843_v27  ;;  %v16996_v30 = vrot.slane %v16982_v9, %v27673_v11  ;;  %v16333_v54 = vcombine.high %v16325_v17, %v16325_v17 }
 0x3fe   : > { %25715 = vmatmul.mubr.msk.f32.gmra.mrb[62].mxu0 %vm2554_vm4, %v16912_v34  ;;  %24983 = vmatmul.mubr.msk.f32.gmra.mrb[90].mxu1 %vm2554_vm4, %v5482_v29  ;;  %v23537_v34 = vld [vmem:[%s27678_s5 + $0x1ba] sm:$0xff]  ;;  %v16997_v29 = vcombine.low %v16989_v61, %v16996_v30 }
 0x3ff   : > { %25717 = vmatprep.mubr.msk.f32.mxu0 %vm27572_vm3, %v33293_v36  ;;  %24985 = vmatprep.mubr.msk.f32.mxu1 %vm27572_vm3, %v33293_v36  ;;  %v16335_v6 = vcombine.high %v23537_v34, %v23537_v34  ;;  %v16342_v12 = vrot.slane %v23537_v34, %v27673_v11 }
 0x401   : > { %v16349_v31 = vrot.slane %v16335_v6, %v27673_v11  ;;  %v16350_v44 = vcombine.high %v16342_v12, %v16342_v12 }
 0x402   : > { %25718 = vmatmul.mubr.msk.f32.gmra.mrb[64].mxu0 %vm2554_vm4, %v16929_v24  ;;  %v16332_v24 = vrot.slane %v16318_v7, %v27673_v11  ;;  %24986 = vmatmul.mubr.msk.f32.gmra.mrb[92].mxu1 %vm2554_vm4, %v17013_v62  ;;  %v16359_v7 = vcombine.high %v23539_v21, %v23539_v21 }
 0x403   : > { %25720 = vmatprep.mubr.msk.f32.mxu0 %vm27572_vm3, %v33293_v36  ;;  %25754 = vmatprep.mubr.msk.f32.mxu1 %vm19125_vm5, %v19215_v52  ;;  %v16351_v13 = vcombine.high %v16349_v31, %v16349_v31  ;;  %v17032_v51 = vcombine.low %v16342_v12, %v16350_v44 }
 0x404   : > { %v16334_v4 = vcombine.high %v16332_v24, %v16332_v24 }
 0x405   : > { %v17033_v9 = vcombine.low %v16349_v31, %v16351_v13  ;;  %v17040_v27 = vrot.slane %v17032_v51, %v27673_v11 }
 0x406   : > { %25721 = vmatmul.mubr.msk.f32.gmra.mrb[66].mxu0 %vm2554_vm4, %v16946_v23  ;;  %25755 = vmatmul.mubr.msk.f32.vlgmr.msra.gmra.mrb[94].mxu1 %vm19125_vm5, %v19216_v59  ;;  %v17015_v23 = vcombine.low %v16325_v17, %v16333_v54  ;;  %v17016_v16 = vcombine.low %v16332_v24, %v16334_v4  ;;  %v31903_v17 = vrot.slane %v16359_v7, %v27673_v11  ;;  %v19213_v7 = vld [vmem:[%s33114_s2] sm:$0xff] }
 0x407   : > { %25723 = vmatprep.mubr.msk.f32.mxu0 %vm27572_vm3, %v33293_v36  ;;  %v16374_v24 = vcombine.high %v16366_v55, %v16366_v55  ;;  %v17047_v62 = vrot.slane %v17033_v9, %v27673_v11 }
 0x408   : > { %v17023_v49 = vrot.slane %v17015_v23, %v27673_v11  ;;  %v17030_v34 = vrot.slane %v17016_v16, %v27673_v11  ;;  %33544 = vst [vmem:[#allocation66_spill] sm:$0xff] %v31903_v17 }
 0x409   : > { %v17050_v6 = vcombine.low %v16374_v24, %v31903_v17  ;;  %v17048_v52 = vcombine.low %v17040_v27, %v17047_v62 }
 0x40a   : > { %25724 = vmatmul.mubr.msk.f32.gmra.mrb[68].mxu0 %vm2554_vm4, %v16963_v42  ;;  %v23558_v42 = vld.sshfl [vmem:[%s27678_s5 + $0x1c2] sm:$0x3 pattern:$0x76325410]  ;;  %v17031_v32 = vcombine.low %v17023_v49, %v17030_v34 }
 0x40b   : > { %25726 = vmatprep.mubr.msk.f32.mxu0 %vm27572_vm3, %v33293_v36  ;;  %v17049_v40 = vcombine.low %v23558_v42, %v16366_v55  ;;  %v17064_v61 = vrot.slane %v17050_v6, %v27673_v11  ;;  %v19214_v55 = vld [vmem:[%s33114_s2 + $0x8] sm:$0xff] }
 0x40c   : > { %v26258_v49 = vpack.c.bf16 %v19214_v55, %v19213_v7 }
 0x40d   : > { %v17057_v59 = vrot.slane %v17049_v40, %v27673_v11 }
 0x40e   : > { %25727 = vmatmul.mubr.msk.f32.gmra.mrb[70].mxu0 %vm2554_vm4, %v16980_v50  ;;  %26259 = vmatprep.subr.bf16.mxu1 %v26258_v49 }
 0x40f   : > { %25729 = vmatprep.mubr.msk.f32.mxu0 %vm27572_vm3, %v33293_v36  ;;  %v17065_v30 = vcombine.low %v17057_v59, %v17064_v61  ;;  %26261 = vmatpush3.bf16.msra.mxu1 %v26258_v49 }
 0x412   : > { %25730 = vmatmul.mubr.msk.f32.gmra.mrb[72].mxu0 %vm2554_vm4, %v16997_v29 }
 0x413   : > { %25732 = vmatprep.mubr.msk.f32.mxu0 %vm27572_vm3, %v33293_v36 }
 0x416   : > { %25733 = vmatmul.mubr.msk.f32.gmra.mrb[74].mxu0 %vm2554_vm4, %v17014_v39 }
 0x417   : > { %25735 = vmatprep.mubr.msk.f32.mxu0 %vm27572_vm3, %v33293_v36 }
 0x41a   : > { %25736 = vmatmul.mubr.msk.f32.gmra.mrb[76].mxu0 %vm2554_vm4, %v17031_v32 }
 0x41b   : > { %25738 = vmatprep.mubr.msk.f32.mxu0 %vm27572_vm3, %v33293_v36 }
 0x41e   : > { %25739 = vmatmul.mubr.msk.f32.gmra.mrb[78].mxu0 %vm2554_vm4, %v17048_v52 }
 0x41f   : > { %25741 = vmatprep.mubr.msk.f32.mxu0 %vm27572_vm3, %v33293_v36 }
 0x422   : > { %25742 = vmatmul.mubr.msk.f32.gmra.mrb[80].mxu0 %vm2554_vm4, %v17065_v30 }
 0x423   : > { %25744 = vmatprep.mubr.msk.f32.mxu0 %vm27572_vm3, %v33293_v36 }
 0x455   : > { %v15504_v54 = vpop.f32.mrb[114].mxu0 }
 0x456   : > { %v25619_v4 = vpop.f32.mrb[115].mxu0 }
 0x459   : > { %v15509_v50 = vpop.f32.mrb[116].mxu0 }
 0x45a   : > { %v25622_v12 = vpop.f32.mrb[117].mxu0 }
 0x45d   : > { %v17242_v31 = vpop.f32.mrb[118].mxu0 }
 0x45e   : > { %v25629_v21 = vpop.f32.mrb[119].mxu0 }
 0x461   : > { %v17247_v29 = vpop.f32.mrb[120].mxu0 }
 0x462   : > { %v25632_v23 = vpop.f32.mrb[121].mxu0 }
 0x465   : > { %v17252_v16 = vpop.f32.mrb[4].mxu0 }
 0x466   : > { %v26292_v44 = vadd.f32 %v17252_v16, %v31112_v41  ;;  %v25635_v13 = vpop.f32.mrb[5].mxu0  ;;  %v33545_v16 = vld [vmem:[#allocation8_spill] sm:$0xff] }
 0x467   : > { %vm18261_vm7 = vcmp.ge.s32.totalorder %v33545_v16, 1 }
 0x468   : > { %27430 = vtanh.f32 %v26292_v44  ;;  %v31941_v44 = vadd.s32 16, %v33545_v16  ;;  %v23704_v16 = vld [vmem:[%s33114_s2 + $0x30] sm:$0xff] }
 0x469   : > { %v17257_v39 = vpop.f32.mrb[6].mxu0 }
 0x46a   : > { %v26293_v34 = vadd.f32 %v17257_v39, %v31127_v25  ;;  %v25638_v51 = vpop.f32.mrb[7].mxu0  ;;  %vm18272_vm8 = vcmp.lt.s32.totalorder %v31941_v44, 17  ;;  %v23705_v44 = vld [vmem:[%s33114_s2 + $0x38] sm:$0xff] }
 0x46c   : > { %27432 = vtanh.f32 %v26293_v34 }
 0x46d   : > { %v17262_v9 = vpop.f32.mrb[8].mxu0 }
 0x46e   : > { %v26294_v41 = vadd.f32 %v17262_v9, %v31139_v22  ;;  %v25641_v24 = vpop.f32.mrb[9].mxu0 }
 0x470   : > { %27434 = vtanh.f32 %v26294_v41 }
 0x471   : > { %v17267_v42 = vpop.f32.mrb[10].mxu0 }
 0x472   : > { %v27431_v32 = vpop.eup %27430  ;;  %v26295_v27 = vadd.f32 %v17267_v42, %v31148_v58  ;;  %v25644_v62 = vpop.f32.mrb[11].mxu0 }
 0x473   : > { %v17603_v40 = vcombine.high %v27431_v32, %v27431_v32  ;;  %v17610_v6 = vrot.slane %v27431_v32, %v27673_v11 }
 0x474   : > { %27436 = vtanh.f32 %v26295_v27 }
 0x475   : > { %v17617_v25 = vrot.slane %v17603_v40, %v27673_v11  ;;  %v17618_v52 = vcombine.high %v17610_v6, %v17610_v6  ;;  %v17272_v59 = vpop.f32.mrb[12].mxu0 }
 0x476   : > { %v27433_v61 = vpop.eup %27432  ;;  %v26296_v30 = vadd.f32 %v17272_v59, %v31158_v8  ;;  %v25647_v54 = vpop.f32.mrb[13].mxu0 }
 0x477   : > { %v18320_v22 = vcombine.low %v17618_v52, %v17617_v25  ;;  %v17619_v4 = vcombine.high %v17617_v25, %v17617_v25  ;;  %v17620_v50 = vcombine.high %v27433_v61, %v27433_v61  ;;  %v17627_v12 = vrot.slane %v27433_v61, %v27673_v11 }
 0x478   : > { %27438 = vtanh.f32 %v26296_v30 }
 0x479   : > { %v17634_v58 = vrot.slane %v17620_v50, %v27673_v11  ;;  %v17635_v31 = vcombine.high %v17627_v12, %v17627_v12  ;;  %v18321_v21 = vcombine.low %v17619_v4, %v17627_v12  ;;  %v17277_v29 = vpop.f32.mrb[14].mxu0  ;;  %v18328_v8 = vrot.slane %v18320_v22, %v27673_v11 }
 0x47a   : > { %v27435_v23 = vpop.eup %27434  ;;  %v26297_v13 = vadd.f32 %v17277_v29, %v31165_v53  ;;  %v25650_v7 = vpop.f32.mrb[15].mxu0 }
 0x47b   : > { %v18335_v55 = vrot.slane %v18321_v21, %v27673_v11  ;;  %v17636_v39 = vcombine.high %v17634_v58, %v17634_v58  ;;  %v17637_v49 = vcombine.high %v27435_v23, %v27435_v23  ;;  %v18337_v34 = vcombine.low %v17635_v31, %v17634_v58 }
 0x47c   : > { %v17644_v51 = vrot.slane %v27435_v23, %v27673_v11  ;;  %27440 = vtanh.f32 %v26297_v13 }
 0x47d   : > { %v18336_v9 = vcombine.low %v18328_v8, %v18335_v55  ;;  %v17651_v41 = vrot.slane %v17637_v49, %v27673_v11  ;;  %v17282_v24 = vpop.f32.mrb[16].mxu0  ;;  %v18345_v59 = vrot.slane %v18337_v34, %v27673_v11 }
 0x47e   : > { %v27437_v42 = vpop.eup %27436  ;;  %v17652_v32 = vcombine.high %v17644_v51, %v17644_v51  ;;  %v18338_v53 = vcombine.low %v17636_v39, %v17644_v51  ;;  %v26298_v27 = vadd.f32 %v17282_v24, %v31178_v26  ;;  %v25653_v62 = vpop.f32.mrb[17].mxu0 }
 0x47f   : > { %v19074_v40 = vsel %vm18261_vm7, %v18336_v9, 0.0  ;;  %v17653_v6 = vcombine.high %v17651_v41, %v17651_v41  ;;  %v17654_v25 = vcombine.high %v27437_v42, %v27437_v42  ;;  %v17661_v52 = vrot.slane %v27437_v42, %v27673_v11 }
 0x480   : > { %19130 = vst.msk [vmem:[#allocation2 + $0x18] sm:$0xff] %vm19125_vm5, %v19074_v40  ;;  %v18352_v61 = vrot.slane %v18338_v53, %v27673_v11  ;;  %v18360_v30 = vrot.slane %v17652_v32, %v27673_v11  ;;  %27442 = vtanh.f32 %v26298_v27 }
 0x481   : > { %v18361_v54 = vcombine.low %v17651_v41, %v17653_v6  ;;  %v17668_v26 = vrot.slane %v17654_v25, %v27673_v11  ;;  %v17669_v22 = vcombine.high %v17661_v52, %v17661_v52  ;;  %v17287_v4 = vpop.f32.mrb[18].mxu0 }
 0x482   : > { %v27439_v50 = vpop.eup %27438  ;;  %v18353_v12 = vcombine.low %v18345_v59, %v18352_v61  ;;  %v19076_v58 = vsel %vm18272_vm8, %v18360_v30, 0.0  ;;  %v26299_v31 = vadd.f32 %v17287_v4, %v31194_v57  ;;  %v25656_v21 = vpop.f32.mrb[19].mxu0 }
 0x483   : > { %19132 = vst.msk [vmem:[#allocation2 + $0x28] sm:$0x3] %vm19128_vm6, %v19076_v58  ;;  %v17670_v29 = vcombine.high %v17668_v26, %v17668_v26  ;;  %v18362_v23 = vcombine.low %v17661_v52, %v17669_v22  ;;  %v17671_v13 = vcombine.high %v27439_v50, %v27439_v50  ;;  %v17678_v7 = vrot.slane %v27439_v50, %v27673_v11 }
 0x484   : > { %19131 = vst.msk [vmem:[#allocation2 + $0x20] sm:$0xff] %vm19125_vm5, %v18353_v12  ;;  %27444 = vtanh.f32 %v26299_v31  ;;  %v18369_v8 = vrot.slane %v18361_v54, %v27673_v11 }
 0x485   : > { %v18376_v55 = vrot.slane %v18362_v23, %v27673_v11  ;;  %v18378_v39 = vcombine.low %v17668_v26, %v17670_v29  ;;  %v17685_v49 = vrot.slane %v17671_v13, %v27673_v11  ;;  %v17292_v34 = vpop.f32.mrb[20].mxu0  ;;  %v17686_v51 = vcombine.high %v17678_v7, %v17678_v7  ;;  %v23670_v23 = vld [vmem:[%s33114_s2 + $0x20] sm:$0xff]  ;;  %v23671_v13 = vld [vmem:[%s33114_s2 + $0x28] sm:$0xff] }
 0x486   : > { %v27441_v57 = vpop.eup %27440  ;;  %v26300_v9 = vadd.f32 %v17292_v34, %v31198_v33  ;;  %v25659_v41 = vpop.f32.mrb[21].mxu0 }
 0x487   : > { %v18377_v24 = vcombine.low %v18369_v8, %v18376_v55  ;;  %v18401_v42 = vrot.slane %v17685_v49, %v27673_v11  ;;  %v17687_v32 = vcombine.high %v17685_v49, %v17685_v49  ;;  %v18379_v53 = vcombine.low %v17678_v7, %v17686_v51 }
 0x488   : > { %v17688_v27 = vcombine.high %v27441_v57, %v27441_v57  ;;  %v17695_v62 = vrot.slane %v27441_v57, %v27673_v11  ;;  %27446 = vtanh.f32 %v26300_v9  ;;  %v18386_v40 = vrot.slane %v18378_v39, %v27673_v11 }
 0x489   : > { %v19077_v6 = vsel %vm18261_vm7, %v18377_v24, 0.0  ;;  %v19079_v25 = vsel %vm18272_vm8, %v18401_v42, 0.0  ;;  %v17297_v52 = vpop.f32.mrb[26].mxu0  ;;  %v18393_v59 = vrot.slane %v18379_v53, %v27673_v11  ;;  %v31991_v55 = vpack.c.bf16 %v23671_v13, %v23670_v23 }
 0x48a   : > { %v27443_v33 = vpop.eup %27442  ;;  %19133 = vst.msk [vmem:[#allocation2 + $0x30] sm:$0xff] %vm19125_vm5, %v19077_v6  ;;  %v17702_v61 = vrot.slane %v17688_v27, %v27673_v11  ;;  %v17703_v30 = vcombine.high %v17695_v62, %v17695_v62  ;;  %v18402_v54 = vcombine.low %v17687_v32, %v17695_v62  ;;  %v25662_v26 = vpop.f32.mrb[27].mxu0  ;;  %v26301_v50 = vadd.f32 %v17297_v52, %v31310_v18 }
 0x48b   : > { %19135 = vst.msk [vmem:[#allocation2 + $0x40] sm:$0x3] %vm19128_vm6, %v19079_v25  ;;  %v17705_v22 = vcombine.high %v27443_v33, %v27443_v33  ;;  %v17712_v4 = vrot.slane %v27443_v33, %v27673_v11  ;;  %v19217_v12 = vld [vmem:[#allocation2 + $0x19] sm:$0xff]  ;;  %v19218_v58 = vld [vmem:[#allocation2 + $0x21] sm:$0xff]  ;;  %v18394_v31 = vcombine.low %v18386_v40, %v18393_v59  ;;  %26263 = vmatprep.subr.bf16.mxu1 %v31991_v55 }
 0x48c   : > { %v18403_v21 = vcombine.low %v17703_v30, %v17702_v61  ;;  %v17704_v29 = vcombine.high %v17702_v61, %v17702_v61  ;;  %25757 = vmatprep.mubr.msk.f32.mxu1 %vm19125_vm5, %v19217_v12  ;;  %27448 = vtanh.f32 %v26301_v50  ;;  %v18410_v49 = vrot.slane %v18402_v54, %v27673_v11 }
 0x48d   : > { %v17719_v7 = vrot.slane %v17705_v22, %v27673_v11  ;;  %v17720_v8 = vcombine.high %v17712_v4, %v17712_v4  ;;  %25758 = vmatmul.mubr.msk.f32.gmra.mrb[96].mxu1 %vm19125_vm5, %v19218_v58  ;;  %v17302_v18 = vpop.f32.mrb[28].mxu0  ;;  %19134 = vst.msk [vmem:[#allocation2 + $0x38] sm:$0xff] %vm19125_vm5, %v18394_v31 }
 0x48e   : > { %v27445_v39 = vpop.eup %27444  ;;  %v18417_v34 = vrot.slane %v18403_v21, %v27673_v11  ;;  %v18419_v57 = vcombine.low %v17704_v29, %v17712_v4  ;;  %v26302_v51 = vadd.f32 %v17302_v18, %v31318_v2  ;;  %v25665_v9 = vpop.f32.mrb[29].mxu0 }
 0x48f   : > { %v17721_v41 = vcombine.high %v17719_v7, %v17719_v7  ;;  %v18420_v24 = vcombine.low %v17720_v8, %v17719_v7  ;;  %v17722_v42 = vcombine.high %v27445_v39, %v27445_v39  ;;  %v17729_v32 = vrot.slane %v27445_v39, %v27673_v11 }
 0x490   : > { %v18418_v53 = vcombine.low %v18410_v49, %v18417_v34  ;;  %v18427_v27 = vrot.slane %v18419_v57, %v27673_v11  ;;  %27450 = vtanh.f32 %v26302_v51 }
 0x491   : > { %v18434_v62 = vrot.slane %v18420_v24, %v27673_v11  ;;  %v18442_v40 = vrot.slane %v17721_v41, %v27673_v11  ;;  %v17736_v6 = vrot.slane %v17722_v42, %v27673_v11  ;;  %v17737_v25 = vcombine.high %v17729_v32, %v17729_v32  ;;  %v17307_v2 = vpop.f32.mrb[30].mxu0 }
 0x492   : > { %v27447_v52 = vpop.eup %27446  ;;  %v19080_v33 = vsel %vm18261_vm7, %v18418_v53, 0.0  ;;  %v26303_v59 = vadd.f32 %v17307_v2, %v31328_v38  ;;  %v25668_v61 = vpop.f32.mrb[31].mxu0 }
 0x493   : > { %19136 = vst.msk [vmem:[#allocation2 + $0x48] sm:$0xff] %vm19125_vm5, %v19080_v33  ;;  %v18435_v30 = vcombine.low %v18427_v27, %v18434_v62  ;;  %v19082_v54 = vsel %vm18272_vm8, %v18442_v40, 0.0  ;;  %v17738_v26 = vcombine.high %v17736_v6, %v17736_v6  ;;  %v18443_v22 = vcombine.low %v17729_v32, %v17737_v25 }
 0x494   : > { %19138 = vst.msk [vmem:[#allocation2 + $0x58] sm:$0x3] %vm19128_vm6, %v19082_v54  ;;  %v17739_v4 = vcombine.high %v27447_v52, %v27447_v52  ;;  %v17746_v50 = vrot.slane %v27447_v52, %v27673_v11  ;;  %27452 = vtanh.f32 %v26303_v59  ;;  %v19219_v38 = vld [vmem:[#allocation2 + $0x31] sm:$0xff]  ;;  %v19220_v31 = vld [vmem:[#allocation2 + $0x39] sm:$0xff] }
 0x495   : > { %19137 = vst.msk [vmem:[#allocation2 + $0x50] sm:$0xff] %vm19125_vm5, %v18435_v30  ;;  %v18444_v12 = vcombine.low %v17736_v6, %v17738_v26  ;;  %v17312_v58 = vpop.f32.mrb[32].mxu0  ;;  %25760 = vmatprep.mubr.msk.f32.mxu1 %vm19125_vm5, %v19219_v38  ;;  %v18451_v8 = vrot.slane %v18443_v22, %v27673_v11 }
 0x496   : > { %v17753_v21 = vrot.slane %v17739_v4, %v27673_v11  ;;  %v17754_v29 = vcombine.high %v17746_v50, %v17746_v50  ;;  %v26304_v23 = vadd.f32 %v17312_v58, %v31339_v48  ;;  %v25671_v13 = vpop.f32.mrb[33].mxu0  ;;  %v27449_v7 = vpop.eup %27448  ;;  %25761 = vmatmul.mubr.msk.f32.gmra.mrb[98].mxu1 %vm19125_vm5, %v19220_v31 }
 0x497   : > { %v18458_v18 = vrot.slane %v18444_v12, %v27673_v11  ;;  %v17756_v34 = vcombine.high %v27449_v7, %v27449_v7  ;;  %v17763_v57 = vrot.slane %v27449_v7, %v27673_v11 }
 0x498   : > { %v17755_v39 = vcombine.high %v17753_v21, %v17753_v21  ;;  %v18460_v49 = vcombine.low %v17746_v50, %v17754_v29  ;;  %27454 = vtanh.f32 %v26304_v23 }
 0x499   : > { %v18459_v51 = vcombine.low %v18451_v8, %v18458_v18  ;;  %v17317_v9 = vpop.f32.mrb[34].mxu0  ;;  %v17770_v42 = vrot.slane %v17756_v34, %v27673_v11  ;;  %v17771_v32 = vcombine.high %v17763_v57, %v17763_v57  ;;  %v18483_v62 = vrot.slane %v17763_v57, %v27673_v11 }
 0x49a   : > { %v27451_v41 = vpop.eup %27450  ;;  %v18461_v48 = vcombine.low %v17753_v21, %v17755_v39  ;;  %v18468_v24 = vrot.slane %v18460_v49, %v27673_v11  ;;  %v25674_v53 = vpop.f32.mrb[35].mxu0  ;;  %v26305_v33 = vadd.f32 %v17317_v9, %v31349_v60 }
 0x49b   : > { %v19083_v27 = vsel %vm18261_vm7, %v18459_v51, 0.0  ;;  %v17773_v40 = vcombine.high %v27451_v41, %v27451_v41  ;;  %v17780_v6 = vrot.slane %v27451_v41, %v27673_v11  ;;  %v18484_v2 = vcombine.low %v17771_v32, %v17770_v42 }
 0x49c   : > { %19139 = vst.msk [vmem:[#allocation2 + $0x60] sm:$0xff] %vm19125_vm5, %v19083_v27  ;;  %v18475_v25 = vrot.slane %v18461_v48, %v27673_v11  ;;  %v17772_v52 = vcombine.high %v17770_v42, %v17770_v42  ;;  %v19221_v59 = vld [vmem:[#allocation2 + $0x49] sm:$0xff]  ;;  %v19222_v61 = vld [vmem:[#allocation2 + $0x51] sm:$0xff]  ;;  %v19085_v30 = vsel %vm18272_vm8, %v18483_v62, 0.0  ;;  %27456 = vtanh.f32 %v26305_v33 }
 0x49d   : > { %v17787_v54 = vrot.slane %v17773_v40, %v27673_v11  ;;  %v17788_v26 = vcombine.high %v17780_v6, %v17780_v6  ;;  %v17322_v22 = vpop.f32.mrb[36].mxu0  ;;  %25763 = vmatprep.mubr.msk.f32.mxu1 %vm19125_vm5, %v19221_v59  ;;  %19141 = vst.msk [vmem:[#allocation2 + $0x70] sm:$0x3] %vm19128_vm6, %v19085_v30  ;;  %v18492_v29 = vrot.slane %v18484_v2, %v27673_v11 }
 0x49e   : > { %v27453_v4 = vpop.eup %27452  ;;  %v18476_v50 = vcombine.low %v18468_v24, %v18475_v25  ;;  %v18485_v12 = vcombine.low %v17772_v52, %v17780_v6  ;;  %v25677_v58 = vpop.f32.mrb[37].mxu0  ;;  %25764 = vmatmul.mubr.msk.f32.gmra.mrb[100].mxu1 %vm19125_vm5, %v19222_v61  ;;  %v26306_v13 = vadd.f32 %v17322_v22, %v31358_v43 }
 0x49f   : > { %v18501_v60 = vcombine.low %v17788_v26, %v17787_v54  ;;  %v17789_v38 = vcombine.high %v17787_v54, %v17787_v54  ;;  %v17790_v31 = vcombine.high %v27453_v4, %v27453_v4  ;;  %v17797_v21 = vrot.slane %v27453_v4, %v27673_v11 }
 0x4a0   : > { %19140 = vst.msk [vmem:[#allocation2 + $0x68] sm:$0xff] %vm19125_vm5, %v18476_v50  ;;  %v18499_v23 = vrot.slane %v18485_v12, %v27673_v11  ;;  %27458 = vtanh.f32 %v26306_v13 }
 0x4a1   : > { %v17804_v7 = vrot.slane %v17790_v31, %v27673_v11  ;;  %v17805_v8 = vcombine.high %v17797_v21, %v17797_v21  ;;  %v18502_v18 = vcombine.low %v17789_v38, %v17797_v21  ;;  %v17327_v39 = vpop.f32.mrb[38].mxu0  ;;  %v18509_v9 = vrot.slane %v18501_v60, %v27673_v11 }
 0x4a2   : > { %v18500_v49 = vcombine.low %v18492_v29, %v18499_v23  ;;  %v26307_v34 = vadd.f32 %v17327_v39, %v31369_v1  ;;  %v25680_v57 = vpop.f32.mrb[39].mxu0  ;;  %v27455_v51 = vpop.eup %27454 }
 0x4a3   : > { %v17806_v41 = vcombine.high %v17804_v7, %v17804_v7  ;;  %v18516_v48 = vrot.slane %v18502_v18, %v27673_v11  ;;  %v18524_v24 = vrot.slane %v17805_v8, %v27673_v11  ;;  %v17807_v42 = vcombine.high %v27455_v51, %v27455_v51 }
 0x4a4   : > { %v19086_v43 = vsel %vm18261_vm7, %v18500_v49, 0.0  ;;  %v17814_v32 = vrot.slane %v27455_v51, %v27673_v11  ;;  %27460 = vtanh.f32 %v26307_v34 }
 0x4a5   : > { %19142 = vst.msk [vmem:[#allocation2 + $0x78] sm:$0xff] %vm19125_vm5, %v19086_v43  ;;  %v18517_v53 = vcombine.low %v18509_v9, %v18516_v48  ;;  %v19088_v1 = vsel %vm18272_vm8, %v18524_v24, 0.0  ;;  %v17332_v27 = vpop.f32.mrb[40].mxu0  ;;  %v18525_v62 = vcombine.low %v17804_v7, %v17806_v41  ;;  %v17821_v40 = vrot.slane %v17807_v42, %v27673_v11 }
 0x4a6   : > { %19144 = vst.msk [vmem:[#allocation2 + $0x88] sm:$0x3] %vm19128_vm6, %v19088_v1  ;;  %v17822_v6 = vcombine.high %v17814_v32, %v17814_v32  ;;  %v26308_v25 = vadd.f32 %v17332_v27, %v31380_v14  ;;  %v25683_v2 = vpop.f32.mrb[41].mxu0  ;;  %v27457_v59 = vpop.eup %27456 }
 0x4a7   : > { %19143 = vst.msk [vmem:[#allocation2 + $0x80] sm:$0xff] %vm19125_vm5, %v18517_v53  ;;  %v19223_v52 = vld [vmem:[#allocation2 + $0x61] sm:$0xff]  ;;  %v19224_v33 = vld [vmem:[#allocation2 + $0x69] sm:$0xff]  ;;  %v17823_v61 = vcombine.high %v17821_v40, %v17821_v40  ;;  %v17824_v54 = vcombine.high %v27457_v59, %v27457_v59  ;;  %v17831_v26 = vrot.slane %v27457_v59, %v27673_v11  ;;  %v18533_v4 = vrot.slane %v18525_v62, %v27673_v11 }
 0x4a8   : > { %v18526_v30 = vcombine.low %v17814_v32, %v17822_v6  ;;  %27462 = vtanh.f32 %v26308_v25  ;;  %25766 = vmatprep.mubr.msk.f32.mxu1 %vm19125_vm5, %v19223_v52 }
 0x4a9   : > { %25767 = vmatmul.mubr.msk.f32.gmra.mrb[102].mxu1 %vm19125_vm5, %v19224_v33  ;;  %v17337_v22 = vpop.f32.mrb[42].mxu0  ;;  %v18542_v50 = vcombine.low %v17821_v40, %v17823_v61  ;;  %v17838_v60 = vrot.slane %v17824_v54, %v27673_v11  ;;  %v17839_v38 = vcombine.high %v17831_v26, %v17831_v26 }
 0x4aa   : > { %v18540_v14 = vrot.slane %v18526_v30, %v27673_v11  ;;  %v26309_v12 = vadd.f32 %v17337_v22, %v31389_v15  ;;  %v25686_v58 = vpop.f32.mrb[43].mxu0  ;;  %v27459_v31 = vpop.eup %27458 }
 0x4ab   : > { %v18543_v29 = vcombine.low %v17831_v26, %v17839_v38  ;;  %v18565_v23 = vrot.slane %v17838_v60, %v27673_v11  ;;  %v17840_v13 = vcombine.high %v17838_v60, %v17838_v60  ;;  %v17841_v7 = vcombine.high %v27459_v31, %v27459_v31 }
 0x4ac   : > { %v18541_v21 = vcombine.low %v18533_v4, %v18540_v14  ;;  %27464 = vtanh.f32 %v26309_v12  ;;  %v18550_v39 = vrot.slane %v18542_v50, %v27673_v11  ;;  %v17848_v15 = vrot.slane %v27459_v31, %v27673_v11 }
 0x4ad   : > { %v17342_v8 = vpop.f32.mrb[44].mxu0  ;;  %v18557_v41 = vrot.slane %v18543_v29, %v27673_v11  ;;  %v19091_v48 = vsel %vm18272_vm8, %v18565_v23, 0.0  ;;  %v17855_v24 = vrot.slane %v17841_v7, %v27673_v11 }
 0x4ae   : > { %v27461_v18 = vpop.eup %27460  ;;  %v19089_v49 = vsel %vm18261_vm7, %v18541_v21, 0.0  ;;  %v26310_v34 = vadd.f32 %v17342_v8, %v31401_v5  ;;  %v25689_v57 = vpop.f32.mrb[45].mxu0  ;;  %v19225_v51 = vld [vmem:[#allocation2 + $0x79] sm:$0xff]  ;;  %v19226_v9 = vld [vmem:[#allocation2 + $0x81] sm:$0xff]  ;;  %19147 = vst.msk [vmem:[#allocation2 + $0xa0] sm:$0x3] %vm19128_vm6, %v19091_v48  ;;  %v17856_v42 = vcombine.high %v17848_v15, %v17848_v15  ;;  %v18566_v32 = vcombine.low %v17840_v13, %v17848_v15 }
 0x4af   : > { %19145 = vst.msk [vmem:[#allocation2 + $0x90] sm:$0xff] %vm19125_vm5, %v19089_v49  ;;  %v17858_v43 = vcombine.high %v27461_v18, %v27461_v18  ;;  %25769 = vmatprep.mubr.msk.f32.mxu1 %vm19125_vm5, %v19225_v51  ;;  %v17865_v5 = vrot.slane %v27461_v18, %v27673_v11  ;;  %v18558_v53 = vcombine.low %v18550_v39, %v18557_v41 }
 0x4b0   : > { %27466 = vtanh.f32 %v26310_v34  ;;  %25770 = vmatmul.mubr.msk.f32.gmra.mrb[104].mxu1 %vm19125_vm5, %v19226_v9  ;;  %v17857_v1 = vcombine.high %v17855_v24, %v17855_v24  ;;  %v18567_v6 = vcombine.low %v17856_v42, %v17855_v24  ;;  %v18574_v54 = vrot.slane %v18566_v32, %v27673_v11 }
 0x4b1   : > { %v17872_v27 = vrot.slane %v17858_v43, %v27673_v11  ;;  %v17347_v62 = vpop.f32.mrb[46].mxu0  ;;  %v17873_v25 = vcombine.high %v17865_v5, %v17865_v5  ;;  %19146 = vst.msk [vmem:[#allocation2 + $0x98] sm:$0xff] %vm19125_vm5, %v18558_v53 }
 0x4b2   : > { %v27463_v40 = vpop.eup %27462  ;;  %v26311_v2 = vadd.f32 %v17347_v62, %v31409_v37  ;;  %v25692_v52 = vpop.f32.mrb[47].mxu0  ;;  %v18583_v59 = vcombine.low %v17857_v1, %v17865_v5  ;;  %v18581_v26 = vrot.slane %v18567_v6, %v27673_v11 }
 0x4b3   : > { %v17874_v33 = vcombine.high %v17872_v27, %v17872_v27  ;;  %v17875_v61 = vcombine.high %v27463_v40, %v27463_v40  ;;  %v17882_v30 = vrot.slane %v27463_v40, %v27673_v11  ;;  %v18584_v22 = vcombine.low %v17873_v25, %v17872_v27 }
 0x4b4   : > { %27468 = vtanh.f32 %v26311_v2  ;;  %v18582_v58 = vcombine.low %v18574_v54, %v18581_v26  ;;  %v18591_v60 = vrot.slane %v18583_v59, %v27673_v11 }
 0x4b5   : > { %v18606_v4 = vrot.slane %v17874_v33, %v27673_v11  ;;  %v17889_v14 = vrot.slane %v17875_v61, %v27673_v11  ;;  %v17890_v50 = vcombine.high %v17882_v30, %v17882_v30  ;;  %v17352_v37 = vpop.f32.mrb[48].mxu0  ;;  %v18598_v38 = vrot.slane %v18584_v22, %v27673_v11 }
 0x4b6   : > { %v27465_v12 = vpop.eup %27464  ;;  %v26312_v31 = vadd.f32 %v17352_v37, %v31419_v10  ;;  %v25695_v21 = vpop.f32.mrb[49].mxu0  ;;  %v19092_v8 = vsel %vm18261_vm7, %v18582_v58, 0.0 }
 0x4b7   : > { %v19094_v29 = vsel %vm18272_vm8, %v18606_v4, 0.0  ;;  %v17891_v23 = vcombine.high %v17889_v14, %v17889_v14  ;;  %v18607_v13 = vcombine.low %v17882_v30, %v17890_v50  ;;  %v17892_v7 = vcombine.high %v27465_v12, %v27465_v12  ;;  %19148 = vst.msk [vmem:[#allocation2 + $0xa8] sm:$0xff] %vm19125_vm5, %v19092_v8 }
 0x4b8   : > { %v18599_v18 = vcombine.low %v18591_v60, %v18598_v38  ;;  %19150 = vst.msk [vmem:[#allocation2 + $0xb8] sm:$0x3] %vm19128_vm6, %v19094_v29  ;;  %v17899_v39 = vrot.slane %v27465_v12, %v27673_v11  ;;  %27470 = vtanh.f32 %v26312_v31  ;;  %v19227_v41 = vld [vmem:[#allocation2 + $0x91] sm:$0xff]  ;;  %v19228_v24 = vld [vmem:[#allocation2 + $0x99] sm:$0xff] }
 0x4b9   : > { %v18608_v49 = vcombine.low %v17889_v14, %v17891_v23  ;;  %v17906_v10 = vrot.slane %v17892_v7, %v27673_v11  ;;  %v17357_v15 = vpop.f32.mrb[50].mxu0  ;;  %v18615_v57 = vrot.slane %v18607_v13, %v27673_v11  ;;  %25772 = vmatprep.mubr.msk.f32.mxu1 %vm19125_vm5, %v19227_v41 }
 0x4ba   : > { %v27467_v34 = vpop.eup %27466  ;;  %19149 = vst.msk [vmem:[#allocation2 + $0xb0] sm:$0xff] %vm19125_vm5, %v18599_v18  ;;  %v17907_v51 = vcombine.high %v17899_v39, %v17899_v39  ;;  %v26313_v9 = vadd.f32 %v17357_v15, %v31430_v56  ;;  %v25698_v48 = vpop.f32.mrb[51].mxu0  ;;  %25773 = vmatmul.mubr.msk.f32.gmra.mrb[106].mxu1 %vm19125_vm5, %v19228_v24 }
 0x4bb   : > { %v18622_v43 = vrot.slane %v18608_v49, %v27673_v11  ;;  %v17908_v42 = vcombine.high %v17906_v10, %v17906_v10  ;;  %v17909_v32 = vcombine.high %v27467_v34, %v27467_v34  ;;  %v17916_v5 = vrot.slane %v27467_v34, %v27673_v11 }
 0x4bc   : > { %v18624_v53 = vcombine.low %v17899_v39, %v17907_v51  ;;  %27472 = vtanh.f32 %v26313_v9 }
 0x4bd   : > { %v18623_v1 = vcombine.low %v18615_v57, %v18622_v43  ;;  %v18625_v27 = vcombine.low %v17906_v10, %v17908_v42  ;;  %v17923_v62 = vrot.slane %v17909_v32, %v27673_v11  ;;  %v17924_v56 = vcombine.high %v17916_v5, %v17916_v5  ;;  %v17362_v40 = vpop.f32.mrb[52].mxu0 }
 0x4be   : > { %v27469_v6 = vpop.eup %27468  ;;  %v18632_v25 = vrot.slane %v18624_v53, %v27673_v11  ;;  %v18647_v2 = vrot.slane %v17916_v5, %v27673_v11  ;;  %v26314_v52 = vadd.f32 %v17362_v40, %v31440_v19  ;;  %v25701_v33 = vpop.f32.mrb[53].mxu0 }
 0x4bf   : > { %v19095_v59 = vsel %vm18261_vm7, %v18623_v1, 0.0  ;;  %v18639_v61 = vrot.slane %v18625_v27, %v27673_v11  ;;  %v18648_v30 = vcombine.low %v17924_v56, %v17923_v62  ;;  %v17925_v54 = vcombine.high %v17923_v62, %v17923_v62 }
 0x4c0   : > { %19151 = vst.msk [vmem:[#allocation2 + $0xc0] sm:$0xff] %vm19125_vm5, %v19095_v59  ;;  %v19097_v26 = vsel %vm18272_vm8, %v18647_v2, 0.0  ;;  %v17926_v22 = vcombine.high %v27469_v6, %v27469_v6  ;;  %v17933_v4 = vrot.slane %v27469_v6, %v27673_v11  ;;  %27474 = vtanh.f32 %v26314_v52 }
 0x4c1   : > { %v18640_v14 = vcombine.low %v18632_v25, %v18639_v61  ;;  %19153 = vst.msk [vmem:[#allocation2 + $0xd0] sm:$0x3] %vm19128_vm6, %v19097_v26  ;;  %v17367_v19 = vpop.f32.mrb[54].mxu0  ;;  %v19229_v50 = vld [vmem:[#allocation2 + $0xa9] sm:$0xff]  ;;  %v19230_v37 = vld [vmem:[#allocation2 + $0xb1] sm:$0xff]  ;;  %v18656_v29 = vrot.slane %v18648_v30, %v27673_v11 }
 0x4c2   : > { %v27471_v12 = vpop.eup %27470  ;;  %v17940_v58 = vrot.slane %v17926_v22, %v27673_v11  ;;  %v17941_v60 = vcombine.high %v17933_v4, %v17933_v4  ;;  %v18649_v38 = vcombine.low %v17925_v54, %v17933_v4  ;;  %v26315_v31 = vadd.f32 %v17367_v19, %v31449_v3  ;;  %25775 = vmatprep.mubr.msk.f32.mxu1 %vm19125_vm5, %v19229_v50  ;;  %v25704_v21 = vpop.f32.mrb[55].mxu0 }
 0x4c3   : > { %19152 = vst.msk [vmem:[#allocation2 + $0xc8] sm:$0xff] %vm19125_vm5, %v18640_v14  ;;  %v17943_v23 = vcombine.high %v27471_v12, %v27471_v12  ;;  %v17950_v13 = vrot.slane %v27471_v12, %v27673_v11  ;;  %25776 = vmatmul.mubr.msk.f32.gmra.mrb[108].mxu1 %vm19125_vm5, %v19230_v37 }
 0x4c4   : > { %v18663_v7 = vrot.slane %v18649_v38, %v27673_v11  ;;  %v18665_v8 = vcombine.low %v17941_v60, %v17940_v58  ;;  %v17942_v18 = vcombine.high %v17940_v58, %v17940_v58  ;;  %27476 = vtanh.f32 %v26315_v31 }
 0x4c5   : > { %v17957_v39 = vrot.slane %v17943_v23, %v27673_v11  ;;  %v17958_v3 = vcombine.high %v17950_v13, %v17950_v13  ;;  %v17372_v49 = vpop.f32.mrb[56].mxu0 }
 0x4c6   : > { %v27473_v10 = vpop.eup %27472  ;;  %v18664_v15 = vcombine.low %v18656_v29, %v18663_v7  ;;  %v18666_v34 = vcombine.low %v17942_v18, %v17950_v13  ;;  %v26316_v57 = vadd.f32 %v17372_v49, %v31460_v63  ;;  %v25707_v51 = vpop.f32.mrb[57].mxu0  ;;  %v18673_v43 = vrot.slane %v18665_v8, %v27673_v11 }
 0x4c7   : > { %v17959_v9 = vcombine.high %v17957_v39, %v17957_v39  ;;  %v18688_v41 = vrot.slane %v17958_v3, %v27673_v11  ;;  %v17960_v48 = vcombine.high %v27473_v10, %v27473_v10  ;;  %v17967_v24 = vrot.slane %v27473_v10, %v27673_v11 }
 0x4c8   : > { %v19098_v42 = vsel %vm18261_vm7, %v18664_v15, 0.0  ;;  %v18680_v32 = vrot.slane %v18666_v34, %v27673_v11  ;;  %27478 = vtanh.f32 %v26316_v57 }
 0x4c9   : > { %19154 = vst.msk [vmem:[#allocation2 + $0xd8] sm:$0xff] %vm19125_vm5, %v19098_v42  ;;  %v18689_v5 = vcombine.low %v17957_v39, %v17959_v9  ;;  %v19100_v63 = vsel %vm18272_vm8, %v18688_v41, 0.0  ;;  %v17974_v53 = vrot.slane %v17960_v48, %v27673_v11  ;;  %v17975_v1 = vcombine.high %v17967_v24, %v17967_v24  ;;  %v17377_v27 = vpop.f32.mrb[58].mxu0 }
 0x4ca   : > { %v27475_v62 = vpop.eup %27474  ;;  %v18681_v56 = vcombine.low %v18673_v43, %v18680_v32  ;;  %19156 = vst.msk [vmem:[#allocation2 + $0xe8] sm:$0x3] %vm19128_vm6, %v19100_v63  ;;  %v26317_v40 = vadd.f32 %v17377_v27, %v31471_v45  ;;  %v25710_v6 = vpop.f32.mrb[59].mxu0  ;;  %v32136_v25 = vld [vmem:[#allocation2 + $0xc1] sm:$0xff]  ;;  %v32138_v2 = vld [vmem:[#allocation2 + $0xc9] sm:$0xff] }
 0x4cb   : > { %v17976_v52 = vcombine.high %v17974_v53, %v17974_v53  ;;  %v18690_v33 = vcombine.low %v17967_v24, %v17975_v1  ;;  %v17977_v59 = vcombine.high %v27475_v62, %v27475_v62  ;;  %25778 = vmatprep.mubr.msk.f32.mxu1 %vm19125_vm5, %v32136_v25  ;;  %v17984_v61 = vrot.slane %v27475_v62, %v27673_v11  ;;  %v32525_v36 = vld [vmem:[#allocation2 + $0xc2] sm:$0xff]  ;;  %v32529_v17 = vld [vmem:[#allocation2 + $0xca] sm:$0xff] }
 0x4cc   : > { %19155 = vst.msk [vmem:[#allocation2 + $0xe0] sm:$0xff] %vm19125_vm5, %v18681_v56  ;;  %27480 = vtanh.f32 %v26317_v40  ;;  %25779 = vmatmul.mubr.msk.f32.gmra.mrb[110].mxu1 %vm19125_vm5, %v32138_v2  ;;  %v18697_v45 = vrot.slane %v18689_v5, %v27673_v11  ;;  %33556 = vst [vmem:[#allocation51_spill] sm:$0xff] %v32525_v36 }
 0x4cd   : > { %v18704_v30 = vrot.slane %v18690_v33, %v27673_v11  ;;  %v18706_v54 = vcombine.low %v17974_v53, %v17976_v52  ;;  %v17991_v26 = vrot.slane %v17977_v59, %v27673_v11  ;;  %v17382_v22 = vpop.f32.mrb[60].mxu0  ;;  %v17992_v14 = vcombine.high %v17984_v61, %v17984_v61  ;;  %33557 = vst [vmem:[#allocation54_spill] sm:$0xff] %v32529_v17 }
 0x4ce   : > { %v27477_v4 = vpop.eup %27476  ;;  %v26318_v19 = vadd.f32 %v17382_v22, %v31481_v28  ;;  %v25713_v50 = vpop.f32.mrb[61].mxu0 }
 0x4cf   : > { %v18705_v37 = vcombine.low %v18697_v45, %v18704_v30  ;;  %v18729_v12 = vrot.slane %v17991_v26, %v27673_v11  ;;  %v17993_v58 = vcombine.high %v17991_v26, %v17991_v26  ;;  %v18707_v60 = vcombine.low %v17984_v61, %v17992_v14 }
 0x4d0   : > { %v17994_v38 = vcombine.high %v27477_v4, %v27477_v4  ;;  %v18001_v31 = vrot.slane %v27477_v4, %v27673_v11  ;;  %27482 = vtanh.f32 %v26318_v19  ;;  %v18714_v21 = vrot.slane %v18706_v54, %v27673_v11 }
 0x4d1   : > { %v19101_v29 = vsel %vm18261_vm7, %v18705_v37, 0.0  ;;  %v19103_v23 = vsel %vm18272_vm8, %v18729_v12, 0.0  ;;  %v17387_v13 = vpop.f32.mrb[62].mxu0  ;;  %v18721_v7 = vrot.slane %v18707_v60, %v27673_v11  ;;  %v5837_v48 = vpop.f32.mrb[90].mxu1 }
 0x4d2   : > { %v27479_v28 = vpop.eup %27478  ;;  %19157 = vst.msk [vmem:[#allocation2 + $0xf0] sm:$0xff] %vm19125_vm5, %v19101_v29  ;;  %v18008_v8 = vrot.slane %v17994_v38, %v27673_v11  ;;  %v18009_v18 = vcombine.high %v18001_v31, %v18001_v31  ;;  %v18730_v39 = vcombine.low %v17993_v58, %v18001_v31  ;;  %v25716_v3 = vpop.f32.mrb[63].mxu0  ;;  %v26319_v15 = vadd.f32 %v17387_v13, %v31490_v0 }
 0x4d3   : > { %19159 = vst.msk [vmem:[#allocation2 + $0x100] sm:$0x3] %vm19128_vm6, %v19103_v23  ;;  %v18011_v49 = vcombine.high %v27479_v28, %v27479_v28  ;;  %v18018_v10 = vrot.slane %v27479_v28, %v27673_v11  ;;  %v32163_v34 = vld [vmem:[#allocation2 + $0xd9] sm:$0xff]  ;;  %v32165_v57 = vld [vmem:[#allocation2 + $0xe1] sm:$0xff]  ;;  %v18722_v51 = vcombine.low %v18714_v21, %v18721_v7  ;;  %v24984_v0 = vpop.f32.mrb[91].mxu1 }
 0x4d4   : > { %v18731_v9 = vcombine.low %v18009_v18, %v18008_v8  ;;  %v18010_v41 = vcombine.high %v18008_v8, %v18008_v8  ;;  %25781 = vmatprep.mubr.msk.f32.mxu1 %vm19125_vm5, %v32163_v34  ;;  %27484 = vtanh.f32 %v26319_v15  ;;  %v18738_v5 = vrot.slane %v18730_v39, %v27673_v11 }
 0x4d5   : > { %v18025_v24 = vrot.slane %v18011_v49, %v27673_v11  ;;  %v18026_v43 = vcombine.high %v18018_v10, %v18018_v10  ;;  %25782 = vmatmul.mubr.msk.f32.gmra.mrb[112].mxu1 %vm19125_vm5, %v32165_v57  ;;  %v17392_v42 = vpop.f32.mrb[64].mxu0  ;;  %19158 = vst.msk [vmem:[#allocation2 + $0xf8] sm:$0xff] %vm19125_vm5, %v18722_v51  ;;  %v5842_v59 = vpop.f32.mrb[92].mxu1 }
 0x4d6   : > { %v27481_v32 = vpop.eup %27480  ;;  %v18745_v63 = vrot.slane %v18731_v9, %v27673_v11  ;;  %v18747_v53 = vcombine.low %v18010_v41, %v18018_v10  ;;  %v26320_v1 = vadd.f32 %v17392_v42, %v31500_v35  ;;  %v25719_v27 = vpop.f32.mrb[65].mxu0 }
 0x4d7   : > { %v18027_v62 = vcombine.high %v18025_v24, %v18025_v24  ;;  %v18748_v56 = vcombine.low %v18026_v43, %v18025_v24  ;;  %v18028_v40 = vcombine.high %v27481_v32, %v27481_v32  ;;  %v18035_v6 = vrot.slane %v27481_v32, %v27673_v11  ;;  %v24987_v35 = vpop.f32.mrb[93].mxu1 }
 0x4d8   : > { %v18746_v52 = vcombine.low %v18738_v5, %v18745_v63  ;;  %v18755_v33 = vrot.slane %v18747_v53, %v27673_v11  ;;  %27486 = vtanh.f32 %v26320_v1 }
 0x4d9   : > { %v18762_v61 = vrot.slane %v18748_v56, %v27673_v11  ;;  %v18770_v45 = vrot.slane %v18027_v62, %v27673_v11  ;;  %v18042_v30 = vrot.slane %v18028_v40, %v27673_v11  ;;  %v18043_v54 = vcombine.high %v18035_v6, %v18035_v6  ;;  %v17397_v26 = vpop.f32.mrb[66].mxu0 }
 0x4da   : > { %v27483_v22 = vpop.eup %27482  ;;  %v19104_v4 = vsel %vm18261_vm7, %v18746_v52, 0.0  ;;  %v26321_v14 = vadd.f32 %v17397_v26, %v31512_v20  ;;  %v25722_v19 = vpop.f32.mrb[67].mxu0 }
 0x4db   : > { %19160 = vst.msk [vmem:[#allocation2 + $0x108] sm:$0xff] %vm19125_vm5, %v19104_v4  ;;  %v18763_v50 = vcombine.low %v18755_v33, %v18762_v61  ;;  %v19106_v37 = vsel %vm18272_vm8, %v18770_v45, 0.0  ;;  %v18044_v12 = vcombine.high %v18042_v30, %v18042_v30  ;;  %v18771_v58 = vcombine.low %v18035_v6, %v18043_v54  ;;  %v33546_v19 = vld [vmem:[#allocation68_spill] sm:$0xff] }
 0x4dc   : > { %19162 = vst.msk [vmem:[#allocation2 + $0x118] sm:$0x3] %vm19128_vm6, %v19106_v37  ;;  %v18045_v60 = vcombine.high %v27483_v22, %v27483_v22  ;;  %v18052_v38 = vrot.slane %v27483_v22, %v27673_v11  ;;  %27488 = vtanh.f32 %v26321_v14  ;;  %v32190_v20 = vld [vmem:[#allocation2 + $0xf1] sm:$0xff]  ;;  %v32192_v29 = vld [vmem:[#allocation2 + $0xf9] sm:$0xff] }
 0x4dd   : > { %19161 = vst.msk [vmem:[#allocation2 + $0x110] sm:$0xff] %vm19125_vm5, %v18763_v50  ;;  %v18772_v31 = vcombine.low %v18042_v30, %v18044_v12  ;;  %v17402_v21 = vpop.f32.mrb[68].mxu0  ;;  %25784 = vmatprep.mubr.msk.f32.mxu1 %vm19125_vm5, %v32190_v20  ;;  %v18779_v18 = vrot.slane %v18771_v58, %v27673_v11 }
 0x4de   : > { %v18059_v23 = vrot.slane %v18045_v60, %v27673_v11  ;;  %v18060_v13 = vcombine.high %v18052_v38, %v18052_v38  ;;  %v26322_v28 = vadd.f32 %v17402_v21, %v31519_v46  ;;  %v25725_v7 = vpop.f32.mrb[69].mxu0  ;;  %v27485_v8 = vpop.eup %27484  ;;  %25785 = vmatmul.mubr.msk.f32.gmra.mrb[114].mxu1 %vm19125_vm5, %v32192_v29 }
 0x4df   : > { %v18786_v39 = vrot.slane %v18772_v31, %v27673_v11  ;;  %v18062_v10 = vcombine.high %v27485_v8, %v27485_v8  ;;  %v18069_v15 = vrot.slane %v27485_v8, %v27673_v11  ;;  %v33547_v31 = vld [vmem:[#allocation39_spill] sm:$0xff] }
 0x4e0   : > { %v18061_v3 = vcombine.high %v18059_v23, %v18059_v23  ;;  %v18788_v49 = vcombine.low %v18052_v38, %v18060_v13  ;;  %27490 = vtanh.f32 %v26322_v28 }
 0x4e1   : > { %v18787_v51 = vcombine.low %v18779_v18, %v18786_v39  ;;  %v17407_v46 = vpop.f32.mrb[70].mxu0  ;;  %v18076_v24 = vrot.slane %v18062_v10, %v27673_v11  ;;  %v18077_v43 = vcombine.high %v18069_v15, %v18069_v15  ;;  %v18811_v32 = vrot.slane %v18069_v15, %v27673_v11 }
 0x4e2   : > { %v27487_v9 = vpop.eup %27486  ;;  %v18789_v41 = vcombine.low %v18059_v23, %v18061_v3  ;;  %v18796_v48 = vrot.slane %v18788_v49, %v27673_v11  ;;  %v25728_v42 = vpop.f32.mrb[71].mxu0  ;;  %v26323_v62 = vadd.f32 %v17407_v46, %v31530_v47 }
 0x4e3   : > { %v19107_v0 = vsel %vm18261_vm7, %v18787_v51, 0.0  ;;  %v18079_v5 = vcombine.high %v27487_v9, %v27487_v9  ;;  %v18086_v63 = vrot.slane %v27487_v9, %v27673_v11  ;;  %v18812_v1 = vcombine.low %v18077_v43, %v18076_v24 }
 0x4e4   : > { %19163 = vst.msk [vmem:[#allocation2 + $0x120] sm:$0xff] %vm19125_vm5, %v19107_v0  ;;  %v18803_v53 = vrot.slane %v18789_v41, %v27673_v11  ;;  %v18078_v27 = vcombine.high %v18076_v24, %v18076_v24  ;;  %v32212_v56 = vld [vmem:[#allocation2 + $0x109] sm:$0xff]  ;;  %v32214_v40 = vld [vmem:[#allocation2 + $0x111] sm:$0xff]  ;;  %v19109_v6 = vsel %vm18272_vm8, %v18811_v32, 0.0  ;;  %27492 = vtanh.f32 %v26323_v62 }
 0x4e5   : > { %v18093_v52 = vrot.slane %v18079_v5, %v27673_v11  ;;  %v18094_v33 = vcombine.high %v18086_v63, %v18086_v63  ;;  %v17412_v59 = vpop.f32.mrb[72].mxu0  ;;  %25787 = vmatprep.mubr.msk.f32.mxu1 %vm19125_vm5, %v32212_v56  ;;  %19165 = vst.msk [vmem:[#allocation2 + $0x130] sm:$0x3] %vm19128_vm6, %v19109_v6  ;;  %v18820_v4 = vrot.slane %v18812_v1, %v27673_v11 }
 0x4e6   : > { %v27489_v61 = vpop.eup %27488  ;;  %v18804_v45 = vcombine.low %v18796_v48, %v18803_v53  ;;  %v18813_v30 = vcombine.low %v18078_v27, %v18086_v63  ;;  %v25731_v47 = vpop.f32.mrb[73].mxu0  ;;  %25788 = vmatmul.mubr.msk.f32.gmra.mrb[116].mxu1 %vm19125_vm5, %v32214_v40  ;;  %v26324_v50 = vadd.f32 %v17412_v59, %v33546_v19  ;;  %v33548_v48 = vld [vmem:[#allocation42_spill] sm:$0xff] }
 0x4e7   : > { %v18829_v54 = vcombine.low %v18094_v33, %v18093_v52  ;;  %v18095_v26 = vcombine.high %v18093_v52, %v18093_v52  ;;  %v18096_v35 = vcombine.high %v27489_v61, %v27489_v61  ;;  %v18103_v22 = vrot.slane %v27489_v61, %v27673_v11  ;;  %v33549_v33 = vld [vmem:[#allocation64_spill] sm:$0xff] }
 0x4e8   : > { %19164 = vst.msk [vmem:[#allocation2 + $0x128] sm:$0xff] %vm19125_vm5, %v18804_v45  ;;  %v18827_v14 = vrot.slane %v18813_v30, %v27673_v11  ;;  %27494 = vtanh.f32 %v26324_v50 }
 0x4e9   : > { %v18110_v37 = vrot.slane %v18096_v35, %v27673_v11  ;;  %v18111_v12 = vcombine.high %v18103_v22, %v18103_v22  ;;  %v18830_v58 = vcombine.low %v18095_v26, %v18103_v22  ;;  %v17417_v60 = vpop.f32.mrb[74].mxu0  ;;  %v18837_v28 = vrot.slane %v18829_v54, %v27673_v11 }
 0x4ea   : > { %v18828_v38 = vcombine.low %v18820_v4, %v18827_v14  ;;  %v26325_v21 = vadd.f32 %v17417_v60, %v33547_v31  ;;  %v25734_v23 = vpop.f32.mrb[75].mxu0  ;;  %v27491_v13 = vpop.eup %27490 }
 0x4eb   : > { %v18112_v7 = vcombine.high %v18110_v37, %v18110_v37  ;;  %v18844_v8 = vrot.slane %v18830_v58, %v27673_v11  ;;  %v18852_v18 = vrot.slane %v18111_v12, %v27673_v11  ;;  %v18113_v3 = vcombine.high %v27491_v13, %v27491_v13  ;;  %v33550_v58 = vld [vmem:[#allocation58_spill] sm:$0xff] }
 0x4ec   : > { %v19110_v39 = vsel %vm18261_vm7, %v18828_v38, 0.0  ;;  %v18120_v49 = vrot.slane %v27491_v13, %v27673_v11  ;;  %27496 = vtanh.f32 %v26325_v21 }
 0x4ed   : > { %19166 = vst.msk [vmem:[#allocation2 + $0x138] sm:$0xff] %vm19125_vm5, %v19110_v39  ;;  %v18845_v10 = vcombine.low %v18837_v28, %v18844_v8  ;;  %v19112_v15 = vsel %vm18272_vm8, %v18852_v18, 0.0  ;;  %v17422_v51 = vpop.f32.mrb[76].mxu0  ;;  %v18853_v46 = vcombine.low %v18110_v37, %v18112_v7  ;;  %v18127_v9 = vrot.slane %v18113_v3, %v27673_v11 }
 0x4ee   : > { %19168 = vst.msk [vmem:[#allocation2 + $0x148] sm:$0x3] %vm19128_vm6, %v19112_v15  ;;  %v18128_v41 = vcombine.high %v18120_v49, %v18120_v49  ;;  %v26326_v24 = vadd.f32 %v17422_v51, %v33548_v48  ;;  %v25737_v43 = vpop.f32.mrb[77].mxu0  ;;  %v27493_v32 = vpop.eup %27492 }
 0x4ef   : > { %19167 = vst.msk [vmem:[#allocation2 + $0x140] sm:$0xff] %vm19125_vm5, %v18845_v10  ;;  %v32244_v42 = vld [vmem:[#allocation2 + $0x121] sm:$0xff]  ;;  %v32246_v0 = vld [vmem:[#allocation2 + $0x129] sm:$0xff]  ;;  %v18129_v5 = vcombine.high %v18127_v9, %v18127_v9  ;;  %v18130_v53 = vcombine.high %v27493_v32, %v27493_v32  ;;  %v18137_v1 = vrot.slane %v27493_v32, %v27673_v11  ;;  %v18861_v62 = vrot.slane %v18853_v46, %v27673_v11 }
 0x4f0   : > { %v18854_v63 = vcombine.low %v18120_v49, %v18128_v41  ;;  %27498 = vtanh.f32 %v26326_v24  ;;  %25790 = vmatprep.mubr.msk.f32.mxu1 %vm19125_vm5, %v32244_v42 }
 0x4f1   : > { %25791 = vmatmul.mubr.msk.f32.gmra.mrb[118].mxu1 %vm19125_vm5, %v32246_v0  ;;  %v17427_v27 = vpop.f32.mrb[78].mxu0  ;;  %v18870_v52 = vcombine.low %v18127_v9, %v18129_v5  ;;  %v18144_v45 = vrot.slane %v18130_v53, %v27673_v11  ;;  %v18145_v30 = vcombine.high %v18137_v1, %v18137_v1 }
 0x4f2   : > { %v18868_v6 = vrot.slane %v18854_v63, %v27673_v11  ;;  %v26327_v59 = vadd.f32 %v17427_v27, %v33549_v33  ;;  %v25740_v61 = vpop.f32.mrb[79].mxu0  ;;  %v27495_v47 = vpop.eup %27494 }
 0x4f3   : > { %v18871_v26 = vcombine.low %v18137_v1, %v18145_v30  ;;  %v18893_v35 = vrot.slane %v18144_v45, %v27673_v11  ;;  %v18146_v22 = vcombine.high %v18144_v45, %v18144_v45  ;;  %v18147_v4 = vcombine.high %v27495_v47, %v27495_v47 }
 0x4f4   : > { %v18869_v54 = vcombine.low %v18861_v62, %v18868_v6  ;;  %27500 = vtanh.f32 %v26327_v59  ;;  %v18878_v50 = vrot.slane %v18870_v52, %v27673_v11  ;;  %v18154_v12 = vrot.slane %v27495_v47, %v27673_v11 }
 0x4f5   : > { %v17432_v14 = vpop.f32.mrb[80].mxu0  ;;  %v18885_v23 = vrot.slane %v18871_v26, %v27673_v11  ;;  %v19115_v13 = vsel %vm18272_vm8, %v18893_v35, 0.0  ;;  %v18161_v28 = vrot.slane %v18147_v4, %v27673_v11 }
 0x4f6   : > { %v27497_v19 = vpop.eup %27496  ;;  %v19113_v37 = vsel %vm18261_vm7, %v18869_v54, 0.0  ;;  %v26328_v60 = vadd.f32 %v17432_v14, %v33550_v58  ;;  %v25743_v38 = vpop.f32.mrb[81].mxu0  ;;  %v32263_v31 = vld [vmem:[#allocation2 + $0x139] sm:$0xff]  ;;  %v32265_v21 = vld [vmem:[#allocation2 + $0x141] sm:$0xff]  ;;  %19171 = vst.msk [vmem:[#allocation2 + $0x160] sm:$0x3] %vm19128_vm6, %v19115_v13  ;;  %v18162_v8 = vcombine.high %v18154_v12, %v18154_v12  ;;  %v18894_v18 = vcombine.low %v18146_v22, %v18154_v12 }
 0x4f7   : > { %19169 = vst.msk [vmem:[#allocation2 + $0x150] sm:$0xff] %vm19125_vm5, %v19113_v37  ;;  %v18164_v7 = vcombine.high %v27497_v19, %v27497_v19  ;;  %25793 = vmatprep.mubr.msk.f32.mxu1 %vm19125_vm5, %v32263_v31  ;;  %v18171_v39 = vrot.slane %v27497_v19, %v27673_v11  ;;  %v18886_v3 = vcombine.low %v18878_v50, %v18885_v23 }
 0x4f8   : > { %27502 = vtanh.f32 %v26328_v60  ;;  %25794 = vmatmul.mubr.msk.f32.gmra.mrb[120].mxu1 %vm19125_vm5, %v32265_v21  ;;  %v18163_v49 = vcombine.high %v18161_v28, %v18161_v28  ;;  %v18895_v51 = vcombine.low %v18162_v8, %v18161_v28  ;;  %v18902_v43 = vrot.slane %v18894_v18, %v27673_v11 }
 0x4f9   : > { %v18178_v10 = vrot.slane %v18164_v7, %v27673_v11  ;;  %v18179_v46 = vcombine.high %v18171_v39, %v18171_v39  ;;  %19170 = vst.msk [vmem:[#allocation2 + $0x158] sm:$0xff] %vm19125_vm5, %v18886_v3 }
 0x4fa   : > { %v27499_v15 = vpop.eup %27498  ;;  %v18911_v41 = vcombine.low %v18163_v49, %v18171_v39  ;;  %v18909_v32 = vrot.slane %v18895_v51, %v27673_v11  ;;  %v32332_v51 = vpack.c.bf16 %v23705_v44, %v23704_v16  ;;  %v32493_v16 = vld [vmem:[#allocation2 + $0x62] sm:$0xff]  ;;  %v32497_v44 = vld [vmem:[#allocation2 + $0x6a] sm:$0xff] }
 0x4fb   : > { %v18180_v9 = vcombine.high %v18178_v10, %v18178_v10  ;;  %v18181_v48 = vcombine.high %v27499_v15, %v27499_v15  ;;  %v18188_v24 = vrot.slane %v27499_v15, %v27673_v11  ;;  %v18912_v5 = vcombine.low %v18179_v46, %v18178_v10  ;;  %v19181_v10 = vld [vmem:[#allocation2] sm:$0xff]  ;;  %v19182_v15 = vld [vmem:[#allocation2 + $0x8] sm:$0xff]  ;;  %v32335_v46 = vld [vmem:[#allocation2 + $0x18] sm:$0xff] }
 0x4fc   : > { %v18910_v62 = vcombine.low %v18902_v43, %v18909_v32  ;;  %v18919_v6 = vrot.slane %v18911_v41, %v27673_v11  ;;  %v32345_v41 = vld [vmem:[#allocation2 + $0x30] sm:$0xff]  ;;  %v32361_v43 = vld [vmem:[#allocation2 + $0x60] sm:$0xff]  ;;  %v32365_v32 = vld [vmem:[#allocation2 + $0x68] sm:$0xff] }
 0x4fd   : > { %v18934_v63 = vrot.slane %v18180_v9, %v27673_v11  ;;  %v18195_v53 = vrot.slane %v18181_v48, %v27673_v11  ;;  %v18196_v1 = vcombine.high %v18188_v24, %v18188_v24  ;;  %v18926_v52 = vrot.slane %v18912_v5, %v27673_v11  ;;  %v32341_v9 = vld [vmem:[#allocation2 + $0x20] sm:$0xff]  ;;  %v32349_v48 = vld [vmem:[#allocation2 + $0x38] sm:$0xff] }
 0x4fe   : > { %v27501_v27 = vpop.eup %27500  ;;  %v19116_v30 = vsel %vm18261_vm7, %v18910_v62, 0.0  ;;  %v32369_v5 = vld [vmem:[#allocation2 + $0x78] sm:$0xff]  ;;  %v32389_v62 = vld [vmem:[#allocation2 + $0xb0] sm:$0xff] }
 0x4ff   : > { %v19118_v33 = vsel %vm18272_vm8, %v18934_v63, 0.0  ;;  %v18197_v59 = vcombine.high %v18195_v53, %v18195_v53  ;;  %v18935_v61 = vcombine.low %v18188_v24, %v18196_v1  ;;  %v18198_v45 = vcombine.high %v27501_v27, %v27501_v27  ;;  %19172 = vst.msk [vmem:[#allocation2 + $0x168] sm:$0xff] %vm19125_vm5, %v19116_v30  ;;  %v32357_v24 = vld [vmem:[#allocation2 + $0x50] sm:$0xff]  ;;  %v32373_v63 = vld [vmem:[#allocation2 + $0x80] sm:$0xff]  ;;  %v32381_v1 = vld [vmem:[#allocation2 + $0x98] sm:$0xff] }
 0x500   : > { %v18927_v47 = vcombine.low %v18919_v6, %v18926_v52  ;;  %19174 = vst.msk [vmem:[#allocation2 + $0x178] sm:$0x3] %vm19128_vm6, %v19118_v33  ;;  %v18205_v54 = vrot.slane %v27501_v27, %v27673_v11  ;;  %v32296_v14 = vld [vmem:[#allocation2 + $0x151] sm:$0xff]  ;;  %v32298_v19 = vld [vmem:[#allocation2 + $0x159] sm:$0xff]  ;;  %v32385_v27 = vld [vmem:[#allocation2 + $0xa8] sm:$0xff] }
 0x501   : > { %v18936_v26 = vcombine.low %v18195_v53, %v18197_v59  ;;  %v18212_v35 = vrot.slane %v18198_v45, %v27673_v11  ;;  %v18943_v50 = vrot.slane %v18935_v61, %v27673_v11  ;;  %25796 = vmatprep.mubr.msk.f32.mxu1 %vm19125_vm5, %v32296_v14  ;;  %v32377_v53 = vld [vmem:[#allocation2 + $0x90] sm:$0xff]  ;;  %v32393_v6 = vld [vmem:[#allocation2 + $0xc0] sm:$0xff]  ;;  %v32397_v52 = vld [vmem:[#allocation2 + $0xc8] sm:$0xff] }
 0x502   : > { %v27503_v22 = vpop.eup %27502  ;;  %19173 = vst.msk [vmem:[#allocation2 + $0x170] sm:$0xff] %vm19125_vm5, %v18927_v47  ;;  %v18213_v4 = vcombine.high %v18205_v54, %v18205_v54  ;;  %25797 = vmatmul.mubr.msk.f32.gmra.mrb[122].mxu1 %vm19125_vm5, %v32298_v19  ;;  %v32401_v33 = vld [vmem:[#allocation2 + $0xd8] sm:$0xff]  ;;  %v32405_v59 = vld [vmem:[#allocation2 + $0xe0] sm:$0xff]  ;;  %v32409_v61 = vld [vmem:[#allocation2 + $0xf0] sm:$0xff] }
 0x503   : > { %v18950_v37 = vrot.slane %v18936_v26, %v27673_v11  ;;  %v18214_v12 = vcombine.high %v18212_v35, %v18212_v35  ;;  %v18222_v58 = vrot.slane %v27503_v22, %v27673_v11  ;;  %v32413_v45 = vld [vmem:[#allocation2 + $0xf8] sm:$0xff]  ;;  %v32417_v30 = vld [vmem:[#allocation2 + $0x108] sm:$0xff]  ;;  %v32421_v47 = vld [vmem:[#allocation2 + $0x110] sm:$0xff] }
 0x504   : > { %v18952_v60 = vcombine.low %v18205_v54, %v18213_v4  ;;  %v32425_v54 = vld [vmem:[#allocation2 + $0x120] sm:$0xff]  ;;  %v32429_v26 = vld [vmem:[#allocation2 + $0x128] sm:$0xff]  ;;  %v32441_v4 = vld [vmem:[#allocation2 + $0x150] sm:$0xff] }
 0x505   : > { %v18951_v38 = vcombine.low %v18943_v50, %v18950_v37  ;;  %v18953_v23 = vcombine.low %v18212_v35, %v18214_v12  ;;  %v18975_v13 = vrot.slane %v18222_v58, %v27673_v11  ;;  %v32433_v35 = vld [vmem:[#allocation2 + $0x138] sm:$0xff]  ;;  %v32437_v22 = vld [vmem:[#allocation2 + $0x140] sm:$0xff] }
 0x506   : > { %v18960_v7 = vrot.slane %v18952_v60, %v27673_v11  ;;  %v32445_v50 = vld [vmem:[#allocation2 + $0x158] sm:$0xff]  ;;  %v32449_v37 = vld [vmem:[#allocation2 + $0x168] sm:$0xff]  ;;  %v23738_v60 = vld [vmem:[%s33114_s2 + $0x40] sm:$0xff] }
 0x507   : > { %v19119_v28 = vsel %vm18261_vm7, %v18951_v38, 0.0  ;;  %v18967_v8 = vrot.slane %v18953_v23, %v27673_v11  ;;  %v19121_v18 = vsel %vm18272_vm8, %v18975_v13, 0.0  ;;  %33551 = vst [vmem:[#allocation65_spill] sm:$0xff] %v32445_v50  ;;  %33552 = vst [vmem:[#allocation52_spill] sm:$0xff] %v32449_v37  ;;  %v19892_v12 = vld [vmem:[#allocation2 + $0x2] sm:$0xff]  ;;  %v19893_v23 = vld [vmem:[#allocation2 + $0xa] sm:$0xff] }
 0x508   : > { %19175 = vst.msk [vmem:[#allocation2 + $0x180] sm:$0xff] %vm19125_vm5, %v19119_v28  ;;  %v23739_v38 = vld [vmem:[%s33114_s2 + $0x48] sm:$0xff]  ;;  %v32467_v28 = vld [vmem:[#allocation2 + $0x1a] sm:$0xff] }
 0x509   : > { %19177 = vst.msk [vmem:[#allocation2 + $0x190] sm:$0x3] %vm19128_vm6, %v19121_v18  ;;  %v18968_v39 = vcombine.low %v18960_v7, %v18967_v8  ;;  %v32316_v3 = vld [vmem:[#allocation2 + $0x169] sm:$0xff]  ;;  %v32318_v49 = vld [vmem:[#allocation2 + $0x171] sm:$0xff]  ;;  %v32464_v13 = vpack.c.bf16 %v23739_v38, %v23738_v60  ;;  %v32481_v18 = vld [vmem:[#allocation2 + $0x3a] sm:$0xff] }
 0x50a   : > { %25799 = vmatprep.mubr.msk.f32.mxu1 %vm19125_vm5, %v32316_v3  ;;  %v32453_v58 = vld [vmem:[#allocation2 + $0x170] sm:$0xff]  ;;  %v32473_v7 = vld [vmem:[#allocation2 + $0x22] sm:$0xff]  ;;  %v32513_v60 = vld [vmem:[#allocation2 + $0x9a] sm:$0xff] }
 0x50b   : > { %19176 = vst.msk [vmem:[#allocation2 + $0x188] sm:$0xff] %vm19125_vm5, %v18968_v39  ;;  %25800 = vmatmul.mubr.msk.f32.gmra.mrb[124].mxu1 %vm19125_vm5, %v32318_v49  ;;  %33553 = vst [vmem:[#allocation48_spill] sm:$0xff] %v32453_v58  ;;  %v32477_v8 = vld [vmem:[#allocation2 + $0x32] sm:$0xff]  ;;  %v32485_v39 = vld [vmem:[#allocation2 + $0x4a] sm:$0xff] }
 0x50c   : > { %25806 = vmatprep.mubr.msk.f32.mxu1 %vm19125_vm5, %v19181_v10  ;;  %v32489_v10 = vld [vmem:[#allocation2 + $0x52] sm:$0xff]  ;;  %v32517_v38 = vld [vmem:[#allocation2 + $0xaa] sm:$0xff]  ;;  %v32533_v11 = vld [vmem:[#allocation2 + $0xda] sm:$0xff] }
 0x50d   : > { %33554 = vst [vmem:[#allocation72_spill] sm:$0xff] %v32517_v38  ;;  %33558 = vst [vmem:[#allocation55_spill] sm:$0xff] %v32533_v11 }
 0x50f   : > { %25807 = vmatmul.mubr.msk.f32.vlgmr.msra.gmra.mrb[94].mxu1 %vm19125_vm5, %v19182_v15  ;;  %v32501_v15 = vld [vmem:[#allocation2 + $0x7a] sm:$0xff] }
 0x510   : > { %26265 = vmatpush3.bf16.msra.mxu1 %v31991_v55  ;;  %25809 = vmatprep.mubr.msk.f32.mxu1 %vm19125_vm5, %v32335_v46  ;;  %v32353_v55 = vld [vmem:[#allocation2 + $0x48] sm:$0xff] }
 0x511   : > { %26267 = vmatprep.subr.bf16.mxu1 %v32332_v51 }
 0x513   : > { %25810 = vmatmul.mubr.msk.f32.gmra.mrb[96].mxu1 %vm19125_vm5, %v32341_v9 }
 0x514   : > { %25812 = vmatprep.mubr.msk.f32.mxu1 %vm19125_vm5, %v32345_v41 }
 0x517   : > { %25813 = vmatmul.mubr.msk.f32.gmra.mrb[98].mxu1 %vm19125_vm5, %v32349_v48 }
 0x518   : > { %25815 = vmatprep.mubr.msk.f32.mxu1 %vm19125_vm5, %v32353_v55 }
 0x51b   : > { %25816 = vmatmul.mubr.msk.f32.gmra.mrb[100].mxu1 %vm19125_vm5, %v32357_v24 }
 0x51c   : > { %25818 = vmatprep.mubr.msk.f32.mxu1 %vm19125_vm5, %v32361_v43 }
 0x51f   : > { %25819 = vmatmul.mubr.msk.f32.gmra.mrb[102].mxu1 %vm19125_vm5, %v32365_v32 }
 0x520   : > { %25821 = vmatprep.mubr.msk.f32.mxu1 %vm19125_vm5, %v32369_v5 }
 0x523   : > { %25822 = vmatmul.mubr.msk.f32.gmra.mrb[104].mxu1 %vm19125_vm5, %v32373_v63 }
 0x524   : > { %25824 = vmatprep.mubr.msk.f32.mxu1 %vm19125_vm5, %v32377_v53 }
 0x527   : > { %25825 = vmatmul.mubr.msk.f32.gmra.mrb[106].mxu1 %vm19125_vm5, %v32381_v1 }
 0x528   : > { %25827 = vmatprep.mubr.msk.f32.mxu1 %vm19125_vm5, %v32385_v27 }
 0x52b   : > { %25828 = vmatmul.mubr.msk.f32.gmra.mrb[108].mxu1 %vm19125_vm5, %v32389_v62 }
 0x52c   : > { %25830 = vmatprep.mubr.msk.f32.mxu1 %vm19125_vm5, %v32393_v6 }
 0x52f   : > { %25831 = vmatmul.mubr.msk.f32.gmra.mrb[110].mxu1 %vm19125_vm5, %v32397_v52 }
 0x530   : > { %25833 = vmatprep.mubr.msk.f32.mxu1 %vm19125_vm5, %v32401_v33 }
 0x533   : > { %25834 = vmatmul.mubr.msk.f32.gmra.mrb[112].mxu1 %vm19125_vm5, %v32405_v59 }
 0x534   : > { %25836 = vmatprep.mubr.msk.f32.mxu1 %vm19125_vm5, %v32409_v61 }
 0x537   : > { %25837 = vmatmul.mubr.msk.f32.gmra.mrb[114].mxu1 %vm19125_vm5, %v32413_v45 }
 0x538   : > { %25839 = vmatprep.mubr.msk.f32.mxu1 %vm19125_vm5, %v32417_v30 }
 0x53b   : > { %25840 = vmatmul.mubr.msk.f32.gmra.mrb[116].mxu1 %vm19125_vm5, %v32421_v47 }
 0x53c   : > { %25842 = vmatprep.mubr.msk.f32.mxu1 %vm19125_vm5, %v32425_v54 }
 0x53f   : > { %25843 = vmatmul.mubr.msk.f32.gmra.mrb[118].mxu1 %vm19125_vm5, %v32429_v26 }
 0x540   : > { %25845 = vmatprep.mubr.msk.f32.mxu1 %vm19125_vm5, %v32433_v35 }
 0x543   : > { %25846 = vmatmul.mubr.msk.f32.gmra.mrb[120].mxu1 %vm19125_vm5, %v32437_v22 }
 0x544   : > { %25848 = vmatprep.mubr.msk.f32.mxu1 %vm19125_vm5, %v32441_v4 }
 0x547   : > { %25849 = vmatmul.mubr.msk.f32.gmra.mrb[122].mxu1 %vm19125_vm5, %v32445_v50 }
 0x548   : > { %25851 = vmatprep.mubr.msk.f32.mxu1 %vm19125_vm5, %v32449_v37 }
 0x54b   : > { %25852 = vmatmul.mubr.msk.f32.gmra.mrb[124].mxu1 %vm19125_vm5, %v32453_v58 }
 0x54c   : > { %25858 = vmatprep.mubr.msk.f32.mxu1 %vm19125_vm5, %v19892_v12  ;;  %v32509_v12 = vld [vmem:[#allocation2 + $0x92] sm:$0xff] }
 0x54f   : > { %25859 = vmatmul.mubr.msk.f32.vlgmr.msra.gmra.mrb[94].mxu1 %vm19125_vm5, %v19893_v23  ;;  %v32521_v23 = vld [vmem:[#allocation2 + $0xb2] sm:$0xff] }
 0x550   : > { %26269 = vmatpush3.bf16.msra.mxu1 %v32332_v51  ;;  %25861 = vmatprep.mubr.msk.f32.mxu1 %vm19125_vm5, %v32467_v28  ;;  %v32505_v51 = vld [vmem:[#allocation2 + $0x82] sm:$0xff]  ;;  %33555 = vst [vmem:[#allocation53_spill] sm:$0xff] %v32521_v23 }
 0x551   : > { %26271 = vmatprep.subr.bf16.mxu1 %v32464_v13 }
 0x553   : > { %25862 = vmatmul.mubr.msk.f32.gmra.mrb[96].mxu1 %vm19125_vm5, %v32473_v7 }
 0x554   : > { %25864 = vmatprep.mubr.msk.f32.mxu1 %vm19125_vm5, %v32477_v8 }
 0x557   : > { %25865 = vmatmul.mubr.msk.f32.gmra.mrb[98].mxu1 %vm19125_vm5, %v32481_v18 }
 0x558   : > { %25867 = vmatprep.mubr.msk.f32.mxu1 %vm19125_vm5, %v32485_v39 }
 0x55b   : > { %25868 = vmatmul.mubr.msk.f32.gmra.mrb[100].mxu1 %vm19125_vm5, %v32489_v10 }
 0x55c   : > { %25870 = vmatprep.mubr.msk.f32.mxu1 %vm19125_vm5, %v32493_v16 }
 0x55f   : > { %25871 = vmatmul.mubr.msk.f32.gmra.mrb[102].mxu1 %vm19125_vm5, %v32497_v44 }
 0x560   : > { %25873 = vmatprep.mubr.msk.f32.mxu1 %vm19125_vm5, %v32501_v15 }
 0x563   : > { %25874 = vmatmul.mubr.msk.f32.gmra.mrb[104].mxu1 %vm19125_vm5, %v32505_v51 }
 0x564   : > { %25876 = vmatprep.mubr.msk.f32.mxu1 %vm19125_vm5, %v32509_v12 }
 0x567   : > { %25877 = vmatmul.mubr.msk.f32.gmra.mrb[106].mxu1 %vm19125_vm5, %v32513_v60 }
 0x568   : > { %25879 = vmatprep.mubr.msk.f32.mxu1 %vm19125_vm5, %v32517_v38  ;;  %v32537_v38 = vld [vmem:[#allocation2 + $0xe2] sm:$0xff] }
 0x569   : > { %33559 = vst [vmem:[#allocation56_spill] sm:$0xff] %v32537_v38 }
 0x56b   : > { %25880 = vmatmul.mubr.msk.f32.gmra.mrb[108].mxu1 %vm19125_vm5, %v32521_v23  ;;  %v32541_v23 = vld [vmem:[#allocation2 + $0xf2] sm:$0xff] }
 0x56c   : > { %25882 = vmatprep.mubr.msk.f32.mxu1 %vm19125_vm5, %v32525_v36  ;;  %33560 = vst [vmem:[#allocation57_spill] sm:$0xff] %v32541_v23  ;;  %v32545_v36 = vld [vmem:[#allocation2 + $0xfa] sm:$0xff] }
 0x56d   : > { %33561 = vst [vmem:[#allocation59_spill] sm:$0xff] %v32545_v36 }
 0x56f   : > { %25883 = vmatmul.mubr.msk.f32.gmra.mrb[110].mxu1 %vm19125_vm5, %v32529_v17  ;;  %v32549_v17 = vld [vmem:[#allocation2 + $0x10a] sm:$0xff] }
 0x570   : > { %25885 = vmatprep.mubr.msk.f32.mxu1 %vm19125_vm5, %v32533_v11  ;;  %33562 = vst [vmem:[#allocation60_spill] sm:$0xff] %v32549_v17  ;;  %v32553_v11 = vld [vmem:[#allocation2 + $0x112] sm:$0xff] }
 0x571   : > { %33563 = vst [vmem:[#allocation62_spill] sm:$0xff] %v32553_v11 }
 0x573   : > { %25886 = vmatmul.mubr.msk.f32.gmra.mrb[112].mxu1 %vm19125_vm5, %v32537_v38  ;;  %v32557_v38 = vld [vmem:[#allocation2 + $0x122] sm:$0xff] }
 0x574   : > { %25888 = vmatprep.mubr.msk.f32.mxu1 %vm19125_vm5, %v32541_v23  ;;  %33564 = vst [vmem:[#allocation63_spill] sm:$0xff] %v32557_v38  ;;  %v32561_v23 = vld [vmem:[#allocation2 + $0x12a] sm:$0xff] }
 0x575   : > { %33565 = vst [vmem:[#allocation67_spill] sm:$0xff] %v32561_v23 }
 0x577   : > { %25889 = vmatmul.mubr.msk.f32.gmra.mrb[114].mxu1 %vm19125_vm5, %v32545_v36  ;;  %v32565_v36 = vld [vmem:[#allocation2 + $0x13a] sm:$0xff] }
 0x578   : > { %25891 = vmatprep.mubr.msk.f32.mxu1 %vm19125_vm5, %v32549_v17  ;;  %33566 = vst [vmem:[#allocation69_spill] sm:$0xff] %v32565_v36  ;;  %v32569_v17 = vld [vmem:[#allocation2 + $0x142] sm:$0xff] }
 0x579   : > { %33567 = vst [vmem:[#allocation70_spill] sm:$0xff] %v32569_v17 }
 0x57b   : > { %25892 = vmatmul.mubr.msk.f32.gmra.mrb[116].mxu1 %vm19125_vm5, %v32553_v11  ;;  %v32573_v11 = vld [vmem:[#allocation2 + $0x152] sm:$0xff] }
 0x57c   : > { %25894 = vmatprep.mubr.msk.f32.mxu1 %vm19125_vm5, %v32557_v38  ;;  %33568 = vst [vmem:[#allocation71_spill] sm:$0xff] %v32573_v11  ;;  %v32577_v38 = vld [vmem:[#allocation2 + $0x15a] sm:$0xff] }
 0x57d   : > { %33569 = vst [vmem:[#allocation7_spill] sm:$0xff] %v32577_v38 }
 0x57f   : > { %25895 = vmatmul.mubr.msk.f32.gmra.mrb[118].mxu1 %vm19125_vm5, %v32561_v23  ;;  %v32581_v23 = vld [vmem:[#allocation2 + $0x16a] sm:$0xff] }
 0x580   : > { %25897 = vmatprep.mubr.msk.f32.mxu1 %vm19125_vm5, %v32565_v36  ;;  %v32585_v36 = vld [vmem:[#allocation2 + $0x172] sm:$0xff] }
 0x581   : > { %33570 = vst [vmem:[#allocation37_spill] sm:$0xff] %v32585_v36 }
 0x583   : > { %25898 = vmatmul.mubr.msk.f32.gmra.mrb[120].mxu1 %vm19125_vm5, %v32569_v17  ;;  %v23772_v17 = vld [vmem:[%s33114_s2 + $0x50] sm:$0xff] }
 0x584   : > { %25900 = vmatprep.mubr.msk.f32.mxu1 %vm19125_vm5, %v32573_v11  ;;  %v23773_v11 = vld [vmem:[%s33114_s2 + $0x58] sm:$0xff] }
 0x587   : > { %25901 = vmatmul.mubr.msk.f32.gmra.mrb[122].mxu1 %vm19125_vm5, %v32577_v38  ;;  %v26274_v38 = vpack.c.bf16 %v23773_v11, %v23772_v17  ;;  %v32656_v11 = vld [vmem:[#allocation2 + $0x180] sm:$0xff]  ;;  %v32660_v17 = vld [vmem:[#allocation2 + $0x188] sm:$0xff] }
 0x588   : > { %25903 = vmatprep.mubr.msk.f32.mxu1 %vm19125_vm5, %v32581_v23  ;;  %33571 = vst [vmem:[#allocation43_spill] sm:$0xff] %v32656_v11  ;;  %33572 = vst [vmem:[#allocation31_spill] sm:$0xff] %v32660_v17 }
 0x58b   : > { %25904 = vmatmul.mubr.msk.f32.gmra.mrb[124].mxu1 %vm19125_vm5, %v32585_v36 }
 0x58c   : > { %25910 = vmatprep.mubr.msk.f32.mxu1 %vm19125_vm5, %v32335_v46  ;;  %v23806_v46 = vld [vmem:[%s33114_s2 + $0x60] sm:$0xff] }
 0x58f   : > { %25911 = vmatmul.mubr.msk.f32.vlgmr.msra.gmra.mrb[94].mxu1 %vm19125_vm5, %v32341_v9  ;;  %v23807_v9 = vld [vmem:[%s33114_s2 + $0x68] sm:$0xff] }
 0x590   : > { %26273 = vmatpush3.bf16.msra.mxu1 %v32464_v13  ;;  %25913 = vmatprep.mubr.msk.f32.mxu1 %vm19125_vm5, %v32345_v41  ;;  %v20669_v13 = vld [vmem:[#allocation2 + $0x19] sm:$0xff] }
 0x591   : > { %26275 = vmatprep.subr.bf16.mxu1 %v26274_v38 }
 0x593   : > { %25914 = vmatmul.mubr.msk.f32.gmra.mrb[96].mxu1 %vm19125_vm5, %v32349_v48 }
 0x594   : > { %25916 = vmatprep.mubr.msk.f32.mxu1 %vm19125_vm5, %v32353_v55 }
 0x597   : > { %25917 = vmatmul.mubr.msk.f32.gmra.mrb[98].mxu1 %vm19125_vm5, %v32357_v24 }
 0x598   : > { %25919 = vmatprep.mubr.msk.f32.mxu1 %vm19125_vm5, %v32361_v43 }
 0x59b   : > { %25920 = vmatmul.mubr.msk.f32.gmra.mrb[100].mxu1 %vm19125_vm5, %v32365_v32 }
 0x59c   : > { %25922 = vmatprep.mubr.msk.f32.mxu1 %vm19125_vm5, %v32369_v5 }
 0x59f   : > { %25923 = vmatmul.mubr.msk.f32.gmra.mrb[102].mxu1 %vm19125_vm5, %v32373_v63 }
 0x5a0   : > { %25925 = vmatprep.mubr.msk.f32.mxu1 %vm19125_vm5, %v32377_v53 }
 0x5a3   : > { %25926 = vmatmul.mubr.msk.f32.gmra.mrb[104].mxu1 %vm19125_vm5, %v32381_v1 }
 0x5a4   : > { %25928 = vmatprep.mubr.msk.f32.mxu1 %vm19125_vm5, %v32385_v27 }
 0x5a7   : > { %25929 = vmatmul.mubr.msk.f32.gmra.mrb[106].mxu1 %vm19125_vm5, %v32389_v62 }
 0x5a8   : > { %25931 = vmatprep.mubr.msk.f32.mxu1 %vm19125_vm5, %v32393_v6 }
 0x5ab   : > { %25932 = vmatmul.mubr.msk.f32.gmra.mrb[108].mxu1 %vm19125_vm5, %v32397_v52 }
 0x5ac   : > { %25934 = vmatprep.mubr.msk.f32.mxu1 %vm19125_vm5, %v32401_v33 }
 0x5af   : > { %25935 = vmatmul.mubr.msk.f32.gmra.mrb[110].mxu1 %vm19125_vm5, %v32405_v59 }
 0x5b0   : > { %25937 = vmatprep.mubr.msk.f32.mxu1 %vm19125_vm5, %v32409_v61 }
 0x5b3   : > { %25938 = vmatmul.mubr.msk.f32.gmra.mrb[112].mxu1 %vm19125_vm5, %v32413_v45 }
 0x5b4   : > { %25940 = vmatprep.mubr.msk.f32.mxu1 %vm19125_vm5, %v32417_v30 }
 0x5b7   : > { %25941 = vmatmul.mubr.msk.f32.gmra.mrb[114].mxu1 %vm19125_vm5, %v32421_v47 }
 0x5b8   : > { %25943 = vmatprep.mubr.msk.f32.mxu1 %vm19125_vm5, %v32425_v54 }
 0x5bb   : > { %25944 = vmatmul.mubr.msk.f32.gmra.mrb[116].mxu1 %vm19125_vm5, %v32429_v26 }
 0x5bc   : > { %25946 = vmatprep.mubr.msk.f32.mxu1 %vm19125_vm5, %v32433_v35 }
 0x5bf   : > { %25947 = vmatmul.mubr.msk.f32.gmra.mrb[118].mxu1 %vm19125_vm5, %v32437_v22 }
 0x5c0   : > { %25949 = vmatprep.mubr.msk.f32.mxu1 %vm19125_vm5, %v32441_v4 }
 0x5c3   : > { %25950 = vmatmul.mubr.msk.f32.gmra.mrb[120].mxu1 %vm19125_vm5, %v32445_v50  ;;  %v32676_v50 = vld [vmem:[#allocation2 + $0x39] sm:$0xff] }
 0x5c4   : > { %25952 = vmatprep.mubr.msk.f32.mxu1 %vm19125_vm5, %v32449_v37  ;;  %v20670_v37 = vld [vmem:[#allocation2 + $0x21] sm:$0xff] }
 0x5c7   : > { %25953 = vmatmul.mubr.msk.f32.gmra.mrb[122].mxu1 %vm19125_vm5, %v32453_v58  ;;  %v26278_v58 = vpack.c.bf16 %v23807_v9, %v23806_v46  ;;  %v32684_v46 = vld [vmem:[#allocation2 + $0x51] sm:$0xff]  ;;  %v32696_v9 = vld [vmem:[#allocation2 + $0x79] sm:$0xff] }
 0x5c8   : > { %25955 = vmatprep.mubr.msk.f32.mxu1 %vm19125_vm5, %v32656_v11  ;;  %v32672_v11 = vld [vmem:[#allocation2 + $0x31] sm:$0xff]  ;;  %33574 = vst [vmem:[#allocation12_spill] sm:$0xff] %v32684_v46 }
 0x5cb   : > { %25956 = vmatmul.mubr.msk.f32.gmra.mrb[124].mxu1 %vm19125_vm5, %v32660_v17  ;;  %v32680_v17 = vld [vmem:[#allocation2 + $0x49] sm:$0xff] }
 0x5cc   : > { %25962 = vmatprep.mubr.msk.f32.mxu1 %vm19125_vm5, %v20669_v13  ;;  %33573 = vst [vmem:[#allocation21_spill] sm:$0xff] %v32680_v17  ;;  %v32700_v13 = vld [vmem:[#allocation2 + $0x81] sm:$0xff] }
 0x5cf   : > { %25963 = vmatmul.mubr.msk.f32.vlgmr.msra.gmra.mrb[94].mxu1 %vm19125_vm5, %v20670_v37  ;;  %v32688_v37 = vld [vmem:[#allocation2 + $0x61] sm:$0xff] }
 0x5d0   : > { %26277 = vmatpush3.bf16.msra.mxu1 %v26274_v38  ;;  %25965 = vmatprep.mubr.msk.f32.mxu1 %vm19125_vm5, %v32672_v11  ;;  %33575 = vst [vmem:[#allocation20_spill] sm:$0xff] %v32688_v37  ;;  %v32692_v38 = vld [vmem:[#allocation2 + $0x69] sm:$0xff] }
 0x5d1   : > { %26279 = vmatprep.subr.bf16.mxu1 %v26278_v58  ;;  %33576 = vst [vmem:[#allocation6_spill] sm:$0xff] %v32692_v38 }
 0x5d3   : > { %25966 = vmatmul.mubr.msk.f32.gmra.mrb[96].mxu1 %vm19125_vm5, %v32676_v50 }
 0x5d4   : > { %25968 = vmatprep.mubr.msk.f32.mxu1 %vm19125_vm5, %v32680_v17  ;;  %v27505_v17 = vld [vmem:[#allocation2 + $0xb1] sm:$0xff] }
 0x5d7   : > { %25969 = vmatmul.mubr.msk.f32.gmra.mrb[98].mxu1 %vm19125_vm5, %v32684_v46  ;;  %v32704_v46 = vld [vmem:[#allocation2 + $0x91] sm:$0xff] }
 0x5d8   : > { %25971 = vmatprep.mubr.msk.f32.mxu1 %vm19125_vm5, %v32688_v37  ;;  %v32708_v37 = vld [vmem:[#allocation2 + $0x99] sm:$0xff] }
 0x5db   : > { %25972 = vmatmul.mubr.msk.f32.gmra.mrb[100].mxu1 %vm19125_vm5, %v32692_v38  ;;  %v27504_v38 = vld [vmem:[#allocation2 + $0xa9] sm:$0xff] }
 0x5dc   : > { %25974 = vmatprep.mubr.msk.f32.mxu1 %vm19125_vm5, %v32696_v9 }
 0x5df   : > { %25975 = vmatmul.mubr.msk.f32.gmra.mrb[102].mxu1 %vm19125_vm5, %v32700_v13 }
 0x5e0   : > { %25977 = vmatprep.mubr.msk.f32.mxu1 %vm19125_vm5, %v32704_v46 }
 0x5e3   : > { %25978 = vmatmul.mubr.msk.f32.gmra.mrb[104].mxu1 %vm19125_vm5, %v32708_v37 }
 0x5e4   : > { %25980 = vmatprep.mubr.msk.f32.mxu1 %vm19125_vm5, %v27504_v38  ;;  %v33584_v38 = vld [vmem:[#allocation59_spill] sm:$0xff] }
 0x5e7   : > { %25981 = vmatmul.mubr.msk.f32.gmra.mrb[106].mxu1 %vm19125_vm5, %v27505_v17  ;;  %v33583_v17 = vld [vmem:[#allocation57_spill] sm:$0xff] }
 0x5e8   : > { %25983 = vmatprep.mubr.msk.f32.mxu1 %vm19125_vm5, %v32136_v25  ;;  %v32746_v25 = vld [vmem:[#allocation2 + $0x181] sm:$0xff] }
 0x5eb   : > { %25984 = vmatmul.mubr.msk.f32.gmra.mrb[108].mxu1 %vm19125_vm5, %v32138_v2  ;;  %v32750_v2 = vld [vmem:[#allocation2 + $0x189] sm:$0xff] }
 0x5ec   : > { %25986 = vmatprep.mubr.msk.f32.mxu1 %vm19125_vm5, %v32163_v34  ;;  %v23840_v34 = vld [vmem:[%s33114_s2 + $0x70] sm:$0xff] }
 0x5ef   : > { %25987 = vmatmul.mubr.msk.f32.gmra.mrb[110].mxu1 %vm19125_vm5, %v32165_v57  ;;  %v23841_v57 = vld [vmem:[%s33114_s2 + $0x78] sm:$0xff] }
 0x5f0   : > { %25989 = vmatprep.mubr.msk.f32.mxu1 %vm19125_vm5, %v32190_v20  ;;  %v26282_v20 = vpack.c.bf16 %v23841_v57, %v23840_v34  ;;  %v33585_v34 = vld [vmem:[#allocation60_spill] sm:$0xff]  ;;  %v33586_v57 = vld [vmem:[#allocation62_spill] sm:$0xff] }
 0x5f3   : > { %25990 = vmatmul.mubr.msk.f32.gmra.mrb[112].mxu1 %vm19125_vm5, %v32192_v29  ;;  %v33577_v29 = vld [vmem:[#allocation72_spill] sm:$0xff] }
 0x5f4   : > { %25992 = vmatprep.mubr.msk.f32.mxu1 %vm19125_vm5, %v32212_v56  ;;  %v33578_v56 = vld [vmem:[#allocation53_spill] sm:$0xff] }
 0x5f7   : > { %25993 = vmatmul.mubr.msk.f32.gmra.mrb[114].mxu1 %vm19125_vm5, %v32214_v40  ;;  %v33579_v40 = vld [vmem:[#allocation51_spill] sm:$0xff] }
 0x5f8   : > { %25995 = vmatprep.mubr.msk.f32.mxu1 %vm19125_vm5, %v32244_v42 }
 0x5fb   : > { %25996 = vmatmul.mubr.msk.f32.gmra.mrb[116].mxu1 %vm19125_vm5, %v32246_v0 }
 0x5fc   : > { %25998 = vmatprep.mubr.msk.f32.mxu1 %vm19125_vm5, %v32263_v31 }
 0x5ff   : > { %25999 = vmatmul.mubr.msk.f32.gmra.mrb[118].mxu1 %vm19125_vm5, %v32265_v21 }
 0x600   : > { %26001 = vmatprep.mubr.msk.f32.mxu1 %vm19125_vm5, %v32296_v14 }
 0x603   : > { %26002 = vmatmul.mubr.msk.f32.gmra.mrb[120].mxu1 %vm19125_vm5, %v32298_v19 }
 0x604   : > { %26004 = vmatprep.mubr.msk.f32.mxu1 %vm19125_vm5, %v32316_v3 }
 0x607   : > { %26005 = vmatmul.mubr.msk.f32.gmra.mrb[122].mxu1 %vm19125_vm5, %v32318_v49 }
 0x608   : > { %26007 = vmatprep.mubr.msk.f32.mxu1 %vm19125_vm5, %v32746_v25 }
 0x60b   : > { %26008 = vmatmul.mubr.msk.f32.gmra.mrb[124].mxu1 %vm19125_vm5, %v32750_v2 }
 0x60c   : > { %26014 = vmatprep.mubr.msk.f32.mxu1 %vm19125_vm5, %v32467_v28  ;;  %v33581_v28 = vld [vmem:[#allocation55_spill] sm:$0xff] }
 0x60f   : > { %26015 = vmatmul.mubr.msk.f32.vlgmr.msra.gmra.mrb[94].mxu1 %vm19125_vm5, %v32473_v7  ;;  %v33582_v7 = vld [vmem:[#allocation56_spill] sm:$0xff] }
 0x610   : > { %26281 = vmatpush3.bf16.msra.mxu1 %v26278_v58  ;;  %26017 = vmatprep.mubr.msk.f32.mxu1 %vm19125_vm5, %v32477_v8  ;;  %v33580_v58 = vld [vmem:[#allocation54_spill] sm:$0xff] }
 0x611   : > { %26283 = vmatprep.subr.bf16.mxu1 %v26282_v20 }
 0x613   : > { %26018 = vmatmul.mubr.msk.f32.gmra.mrb[96].mxu1 %vm19125_vm5, %v32481_v18 }
 0x614   : > { %26020 = vmatprep.mubr.msk.f32.mxu1 %vm19125_vm5, %v32485_v39 }
 0x617   : > { %26021 = vmatmul.mubr.msk.f32.gmra.mrb[98].mxu1 %vm19125_vm5, %v32489_v10 }
 0x618   : > { %26023 = vmatprep.mubr.msk.f32.mxu1 %vm19125_vm5, %v32493_v16 }
 0x61b   : > { %26024 = vmatmul.mubr.msk.f32.gmra.mrb[100].mxu1 %vm19125_vm5, %v32497_v44 }
 0x61c   : > { %26026 = vmatprep.mubr.msk.f32.mxu1 %vm19125_vm5, %v32501_v15 }
 0x61f   : > { %26027 = vmatmul.mubr.msk.f32.gmra.mrb[102].mxu1 %vm19125_vm5, %v32505_v51 }
 0x620   : > { %26029 = vmatprep.mubr.msk.f32.mxu1 %vm19125_vm5, %v32509_v12 }
 0x623   : > { %26030 = vmatmul.mubr.msk.f32.gmra.mrb[104].mxu1 %vm19125_vm5, %v32513_v60 }
 0x624   : > { %26032 = vmatprep.mubr.msk.f32.mxu1 %vm19125_vm5, %v33577_v29 }
 0x627   : > { %26033 = vmatmul.mubr.msk.f32.gmra.mrb[106].mxu1 %vm19125_vm5, %v33578_v56 }
 0x628   : > { %26035 = vmatprep.mubr.msk.f32.mxu1 %vm19125_vm5, %v33579_v40  ;;  %v33587_v40 = vld [vmem:[#allocation63_spill] sm:$0xff] }
 0x62b   : > { %26036 = vmatmul.mubr.msk.f32.gmra.mrb[108].mxu1 %vm19125_vm5, %v33580_v58  ;;  %v33588_v58 = vld [vmem:[#allocation67_spill] sm:$0xff] }
 0x62c   : > { %26038 = vmatprep.mubr.msk.f32.mxu1 %vm19125_vm5, %v33581_v28  ;;  %v33589_v28 = vld [vmem:[#allocation69_spill] sm:$0xff] }
 0x62f   : > { %26039 = vmatmul.mubr.msk.f32.gmra.mrb[110].mxu1 %vm19125_vm5, %v33582_v7  ;;  %v33590_v7 = vld [vmem:[#allocation70_spill] sm:$0xff] }
 0x630   : > { %26041 = vmatprep.mubr.msk.f32.mxu1 %vm19125_vm5, %v33583_v17  ;;  %v33591_v17 = vld [vmem:[#allocation71_spill] sm:$0xff] }
 0x633   : > { %26042 = vmatmul.mubr.msk.f32.gmra.mrb[112].mxu1 %vm19125_vm5, %v33584_v38  ;;  %v33592_v38 = vld [vmem:[#allocation7_spill] sm:$0xff] }
 0x634   : > { %26044 = vmatprep.mubr.msk.f32.mxu1 %vm19125_vm5, %v33585_v34 }
 0x637   : > { %26045 = vmatmul.mubr.msk.f32.gmra.mrb[114].mxu1 %vm19125_vm5, %v33586_v57 }
 0x638   : > { %26047 = vmatprep.mubr.msk.f32.mxu1 %vm19125_vm5, %v33587_v40  ;;  %v32820_v40 = vld [vmem:[#allocation2 + $0x182] sm:$0xff] }
 0x63b   : > { %26048 = vmatmul.mubr.msk.f32.gmra.mrb[116].mxu1 %vm19125_vm5, %v33588_v58 }
 0x63c   : > { %26050 = vmatprep.mubr.msk.f32.mxu1 %vm19125_vm5, %v33589_v28  ;;  %v32824_v28 = vld [vmem:[#allocation2 + $0x18a] sm:$0xff] }
 0x63f   : > { %26051 = vmatmul.mubr.msk.f32.gmra.mrb[118].mxu1 %vm19125_vm5, %v33590_v7 }
 0x640   : > { %26053 = vmatprep.mubr.msk.f32.mxu1 %vm19125_vm5, %v33591_v17  ;;  %v23874_v17 = vld [vmem:[%s33114_s2 + $0x80] sm:$0xff] }
 0x643   : > { %26054 = vmatmul.mubr.msk.f32.gmra.mrb[120].mxu1 %vm19125_vm5, %v33592_v38  ;;  %v23875_v38 = vld [vmem:[%s33114_s2 + $0x88] sm:$0xff] }
 0x644   : > { %26056 = vmatprep.mubr.msk.f32.mxu1 %vm19125_vm5, %v32581_v23 }
 0x647   : > { %26057 = vmatmul.mubr.msk.f32.gmra.mrb[122].mxu1 %vm19125_vm5, %v32585_v36  ;;  %v26286_v36 = vpack.c.bf16 %v23875_v38, %v23874_v17  ;;  %v33602_v17 = vld [vmem:[#allocation12_spill] sm:$0xff] }
 0x648   : > { %26059 = vmatprep.mubr.msk.f32.mxu1 %vm19125_vm5, %v32820_v40  ;;  %v33603_v38 = vld [vmem:[#allocation20_spill] sm:$0xff] }
 0x64b   : > { %26060 = vmatmul.mubr.msk.f32.gmra.mrb[124].mxu1 %vm19125_vm5, %v32824_v28 }
 0x64c   : > { %26066 = vmatprep.mubr.msk.f32.mxu1 %vm19125_vm5, %v32345_v41  ;;  %v33593_v41 = vld [vmem:[#allocation65_spill] sm:$0xff] }
 0x64f   : > { %26067 = vmatmul.mubr.msk.f32.vlgmr.msra.gmra.mrb[94].mxu1 %vm19125_vm5, %v32349_v48  ;;  %v33594_v48 = vld [vmem:[#allocation52_spill] sm:$0xff] }
 0x650   : > { %26285 = vmatpush3.bf16.msra.mxu1 %v26282_v20  ;;  %26069 = vmatprep.mubr.msk.f32.mxu1 %vm19125_vm5, %v32353_v55  ;;  %v23540_v55 = vld [vmem:[%s27678_s5 + $0x1d2] sm:$0xff]  ;;  %v33601_v20 = vld [vmem:[#allocation21_spill] sm:$0xff] }
 0x651   : > { %26287 = vmatprep.subr.bf16.mxu1 %v26286_v36 }
 0x653   : > { %26070 = vmatmul.mubr.msk.f32.gmra.mrb[96].mxu1 %vm19125_vm5, %v32357_v24  ;;  %v16376_v24 = vcombine.high %v23540_v55, %v23540_v55 }
 0x654   : > { %26072 = vmatprep.mubr.msk.f32.mxu1 %vm19125_vm5, %v32361_v43  ;;  %v33595_v43 = vld [vmem:[#allocation9_spill] sm:$0xff] }
 0x657   : > { %26073 = vmatmul.mubr.msk.f32.gmra.mrb[98].mxu1 %vm19125_vm5, %v32365_v32  ;;  %v16383_v32 = vrot.slane %v23540_v55, %v33595_v43  ;;  %v21852_v55 = vld [vmem:[#allocation2 + $0x109] sm:$0xff] }
 0x658   : > { %26075 = vmatprep.mubr.msk.f32.mxu1 %vm19125_vm5, %v32369_v5  ;;  %v33596_v5 = vld [vmem:[#allocation48_spill] sm:$0xff] }
 0x65b   : > { %26076 = vmatmul.mubr.msk.f32.gmra.mrb[100].mxu1 %vm19125_vm5, %v32373_v63  ;;  %v33597_v63 = vld [vmem:[#allocation66_spill] sm:$0xff] }
 0x65c   : > { %26078 = vmatprep.mubr.msk.f32.mxu1 %vm19125_vm5, %v32377_v53  ;;  %v16375_v53 = vcombine.high %v33597_v63, %v33597_v63 }
 0x65f   : > { %26079 = vmatmul.mubr.msk.f32.gmra.mrb[102].mxu1 %vm19125_vm5, %v32381_v1  ;;  %v16390_v1 = vrot.slane %v16376_v24, %v33595_v43  ;;  %v21853_v24 = vld [vmem:[#allocation2 + $0x111] sm:$0xff] }
 0x660   : > { %26081 = vmatprep.mubr.msk.f32.mxu1 %vm19125_vm5, %v32385_v27  ;;  %v16391_v27 = vcombine.high %v16383_v32, %v16383_v32 }
 0x663   : > { %26082 = vmatmul.mubr.msk.f32.gmra.mrb[104].mxu1 %vm19125_vm5, %v32389_v62  ;;  %v33598_v62 = vld [vmem:[#allocation43_spill] sm:$0xff] }
 0x664   : > { %26084 = vmatprep.mubr.msk.f32.mxu1 %vm19125_vm5, %v32393_v6  ;;  %v21476_v6 = vld [vmem:[#allocation2 + $0x198] sm:$0xff] }
 0x667   : > { %26085 = vmatmul.mubr.msk.f32.gmra.mrb[106].mxu1 %vm19125_vm5, %v32397_v52  ;;  %v17066_v52 = vcombine.low %v16375_v53, %v16383_v32 }
 0x668   : > { %26087 = vmatprep.mubr.msk.f32.mxu1 %vm19125_vm5, %v32401_v33  ;;  %v17067_v33 = vcombine.low %v16391_v27, %v16390_v1 }
 0x66b   : > { %26088 = vmatmul.mubr.msk.f32.gmra.mrb[108].mxu1 %vm19125_vm5, %v32405_v59  ;;  %v33599_v59 = vld [vmem:[#allocation31_spill] sm:$0xff] }
 0x66c   : > { %26090 = vmatprep.mubr.msk.f32.mxu1 %vm19125_vm5, %v32409_v61  ;;  %v17074_v61 = vrot.slane %v17066_v52, %v33595_v43 }
 0x66f   : > { %26091 = vmatmul.mubr.msk.f32.gmra.mrb[110].mxu1 %vm19125_vm5, %v32413_v45  ;;  %v17081_v45 = vrot.slane %v17067_v33, %v33595_v43 }
 0x670   : > { %26093 = vmatprep.mubr.msk.f32.mxu1 %vm19125_vm5, %v32417_v30  ;;  %v21477_v30 = vld [vmem:[#allocation2 + $0x1a0] sm:$0xff] }
 0x673   : > { %26094 = vmatmul.mubr.msk.f32.gmra.mrb[112].mxu1 %vm19125_vm5, %v32421_v47  ;;  %v17082_v47 = vcombine.low %v17074_v61, %v17081_v45 }
 0x674   : > { %26096 = vmatprep.mubr.msk.f32.mxu1 %vm19125_vm5, %v32425_v54  ;;  %v16392_v54 = vcombine.high %v16390_v1, %v16390_v1 }
 0x675   : > { %25745 = vmatmul.mubr.msk.f32.gmra.mrb[122].mxu0 %vm2554_vm4, %v17082_v47 }
 0x677   : > { %26097 = vmatmul.mubr.msk.f32.gmra.mrb[114].mxu1 %vm19125_vm5, %v32429_v26  ;;  %v23559_v26 = vld.sshfl [vmem:[%s27678_s5 + $0x1da] sm:$0x3 pattern:$0x76325410]  ;;  %s161_s5 = sand.u32 1, %s27560_s13  }
 0x678   : > { %26099 = vmatprep.mubr.msk.f32.mxu1 %vm19125_vm5, %v32433_v35  ;;  %v17083_v35 = vcombine.low %v16392_v54, %v23559_v26  ;;  %s22722_s6 = sshll.u32 %s161_s5, 8  ;;  %s33071_s16 = scalar_lea.sflag [#allocation4], %s161_s5 }
 0x679   : > { %s33026_s7 = scalar_lea.vmem [#allocation3], %s22722_s6 }
 0x67a   : > { %s22656_s9 = sshll.u32 %s33026_s7, 4  ;;  %s33065_s9 = int_to_ptr.vmem [resolvable:$true] %s22656_s9 }
 0x67b   : > { %26100 = vmatmul.mubr.msk.f32.gmra.mrb[116].mxu1 %vm19125_vm5, %v32437_v22  ;;  %v33600_v22 = vmov 0.0   ;;  %s27506_s19 = scalar_lea.vmem %s33065_s9, 4096  ;;  %p27513_p0 = scmp.lt.s32.totalorder %s33065_s9, %s27511_s24 }
 0x67c   : > { %26102 = vmatprep.mubr.msk.f32.mxu1 %vm19125_vm5, %v32441_v4  ;;  %25747 = vmatprep.mubr.msk.f32.mxu0 %vm27572_vm3, %v33600_v22  ;;  %v17090_v4 = vrot.slane %v17083_v35, %v33595_v43  ;;  %p27507_p11 = scmp.ne.s32.totalorder %s33065_s9, %s27506_s19  ;;  %p27514_p1 = scmp.lt.s32.totalorder %s27512_s25, %s27506_s19 }
 0x67e   : > { %25748 = vmatmul.mubr.msk.f32.gmra.mrb[124].mxu0 %vm2554_vm4, %v17090_v4  ;;  %p27508_p12 = pnand %p27507_p11, %p27636_p5  ;;  %p27515_p2 = por %p27514_p1, %p27513_p0 }
 0x67f   : > { %26103 = vmatmul.mubr.msk.f32.gmra.mrb[118].mxu1 %vm19125_vm5, %v33593_v41  ;;  %v21846_v41 = vld [vmem:[#allocation2 + $0xc1] sm:$0xff] }
 0x680   : > { %26105 = vmatprep.mubr.msk.f32.mxu1 %vm19125_vm5, %v33594_v48  ;;  %v21847_v48 = vld [vmem:[#allocation2 + $0xc9] sm:$0xff]  ;;  %p27509_p13 = pneg %p27508_p12 }
 0x682   : > { %p27516_p3 = pnand %p27515_p2, %p27509_p13 }
 0x683   : > { %26106 = vmatmul.mubr.msk.f32.gmra.mrb[120].mxu1 %vm19125_vm5, %v33596_v5 }
 0x684   : > { %26108 = vmatprep.mubr.msk.f32.mxu1 %vm19125_vm5, %v33598_v62 }
 0x687   : > { %26109 = vmatmul.mubr.msk.f32.gmra.mrb[122].mxu1 %vm19125_vm5, %v33599_v59 }
 0x688   : > { %26111 = vmatprep.mubr.msk.f32.mxu1 %vm19125_vm5, %v21476_v6 }
 0x68b   : > { %26112 = vmatmul.mubr.msk.f32.gmra.mrb[124].mxu1 %vm19125_vm5, %v21477_v30 }
 0x68c   : > { %26118 = vmatprep.mubr.msk.f32.mxu1 %vm19125_vm5, %v32672_v11  ;;  %v33604_v11 = vld [vmem:[#allocation6_spill] sm:$0xff] }
 0x68f   : > { %26119 = vmatmul.mubr.msk.f32.vlgmr.msra.gmra.mrb[94].mxu1 %vm19125_vm5, %v32676_v50  ;;  %v21845_v50 = vld [vmem:[#allocation2 + $0xb1] sm:$0xff] }
 0x690   : > { %26289 = vmatpush3.bf16.msra.mxu1 %v26286_v36  ;;  %26121 = vmatprep.mubr.msk.f32.mxu1 %vm19125_vm5, %v33601_v20  ;;  %v21844_v36 = vld [vmem:[#allocation2 + $0xa9] sm:$0xff] }
 0x693   : > { %26122 = vmatmul.mubr.msk.f32.gmra.mrb[96].mxu1 %vm19125_vm5, %v33602_v17 }
 0x694   : > { %26124 = vmatprep.mubr.msk.f32.mxu1 %vm19125_vm5, %v33603_v38 }
 0x697   : > { %26125 = vmatmul.mubr.msk.f32.gmra.mrb[98].mxu1 %vm19125_vm5, %v33604_v11 }
 0x698   : > { %26127 = vmatprep.mubr.msk.f32.mxu1 %vm19125_vm5, %v32696_v9  ;;  %v21848_v9 = vld [vmem:[#allocation2 + $0xd9] sm:$0xff] }
 0x69b   : > { %26128 = vmatmul.mubr.msk.f32.gmra.mrb[100].mxu1 %vm19125_vm5, %v32700_v13  ;;  %v21849_v13 = vld [vmem:[#allocation2 + $0xe1] sm:$0xff] }
 0x69c   : > { %26130 = vmatprep.mubr.msk.f32.mxu1 %vm19125_vm5, %v32704_v46  ;;  %v21850_v46 = vld [vmem:[#allocation2 + $0xf1] sm:$0xff] }
 0x69f   : > { %26131 = vmatmul.mubr.msk.f32.gmra.mrb[102].mxu1 %vm19125_vm5, %v32708_v37  ;;  %v21851_v37 = vld [vmem:[#allocation2 + $0xf9] sm:$0xff] }
 0x6a0   : > { %26133 = vmatprep.mubr.msk.f32.mxu1 %vm19125_vm5, %v21844_v36 }
 0x6a3   : > { %26134 = vmatmul.mubr.msk.f32.gmra.mrb[104].mxu1 %vm19125_vm5, %v21845_v50 }
 0x6a4   : > { %26136 = vmatprep.mubr.msk.f32.mxu1 %vm19125_vm5, %v21846_v41 }
 0x6a7   : > { %26137 = vmatmul.mubr.msk.f32.gmra.mrb[106].mxu1 %vm19125_vm5, %v21847_v48 }
 0x6a8   : > { %26139 = vmatprep.mubr.msk.f32.mxu1 %vm19125_vm5, %v21848_v9 }
 0x6ab   : > { %26140 = vmatmul.mubr.msk.f32.gmra.mrb[108].mxu1 %vm19125_vm5, %v21849_v13 }
 0x6ac   : > { %26142 = vmatprep.mubr.msk.f32.mxu1 %vm19125_vm5, %v21850_v46 }
 0x6af   : > { %26143 = vmatmul.mubr.msk.f32.gmra.mrb[110].mxu1 %vm19125_vm5, %v21851_v37 }
 0x6b0   : > { %26145 = vmatprep.mubr.msk.f32.mxu1 %vm19125_vm5, %v21852_v55 }
 0x6b3   : > { %26146 = vmatmul.mubr.msk.f32.gmra.mrb[112].mxu1 %vm19125_vm5, %v21853_v24 }
 0x6b4   : > { %26148 = vmatprep.mubr.msk.f32.mxu1 %vm19125_vm5, %v32244_v42  ;;  %v21864_v42 = vld [vmem:[#allocation2 + $0x199] sm:$0xff] }
 0x6b7   : > { %26149 = vmatmul.mubr.msk.f32.gmra.mrb[114].mxu1 %vm19125_vm5, %v32246_v0  ;;  %v21865_v0 = vld [vmem:[#allocation2 + $0x1a1] sm:$0xff] }
 0x6b8   : > { %26151 = vmatprep.mubr.msk.f32.mxu1 %vm19125_vm5, %v32263_v31  ;;  %v33605_v31 = vld [vmem:[#allocation51_spill] sm:$0xff] }
 0x6bb   : > { %26152 = vmatmul.mubr.msk.f32.gmra.mrb[116].mxu1 %vm19125_vm5, %v32265_v21  ;;  %v33606_v21 = vld [vmem:[#allocation54_spill] sm:$0xff] }
 0x6bc   : > { %26154 = vmatprep.mubr.msk.f32.mxu1 %vm19125_vm5, %v32296_v14  ;;  %v33607_v14 = vld [vmem:[#allocation55_spill] sm:$0xff] }
 0x6bf   : > { %26155 = vmatmul.mubr.msk.f32.gmra.mrb[118].mxu1 %vm19125_vm5, %v32298_v19  ;;  %v33608_v19 = vld [vmem:[#allocation56_spill] sm:$0xff] }
 0x6c0   : > { %26157 = vmatprep.mubr.msk.f32.mxu1 %vm19125_vm5, %v32316_v3  ;;  %v33609_v3 = vld [vmem:[#allocation57_spill] sm:$0xff] }
 0x6c3   : > { %26158 = vmatmul.mubr.msk.f32.gmra.mrb[120].mxu1 %vm19125_vm5, %v32318_v49  ;;  %v33610_v49 = vld [vmem:[#allocation59_spill] sm:$0xff] }
 0x6c4   : > { %26160 = vmatprep.mubr.msk.f32.mxu1 %vm19125_vm5, %v32746_v25 }
 0x6c7   : > { %26161 = vmatmul.mubr.msk.f32.gmra.mrb[122].mxu1 %vm19125_vm5, %v32750_v2 }
 0x6c8   : > { %26163 = vmatprep.mubr.msk.f32.mxu1 %vm19125_vm5, %v21864_v42 }
 0x6cb   : > { %26164 = vmatmul.mubr.msk.f32.gmra.mrb[124].mxu1 %vm19125_vm5, %v21865_v0 }
 0x6cc   : > { %26170 = vmatprep.mubr.msk.f32.mxu1 %vm19125_vm5, %v32477_v8  ;;  %v33611_v8 = vld [vmem:[#allocation63_spill] sm:$0xff] }
 0x6cf   : > { %26171 = vmatmul.mubr.msk.f32.vlgmr.msra.gmra.mrb[94].mxu1 %vm19125_vm5, %v32481_v18  ;;  %v33612_v18 = vld [vmem:[#allocation69_spill] sm:$0xff] }
 0x6d0   : > { %26173 = vmatprep.mubr.msk.f32.mxu1 %vm19125_vm5, %v32485_v39  ;;  %v33613_v39 = vld [vmem:[#allocation71_spill] sm:$0xff] }
 0x6d3   : > { %26174 = vmatmul.mubr.msk.f32.gmra.mrb[96].mxu1 %vm19125_vm5, %v32489_v10  ;;  %v33614_v10 = vld [vmem:[#allocation7_spill] sm:$0xff] }
 0x6d4   : > { %26176 = vmatprep.mubr.msk.f32.mxu1 %vm19125_vm5, %v32493_v16  ;;  %v33615_v16 = vld [vmem:[#allocation37_spill] sm:$0xff] }
 0x6d7   : > { %26177 = vmatmul.mubr.msk.f32.gmra.mrb[98].mxu1 %vm19125_vm5, %v32497_v44  ;;  %v22252_v44 = vld [vmem:[#allocation2 + $0x19a] sm:$0xff] }
 0x6d8   : > { %26179 = vmatprep.mubr.msk.f32.mxu1 %vm19125_vm5, %v32501_v15  ;;  %v22253_v15 = vld [vmem:[#allocation2 + $0x1a2] sm:$0xff] }
 0x6db   : > { %26180 = vmatmul.mubr.msk.f32.gmra.mrb[100].mxu1 %vm19125_vm5, %v32505_v51 }
 0x6dc   : > { %26182 = vmatprep.mubr.msk.f32.mxu1 %vm19125_vm5, %v32509_v12 }
 0x6df   : > { %26183 = vmatmul.mubr.msk.f32.gmra.mrb[102].mxu1 %vm19125_vm5, %v32513_v60 }
 0x6e0   : > { %26185 = vmatprep.mubr.msk.f32.mxu1 %vm19125_vm5, %v33577_v29 }
 0x6e3   : > { %26186 = vmatmul.mubr.msk.f32.gmra.mrb[104].mxu1 %vm19125_vm5, %v33578_v56 }
 0x6e4   : > { %26188 = vmatprep.mubr.msk.f32.mxu1 %vm19125_vm5, %v33605_v31 }
 0x6e7   : > { %26189 = vmatmul.mubr.msk.f32.gmra.mrb[106].mxu1 %vm19125_vm5, %v33606_v21 }
 0x6e8   : > { %26191 = vmatprep.mubr.msk.f32.mxu1 %vm19125_vm5, %v33607_v14 }
 0x6eb   : > { %26192 = vmatmul.mubr.msk.f32.gmra.mrb[108].mxu1 %vm19125_vm5, %v33608_v19 }
 0x6ec   : > { %26194 = vmatprep.mubr.msk.f32.mxu1 %vm19125_vm5, %v33609_v3 }
 0x6ef   : > { %26195 = vmatmul.mubr.msk.f32.gmra.mrb[110].mxu1 %vm19125_vm5, %v33610_v49 }
 0x6f0   : > { %26197 = vmatprep.mubr.msk.f32.mxu1 %vm19125_vm5, %v33585_v34 }
 0x6f3   : > { %26198 = vmatmul.mubr.msk.f32.gmra.mrb[112].mxu1 %vm19125_vm5, %v33586_v57 }
 0x6f4   : > { %26200 = vmatprep.mubr.msk.f32.mxu1 %vm19125_vm5, %v33611_v8 }
 0x6f7   : > { %26201 = vmatmul.mubr.msk.f32.gmra.mrb[114].mxu1 %vm19125_vm5, %v33588_v58 }
 0x6f8   : > { %26203 = vmatprep.mubr.msk.f32.mxu1 %vm19125_vm5, %v33612_v18 }
 0x6fb   : > { %26204 = vmatmul.mubr.msk.f32.gmra.mrb[116].mxu1 %vm19125_vm5, %v33590_v7 }
 0x6fc   : > { %26206 = vmatprep.mubr.msk.f32.mxu1 %vm19125_vm5, %v33613_v39 }
 0x6ff   : > { %26207 = vmatmul.mubr.msk.f32.gmra.mrb[118].mxu1 %vm19125_vm5, %v33614_v10 }
 0x700   : > { %26209 = vmatprep.mubr.msk.f32.mxu1 %vm19125_vm5, %v32581_v23 }
 0x703   : > { %26210 = vmatmul.mubr.msk.f32.gmra.mrb[120].mxu1 %vm19125_vm5, %v33615_v16 }
 0x704   : > { %26212 = vmatprep.mubr.msk.f32.mxu1 %vm19125_vm5, %v32820_v40 }
 0x707   : > { %26213 = vmatmul.mubr.msk.f32.gmra.mrb[122].mxu1 %vm19125_vm5, %v32824_v28 }
 0x708   : > { %26215 = vmatprep.mubr.msk.f32.mxu1 %vm19125_vm5, %v22252_v44 }
 0x70b   : > { %26216 = vmatmul.mubr.msk.f32.gmra.mrb[124].mxu1 %vm19125_vm5, %v22253_v15 }
 0x748   : > { %v17437_v51 = vpop.f32.mrb[122].mxu0 }
 0x749   : > { %v25746_v12 = vpop.f32.mrb[123].mxu0 }
 0x751   : > { %v17442_v60 = vpop.f32.mrb[124].mxu0 }
 0x752   : > { %v25749_v25 = vpop.f32.mrb[125].mxu0 }
 0x7a2   : > { %v26172_v23 = vpop.f32.mrb[94].mxu1 }
 0x7a3   : > { %22611 = vst [vmem:[%s33026_s7 + $0x8] sm:$0xff] %v26172_v23  ;;  %v22419_v2 = vpop.f32.mrb[95].mxu1 }
 0x7a4   : > { %22610 = vst [vmem:[%s33026_s7] sm:$0xff] %v22419_v2 }
 0x7a6   : > { %v26175_v29 = vpop.f32.mrb[96].mxu1 }
 0x7a7   : > { %22613 = vst [vmem:[%s33026_s7 + $0x18] sm:$0xff] %v26175_v29  ;;  %v22429_v56 = vpop.f32.mrb[97].mxu1 }
 0x7a8   : > { %22612 = vst [vmem:[%s33026_s7 + $0x10] sm:$0xff] %v22429_v56 }
 0x7aa   : > { %v26178_v40 = vpop.f32.mrb[98].mxu1 }
 0x7ab   : > { %22615 = vst [vmem:[%s33026_s7 + $0x28] sm:$0xff] %v26178_v40  ;;  %v22439_v58 = vpop.f32.mrb[99].mxu1 }
 0x7ac   : > { %22614 = vst [vmem:[%s33026_s7 + $0x20] sm:$0xff] %v22439_v58 }
 0x7ae   : > { %v26181_v28 = vpop.f32.mrb[100].mxu1 }
 0x7af   : > { %22617 = vst [vmem:[%s33026_s7 + $0x38] sm:$0xff] %v26181_v28  ;;  %v22449_v7 = vpop.f32.mrb[101].mxu1 }
 0x7b0   : > { %22616 = vst [vmem:[%s33026_s7 + $0x30] sm:$0xff] %v22449_v7 }
 0x7b2   : > { %v26184_v34 = vpop.f32.mrb[102].mxu1 }
 0x7b3   : > { %22619 = vst [vmem:[%s33026_s7 + $0x48] sm:$0xff] %v26184_v34  ;;  %v22459_v57 = vpop.f32.mrb[103].mxu1 }
 0x7b4   : > { %22618 = vst [vmem:[%s33026_s7 + $0x40] sm:$0xff] %v22459_v57 }
 0x7b6   : > { %v26187_v43 = vpop.f32.mrb[104].mxu1 }
 0x7b7   : > { %22621 = vst [vmem:[%s33026_s7 + $0x58] sm:$0xff] %v26187_v43  ;;  %v22469_v32 = vpop.f32.mrb[105].mxu1 }
 0x7b8   : > { %22620 = vst [vmem:[%s33026_s7 + $0x50] sm:$0xff] %v22469_v32 }
 0x7ba   : > { %v26190_v5 = vpop.f32.mrb[106].mxu1 }
 0x7bb   : > { %22623 = vst [vmem:[%s33026_s7 + $0x68] sm:$0xff] %v26190_v5  ;;  %v22479_v63 = vpop.f32.mrb[107].mxu1 }
 0x7bc   : > { %22622 = vst [vmem:[%s33026_s7 + $0x60] sm:$0xff] %v22479_v63 }
 0x7be   : > { %v26193_v53 = vpop.f32.mrb[108].mxu1 }
 0x7bf   : > { %22625 = vst [vmem:[%s33026_s7 + $0x78] sm:$0xff] %v26193_v53  ;;  %v22489_v1 = vpop.f32.mrb[109].mxu1 }
 0x7c0   : > { %22624 = vst [vmem:[%s33026_s7 + $0x70] sm:$0xff] %v22489_v1 }
 0x7c2   : > { %v26196_v27 = vpop.f32.mrb[110].mxu1 }
 0x7c3   : > { %22627 = vst [vmem:[%s33026_s7 + $0x88] sm:$0xff] %v26196_v27  ;;  %v22499_v62 = vpop.f32.mrb[111].mxu1 }
 0x7c4   : > { %22626 = vst [vmem:[%s33026_s7 + $0x80] sm:$0xff] %v22499_v62 }
 0x7c6   : > { %v26199_v6 = vpop.f32.mrb[112].mxu1 }
 0x7c7   : > { %22629 = vst [vmem:[%s33026_s7 + $0x98] sm:$0xff] %v26199_v6  ;;  %v22509_v52 = vpop.f32.mrb[113].mxu1 }
 0x7c8   : > { %22628 = vst [vmem:[%s33026_s7 + $0x90] sm:$0xff] %v22509_v52 }
 0x7ca   : > { %v26202_v33 = vpop.f32.mrb[114].mxu1 }
 0x7cb   : > { %22631 = vst [vmem:[%s33026_s7 + $0xa8] sm:$0xff] %v26202_v33  ;;  %v22519_v59 = vpop.f32.mrb[115].mxu1 }
 0x7cc   : > { %22630 = vst [vmem:[%s33026_s7 + $0xa0] sm:$0xff] %v22519_v59 }
 0x7ce   : > { %v26205_v61 = vpop.f32.mrb[116].mxu1 }
 0x7cf   : > { %22633 = vst [vmem:[%s33026_s7 + $0xb8] sm:$0xff] %v26205_v61  ;;  %v22529_v45 = vpop.f32.mrb[117].mxu1 }
 0x7d0   : > { %22632 = vst [vmem:[%s33026_s7 + $0xb0] sm:$0xff] %v22529_v45 }
 0x7d2   : > { %v26208_v30 = vpop.f32.mrb[118].mxu1 }
 0x7d3   : > { %22635 = vst [vmem:[%s33026_s7 + $0xc8] sm:$0xff] %v26208_v30  ;;  %v22539_v47 = vpop.f32.mrb[119].mxu1 }
 0x7d4   : > { %22634 = vst [vmem:[%s33026_s7 + $0xc0] sm:$0xff] %v22539_v47 }
 0x7d6   : > { %v26211_v54 = vpop.f32.mrb[120].mxu1 }
 0x7d7   : > { %22637 = vst [vmem:[%s33026_s7 + $0xd8] sm:$0xff] %v26211_v54  ;;  %v22549_v26 = vpop.f32.mrb[121].mxu1 }
 0x7d8   : > { %22636 = vst [vmem:[%s33026_s7 + $0xd0] sm:$0xff] %v22549_v26 }
 0x7da   : > { %v26214_v35 = vpop.f32.mrb[122].mxu1 }
 0x7db   : > { %22639 = vst [vmem:[%s33026_s7 + $0xe8] sm:$0xff] %v26214_v35  ;;  %v22559_v22 = vpop.f32.mrb[123].mxu1 }
 0x7dc   : > { %22638 = vst [vmem:[%s33026_s7 + $0xe0] sm:$0xff] %v22559_v22 }
 0x7de   : > { %v26217_v4 = vpop.f32.mrb[124].mxu1 }
 0x7df   : > { %22641 = vst [vmem:[%s33026_s7 + $0xf8] sm:$0xff] %v26217_v4  ;;  %v22569_v20 = vpop.f32.mrb[125].mxu1 }
 0x7e0   : > { %22640 = vst [vmem:[%s33026_s7 + $0xf0] sm:$0xff] %v22569_v20 }
 0x7e1   : > { %27519 = shalt.err (!%p27516_p3)
}
 0x7e2   : > { %s27520_s26 = scalar_lea.hbm %s33063_s17, 4096  ;;  %s27524_s29 = scalar_lea.hbm %s33115_s3, 8192 }
 0x7e3   : > { %p27521_p4 = scmp.ne.s32.totalorder %s33063_s17, %s27520_s26  ;;  %p27525_p9 = scmp.lt.u32.totalorder %s33063_s17, %s33115_s3 }
 0x7e4   : > { %p27526_p10 = scmp.lt.u32.totalorder %s27524_s29, %s27520_s26  ;;  %p27528_p12 = scmp.lt.u32.totalorder %s27520_s26, %s33063_s17 }
 0x7e5   : > { %p27522_p7 = pnand %p27521_p4, %p27636_p5 }
 0x7e6   : > { %p27527_p11 = por %p27526_p10, %p27525_p9 }
 0x7e7   : > { %p27523_p8 = pneg %p27522_p7 }
 0x7e8   : > { %p27529_p13 = por %p27528_p12, %p27527_p11 }
 0x7ea   : > { %p27530_p0 = pnand %p27529_p13, %p27523_p8 }
 0x7ec   : > { %27533 = shalt.err (!%p27530_p0)
}
 0x7ed   : > { %s27576_s5 = smov 128   ;;  %s27577_s6 = smov 8  }
 0x7ee   : > { %27104 = dma.vmem_to_hbm [thread:$0]  (%p27636_p5), %s33065_s9, 4096, %s33063_s17, %s33071_s16, %s27576_s5, %s27576_s5, %s27577_s6  }
 0x7ef PF: > { %p27110_p1 = scmp.ge.s32.totalorder %s27568_s15, 2  ;;  %s22671_s7 = sand.u32 1, %s27556_s12  }
 0x7f0   : > { %s22672_s8 = scalar_lea.sflag [#allocation4], %s22671_s7 }
 0x7f1   : > { %p27107_p2 = pnand %p27110_p1, %p27640_p6 }
 0x7f3   : > { %27551 = dma.done.wait (!%p27107_p2), %s22672_s8, 4096  }
 0x7f4   : > { %27553 = vsyncadd (!%p27107_p2), %s22672_s8, 4294963200  ;;  %p13_p3 = scmp.ge.s32.totalorder %s27623_s18, 4   ;;  %s33616_s12 = smov %s27560_s13 }
 0x7f5   : > { %s33617_s13 = smov %s27564_s14  ;;  %s33618_s14 = smov %s27634_s21 }
 0x7f6   : > { %s33619_s15 = smov %s27623_s18  ;;  %15 = sbr.rel (!%p13_p3) target bundleno = 3 (0x3), region = 87 }
 0x7fd   :  { %22677 = vsyncpa [#allocation4], 1 }
 0x7fe   :  { %22679 = vsyncpa [#allocation4 + $0x1], 1 }

</bundles_post_ra>
